<compile_context>
chip_gen: v5e
topology: v5e:2x2
jax: 0.10.0
libtpu: 0.0.40
codegen_flags: <defaults>
</compile_context>

<pallas_src>
import functools
import math

import numpy as np
import jax
import jax.numpy as jnp
from jax import lax
from jax.experimental import pallas as pl
from jax.experimental.pallas import tpu as pltpu
from jax.scipy.linalg import block_diag as jsp_block_diag


CONFIG = dict(
    num_joints=4,
    transformer_d_model=32,
    transformer_window_length=8,
    transformer_num_heads_spacial=4,
    transformer_num_heads_temporal=4,
    transformer_num_layers=2,
    transformer_dropout_rate=0.0,
    shared_templ_kv=False,
    temp_abs_pos_encoding=False,
    temp_rel_pos_encoding=False,
    abs_pos_encoding=True,
    use_6d_outputs=False,
    joint_size=3,
    residual_velocity=True,
    loss_type="all_mean",
)


# -----------------------------------------------------------------------------
# Positional encoding (host-side numpy, exactly as the reference)
# -----------------------------------------------------------------------------
def positional_encoding(window_len, d_model):
    pos = np.arange(window_len)[:, None]
    i = np.arange(d_model)[None, :]
    angle_rates = 1.0 / np.power(10000, 2 * (i // 2) / np.float32(d_model))
    angle_rads = pos * angle_rates
    angle_rads[:, 0::2] = np.sin(angle_rads[:, 0::2])
    angle_rads[:, 1::2] = np.cos(angle_rads[:, 1::2])
    return angle_rads[np.newaxis, :, np.newaxis, :]  # (1, W, 1, D)


# -----------------------------------------------------------------------------
# Parameters (deterministic synthetic init, same structure as the reference)
# -----------------------------------------------------------------------------
def init_params(key, config):
    J = config["num_joints"]
    D = config["transformer_d_model"]
    Jsz = config["joint_size"]
    L = config["transformer_num_layers"]
    W = config["transformer_window_length"]

    keys = iter(jax.random.split(key, 256))

    def w(shape, scale=0.05):
        return (scale * jax.random.normal(next(keys), shape)).astype(jnp.float32)

    params = {
        "emb_w": w((J, Jsz, D)),
        "emb_b": w((J, D)),
        "out_w": w((J, D, Jsz)),
        "out_b": w((J, Jsz)),
        "pos_encoding": jnp.asarray(positional_encoding(W, D), jnp.float32),
        "layers": [],
    }
    for _ in range(L):
        lp = {
            "t_q_w": w((J, D, D)), "t_q_b": w((J, D)),
            "t_k_w": w((J, D, D)), "t_k_b": w((J, D)),
            "t_v_w": w((J, D, D)), "t_v_b": w((J, D)),
            "t_o_w": w((D, D)), "t_o_b": w((D,)),
            "s_k_w": w((D, D)), "s_k_b": w((D,)),
            "s_v_w": w((D, D)), "s_v_b": w((D,)),
            "s_q_w": w((J, D, D)), "s_q_b": w((J, D)),
            "s_o_w": w((D, D)), "s_o_b": w((D,)),
            "ff1_w": w((J, D, D)), "ff1_b": w((J, D)),
            "ff2_w": w((J, D, D)), "ff2_b": w((J, D)),
            "ln_t_g": jnp.ones((D,), jnp.float32), "ln_t_b": jnp.zeros((D,), jnp.float32),
            "ln_s_g": jnp.ones((D,), jnp.float32), "ln_s_b": jnp.zeros((D,), jnp.float32),
            "ln_f_g": jnp.ones((D,), jnp.float32), "ln_f_b": jnp.zeros((D,), jnp.float32),
        }
        params["layers"].append(lp)
    return params


# -----------------------------------------------------------------------------
# Host-side packing: per-joint / shared weights -> block-diagonal, lane-dense,
# bf16 slabs.  The 1/sqrt(depth) attention scales are folded into the q weights.
# -----------------------------------------------------------------------------
def pack_params(params, config):
    J = config["num_joints"]
    D = config["transformer_d_model"]
    Ht = config["transformer_num_heads_temporal"]
    Hs = config["transformer_num_heads_spacial"]
    Jsz = config["joint_size"]
    JD = J * D
    scale_t = 1.0 / math.sqrt(D // Ht)
    scale_s = 1.0 / math.sqrt(D // Hs)
    bf = jnp.bfloat16

    def bd(stacked):                       # (J, din, dout) -> (J*din, J*dout)
        return jsp_block_diag(*[stacked[j] for j in range(J)])

    def bd_rep(w):                         # shared (din, dout) repeated per joint
        return jsp_block_diag(*([w] * J))

    # embedding (12 -> 128) and output projection (128 -> 12), zero-padded to 128 lanes
    w_emb = jnp.zeros((JD, JD), jnp.float32).at[:J * Jsz, :].set(bd(params["emb_w"]))
    w_out = jnp.zeros((JD, JD), jnp.float32).at[:, :J * Jsz].set(bd(params["out_w"]))
    w_global = jnp.concatenate([w_emb, w_out], axis=1).astype(bf)        # (JD, 2*JD)
    b_emb = params["emb_b"].reshape(1, JD)
    b_out = jnp.zeros((1, JD), jnp.float32).at[:, :J * Jsz].set(
        params["out_b"].reshape(1, J * Jsz))
    b_global = jnp.concatenate([b_emb, b_out], axis=0)                   # (2, JD) f32

    w_layers, b_layers = [], []
    for lp in params["layers"]:
        blocks = [
            bd(lp["t_q_w"]) * scale_t, bd(lp["t_k_w"]), bd(lp["t_v_w"]),
            bd(lp["s_q_w"]) * scale_s, bd_rep(lp["s_k_w"]), bd_rep(lp["s_v_w"]),
            bd_rep(lp["t_o_w"]), bd_rep(lp["s_o_w"]),
            bd(lp["ff1_w"]), bd(lp["ff2_w"]),
        ]
        w_layers.append(jnp.concatenate(blocks, axis=1))                 # (JD, 10*JD)
        rows = [
            lp["t_q_b"].reshape(1, JD) * scale_t,
            lp["t_k_b"].reshape(1, JD),
            lp["t_v_b"].reshape(1, JD),
            lp["s_q_b"].reshape(1, JD) * scale_s,
            jnp.tile(lp["s_k_b"], J).reshape(1, JD),
            jnp.tile(lp["s_v_b"], J).reshape(1, JD),
            jnp.tile(lp["t_o_b"], J).reshape(1, JD),
            jnp.tile(lp["s_o_b"], J).reshape(1, JD),
            lp["ff1_b"].reshape(1, JD),
            lp["ff2_b"].reshape(1, JD),
            jnp.tile(lp["ln_t_g"], J).reshape(1, JD),
            jnp.tile(lp["ln_s_g"], J).reshape(1, JD),
            jnp.tile(lp["ln_f_g"], J).reshape(1, JD),
            jnp.tile(lp["ln_t_b"], J).reshape(1, JD),
            jnp.tile(lp["ln_s_b"], J).reshape(1, JD),
            jnp.tile(lp["ln_f_b"], J).reshape(1, JD),
        ]
        b_layers.append(jnp.concatenate(rows, axis=0))                   # (16, JD)

    pos = jnp.tile(params["pos_encoding"][0, :, 0, :], (1, J))           # (W, JD)
    if not config["abs_pos_encoding"]:
        pos = jnp.zeros_like(pos)

    return dict(
        w_global=w_global,
        b_global=b_global,
        w_layers=jnp.stack(w_layers).astype(bf),                         # (L, JD, 10*JD) bf16
        b_layers=jnp.stack(b_layers),                                    # (L, 16, JD) f32
        pos=pos,
    )


# -----------------------------------------------------------------------------
# Structural 0/1 constants (host numpy) that turn all small attention reductions
# into lane-dense MXU matmuls.
# -----------------------------------------------------------------------------
def make_constants(config, batch_size):
    J = config["num_joints"]
    D = config["transformer_d_model"]
    Ht = config["transformer_num_heads_temporal"]
    Hs = config["transformer_num_heads_spacial"]
    S = config["transformer_window_length"]
    B = batch_size
    JD = J * D
    M = B * S
    G = J * Ht
    dt = D // Ht
    ds = D // Hs

    # temporal: replicate the M rows of k / v G times along the row axis
    spread_rows = np.tile(np.eye(M, dtype=np.float32), (G, 1))           # (G*M, M)
    # block-diagonal selector: row block g keeps only the columns of group g
    sel_v = np.zeros((G * M, JD), np.float32)
    for g in range(G):
        sel_v[g * M:(g + 1) * M, g * dt:(g + 1) * dt] = 1.0
    # per-group softmax denominator summation: block-diag of ones(M, M)
    ones_t = np.kron(np.eye(G, dtype=np.float32), np.ones((M, M), np.float32))
    # block-causal additive look-ahead mask (forbids cross-batch attention),
    # replicated for every (joint, head) group along the columns
    allow = np.zeros((M, M), np.float32)
    for i in range(M):
        for j in range(M):
            if (i // S == j // S) and (j % S <= i % S):
                allow[i, j] = 1.0
    mask_all = np.tile((1.0 - allow) * (-1e9), (1, G))                   # (M, G*M)

    # spatial: expanded 512-lane space, column layout (j1, j2, h, d)
    E = J * JD
    a_all = np.zeros((JD, E), np.float32)       # broadcast q of joint j1 over j2
    sum_all = np.zeros((E, J * Hs * J), np.float32)   # sum over depth d
    we = np.zeros((J * Hs * J, E), np.float32)        # broadcast weights over d
    rmat = np.zeros((E, JD), np.float32)              # sum over j2, place (j1,h,d)
    for c in range(E):
        j1 = c // JD
        rest = c % JD
        j2 = rest // D
        h = (rest % D) // ds
        d = rest % ds
        a_all[j1 * D + h * ds + d, c] = 1.0
        col64 = j1 * (Hs * J) + h * J + j2
        sum_all[c, col64] = 1.0
        we[col64, c] = 1.0
        rmat[c, j1 * D + h * ds + d] = 1.0
    ones_s = np.kron(np.eye(J * Hs, dtype=np.float32), np.ones((J, J), np.float32))

    # per-joint LayerNorm averaging matrix (block-diag of ones(D,D)/D)
    p_seg = np.kron(np.eye(J, dtype=np.float32), np.full((D, D), 1.0 / D, np.float32))

    bf = jnp.bfloat16
    return dict(
        spread_rows=jnp.asarray(spread_rows, bf),
        sel_v=jnp.asarray(sel_v, jnp.float32),
        ones_t=jnp.asarray(ones_t, bf),
        mask_all=jnp.asarray(mask_all, jnp.float32),
        a_all=jnp.asarray(a_all, bf),
        sum_all=jnp.asarray(sum_all, bf),
        ones_s=jnp.asarray(ones_s, bf),
        we=jnp.asarray(we, bf),
        rmat=jnp.asarray(rmat, bf),
        p_seg=jnp.asarray(p_seg, jnp.float32),
    )


# -----------------------------------------------------------------------------
# Fused Pallas kernel: whole forward pass, single grid step, batch on sublanes.
# -----------------------------------------------------------------------------
def _fused_transformer_kernel(
    x_in_ref, pos_ref, mask_ref, p_seg_ref,
    spread_ref, sel_v_ref, ones_t_ref,
    a_all_ref, sum_all_ref, ones_s_ref, we_ref, rmat_ref,
    w_global_ref, b_global_ref, w_layers_ref, b_layers_ref,
    o_ref, t_attn_ref, s_attn_ref,
    *, num_layers, num_joints, num_heads_t, num_heads_s, d_model, seq_len,
    batch, ln_eps):
    f32 = jnp.float32
    bf16 = jnp.bfloat16
    J, D, S, B = num_joints, d_model, seq_len, batch
    JD = J * D
    M = B * S

    x_in = x_in_ref[...]            # (M, JD) f32, raw inputs zero-padded to 128 lanes
    pos = pos_ref[...]              # (M, JD)
    mask_all = mask_ref[...]        # (M, G*M) additive block-causal mask
    p_seg = p_seg_ref[...]          # (JD, JD) f32 LayerNorm averaging matrix
    sel_v = sel_v_ref[...]          # (G*M, JD) f32 block-diag 0/1 selector
    spread = spread_ref[...]        # (G*M, M) bf16 row-replication matrix
    ones_t = ones_t_ref[...]        # (G*M, G*M) bf16 temporal softmax denominators
    a_all = a_all_ref[...]          # (JD, 4*JD) bf16 spatial q broadcast
    sum_all = sum_all_ref[...]      # (4*JD, 64) bf16 spatial depth-sum
    ones_s = ones_s_ref[...]        # (64, 64) bf16 spatial softmax denominators
    we = we_ref[...]                # (64, 4*JD) bf16 spatial weight broadcast
    rmat = rmat_ref[...]            # (4*JD, JD) bf16 spatial joint-sum / placement

    def mmul(a, b):                 # bf16 MXU matmul, f32 accumulate
        return jnp.dot(a.astype(bf16), b.astype(bf16), preferred_element_type=f32)

    def seg_layer_norm(y, gamma, beta):
        # LayerNorm over each joint's D-wide block.  One f32 matmul produces both
        # E[y] and E[y^2] (y and y*y stacked on sublanes); var clamped >= 0.
        stats = jnp.dot(jnp.concatenate([y, y * y], axis=0), p_seg,
                        preferred_element_type=f32)
        mu = stats[:M]
        var = jnp.maximum(stats[M:] - mu * mu, 0.0)
        return (y - mu) * lax.rsqrt(var + ln_eps) * gamma + beta

    def block_softmax(logits, ones_blk):
        # Softmax over consecutive lane blocks.  Subtracting the per-row GLOBAL
        # max is a per-row constant => per-block softmax unchanged; per-block
        # denominators come from a block-diag-ones matmul (no lane reductions).
        m = jnp.max(logits, axis=-1, keepdims=True)
        p = jnp.exp(logits - m)
        denom = mmul(p, ones_blk)
        return p * pl.reciprocal(jnp.maximum(denom, 1e-30), approx=True)

    # ---- per-joint embedding + absolute positional encoding -------------------
    x = mmul(x_in, w_global_ref[:, :JD]) + b_global_ref[0:1, :] + pos

    # dropout_rate == 0.0 -> all nn.Dropout layers are identity.

    for l in range(num_layers):
        def wcols(c0, c1, l=l):
            return w_layers_ref[l, :, c0:c1]          # bf16 (JD, c1-c0)

        def brow(i, l=l):
            return b_layers_ref[l, i:i + 1, :]        # f32 (1, JD)

        # ---- fused temporal+spatial q/k/v projections: one (M,128)@(128,768) --
        qkv = mmul(x, wcols(0, 6 * JD))
        tq = qkv[:, 0 * JD:1 * JD] + brow(0)          # temporal q (scale folded in)
        tk = qkv[:, 1 * JD:2 * JD] + brow(1)
        tv = qkv[:, 2 * JD:3 * JD] + brow(2)
        sq = qkv[:, 3 * JD:4 * JD] + brow(3)          # spatial q (scale folded in)
        sk = qkv[:, 4 * JD:5 * JD] + brow(4)
        sv = qkv[:, 5 * JD:6 * JD] + brow(5)

        # ---- temporal attention: all 16 (joint, head) groups in 3 big matmuls --
        k_bd = mmul(spread, tk) * sel_v               # (G*M, JD) block-diag keys
        v_bd = mmul(spread, tv) * sel_v               # (G*M, JD) block-diag values
        logits = lax.dot_general(
            tq.astype(bf16), k_bd.astype(bf16), (((1,), (1,)), ((), ())),
            preferred_element_type=f32) + mask_all    # (M, G*M)
        wgt = block_softmax(logits, ones_t)           # (M, G*M) normalized weights
        attn_t = mmul(wgt, v_bd)                      # (M, JD) joint-major (j,h,d)
        # last-query-row attention weights per batch element (256-lane store)
        t_attn_ref[l] = jnp.concatenate(
            [wgt[b * S + S - 1:b * S + S, :] for b in range(B)], axis=0)

        t_out = mmul(attn_t, wcols(6 * JD, 7 * JD)) + brow(6)
        temporal_out = seg_layer_norm(t_out + x, brow(10), brow(13))

        # ---- spatial attention: per-row joint attention via expanded lanes -----
        sk4 = jnp.concatenate([sk] * J, axis=1)       # (M, 4*JD)
        sv4 = jnp.concatenate([sv] * J, axis=1)       # (M, 4*JD)
        sq_exp = mmul(sq, a_all)                      # (M, 4*JD) q broadcast over j2
        logits_s = mmul(sq_exp * sk4, sum_all)        # (M, 64) cols (j1, h, j2)
        ws = block_softmax(logits_s, ones_s)          # (M, 64) normalized weights
        # last-time-step weights, packed lane-dense into a single 128-wide row
        s_attn_ref[l] = jnp.concatenate(
            [ws[b * S + S - 1:b * S + S, :] for b in range(B)], axis=1)
        w_exp = mmul(ws, we)                          # (M, 4*JD) weights over d
        attn_s = mmul(w_exp * sv4, rmat)              # (M, JD) joint-major (j,h,d)

        s_out = mmul(attn_s, wcols(7 * JD, 8 * JD)) + brow(7)
        spatial_out = seg_layer_norm(s_out + x, brow(11), brow(14))

        out = temporal_out + spatial_out

        # ---- per-joint pointwise feed-forward (block-diagonal matmuls) ---------
        h1 = jnp.maximum(mmul(out, wcols(8 * JD, 9 * JD)) + brow(8), 0.0)
        h2 = mmul(h1, wcols(9 * JD, 10 * JD)) + brow(9)
        x = seg_layer_norm(h2 + out, brow(12), brow(15))

    # ---- per-joint output projection (padded to 128 lanes) + residual velocity -
    y = mmul(x, w_global_ref[:, JD:2 * JD]) + b_global_ref[1:2, :] + x_in
    o_ref[...] = y                                    # lane-dense store


# -----------------------------------------------------------------------------
# Full forward pass (single fused pallas_call, one grid step)
# -----------------------------------------------------------------------------
def transformer_forward(packed, consts, inputs, config):
    """inputs: (B, S, J, joint_size).  Returns (final_output, attention_weights)."""
    B, S, J, Jsz = inputs.shape
    D = config["transformer_d_model"]
    L = config["transformer_num_layers"]
    Ht = config["transformer_num_heads_temporal"]
    Hs = config["transformer_num_heads_spacial"]
    JD = J * D
    M = B * S
    G = J * Ht

    x_flat = inputs.reshape(M, J * Jsz).astype(jnp.float32)
    x_in = jnp.pad(x_flat, ((0, 0), (0, JD - J * Jsz)))          # (M, JD)
    pos = jnp.tile(packed["pos"][:S], (B, 1))                    # (M, JD)

    kernel = functools.partial(
        _fused_transformer_kernel,
        num_layers=L, num_joints=J, num_heads_t=Ht, num_heads_s=Hs,
        d_model=D, seq_len=S, batch=B, ln_eps=1e-5)

    def full(shape):
        nd = len(shape)
        return pl.BlockSpec(shape, lambda i, nd=nd: (0,) * nd)

    operands = [
        x_in, pos, consts["mask_all"], consts["p_seg"],
        consts["spread_rows"], consts["sel_v"], consts["ones_t"],
        consts["a_all"], consts["sum_all"], consts["ones_s"], consts["we"],
        consts["rmat"],
        packed["w_global"], packed["b_global"],
        packed["w_layers"], packed["b_layers"],
    ]

    out_pad, t_attn, s_attn = pl.pallas_call(
        kernel,
        out_shape=(
            jax.ShapeDtypeStruct((M, JD), jnp.float32),
            jax.ShapeDtypeStruct((L, B, G * M), jnp.float32),
            jax.ShapeDtypeStruct((L, 1, B * Hs * J * J), jnp.float32),
        ),
        grid=(1,),
        in_specs=[full(op.shape) for op in operands],
        out_specs=(
            full((M, JD)),
            full((L, B, G * M)),
            full((L, 1, B * Hs * J * J)),
        ),
        compiler_params=pltpu.CompilerParams(
            dimension_semantics=("arbitrary",)),
    )(*operands)

    final_output = out_pad[:, :J * Jsz].reshape(B, S, J, Jsz)

    # temporal last-query-row weights: keep each batch's own key window
    t_raw = t_attn.reshape(L, B, G, B, S)
    temporal = jnp.stack([t_raw[:, b, :, b, :] for b in range(B)], axis=0)
    temporal = temporal.reshape(B, L, J, Ht, S)

    # spatial last-time-step weights: kernel layout (L, B, j1, h, j2)
    s_raw = s_attn.reshape(L, B, J, Hs, J)
    spatial = jnp.transpose(s_raw, (1, 0, 3, 2, 4))              # (B, L, Hs, J, J)

    attention_weights = {"temporal": temporal, "spatial": spatial}
    return final_output, attention_weights


# -----------------------------------------------------------------------------
if __name__ == "__main__":
    key = jax.random.PRNGKey(0)
    pkey, xkey = jax.random.split(key)
    params = init_params(pkey, CONFIG)
    packed = pack_params(params, CONFIG)

    B = 2
    S = CONFIG["transformer_window_length"]       # 8
    J = CONFIG["num_joints"]                      # 4
    Jsz = CONFIG["joint_size"]                    # 3
    L = CONFIG["transformer_num_layers"]          # 2
    Ht = CONFIG["transformer_num_heads_temporal"]
    Hs = CONFIG["transformer_num_heads_spacial"]

    consts = make_constants(CONFIG, B)
    inputs = jax.random.normal(xkey, (B, S, J, Jsz), dtype=jnp.float32)

    fwd = jax.jit(functools.partial(transformer_forward, config=CONFIG))
    final_out, attn = fwd(packed, consts, inputs)
    jax.block_until_ready(final_out)
    jax.block_until_ready(attn["temporal"])
    jax.block_until_ready(attn["spatial"])

    assert final_out.shape == (B, S, J, Jsz)
    assert attn["temporal"].shape == (B, L, J, Ht, S)
    assert attn["spatial"].shape == (B, L, Hs, J, J)
    assert bool(jnp.all(jnp.isfinite(final_out)))
    assert bool(jnp.all(jnp.isfinite(attn["temporal"])))
    assert bool(jnp.all(jnp.isfinite(attn["spatial"])))
    print("KERNEL_OK")
</pallas_src>

<mosaic_0001>
module attributes {stable_mosaic.version = 11 : i64} {
  func.func @_fused_transformer_kernel(%arg0: i32, %arg1: memref<16x128xf32, #tpu.memory_space<vmem>>, %arg2: memref<16x128xf32, #tpu.memory_space<vmem>>, %arg3: memref<16x256xf32, #tpu.memory_space<vmem>>, %arg4: memref<128x128xf32, #tpu.memory_space<vmem>>, %arg5: memref<256x16xbf16, #tpu.memory_space<vmem>>, %arg6: memref<256x128xf32, #tpu.memory_space<vmem>>, %arg7: memref<256x256xbf16, #tpu.memory_space<vmem>>, %arg8: memref<128x512xbf16, #tpu.memory_space<vmem>>, %arg9: memref<512x64xbf16, #tpu.memory_space<vmem>>, %arg10: memref<64x64xbf16, #tpu.memory_space<vmem>>, %arg11: memref<64x512xbf16, #tpu.memory_space<vmem>>, %arg12: memref<512x128xbf16, #tpu.memory_space<vmem>>, %arg13: memref<128x256xbf16, #tpu.memory_space<vmem>>, %arg14: memref<2x128xf32, #tpu.memory_space<vmem>>, %arg15: memref<2x128x1280xbf16, #tpu.memory_space<vmem>>, %arg16: memref<2x16x128xf32, #tpu.memory_space<vmem>>, %arg17: memref<16x128xf32, #tpu.memory_space<vmem>>, %arg18: memref<2x2x256xf32, #tpu.memory_space<vmem>>, %arg19: memref<2x1x128xf32, #tpu.memory_space<vmem>>) attributes {dimension_semantics = [#tpu.dimension_semantics<arbitrary>], iteration_bounds = array<i64: 1>, scalar_prefetch = 0 : i64, scratch_operands = 0 : i64, tpu.core_type = #tpu.core_type<tc>, window_params = [{pipeline_mode = #tpu.pipeline_mode<synchronous>, transform_indices = @transform_0, window_bounds = array<i64: 16, 128>}, {pipeline_mode = #tpu.pipeline_mode<synchronous>, transform_indices = @transform_1, window_bounds = array<i64: 16, 128>}, {pipeline_mode = #tpu.pipeline_mode<synchronous>, transform_indices = @transform_2, window_bounds = array<i64: 16, 256>}, {pipeline_mode = #tpu.pipeline_mode<synchronous>, transform_indices = @transform_3, window_bounds = array<i64: 128, 128>}, {pipeline_mode = #tpu.pipeline_mode<synchronous>, transform_indices = @transform_4, window_bounds = array<i64: 256, 16>}, {pipeline_mode = #tpu.pipeline_mode<synchronous>, transform_indices = @transform_5, window_bounds = array<i64: 256, 128>}, {pipeline_mode = #tpu.pipeline_mode<synchronous>, transform_indices = @transform_6, window_bounds = array<i64: 256, 256>}, {pipeline_mode = #tpu.pipeline_mode<synchronous>, transform_indices = @transform_7, window_bounds = array<i64: 128, 512>}, {pipeline_mode = #tpu.pipeline_mode<synchronous>, transform_indices = @transform_8, window_bounds = array<i64: 512, 64>}, {pipeline_mode = #tpu.pipeline_mode<synchronous>, transform_indices = @transform_9, window_bounds = array<i64: 64, 64>}, {pipeline_mode = #tpu.pipeline_mode<synchronous>, transform_indices = @transform_10, window_bounds = array<i64: 64, 512>}, {pipeline_mode = #tpu.pipeline_mode<synchronous>, transform_indices = @transform_11, window_bounds = array<i64: 512, 128>}, {pipeline_mode = #tpu.pipeline_mode<synchronous>, transform_indices = @transform_12, window_bounds = array<i64: 128, 256>}, {pipeline_mode = #tpu.pipeline_mode<synchronous>, transform_indices = @transform_13, window_bounds = array<i64: 2, 128>}, {pipeline_mode = #tpu.pipeline_mode<synchronous>, transform_indices = @transform_14, window_bounds = array<i64: 2, 128, 1280>}, {pipeline_mode = #tpu.pipeline_mode<synchronous>, transform_indices = @transform_15, window_bounds = array<i64: 2, 16, 128>}, {pipeline_mode = #tpu.pipeline_mode<synchronous>, transform_indices = @transform_16, window_bounds = array<i64: 16, 128>}, {pipeline_mode = #tpu.pipeline_mode<synchronous>, transform_indices = @transform_17, window_bounds = array<i64: 2, 2, 256>}, {pipeline_mode = #tpu.pipeline_mode<synchronous>, transform_indices = @transform_18, window_bounds = array<i64: 2, 1, 128>}]} {
    %c0 = arith.constant 0 : index
    %c0_0 = arith.constant 0 : index
    %0 = vector.load %arg1[%c0, %c0_0] : memref<16x128xf32, #tpu.memory_space<vmem>>, vector<16x128xf32>
    %c0_1 = arith.constant 0 : index
    %c0_2 = arith.constant 0 : index
    %1 = vector.load %arg2[%c0_1, %c0_2] : memref<16x128xf32, #tpu.memory_space<vmem>>, vector<16x128xf32>
    %c0_3 = arith.constant 0 : index
    %c0_4 = arith.constant 0 : index
    %2 = vector.load %arg3[%c0_3, %c0_4] : memref<16x256xf32, #tpu.memory_space<vmem>>, vector<16x256xf32>
    %c0_5 = arith.constant 0 : index
    %c0_6 = arith.constant 0 : index
    %3 = vector.load %arg4[%c0_5, %c0_6] : memref<128x128xf32, #tpu.memory_space<vmem>>, vector<128x128xf32>
    %c0_7 = arith.constant 0 : index
    %c0_8 = arith.constant 0 : index
    %4 = vector.load %arg6[%c0_7, %c0_8] : memref<256x128xf32, #tpu.memory_space<vmem>>, vector<256x128xf32>
    %c0_9 = arith.constant 0 : index
    %c0_10 = arith.constant 0 : index
    %5 = vector.load %arg5[%c0_9, %c0_10] : memref<256x16xbf16, #tpu.memory_space<vmem>>, vector<256x16xbf16>
    %c0_11 = arith.constant 0 : index
    %c0_12 = arith.constant 0 : index
    %6 = vector.load %arg7[%c0_11, %c0_12] : memref<256x256xbf16, #tpu.memory_space<vmem>>, vector<256x256xbf16>
    %c0_13 = arith.constant 0 : index
    %c0_14 = arith.constant 0 : index
    %7 = vector.load %arg8[%c0_13, %c0_14] : memref<128x512xbf16, #tpu.memory_space<vmem>>, vector<128x512xbf16>
    %c0_15 = arith.constant 0 : index
    %c0_16 = arith.constant 0 : index
    %8 = vector.load %arg9[%c0_15, %c0_16] : memref<512x64xbf16, #tpu.memory_space<vmem>>, vector<512x64xbf16>
    %c0_17 = arith.constant 0 : index
    %c0_18 = arith.constant 0 : index
    %9 = vector.load %arg10[%c0_17, %c0_18] : memref<64x64xbf16, #tpu.memory_space<vmem>>, vector<64x64xbf16>
    %c0_19 = arith.constant 0 : index
    %c0_20 = arith.constant 0 : index
    %10 = vector.load %arg11[%c0_19, %c0_20] : memref<64x512xbf16, #tpu.memory_space<vmem>>, vector<64x512xbf16>
    %c0_21 = arith.constant 0 : index
    %c0_22 = arith.constant 0 : index
    %11 = vector.load %arg12[%c0_21, %c0_22] : memref<512x128xbf16, #tpu.memory_space<vmem>>, vector<512x128xbf16>
    %c0_23 = arith.constant 0 : index
    %c0_24 = arith.constant 0 : index
    %12 = vector.load %arg13[%c0_23, %c0_24] : memref<128x256xbf16, #tpu.memory_space<vmem>>, vector<128x128xbf16>
    %13 = arith.truncf %0 : vector<16x128xf32> to vector<16x128xbf16>
    %cst = arith.constant dense<0.000000e+00> : vector<16x128xf32>
    %14 = tpu.matmul %13, %12, %cst {dimension_numbers = #tpu.dot_dimension_numbers<[1], [0], [0], [1], [0, 0, 1, 1], [], []>} : vector<16x128xbf16>, vector<128x128xbf16>, vector<16x128xf32> -> vector<16x128xf32>
    %c0_25 = arith.constant 0 : index
    %c0_26 = arith.constant 0 : index
    %15 = vector.load %arg14[%c0_25, %c0_26] : memref<2x128xf32, #tpu.memory_space<vmem>>, vector<1x128xf32>
    %16 = vector.broadcast %15 : vector<1x128xf32> to vector<16x128xf32>
    %17 = arith.addf %14, %16 : vector<16x128xf32>
    %18 = arith.addf %17, %1 : vector<16x128xf32>
    %c0_27 = arith.constant 0 : index
    %c0_28 = arith.constant 0 : index
    %c0_29 = arith.constant 0 : index
    %19 = vector.load %arg15[%c0_27, %c0_28, %c0_29] : memref<2x128x1280xbf16, #tpu.memory_space<vmem>>, vector<1x128x768xbf16>
    %20 = vector.shape_cast %19 : vector<1x128x768xbf16> to vector<128x768xbf16>
    %21 = arith.truncf %18 : vector<16x128xf32> to vector<16x128xbf16>
    %cst_30 = arith.constant dense<0.000000e+00> : vector<16x768xf32>
    %22 = tpu.matmul %21, %20, %cst_30 {dimension_numbers = #tpu.dot_dimension_numbers<[1], [0], [0], [1], [0, 0, 1, 1], [], []>} : vector<16x128xbf16>, vector<128x768xbf16>, vector<16x768xf32> -> vector<16x768xf32>
    %23 = vector.extract_strided_slice %22 {offsets = [0, 0], sizes = [16, 128], strides = [1, 1]} : vector<16x768xf32> to vector<16x128xf32>
    %c0_31 = arith.constant 0 : index
    %c0_32 = arith.constant 0 : index
    %c0_33 = arith.constant 0 : index
    %24 = vector.load %arg16[%c0_31, %c0_32, %c0_33] : memref<2x16x128xf32, #tpu.memory_space<vmem>>, vector<1x1x128xf32>
    %25 = vector.shape_cast %24 : vector<1x1x128xf32> to vector<1x128xf32>
    %26 = vector.broadcast %25 : vector<1x128xf32> to vector<16x128xf32>
    %27 = arith.addf %23, %26 : vector<16x128xf32>
    %28 = vector.extract_strided_slice %22 {offsets = [0, 128], sizes = [16, 128], strides = [1, 1]} : vector<16x768xf32> to vector<16x128xf32>
    %c0_34 = arith.constant 0 : index
    %c1 = arith.constant 1 : index
    %c0_35 = arith.constant 0 : index
    %29 = vector.load %arg16[%c0_34, %c1, %c0_35] : memref<2x16x128xf32, #tpu.memory_space<vmem>>, vector<1x1x128xf32>
    %30 = vector.shape_cast %29 : vector<1x1x128xf32> to vector<1x128xf32>
    %31 = vector.broadcast %30 : vector<1x128xf32> to vector<16x128xf32>
    %32 = arith.addf %28, %31 : vector<16x128xf32>
    %33 = vector.extract_strided_slice %22 {offsets = [0, 256], sizes = [16, 128], strides = [1, 1]} : vector<16x768xf32> to vector<16x128xf32>
    %c0_36 = arith.constant 0 : index
    %c2 = arith.constant 2 : index
    %c0_37 = arith.constant 0 : index
    %34 = vector.load %arg16[%c0_36, %c2, %c0_37] : memref<2x16x128xf32, #tpu.memory_space<vmem>>, vector<1x1x128xf32>
    %35 = vector.shape_cast %34 : vector<1x1x128xf32> to vector<1x128xf32>
    %36 = vector.broadcast %35 : vector<1x128xf32> to vector<16x128xf32>
    %37 = arith.addf %33, %36 : vector<16x128xf32>
    %38 = vector.extract_strided_slice %22 {offsets = [0, 384], sizes = [16, 128], strides = [1, 1]} : vector<16x768xf32> to vector<16x128xf32>
    %c0_38 = arith.constant 0 : index
    %c3 = arith.constant 3 : index
    %c0_39 = arith.constant 0 : index
    %39 = vector.load %arg16[%c0_38, %c3, %c0_39] : memref<2x16x128xf32, #tpu.memory_space<vmem>>, vector<1x1x128xf32>
    %40 = vector.shape_cast %39 : vector<1x1x128xf32> to vector<1x128xf32>
    %41 = vector.broadcast %40 : vector<1x128xf32> to vector<16x128xf32>
    %42 = arith.addf %38, %41 : vector<16x128xf32>
    %43 = vector.extract_strided_slice %22 {offsets = [0, 512], sizes = [16, 128], strides = [1, 1]} : vector<16x768xf32> to vector<16x128xf32>
    %c0_40 = arith.constant 0 : index
    %c4 = arith.constant 4 : index
    %c0_41 = arith.constant 0 : index
    %44 = vector.load %arg16[%c0_40, %c4, %c0_41] : memref<2x16x128xf32, #tpu.memory_space<vmem>>, vector<1x1x128xf32>
    %45 = vector.shape_cast %44 : vector<1x1x128xf32> to vector<1x128xf32>
    %46 = vector.broadcast %45 : vector<1x128xf32> to vector<16x128xf32>
    %47 = arith.addf %43, %46 : vector<16x128xf32>
    %48 = vector.extract_strided_slice %22 {offsets = [0, 640], sizes = [16, 128], strides = [1, 1]} : vector<16x768xf32> to vector<16x128xf32>
    %c0_42 = arith.constant 0 : index
    %c5 = arith.constant 5 : index
    %c0_43 = arith.constant 0 : index
    %49 = vector.load %arg16[%c0_42, %c5, %c0_43] : memref<2x16x128xf32, #tpu.memory_space<vmem>>, vector<1x1x128xf32>
    %50 = vector.shape_cast %49 : vector<1x1x128xf32> to vector<1x128xf32>
    %51 = vector.broadcast %50 : vector<1x128xf32> to vector<16x128xf32>
    %52 = arith.addf %48, %51 : vector<16x128xf32>
    %53 = arith.truncf %32 : vector<16x128xf32> to vector<16x128xbf16>
    %cst_44 = arith.constant dense<0.000000e+00> : vector<256x128xf32>
    %54 = tpu.matmul %5, %53, %cst_44 {dimension_numbers = #tpu.dot_dimension_numbers<[1], [0], [0], [1], [0, 0, 1, 1], [], []>} : vector<256x16xbf16>, vector<16x128xbf16>, vector<256x128xf32> -> vector<256x128xf32>
    %55 = arith.mulf %54, %4 : vector<256x128xf32>
    %56 = arith.truncf %37 : vector<16x128xf32> to vector<16x128xbf16>
    %cst_45 = arith.constant dense<0.000000e+00> : vector<256x128xf32>
    %57 = tpu.matmul %5, %56, %cst_45 {dimension_numbers = #tpu.dot_dimension_numbers<[1], [0], [0], [1], [0, 0, 1, 1], [], []>} : vector<256x16xbf16>, vector<16x128xbf16>, vector<256x128xf32> -> vector<256x128xf32>
    %58 = arith.mulf %57, %4 : vector<256x128xf32>
    %59 = arith.truncf %27 : vector<16x128xf32> to vector<16x128xbf16>
    %60 = arith.truncf %55 : vector<256x128xf32> to vector<256x128xbf16>
    %cst_46 = arith.constant dense<0.000000e+00> : vector<16x256xf32>
    %61 = tpu.matmul %59, %60, %cst_46 {dimension_numbers = #tpu.dot_dimension_numbers<[1], [1], [0], [0], [0, 0, 1, 0], [], []>} : vector<16x128xbf16>, vector<256x128xbf16>, vector<16x256xf32> -> vector<16x256xf32>
    %62 = arith.addf %61, %2 : vector<16x256xf32>
    %cst_47 = arith.constant dense<0xFF800000> : vector<16xf32>
    %63 = vector.multi_reduction <maximumf>, %62, %cst_47 [1] : vector<16x256xf32> to vector<16xf32>
    %64 = vector.shape_cast %63 : vector<16xf32> to vector<16x1xf32>
    %65 = vector.broadcast %64 : vector<16x1xf32> to vector<16x256xf32>
    %66 = arith.subf %62, %65 : vector<16x256xf32>
    %67 = math.exp %66 : vector<16x256xf32>
    %68 = arith.truncf %67 : vector<16x256xf32> to vector<16x256xbf16>
    %cst_48 = arith.constant dense<0.000000e+00> : vector<16x256xf32>
    %69 = tpu.matmul %68, %6, %cst_48 {dimension_numbers = #tpu.dot_dimension_numbers<[1], [0], [0], [1], [0, 0, 1, 1], [], []>} : vector<16x256xbf16>, vector<256x256xbf16>, vector<16x256xf32> -> vector<16x256xf32>
    %cst_49 = arith.constant 1.000000e-30 : f32
    %70 = vector.broadcast %cst_49 : f32 to vector<16x256xf32>
    %71 = arith.maximumf %69, %70 : vector<16x256xf32>
    %72 = tpu.reciprocal %71 {approx = true} : vector<16x256xf32> -> vector<16x256xf32>
    %73 = arith.mulf %67, %72 : vector<16x256xf32>
    %74 = arith.truncf %73 : vector<16x256xf32> to vector<16x256xbf16>
    %75 = arith.truncf %58 : vector<256x128xf32> to vector<256x128xbf16>
    %cst_50 = arith.constant dense<0.000000e+00> : vector<16x128xf32>
    %76 = tpu.matmul %74, %75, %cst_50 {dimension_numbers = #tpu.dot_dimension_numbers<[1], [0], [0], [1], [0, 0, 1, 1], [], []>} : vector<16x256xbf16>, vector<256x128xbf16>, vector<16x128xf32> -> vector<16x128xf32>
    %77 = vector.extract_strided_slice %73 {offsets = [7, 0], sizes = [1, 256], strides = [1, 1]} : vector<16x256xf32> to vector<1x256xf32>
    %78 = vector.extract_strided_slice %73 {offsets = [15, 0], sizes = [1, 256], strides = [1, 1]} : vector<16x256xf32> to vector<1x256xf32>
    %79 = tpu.concatenate %77, %78 in 0 : vector<1x256xf32>, vector<1x256xf32> -> vector<2x256xf32>
    %c0_51 = arith.constant 0 : index
    %c0_52 = arith.constant 0 : index
    %c0_53 = arith.constant 0 : index
    %80 = vector.load %arg18[%c0_51, %c0_52, %c0_53] : memref<2x2x256xf32, #tpu.memory_space<vmem>>, vector<1x2x256xf32>
    %81 = vector.shape_cast %80 : vector<1x2x256xf32> to vector<2x256xf32>
    %82 = vector.shape_cast %79 : vector<2x256xf32> to vector<1x2x256xf32>
    tpu.vector_store %arg18[%c0_51, %c0_52, %c0_53], %82 {strides = array<i32>} : memref<2x2x256xf32, #tpu.memory_space<vmem>>, vector<1x2x256xf32>,
    %c0_54 = arith.constant 0 : index
    %c0_55 = arith.constant 0 : index
    %c768 = arith.constant 768 : index
    %83 = vector.load %arg15[%c0_54, %c0_55, %c768] : memref<2x128x1280xbf16, #tpu.memory_space<vmem>>, vector<1x128x128xbf16>
    %84 = vector.shape_cast %83 : vector<1x128x128xbf16> to vector<128x128xbf16>
    %85 = arith.truncf %76 : vector<16x128xf32> to vector<16x128xbf16>
    %cst_56 = arith.constant dense<0.000000e+00> : vector<16x128xf32>
    %86 = tpu.matmul %85, %84, %cst_56 {dimension_numbers = #tpu.dot_dimension_numbers<[1], [0], [0], [1], [0, 0, 1, 1], [], []>} : vector<16x128xbf16>, vector<128x128xbf16>, vector<16x128xf32> -> vector<16x128xf32>
    %c0_57 = arith.constant 0 : index
    %c6 = arith.constant 6 : index
    %c0_58 = arith.constant 0 : index
    %87 = vector.load %arg16[%c0_57, %c6, %c0_58] : memref<2x16x128xf32, #tpu.memory_space<vmem>>, vector<1x1x128xf32>
    %88 = vector.shape_cast %87 : vector<1x1x128xf32> to vector<1x128xf32>
    %89 = vector.broadcast %88 : vector<1x128xf32> to vector<16x128xf32>
    %90 = arith.addf %86, %89 : vector<16x128xf32>
    %91 = arith.addf %90, %18 : vector<16x128xf32>
    %c0_59 = arith.constant 0 : index
    %c10 = arith.constant 10 : index
    %c0_60 = arith.constant 0 : index
    %92 = vector.load %arg16[%c0_59, %c10, %c0_60] : memref<2x16x128xf32, #tpu.memory_space<vmem>>, vector<1x1x128xf32>
    %93 = vector.shape_cast %92 : vector<1x1x128xf32> to vector<1x128xf32>
    %c0_61 = arith.constant 0 : index
    %c13 = arith.constant 13 : index
    %c0_62 = arith.constant 0 : index
    %94 = vector.load %arg16[%c0_61, %c13, %c0_62] : memref<2x16x128xf32, #tpu.memory_space<vmem>>, vector<1x1x128xf32>
    %95 = vector.shape_cast %94 : vector<1x1x128xf32> to vector<1x128xf32>
    %96 = arith.mulf %91, %91 : vector<16x128xf32>
    %97 = tpu.concatenate %91, %96 in 0 : vector<16x128xf32>, vector<16x128xf32> -> vector<32x128xf32>
    %cst_63 = arith.constant dense<0.000000e+00> : vector<32x128xf32>
    %98 = tpu.matmul %97, %3, %cst_63 {dimension_numbers = #tpu.dot_dimension_numbers<[1], [0], [0], [1], [0, 0, 1, 1], [], []>} : vector<32x128xf32>, vector<128x128xf32>, vector<32x128xf32> -> vector<32x128xf32>
    %99 = vector.extract_strided_slice %98 {offsets = [0, 0], sizes = [16, 128], strides = [1, 1]} : vector<32x128xf32> to vector<16x128xf32>
    %100 = vector.extract_strided_slice %98 {offsets = [16, 0], sizes = [16, 128], strides = [1, 1]} : vector<32x128xf32> to vector<16x128xf32>
    %101 = arith.mulf %99, %99 : vector<16x128xf32>
    %102 = arith.subf %100, %101 : vector<16x128xf32>
    %cst_64 = arith.constant 0.000000e+00 : f32
    %103 = vector.broadcast %cst_64 : f32 to vector<16x128xf32>
    %104 = arith.maximumf %102, %103 : vector<16x128xf32>
    %105 = arith.subf %91, %99 : vector<16x128xf32>
    %cst_65 = arith.constant 9.99999974E-6 : f32
    %106 = vector.broadcast %cst_65 : f32 to vector<16x128xf32>
    %107 = arith.addf %104, %106 : vector<16x128xf32>
    %108 = math.rsqrt %107 : vector<16x128xf32>
    %109 = arith.mulf %105, %108 : vector<16x128xf32>
    %110 = vector.broadcast %93 : vector<1x128xf32> to vector<16x128xf32>
    %111 = arith.mulf %109, %110 : vector<16x128xf32>
    %112 = vector.broadcast %95 : vector<1x128xf32> to vector<16x128xf32>
    %113 = arith.addf %111, %112 : vector<16x128xf32>
    %114 = tpu.concatenate %47, %47, %47, %47 in 1 : vector<16x128xf32>, vector<16x128xf32>, vector<16x128xf32>, vector<16x128xf32> -> vector<16x512xf32>
    %115 = tpu.concatenate %52, %52, %52, %52 in 1 : vector<16x128xf32>, vector<16x128xf32>, vector<16x128xf32>, vector<16x128xf32> -> vector<16x512xf32>
    %116 = arith.truncf %42 : vector<16x128xf32> to vector<16x128xbf16>
    %cst_66 = arith.constant dense<0.000000e+00> : vector<16x512xf32>
    %117 = tpu.matmul %116, %7, %cst_66 {dimension_numbers = #tpu.dot_dimension_numbers<[1], [0], [0], [1], [0, 0, 1, 1], [], []>} : vector<16x128xbf16>, vector<128x512xbf16>, vector<16x512xf32> -> vector<16x512xf32>
    %118 = arith.mulf %117, %114 : vector<16x512xf32>
    %119 = arith.truncf %118 : vector<16x512xf32> to vector<16x512xbf16>
    %cst_67 = arith.constant dense<0.000000e+00> : vector<16x64xf32>
    %120 = tpu.matmul %119, %8, %cst_67 {dimension_numbers = #tpu.dot_dimension_numbers<[1], [0], [0], [1], [0, 0, 1, 1], [], []>} : vector<16x512xbf16>, vector<512x64xbf16>, vector<16x64xf32> -> vector<16x64xf32>
    %cst_68 = arith.constant dense<0xFF800000> : vector<16xf32>
    %121 = vector.multi_reduction <maximumf>, %120, %cst_68 [1] : vector<16x64xf32> to vector<16xf32>
    %122 = vector.shape_cast %121 : vector<16xf32> to vector<16x1xf32>
    %123 = vector.broadcast %122 : vector<16x1xf32> to vector<16x64xf32>
    %124 = arith.subf %120, %123 : vector<16x64xf32>
    %125 = math.exp %124 : vector<16x64xf32>
    %126 = arith.truncf %125 : vector<16x64xf32> to vector<16x64xbf16>
    %cst_69 = arith.constant dense<0.000000e+00> : vector<16x64xf32>
    %127 = tpu.matmul %126, %9, %cst_69 {dimension_numbers = #tpu.dot_dimension_numbers<[1], [0], [0], [1], [0, 0, 1, 1], [], []>} : vector<16x64xbf16>, vector<64x64xbf16>, vector<16x64xf32> -> vector<16x64xf32>
    %cst_70 = arith.constant 1.000000e-30 : f32
    %128 = vector.broadcast %cst_70 : f32 to vector<16x64xf32>
    %129 = arith.maximumf %127, %128 : vector<16x64xf32>
    %130 = tpu.reciprocal %129 {approx = true} : vector<16x64xf32> -> vector<16x64xf32>
    %131 = arith.mulf %125, %130 : vector<16x64xf32>
    %132 = vector.extract_strided_slice %131 {offsets = [7, 0], sizes = [1, 64], strides = [1, 1]} : vector<16x64xf32> to vector<1x64xf32>
    %133 = vector.extract_strided_slice %131 {offsets = [15, 0], sizes = [1, 64], strides = [1, 1]} : vector<16x64xf32> to vector<1x64xf32>
    %134 = tpu.concatenate %132, %133 in 1 : vector<1x64xf32>, vector<1x64xf32> -> vector<1x128xf32>
    %c0_71 = arith.constant 0 : index
    %c0_72 = arith.constant 0 : index
    %c0_73 = arith.constant 0 : index
    %135 = vector.load %arg19[%c0_71, %c0_72, %c0_73] : memref<2x1x128xf32, #tpu.memory_space<vmem>>, vector<1x1x128xf32>
    %136 = vector.shape_cast %135 : vector<1x1x128xf32> to vector<1x128xf32>
    %137 = vector.shape_cast %134 : vector<1x128xf32> to vector<1x1x128xf32>
    tpu.vector_store %arg19[%c0_71, %c0_72, %c0_73], %137 {strides = array<i32>} : memref<2x1x128xf32, #tpu.memory_space<vmem>>, vector<1x1x128xf32>,
    %138 = arith.truncf %131 : vector<16x64xf32> to vector<16x64xbf16>
    %cst_74 = arith.constant dense<0.000000e+00> : vector<16x512xf32>
    %139 = tpu.matmul %138, %10, %cst_74 {dimension_numbers = #tpu.dot_dimension_numbers<[1], [0], [0], [1], [0, 0, 1, 1], [], []>} : vector<16x64xbf16>, vector<64x512xbf16>, vector<16x512xf32> -> vector<16x512xf32>
    %140 = arith.mulf %139, %115 : vector<16x512xf32>
    %141 = arith.truncf %140 : vector<16x512xf32> to vector<16x512xbf16>
    %cst_75 = arith.constant dense<0.000000e+00> : vector<16x128xf32>
    %142 = tpu.matmul %141, %11, %cst_75 {dimension_numbers = #tpu.dot_dimension_numbers<[1], [0], [0], [1], [0, 0, 1, 1], [], []>} : vector<16x512xbf16>, vector<512x128xbf16>, vector<16x128xf32> -> vector<16x128xf32>
    %c0_76 = arith.constant 0 : index
    %c0_77 = arith.constant 0 : index
    %c896 = arith.constant 896 : index
    %143 = vector.load %arg15[%c0_76, %c0_77, %c896] : memref<2x128x1280xbf16, #tpu.memory_space<vmem>>, vector<1x128x128xbf16>
    %144 = vector.shape_cast %143 : vector<1x128x128xbf16> to vector<128x128xbf16>
    %145 = arith.truncf %142 : vector<16x128xf32> to vector<16x128xbf16>
    %cst_78 = arith.constant dense<0.000000e+00> : vector<16x128xf32>
    %146 = tpu.matmul %145, %144, %cst_78 {dimension_numbers = #tpu.dot_dimension_numbers<[1], [0], [0], [1], [0, 0, 1, 1], [], []>} : vector<16x128xbf16>, vector<128x128xbf16>, vector<16x128xf32> -> vector<16x128xf32>
    %c0_79 = arith.constant 0 : index
    %c7 = arith.constant 7 : index
    %c0_80 = arith.constant 0 : index
    %147 = vector.load %arg16[%c0_79, %c7, %c0_80] : memref<2x16x128xf32, #tpu.memory_space<vmem>>, vector<1x1x128xf32>
    %148 = vector.shape_cast %147 : vector<1x1x128xf32> to vector<1x128xf32>
    %149 = vector.broadcast %148 : vector<1x128xf32> to vector<16x128xf32>
    %150 = arith.addf %146, %149 : vector<16x128xf32>
    %151 = arith.addf %150, %18 : vector<16x128xf32>
    %c0_81 = arith.constant 0 : index
    %c11 = arith.constant 11 : index
    %c0_82 = arith.constant 0 : index
    %152 = vector.load %arg16[%c0_81, %c11, %c0_82] : memref<2x16x128xf32, #tpu.memory_space<vmem>>, vector<1x1x128xf32>
    %153 = vector.shape_cast %152 : vector<1x1x128xf32> to vector<1x128xf32>
    %c0_83 = arith.constant 0 : index
    %c14 = arith.constant 14 : index
    %c0_84 = arith.constant 0 : index
    %154 = vector.load %arg16[%c0_83, %c14, %c0_84] : memref<2x16x128xf32, #tpu.memory_space<vmem>>, vector<1x1x128xf32>
    %155 = vector.shape_cast %154 : vector<1x1x128xf32> to vector<1x128xf32>
    %156 = arith.mulf %151, %151 : vector<16x128xf32>
    %157 = tpu.concatenate %151, %156 in 0 : vector<16x128xf32>, vector<16x128xf32> -> vector<32x128xf32>
    %cst_85 = arith.constant dense<0.000000e+00> : vector<32x128xf32>
    %158 = tpu.matmul %157, %3, %cst_85 {dimension_numbers = #tpu.dot_dimension_numbers<[1], [0], [0], [1], [0, 0, 1, 1], [], []>} : vector<32x128xf32>, vector<128x128xf32>, vector<32x128xf32> -> vector<32x128xf32>
    %159 = vector.extract_strided_slice %158 {offsets = [0, 0], sizes = [16, 128], strides = [1, 1]} : vector<32x128xf32> to vector<16x128xf32>
    %160 = vector.extract_strided_slice %158 {offsets = [16, 0], sizes = [16, 128], strides = [1, 1]} : vector<32x128xf32> to vector<16x128xf32>
    %161 = arith.mulf %159, %159 : vector<16x128xf32>
    %162 = arith.subf %160, %161 : vector<16x128xf32>
    %cst_86 = arith.constant 0.000000e+00 : f32
    %163 = vector.broadcast %cst_86 : f32 to vector<16x128xf32>
    %164 = arith.maximumf %162, %163 : vector<16x128xf32>
    %165 = arith.subf %151, %159 : vector<16x128xf32>
    %cst_87 = arith.constant 9.99999974E-6 : f32
    %166 = vector.broadcast %cst_87 : f32 to vector<16x128xf32>
    %167 = arith.addf %164, %166 : vector<16x128xf32>
    %168 = math.rsqrt %167 : vector<16x128xf32>
    %169 = arith.mulf %165, %168 : vector<16x128xf32>
    %170 = vector.broadcast %153 : vector<1x128xf32> to vector<16x128xf32>
    %171 = arith.mulf %169, %170 : vector<16x128xf32>
    %172 = vector.broadcast %155 : vector<1x128xf32> to vector<16x128xf32>
    %173 = arith.addf %171, %172 : vector<16x128xf32>
    %174 = arith.addf %113, %173 : vector<16x128xf32>
    %c0_88 = arith.constant 0 : index
    %c0_89 = arith.constant 0 : index
    %c1024 = arith.constant 1024 : index
    %175 = vector.load %arg15[%c0_88, %c0_89, %c1024] : memref<2x128x1280xbf16, #tpu.memory_space<vmem>>, vector<1x128x128xbf16>
    %176 = vector.shape_cast %175 : vector<1x128x128xbf16> to vector<128x128xbf16>
    %177 = arith.truncf %174 : vector<16x128xf32> to vector<16x128xbf16>
    %cst_90 = arith.constant dense<0.000000e+00> : vector<16x128xf32>
    %178 = tpu.matmul %177, %176, %cst_90 {dimension_numbers = #tpu.dot_dimension_numbers<[1], [0], [0], [1], [0, 0, 1, 1], [], []>} : vector<16x128xbf16>, vector<128x128xbf16>, vector<16x128xf32> -> vector<16x128xf32>
    %c0_91 = arith.constant 0 : index
    %c8 = arith.constant 8 : index
    %c0_92 = arith.constant 0 : index
    %179 = vector.load %arg16[%c0_91, %c8, %c0_92] : memref<2x16x128xf32, #tpu.memory_space<vmem>>, vector<1x1x128xf32>
    %180 = vector.shape_cast %179 : vector<1x1x128xf32> to vector<1x128xf32>
    %181 = vector.broadcast %180 : vector<1x128xf32> to vector<16x128xf32>
    %182 = arith.addf %178, %181 : vector<16x128xf32>
    %cst_93 = arith.constant 0.000000e+00 : f32
    %183 = vector.broadcast %cst_93 : f32 to vector<16x128xf32>
    %184 = arith.maximumf %182, %183 : vector<16x128xf32>
    %c0_94 = arith.constant 0 : index
    %c0_95 = arith.constant 0 : index
    %c1152 = arith.constant 1152 : index
    %185 = vector.load %arg15[%c0_94, %c0_95, %c1152] : memref<2x128x1280xbf16, #tpu.memory_space<vmem>>, vector<1x128x128xbf16>
    %186 = vector.shape_cast %185 : vector<1x128x128xbf16> to vector<128x128xbf16>
    %187 = arith.truncf %184 : vector<16x128xf32> to vector<16x128xbf16>
    %cst_96 = arith.constant dense<0.000000e+00> : vector<16x128xf32>
    %188 = tpu.matmul %187, %186, %cst_96 {dimension_numbers = #tpu.dot_dimension_numbers<[1], [0], [0], [1], [0, 0, 1, 1], [], []>} : vector<16x128xbf16>, vector<128x128xbf16>, vector<16x128xf32> -> vector<16x128xf32>
    %c0_97 = arith.constant 0 : index
    %c9 = arith.constant 9 : index
    %c0_98 = arith.constant 0 : index
    %189 = vector.load %arg16[%c0_97, %c9, %c0_98] : memref<2x16x128xf32, #tpu.memory_space<vmem>>, vector<1x1x128xf32>
    %190 = vector.shape_cast %189 : vector<1x1x128xf32> to vector<1x128xf32>
    %191 = vector.broadcast %190 : vector<1x128xf32> to vector<16x128xf32>
    %192 = arith.addf %188, %191 : vector<16x128xf32>
    %193 = arith.addf %192, %174 : vector<16x128xf32>
    %c0_99 = arith.constant 0 : index
    %c12 = arith.constant 12 : index
    %c0_100 = arith.constant 0 : index
    %194 = vector.load %arg16[%c0_99, %c12, %c0_100] : memref<2x16x128xf32, #tpu.memory_space<vmem>>, vector<1x1x128xf32>
    %195 = vector.shape_cast %194 : vector<1x1x128xf32> to vector<1x128xf32>
    %c0_101 = arith.constant 0 : index
    %c15 = arith.constant 15 : index
    %c0_102 = arith.constant 0 : index
    %196 = vector.load %arg16[%c0_101, %c15, %c0_102] : memref<2x16x128xf32, #tpu.memory_space<vmem>>, vector<1x1x128xf32>
    %197 = vector.shape_cast %196 : vector<1x1x128xf32> to vector<1x128xf32>
    %198 = arith.mulf %193, %193 : vector<16x128xf32>
    %199 = tpu.concatenate %193, %198 in 0 : vector<16x128xf32>, vector<16x128xf32> -> vector<32x128xf32>
    %cst_103 = arith.constant dense<0.000000e+00> : vector<32x128xf32>
    %200 = tpu.matmul %199, %3, %cst_103 {dimension_numbers = #tpu.dot_dimension_numbers<[1], [0], [0], [1], [0, 0, 1, 1], [], []>} : vector<32x128xf32>, vector<128x128xf32>, vector<32x128xf32> -> vector<32x128xf32>
    %201 = vector.extract_strided_slice %200 {offsets = [0, 0], sizes = [16, 128], strides = [1, 1]} : vector<32x128xf32> to vector<16x128xf32>
    %202 = vector.extract_strided_slice %200 {offsets = [16, 0], sizes = [16, 128], strides = [1, 1]} : vector<32x128xf32> to vector<16x128xf32>
    %203 = arith.mulf %201, %201 : vector<16x128xf32>
    %204 = arith.subf %202, %203 : vector<16x128xf32>
    %cst_104 = arith.constant 0.000000e+00 : f32
    %205 = vector.broadcast %cst_104 : f32 to vector<16x128xf32>
    %206 = arith.maximumf %204, %205 : vector<16x128xf32>
    %207 = arith.subf %193, %201 : vector<16x128xf32>
    %cst_105 = arith.constant 9.99999974E-6 : f32
    %208 = vector.broadcast %cst_105 : f32 to vector<16x128xf32>
    %209 = arith.addf %206, %208 : vector<16x128xf32>
    %210 = math.rsqrt %209 : vector<16x128xf32>
    %211 = arith.mulf %207, %210 : vector<16x128xf32>
    %212 = vector.broadcast %195 : vector<1x128xf32> to vector<16x128xf32>
    %213 = arith.mulf %211, %212 : vector<16x128xf32>
    %214 = vector.broadcast %197 : vector<1x128xf32> to vector<16x128xf32>
    %215 = arith.addf %213, %214 : vector<16x128xf32>
    %c1_106 = arith.constant 1 : index
    %c0_107 = arith.constant 0 : index
    %c0_108 = arith.constant 0 : index
    %216 = vector.load %arg15[%c1_106, %c0_107, %c0_108] : memref<2x128x1280xbf16, #tpu.memory_space<vmem>>, vector<1x128x768xbf16>
    %217 = vector.shape_cast %216 : vector<1x128x768xbf16> to vector<128x768xbf16>
    %218 = arith.truncf %215 : vector<16x128xf32> to vector<16x128xbf16>
    %cst_109 = arith.constant dense<0.000000e+00> : vector<16x768xf32>
    %219 = tpu.matmul %218, %217, %cst_109 {dimension_numbers = #tpu.dot_dimension_numbers<[1], [0], [0], [1], [0, 0, 1, 1], [], []>} : vector<16x128xbf16>, vector<128x768xbf16>, vector<16x768xf32> -> vector<16x768xf32>
    %220 = vector.extract_strided_slice %219 {offsets = [0, 0], sizes = [16, 128], strides = [1, 1]} : vector<16x768xf32> to vector<16x128xf32>
    %c1_110 = arith.constant 1 : index
    %c0_111 = arith.constant 0 : index
    %c0_112 = arith.constant 0 : index
    %221 = vector.load %arg16[%c1_110, %c0_111, %c0_112] : memref<2x16x128xf32, #tpu.memory_space<vmem>>, vector<1x1x128xf32>
    %222 = vector.shape_cast %221 : vector<1x1x128xf32> to vector<1x128xf32>
    %223 = vector.broadcast %222 : vector<1x128xf32> to vector<16x128xf32>
    %224 = arith.addf %220, %223 : vector<16x128xf32>
    %225 = vector.extract_strided_slice %219 {offsets = [0, 128], sizes = [16, 128], strides = [1, 1]} : vector<16x768xf32> to vector<16x128xf32>
    %c1_113 = arith.constant 1 : index
    %c1_114 = arith.constant 1 : index
    %c0_115 = arith.constant 0 : index
    %226 = vector.load %arg16[%c1_113, %c1_114, %c0_115] : memref<2x16x128xf32, #tpu.memory_space<vmem>>, vector<1x1x128xf32>
    %227 = vector.shape_cast %226 : vector<1x1x128xf32> to vector<1x128xf32>
    %228 = vector.broadcast %227 : vector<1x128xf32> to vector<16x128xf32>
    %229 = arith.addf %225, %228 : vector<16x128xf32>
    %230 = vector.extract_strided_slice %219 {offsets = [0, 256], sizes = [16, 128], strides = [1, 1]} : vector<16x768xf32> to vector<16x128xf32>
    %c1_116 = arith.constant 1 : index
    %c2_117 = arith.constant 2 : index
    %c0_118 = arith.constant 0 : index
    %231 = vector.load %arg16[%c1_116, %c2_117, %c0_118] : memref<2x16x128xf32, #tpu.memory_space<vmem>>, vector<1x1x128xf32>
    %232 = vector.shape_cast %231 : vector<1x1x128xf32> to vector<1x128xf32>
    %233 = vector.broadcast %232 : vector<1x128xf32> to vector<16x128xf32>
    %234 = arith.addf %230, %233 : vector<16x128xf32>
    %235 = vector.extract_strided_slice %219 {offsets = [0, 384], sizes = [16, 128], strides = [1, 1]} : vector<16x768xf32> to vector<16x128xf32>
    %c1_119 = arith.constant 1 : index
    %c3_120 = arith.constant 3 : index
    %c0_121 = arith.constant 0 : index
    %236 = vector.load %arg16[%c1_119, %c3_120, %c0_121] : memref<2x16x128xf32, #tpu.memory_space<vmem>>, vector<1x1x128xf32>
    %237 = vector.shape_cast %236 : vector<1x1x128xf32> to vector<1x128xf32>
    %238 = vector.broadcast %237 : vector<1x128xf32> to vector<16x128xf32>
    %239 = arith.addf %235, %238 : vector<16x128xf32>
    %240 = vector.extract_strided_slice %219 {offsets = [0, 512], sizes = [16, 128], strides = [1, 1]} : vector<16x768xf32> to vector<16x128xf32>
    %c1_122 = arith.constant 1 : index
    %c4_123 = arith.constant 4 : index
    %c0_124 = arith.constant 0 : index
    %241 = vector.load %arg16[%c1_122, %c4_123, %c0_124] : memref<2x16x128xf32, #tpu.memory_space<vmem>>, vector<1x1x128xf32>
    %242 = vector.shape_cast %241 : vector<1x1x128xf32> to vector<1x128xf32>
    %243 = vector.broadcast %242 : vector<1x128xf32> to vector<16x128xf32>
    %244 = arith.addf %240, %243 : vector<16x128xf32>
    %245 = vector.extract_strided_slice %219 {offsets = [0, 640], sizes = [16, 128], strides = [1, 1]} : vector<16x768xf32> to vector<16x128xf32>
    %c1_125 = arith.constant 1 : index
    %c5_126 = arith.constant 5 : index
    %c0_127 = arith.constant 0 : index
    %246 = vector.load %arg16[%c1_125, %c5_126, %c0_127] : memref<2x16x128xf32, #tpu.memory_space<vmem>>, vector<1x1x128xf32>
    %247 = vector.shape_cast %246 : vector<1x1x128xf32> to vector<1x128xf32>
    %248 = vector.broadcast %247 : vector<1x128xf32> to vector<16x128xf32>
    %249 = arith.addf %245, %248 : vector<16x128xf32>
    %250 = arith.truncf %229 : vector<16x128xf32> to vector<16x128xbf16>
    %cst_128 = arith.constant dense<0.000000e+00> : vector<256x128xf32>
    %251 = tpu.matmul %5, %250, %cst_128 {dimension_numbers = #tpu.dot_dimension_numbers<[1], [0], [0], [1], [0, 0, 1, 1], [], []>} : vector<256x16xbf16>, vector<16x128xbf16>, vector<256x128xf32> -> vector<256x128xf32>
    %252 = arith.mulf %251, %4 : vector<256x128xf32>
    %253 = arith.truncf %234 : vector<16x128xf32> to vector<16x128xbf16>
    %cst_129 = arith.constant dense<0.000000e+00> : vector<256x128xf32>
    %254 = tpu.matmul %5, %253, %cst_129 {dimension_numbers = #tpu.dot_dimension_numbers<[1], [0], [0], [1], [0, 0, 1, 1], [], []>} : vector<256x16xbf16>, vector<16x128xbf16>, vector<256x128xf32> -> vector<256x128xf32>
    %255 = arith.mulf %254, %4 : vector<256x128xf32>
    %256 = arith.truncf %224 : vector<16x128xf32> to vector<16x128xbf16>
    %257 = arith.truncf %252 : vector<256x128xf32> to vector<256x128xbf16>
    %cst_130 = arith.constant dense<0.000000e+00> : vector<16x256xf32>
    %258 = tpu.matmul %256, %257, %cst_130 {dimension_numbers = #tpu.dot_dimension_numbers<[1], [1], [0], [0], [0, 0, 1, 0], [], []>} : vector<16x128xbf16>, vector<256x128xbf16>, vector<16x256xf32> -> vector<16x256xf32>
    %259 = arith.addf %258, %2 : vector<16x256xf32>
    %cst_131 = arith.constant dense<0xFF800000> : vector<16xf32>
    %260 = vector.multi_reduction <maximumf>, %259, %cst_131 [1] : vector<16x256xf32> to vector<16xf32>
    %261 = vector.shape_cast %260 : vector<16xf32> to vector<16x1xf32>
    %262 = vector.broadcast %261 : vector<16x1xf32> to vector<16x256xf32>
    %263 = arith.subf %259, %262 : vector<16x256xf32>
    %264 = math.exp %263 : vector<16x256xf32>
    %265 = arith.truncf %264 : vector<16x256xf32> to vector<16x256xbf16>
    %cst_132 = arith.constant dense<0.000000e+00> : vector<16x256xf32>
    %266 = tpu.matmul %265, %6, %cst_132 {dimension_numbers = #tpu.dot_dimension_numbers<[1], [0], [0], [1], [0, 0, 1, 1], [], []>} : vector<16x256xbf16>, vector<256x256xbf16>, vector<16x256xf32> -> vector<16x256xf32>
    %cst_133 = arith.constant 1.000000e-30 : f32
    %267 = vector.broadcast %cst_133 : f32 to vector<16x256xf32>
    %268 = arith.maximumf %266, %267 : vector<16x256xf32>
    %269 = tpu.reciprocal %268 {approx = true} : vector<16x256xf32> -> vector<16x256xf32>
    %270 = arith.mulf %264, %269 : vector<16x256xf32>
    %271 = arith.truncf %270 : vector<16x256xf32> to vector<16x256xbf16>
    %272 = arith.truncf %255 : vector<256x128xf32> to vector<256x128xbf16>
    %cst_134 = arith.constant dense<0.000000e+00> : vector<16x128xf32>
    %273 = tpu.matmul %271, %272, %cst_134 {dimension_numbers = #tpu.dot_dimension_numbers<[1], [0], [0], [1], [0, 0, 1, 1], [], []>} : vector<16x256xbf16>, vector<256x128xbf16>, vector<16x128xf32> -> vector<16x128xf32>
    %274 = vector.extract_strided_slice %270 {offsets = [7, 0], sizes = [1, 256], strides = [1, 1]} : vector<16x256xf32> to vector<1x256xf32>
    %275 = vector.extract_strided_slice %270 {offsets = [15, 0], sizes = [1, 256], strides = [1, 1]} : vector<16x256xf32> to vector<1x256xf32>
    %276 = tpu.concatenate %274, %275 in 0 : vector<1x256xf32>, vector<1x256xf32> -> vector<2x256xf32>
    %c1_135 = arith.constant 1 : index
    %c0_136 = arith.constant 0 : index
    %c0_137 = arith.constant 0 : index
    %277 = vector.load %arg18[%c1_135, %c0_136, %c0_137] : memref<2x2x256xf32, #tpu.memory_space<vmem>>, vector<1x2x256xf32>
    %278 = vector.shape_cast %277 : vector<1x2x256xf32> to vector<2x256xf32>
    %279 = vector.shape_cast %276 : vector<2x256xf32> to vector<1x2x256xf32>
    tpu.vector_store %arg18[%c1_135, %c0_136, %c0_137], %279 {strides = array<i32>} : memref<2x2x256xf32, #tpu.memory_space<vmem>>, vector<1x2x256xf32>,
    %c1_138 = arith.constant 1 : index
    %c0_139 = arith.constant 0 : index
    %c768_140 = arith.constant 768 : index
    %280 = vector.load %arg15[%c1_138, %c0_139, %c768_140] : memref<2x128x1280xbf16, #tpu.memory_space<vmem>>, vector<1x128x128xbf16>
    %281 = vector.shape_cast %280 : vector<1x128x128xbf16> to vector<128x128xbf16>
    %282 = arith.truncf %273 : vector<16x128xf32> to vector<16x128xbf16>
    %cst_141 = arith.constant dense<0.000000e+00> : vector<16x128xf32>
    %283 = tpu.matmul %282, %281, %cst_141 {dimension_numbers = #tpu.dot_dimension_numbers<[1], [0], [0], [1], [0, 0, 1, 1], [], []>} : vector<16x128xbf16>, vector<128x128xbf16>, vector<16x128xf32> -> vector<16x128xf32>
    %c1_142 = arith.constant 1 : index
    %c6_143 = arith.constant 6 : index
    %c0_144 = arith.constant 0 : index
    %284 = vector.load %arg16[%c1_142, %c6_143, %c0_144] : memref<2x16x128xf32, #tpu.memory_space<vmem>>, vector<1x1x128xf32>
    %285 = vector.shape_cast %284 : vector<1x1x128xf32> to vector<1x128xf32>
    %286 = vector.broadcast %285 : vector<1x128xf32> to vector<16x128xf32>
    %287 = arith.addf %283, %286 : vector<16x128xf32>
    %288 = arith.addf %287, %215 : vector<16x128xf32>
    %c1_145 = arith.constant 1 : index
    %c10_146 = arith.constant 10 : index
    %c0_147 = arith.constant 0 : index
    %289 = vector.load %arg16[%c1_145, %c10_146, %c0_147] : memref<2x16x128xf32, #tpu.memory_space<vmem>>, vector<1x1x128xf32>
    %290 = vector.shape_cast %289 : vector<1x1x128xf32> to vector<1x128xf32>
    %c1_148 = arith.constant 1 : index
    %c13_149 = arith.constant 13 : index
    %c0_150 = arith.constant 0 : index
    %291 = vector.load %arg16[%c1_148, %c13_149, %c0_150] : memref<2x16x128xf32, #tpu.memory_space<vmem>>, vector<1x1x128xf32>
    %292 = vector.shape_cast %291 : vector<1x1x128xf32> to vector<1x128xf32>
    %293 = arith.mulf %288, %288 : vector<16x128xf32>
    %294 = tpu.concatenate %288, %293 in 0 : vector<16x128xf32>, vector<16x128xf32> -> vector<32x128xf32>
    %cst_151 = arith.constant dense<0.000000e+00> : vector<32x128xf32>
    %295 = tpu.matmul %294, %3, %cst_151 {dimension_numbers = #tpu.dot_dimension_numbers<[1], [0], [0], [1], [0, 0, 1, 1], [], []>} : vector<32x128xf32>, vector<128x128xf32>, vector<32x128xf32> -> vector<32x128xf32>
    %296 = vector.extract_strided_slice %295 {offsets = [0, 0], sizes = [16, 128], strides = [1, 1]} : vector<32x128xf32> to vector<16x128xf32>
    %297 = vector.extract_strided_slice %295 {offsets = [16, 0], sizes = [16, 128], strides = [1, 1]} : vector<32x128xf32> to vector<16x128xf32>
    %298 = arith.mulf %296, %296 : vector<16x128xf32>
    %299 = arith.subf %297, %298 : vector<16x128xf32>
    %cst_152 = arith.constant 0.000000e+00 : f32
    %300 = vector.broadcast %cst_152 : f32 to vector<16x128xf32>
    %301 = arith.maximumf %299, %300 : vector<16x128xf32>
    %302 = arith.subf %288, %296 : vector<16x128xf32>
    %cst_153 = arith.constant 9.99999974E-6 : f32
    %303 = vector.broadcast %cst_153 : f32 to vector<16x128xf32>
    %304 = arith.addf %301, %303 : vector<16x128xf32>
    %305 = math.rsqrt %304 : vector<16x128xf32>
    %306 = arith.mulf %302, %305 : vector<16x128xf32>
    %307 = vector.broadcast %290 : vector<1x128xf32> to vector<16x128xf32>
    %308 = arith.mulf %306, %307 : vector<16x128xf32>
    %309 = vector.broadcast %292 : vector<1x128xf32> to vector<16x128xf32>
    %310 = arith.addf %308, %309 : vector<16x128xf32>
    %311 = tpu.concatenate %244, %244, %244, %244 in 1 : vector<16x128xf32>, vector<16x128xf32>, vector<16x128xf32>, vector<16x128xf32> -> vector<16x512xf32>
    %312 = tpu.concatenate %249, %249, %249, %249 in 1 : vector<16x128xf32>, vector<16x128xf32>, vector<16x128xf32>, vector<16x128xf32> -> vector<16x512xf32>
    %313 = arith.truncf %239 : vector<16x128xf32> to vector<16x128xbf16>
    %cst_154 = arith.constant dense<0.000000e+00> : vector<16x512xf32>
    %314 = tpu.matmul %313, %7, %cst_154 {dimension_numbers = #tpu.dot_dimension_numbers<[1], [0], [0], [1], [0, 0, 1, 1], [], []>} : vector<16x128xbf16>, vector<128x512xbf16>, vector<16x512xf32> -> vector<16x512xf32>
    %315 = arith.mulf %314, %311 : vector<16x512xf32>
    %316 = arith.truncf %315 : vector<16x512xf32> to vector<16x512xbf16>
    %cst_155 = arith.constant dense<0.000000e+00> : vector<16x64xf32>
    %317 = tpu.matmul %316, %8, %cst_155 {dimension_numbers = #tpu.dot_dimension_numbers<[1], [0], [0], [1], [0, 0, 1, 1], [], []>} : vector<16x512xbf16>, vector<512x64xbf16>, vector<16x64xf32> -> vector<16x64xf32>
    %cst_156 = arith.constant dense<0xFF800000> : vector<16xf32>
    %318 = vector.multi_reduction <maximumf>, %317, %cst_156 [1] : vector<16x64xf32> to vector<16xf32>
    %319 = vector.shape_cast %318 : vector<16xf32> to vector<16x1xf32>
    %320 = vector.broadcast %319 : vector<16x1xf32> to vector<16x64xf32>
    %321 = arith.subf %317, %320 : vector<16x64xf32>
    %322 = math.exp %321 : vector<16x64xf32>
    %323 = arith.truncf %322 : vector<16x64xf32> to vector<16x64xbf16>
    %cst_157 = arith.constant dense<0.000000e+00> : vector<16x64xf32>
    %324 = tpu.matmul %323, %9, %cst_157 {dimension_numbers = #tpu.dot_dimension_numbers<[1], [0], [0], [1], [0, 0, 1, 1], [], []>} : vector<16x64xbf16>, vector<64x64xbf16>, vector<16x64xf32> -> vector<16x64xf32>
    %cst_158 = arith.constant 1.000000e-30 : f32
    %325 = vector.broadcast %cst_158 : f32 to vector<16x64xf32>
    %326 = arith.maximumf %324, %325 : vector<16x64xf32>
    %327 = tpu.reciprocal %326 {approx = true} : vector<16x64xf32> -> vector<16x64xf32>
    %328 = arith.mulf %322, %327 : vector<16x64xf32>
    %329 = vector.extract_strided_slice %328 {offsets = [7, 0], sizes = [1, 64], strides = [1, 1]} : vector<16x64xf32> to vector<1x64xf32>
    %330 = vector.extract_strided_slice %328 {offsets = [15, 0], sizes = [1, 64], strides = [1, 1]} : vector<16x64xf32> to vector<1x64xf32>
    %331 = tpu.concatenate %329, %330 in 1 : vector<1x64xf32>, vector<1x64xf32> -> vector<1x128xf32>
    %c1_159 = arith.constant 1 : index
    %c0_160 = arith.constant 0 : index
    %c0_161 = arith.constant 0 : index
    %332 = vector.load %arg19[%c1_159, %c0_160, %c0_161] : memref<2x1x128xf32, #tpu.memory_space<vmem>>, vector<1x1x128xf32>
    %333 = vector.shape_cast %332 : vector<1x1x128xf32> to vector<1x128xf32>
    %334 = vector.shape_cast %331 : vector<1x128xf32> to vector<1x1x128xf32>
    tpu.vector_store %arg19[%c1_159, %c0_160, %c0_161], %334 {strides = array<i32>} : memref<2x1x128xf32, #tpu.memory_space<vmem>>, vector<1x1x128xf32>,
    %335 = arith.truncf %328 : vector<16x64xf32> to vector<16x64xbf16>
    %cst_162 = arith.constant dense<0.000000e+00> : vector<16x512xf32>
    %336 = tpu.matmul %335, %10, %cst_162 {dimension_numbers = #tpu.dot_dimension_numbers<[1], [0], [0], [1], [0, 0, 1, 1], [], []>} : vector<16x64xbf16>, vector<64x512xbf16>, vector<16x512xf32> -> vector<16x512xf32>
    %337 = arith.mulf %336, %312 : vector<16x512xf32>
    %338 = arith.truncf %337 : vector<16x512xf32> to vector<16x512xbf16>
    %cst_163 = arith.constant dense<0.000000e+00> : vector<16x128xf32>
    %339 = tpu.matmul %338, %11, %cst_163 {dimension_numbers = #tpu.dot_dimension_numbers<[1], [0], [0], [1], [0, 0, 1, 1], [], []>} : vector<16x512xbf16>, vector<512x128xbf16>, vector<16x128xf32> -> vector<16x128xf32>
    %c1_164 = arith.constant 1 : index
    %c0_165 = arith.constant 0 : index
    %c896_166 = arith.constant 896 : index
    %340 = vector.load %arg15[%c1_164, %c0_165, %c896_166] : memref<2x128x1280xbf16, #tpu.memory_space<vmem>>, vector<1x128x128xbf16>
    %341 = vector.shape_cast %340 : vector<1x128x128xbf16> to vector<128x128xbf16>
    %342 = arith.truncf %339 : vector<16x128xf32> to vector<16x128xbf16>
    %cst_167 = arith.constant dense<0.000000e+00> : vector<16x128xf32>
    %343 = tpu.matmul %342, %341, %cst_167 {dimension_numbers = #tpu.dot_dimension_numbers<[1], [0], [0], [1], [0, 0, 1, 1], [], []>} : vector<16x128xbf16>, vector<128x128xbf16>, vector<16x128xf32> -> vector<16x128xf32>
    %c1_168 = arith.constant 1 : index
    %c7_169 = arith.constant 7 : index
    %c0_170 = arith.constant 0 : index
    %344 = vector.load %arg16[%c1_168, %c7_169, %c0_170] : memref<2x16x128xf32, #tpu.memory_space<vmem>>, vector<1x1x128xf32>
    %345 = vector.shape_cast %344 : vector<1x1x128xf32> to vector<1x128xf32>
    %346 = vector.broadcast %345 : vector<1x128xf32> to vector<16x128xf32>
    %347 = arith.addf %343, %346 : vector<16x128xf32>
    %348 = arith.addf %347, %215 : vector<16x128xf32>
    %c1_171 = arith.constant 1 : index
    %c11_172 = arith.constant 11 : index
    %c0_173 = arith.constant 0 : index
    %349 = vector.load %arg16[%c1_171, %c11_172, %c0_173] : memref<2x16x128xf32, #tpu.memory_space<vmem>>, vector<1x1x128xf32>
    %350 = vector.shape_cast %349 : vector<1x1x128xf32> to vector<1x128xf32>
    %c1_174 = arith.constant 1 : index
    %c14_175 = arith.constant 14 : index
    %c0_176 = arith.constant 0 : index
    %351 = vector.load %arg16[%c1_174, %c14_175, %c0_176] : memref<2x16x128xf32, #tpu.memory_space<vmem>>, vector<1x1x128xf32>
    %352 = vector.shape_cast %351 : vector<1x1x128xf32> to vector<1x128xf32>
    %353 = arith.mulf %348, %348 : vector<16x128xf32>
    %354 = tpu.concatenate %348, %353 in 0 : vector<16x128xf32>, vector<16x128xf32> -> vector<32x128xf32>
    %cst_177 = arith.constant dense<0.000000e+00> : vector<32x128xf32>
    %355 = tpu.matmul %354, %3, %cst_177 {dimension_numbers = #tpu.dot_dimension_numbers<[1], [0], [0], [1], [0, 0, 1, 1], [], []>} : vector<32x128xf32>, vector<128x128xf32>, vector<32x128xf32> -> vector<32x128xf32>
    %356 = vector.extract_strided_slice %355 {offsets = [0, 0], sizes = [16, 128], strides = [1, 1]} : vector<32x128xf32> to vector<16x128xf32>
    %357 = vector.extract_strided_slice %355 {offsets = [16, 0], sizes = [16, 128], strides = [1, 1]} : vector<32x128xf32> to vector<16x128xf32>
    %358 = arith.mulf %356, %356 : vector<16x128xf32>
    %359 = arith.subf %357, %358 : vector<16x128xf32>
    %cst_178 = arith.constant 0.000000e+00 : f32
    %360 = vector.broadcast %cst_178 : f32 to vector<16x128xf32>
    %361 = arith.maximumf %359, %360 : vector<16x128xf32>
    %362 = arith.subf %348, %356 : vector<16x128xf32>
    %cst_179 = arith.constant 9.99999974E-6 : f32
    %363 = vector.broadcast %cst_179 : f32 to vector<16x128xf32>
    %364 = arith.addf %361, %363 : vector<16x128xf32>
    %365 = math.rsqrt %364 : vector<16x128xf32>
    %366 = arith.mulf %362, %365 : vector<16x128xf32>
    %367 = vector.broadcast %350 : vector<1x128xf32> to vector<16x128xf32>
    %368 = arith.mulf %366, %367 : vector<16x128xf32>
    %369 = vector.broadcast %352 : vector<1x128xf32> to vector<16x128xf32>
    %370 = arith.addf %368, %369 : vector<16x128xf32>
    %371 = arith.addf %310, %370 : vector<16x128xf32>
    %c1_180 = arith.constant 1 : index
    %c0_181 = arith.constant 0 : index
    %c1024_182 = arith.constant 1024 : index
    %372 = vector.load %arg15[%c1_180, %c0_181, %c1024_182] : memref<2x128x1280xbf16, #tpu.memory_space<vmem>>, vector<1x128x128xbf16>
    %373 = vector.shape_cast %372 : vector<1x128x128xbf16> to vector<128x128xbf16>
    %374 = arith.truncf %371 : vector<16x128xf32> to vector<16x128xbf16>
    %cst_183 = arith.constant dense<0.000000e+00> : vector<16x128xf32>
    %375 = tpu.matmul %374, %373, %cst_183 {dimension_numbers = #tpu.dot_dimension_numbers<[1], [0], [0], [1], [0, 0, 1, 1], [], []>} : vector<16x128xbf16>, vector<128x128xbf16>, vector<16x128xf32> -> vector<16x128xf32>
    %c1_184 = arith.constant 1 : index
    %c8_185 = arith.constant 8 : index
    %c0_186 = arith.constant 0 : index
    %376 = vector.load %arg16[%c1_184, %c8_185, %c0_186] : memref<2x16x128xf32, #tpu.memory_space<vmem>>, vector<1x1x128xf32>
    %377 = vector.shape_cast %376 : vector<1x1x128xf32> to vector<1x128xf32>
    %378 = vector.broadcast %377 : vector<1x128xf32> to vector<16x128xf32>
    %379 = arith.addf %375, %378 : vector<16x128xf32>
    %cst_187 = arith.constant 0.000000e+00 : f32
    %380 = vector.broadcast %cst_187 : f32 to vector<16x128xf32>
    %381 = arith.maximumf %379, %380 : vector<16x128xf32>
    %c1_188 = arith.constant 1 : index
    %c0_189 = arith.constant 0 : index
    %c1152_190 = arith.constant 1152 : index
    %382 = vector.load %arg15[%c1_188, %c0_189, %c1152_190] : memref<2x128x1280xbf16, #tpu.memory_space<vmem>>, vector<1x128x128xbf16>
    %383 = vector.shape_cast %382 : vector<1x128x128xbf16> to vector<128x128xbf16>
    %384 = arith.truncf %381 : vector<16x128xf32> to vector<16x128xbf16>
    %cst_191 = arith.constant dense<0.000000e+00> : vector<16x128xf32>
    %385 = tpu.matmul %384, %383, %cst_191 {dimension_numbers = #tpu.dot_dimension_numbers<[1], [0], [0], [1], [0, 0, 1, 1], [], []>} : vector<16x128xbf16>, vector<128x128xbf16>, vector<16x128xf32> -> vector<16x128xf32>
    %c1_192 = arith.constant 1 : index
    %c9_193 = arith.constant 9 : index
    %c0_194 = arith.constant 0 : index
    %386 = vector.load %arg16[%c1_192, %c9_193, %c0_194] : memref<2x16x128xf32, #tpu.memory_space<vmem>>, vector<1x1x128xf32>
    %387 = vector.shape_cast %386 : vector<1x1x128xf32> to vector<1x128xf32>
    %388 = vector.broadcast %387 : vector<1x128xf32> to vector<16x128xf32>
    %389 = arith.addf %385, %388 : vector<16x128xf32>
    %390 = arith.addf %389, %371 : vector<16x128xf32>
    %c1_195 = arith.constant 1 : index
    %c12_196 = arith.constant 12 : index
    %c0_197 = arith.constant 0 : index
    %391 = vector.load %arg16[%c1_195, %c12_196, %c0_197] : memref<2x16x128xf32, #tpu.memory_space<vmem>>, vector<1x1x128xf32>
    %392 = vector.shape_cast %391 : vector<1x1x128xf32> to vector<1x128xf32>
    %c1_198 = arith.constant 1 : index
    %c15_199 = arith.constant 15 : index
    %c0_200 = arith.constant 0 : index
    %393 = vector.load %arg16[%c1_198, %c15_199, %c0_200] : memref<2x16x128xf32, #tpu.memory_space<vmem>>, vector<1x1x128xf32>
    %394 = vector.shape_cast %393 : vector<1x1x128xf32> to vector<1x128xf32>
    %395 = arith.mulf %390, %390 : vector<16x128xf32>
    %396 = tpu.concatenate %390, %395 in 0 : vector<16x128xf32>, vector<16x128xf32> -> vector<32x128xf32>
    %cst_201 = arith.constant dense<0.000000e+00> : vector<32x128xf32>
    %397 = tpu.matmul %396, %3, %cst_201 {dimension_numbers = #tpu.dot_dimension_numbers<[1], [0], [0], [1], [0, 0, 1, 1], [], []>} : vector<32x128xf32>, vector<128x128xf32>, vector<32x128xf32> -> vector<32x128xf32>
    %398 = vector.extract_strided_slice %397 {offsets = [0, 0], sizes = [16, 128], strides = [1, 1]} : vector<32x128xf32> to vector<16x128xf32>
    %399 = vector.extract_strided_slice %397 {offsets = [16, 0], sizes = [16, 128], strides = [1, 1]} : vector<32x128xf32> to vector<16x128xf32>
    %400 = arith.mulf %398, %398 : vector<16x128xf32>
    %401 = arith.subf %399, %400 : vector<16x128xf32>
    %cst_202 = arith.constant 0.000000e+00 : f32
    %402 = vector.broadcast %cst_202 : f32 to vector<16x128xf32>
    %403 = arith.maximumf %401, %402 : vector<16x128xf32>
    %404 = arith.subf %390, %398 : vector<16x128xf32>
    %cst_203 = arith.constant 9.99999974E-6 : f32
    %405 = vector.broadcast %cst_203 : f32 to vector<16x128xf32>
    %406 = arith.addf %403, %405 : vector<16x128xf32>
    %407 = math.rsqrt %406 : vector<16x128xf32>
    %408 = arith.mulf %404, %407 : vector<16x128xf32>
    %409 = vector.broadcast %392 : vector<1x128xf32> to vector<16x128xf32>
    %410 = arith.mulf %408, %409 : vector<16x128xf32>
    %411 = vector.broadcast %394 : vector<1x128xf32> to vector<16x128xf32>
    %412 = arith.addf %410, %411 : vector<16x128xf32>
    %c0_204 = arith.constant 0 : index
    %c128 = arith.constant 128 : index
    %413 = vector.load %arg13[%c0_204, %c128] : memref<128x256xbf16, #tpu.memory_space<vmem>>, vector<128x128xbf16>
    %414 = arith.truncf %412 : vector<16x128xf32> to vector<16x128xbf16>
    %cst_205 = arith.constant dense<0.000000e+00> : vector<16x128xf32>
    %415 = tpu.matmul %414, %413, %cst_205 {dimension_numbers = #tpu.dot_dimension_numbers<[1], [0], [0], [1], [0, 0, 1, 1], [], []>} : vector<16x128xbf16>, vector<128x128xbf16>, vector<16x128xf32> -> vector<16x128xf32>
    %c1_206 = arith.constant 1 : index
    %c0_207 = arith.constant 0 : index
    %416 = vector.load %arg14[%c1_206, %c0_207] : memref<2x128xf32, #tpu.memory_space<vmem>>, vector<1x128xf32>
    %417 = vector.broadcast %416 : vector<1x128xf32> to vector<16x128xf32>
    %418 = arith.addf %415, %417 : vector<16x128xf32>
    %419 = arith.addf %418, %0 : vector<16x128xf32>
    %c0_208 = arith.constant 0 : index
    %c0_209 = arith.constant 0 : index
    %420 = vector.load %arg17[%c0_208, %c0_209] : memref<16x128xf32, #tpu.memory_space<vmem>>, vector<16x128xf32>
    tpu.vector_store %arg17[%c0_208, %c0_209], %419 {strides = array<i32>} : memref<16x128xf32, #tpu.memory_space<vmem>>, vector<16x128xf32>,
    return
  }
  func.func @transform_0(%arg0: i32) -> (i32, i32) {
    %c0_i32 = arith.constant 0 : i32
    %c0_i32_0 = arith.constant 0 : i32
    %c0_i32_1 = arith.constant 0 : i32
    return %c0_i32, %c0_i32_0 : i32, i32
  }
  func.func @transform_1(%arg0: i32) -> (i32, i32) {
    %c0_i32 = arith.constant 0 : i32
    %c0_i32_0 = arith.constant 0 : i32
    %c0_i32_1 = arith.constant 0 : i32
    return %c0_i32, %c0_i32_0 : i32, i32
  }
  func.func @transform_2(%arg0: i32) -> (i32, i32) {
    %c0_i32 = arith.constant 0 : i32
    %c0_i32_0 = arith.constant 0 : i32
    %c0_i32_1 = arith.constant 0 : i32
    return %c0_i32, %c0_i32_0 : i32, i32
  }
  func.func @transform_3(%arg0: i32) -> (i32, i32) {
    %c0_i32 = arith.constant 0 : i32
    %c0_i32_0 = arith.constant 0 : i32
    %c0_i32_1 = arith.constant 0 : i32
    return %c0_i32, %c0_i32_0 : i32, i32
  }
  func.func @transform_4(%arg0: i32) -> (i32, i32) {
    %c0_i32 = arith.constant 0 : i32
    %c0_i32_0 = arith.constant 0 : i32
    %c0_i32_1 = arith.constant 0 : i32
    return %c0_i32, %c0_i32_0 : i32, i32
  }
  func.func @transform_5(%arg0: i32) -> (i32, i32) {
    %c0_i32 = arith.constant 0 : i32
    %c0_i32_0 = arith.constant 0 : i32
    %c0_i32_1 = arith.constant 0 : i32
    return %c0_i32, %c0_i32_0 : i32, i32
  }
  func.func @transform_6(%arg0: i32) -> (i32, i32) {
    %c0_i32 = arith.constant 0 : i32
    %c0_i32_0 = arith.constant 0 : i32
    %c0_i32_1 = arith.constant 0 : i32
    return %c0_i32, %c0_i32_0 : i32, i32
  }
  func.func @transform_7(%arg0: i32) -> (i32, i32) {
    %c0_i32 = arith.constant 0 : i32
    %c0_i32_0 = arith.constant 0 : i32
    %c0_i32_1 = arith.constant 0 : i32
    return %c0_i32, %c0_i32_0 : i32, i32
  }
  func.func @transform_8(%arg0: i32) -> (i32, i32) {
    %c0_i32 = arith.constant 0 : i32
    %c0_i32_0 = arith.constant 0 : i32
    %c0_i32_1 = arith.constant 0 : i32
    return %c0_i32, %c0_i32_0 : i32, i32
  }
  func.func @transform_9(%arg0: i32) -> (i32, i32) {
    %c0_i32 = arith.constant 0 : i32
    %c0_i32_0 = arith.constant 0 : i32
    %c0_i32_1 = arith.constant 0 : i32
    return %c0_i32, %c0_i32_0 : i32, i32
  }
  func.func @transform_10(%arg0: i32) -> (i32, i32) {
    %c0_i32 = arith.constant 0 : i32
    %c0_i32_0 = arith.constant 0 : i32
    %c0_i32_1 = arith.constant 0 : i32
    return %c0_i32, %c0_i32_0 : i32, i32
  }
  func.func @transform_11(%arg0: i32) -> (i32, i32) {
    %c0_i32 = arith.constant 0 : i32
    %c0_i32_0 = arith.constant 0 : i32
    %c0_i32_1 = arith.constant 0 : i32
    return %c0_i32, %c0_i32_0 : i32, i32
  }
  func.func @transform_12(%arg0: i32) -> (i32, i32) {
    %c0_i32 = arith.constant 0 : i32
    %c0_i32_0 = arith.constant 0 : i32
    %c0_i32_1 = arith.constant 0 : i32
    return %c0_i32, %c0_i32_0 : i32, i32
  }
  func.func @transform_13(%arg0: i32) -> (i32, i32) {
    %c0_i32 = arith.constant 0 : i32
    %c0_i32_0 = arith.constant 0 : i32
    %c0_i32_1 = arith.constant 0 : i32
    return %c0_i32, %c0_i32_0 : i32, i32
  }
  func.func @transform_14(%arg0: i32) -> (i32, i32, i32) {
    %c0_i32 = arith.constant 0 : i32
    %c0_i32_0 = arith.constant 0 : i32
    %c0_i32_1 = arith.constant 0 : i32
    %c0_i32_2 = arith.constant 0 : i32
    return %c0_i32, %c0_i32_0, %c0_i32_1 : i32, i32, i32
  }
  func.func @transform_15(%arg0: i32) -> (i32, i32, i32) {
    %c0_i32 = arith.constant 0 : i32
    %c0_i32_0 = arith.constant 0 : i32
    %c0_i32_1 = arith.constant 0 : i32
    %c0_i32_2 = arith.constant 0 : i32
    return %c0_i32, %c0_i32_0, %c0_i32_1 : i32, i32, i32
  }
  func.func @transform_16(%arg0: i32) -> (i32, i32) {
    %c0_i32 = arith.constant 0 : i32
    %c0_i32_0 = arith.constant 0 : i32
    %c0_i32_1 = arith.constant 0 : i32
    return %c0_i32, %c0_i32_0 : i32, i32
  }
  func.func @transform_17(%arg0: i32) -> (i32, i32, i32) {
    %c0_i32 = arith.constant 0 : i32
    %c0_i32_0 = arith.constant 0 : i32
    %c0_i32_1 = arith.constant 0 : i32
    %c0_i32_2 = arith.constant 0 : i32
    return %c0_i32, %c0_i32_0, %c0_i32_1 : i32, i32, i32
  }
  func.func @transform_18(%arg0: i32) -> (i32, i32, i32) {
    %c0_i32 = arith.constant 0 : i32
    %c0_i32_0 = arith.constant 0 : i32
    %c0_i32_1 = arith.constant 0 : i32
    %c0_i32_2 = arith.constant 0 : i32
    return %c0_i32, %c0_i32_0, %c0_i32_1 : i32, i32, i32
  }
}

</mosaic_0001>

<bundles_post_ra>
// kernel: transformer_forward.1
= control target key start
LH: loop header
LB: loop body
LE: loop exit
PB: predicated region body
PF: predicated region fallthrough
CT: control target
= control target key end

     0   :  { %s9623_s0 = inlined_call_operand.vmem [shape: f32[16,128], index: 0, kind: input, shape index: {}]   ;;  %s9624_s1 = inlined_call_operand.vmem [shape: f32[16,128], index: 1, kind: input, shape index: {}]   ;;  %s9625_s2 = inlined_call_operand.vmem [shape: f32[16,256], index: 2, kind: input, shape index: {}]   ;;  %s9626_s3 = inlined_call_operand.vmem [shape: f32[128,128], index: 3, kind: input, shape index: {}]   ;;  %s9627_s4 = inlined_call_operand.vmem [shape: bf16[256,16], index: 4, kind: input, shape index: {}]   ;;  %s9628_s5 = inlined_call_operand.vmem [shape: f32[256,128], index: 5, kind: input, shape index: {}]   ;;  %s9629_s6 = inlined_call_operand.vmem [shape: bf16[256,256], index: 6, kind: input, shape index: {}]   ;;  %s9630_s7 = inlined_call_operand.hbm [shape: bf16[128,512], index: 7, kind: input, shape index: {}]   ;;  %s9631_s8 = inlined_call_operand.vmem [shape: bf16[512,64], index: 8, kind: input, shape index: {}]   ;;  %s9632_s9 = inlined_call_operand.hbm [shape: bf16[64,64], index: 9, kind: input, shape index: {}]   ;;  %s9633_s10 = inlined_call_operand.hbm [shape: bf16[64,512], index: 10, kind: input, shape index: {}]   ;;  %s9634_s11 = inlined_call_operand.hbm [shape: bf16[512,128], index: 11, kind: input, shape index: {}]   ;;  %s9635_s12 = inlined_call_operand.hbm [shape: bf16[128,256], index: 12, kind: input, shape index: {}]   ;;  %s9636_s13 = inlined_call_operand.hbm [shape: f32[2,128], index: 13, kind: input, shape index: {}]   ;;  %s9637_s14 = inlined_call_operand.hbm [shape: bf16[2,128,1280], index: 14, kind: input, shape index: {}]   ;;  %s9638_s15 = inlined_call_operand.hbm [shape: f32[2,16,128], index: 15, kind: input, shape index: {}]   ;;  %s9639_s16 = inlined_call_operand.vmem [shape: f32[16,128], index: 16, kind: output, shape index: {0}]   ;;  %s9640_s17 = inlined_call_operand.vmem [shape: f32[2,2,256], index: 17, kind: output, shape index: {1}]   ;;  %s9641_s18 = inlined_call_operand.vmem [shape: f32[2,1,128], index: 18, kind: output, shape index: {2}]  }
   0x1   :  { %9745 = sst [smem:[#allocation92_spill]] %s9623_s0 }
   0x2   :  { %9746 = sst [smem:[#allocation93_spill]] %s9624_s1 }
   0x3   :  { %9747 = sst [smem:[#allocation94_spill]] %s9625_s2 }
   0x4   :  { %24 = vsyncpa [#allocation3], 0 }
   0x5   :  { %25 = vsyncpa [#allocation5], 0 }
   0x6   :  { %26 = vsyncpa [#allocation8], 0 }
   0x7   :  { %27 = vsyncpa [#allocation11], 0  ;;  %s62_s29 = sshll.u32 %s9632_s9, 4  ;;  %s63_s29 = int_to_ptr.hbm [resolvable:$true] %s62_s29 }
   0x8   :  { %28 = vsyncpa [#allocation14], 0  ;;  %s7215_s30 = smov [#allocation4]   ;;  %s88_s20 = sshll.u32 %s9634_s11, 4  ;;  %s89_s20 = int_to_ptr.hbm [resolvable:$true] %s88_s20 }
   0x9   :  { %s64_s0 = sshll.u32 %s7215_s30, 4  ;;  %s7216_s21 = smov 64   ;;  %s65_s0 = int_to_ptr.vmem [resolvable:$true] %s64_s0 }
   0xa   :  { %s7217_s22 = smov 4   ;;  %s7218_s2 = smov [#allocation7]  }
   0xb   :  { %70 = dma.hbm_to_vmem [thread:$0]  %s63_s29, 512, %s65_s0, [#allocation5], %s7216_s21, %s7216_s21, %s7217_s22  }
   0xc   :  { %s90_s23 = sshll.u32 %s7218_s2, 4  ;;  %s115_s9 = sshll.u32 %s9636_s13, 4  ;;  %s91_s23 = int_to_ptr.vmem [resolvable:$true] %s90_s23  ;;  %s116_s9 = int_to_ptr.hbm [resolvable:$true] %s115_s9 }
   0xd   :  { %96 = dma.hbm_to_vmem [thread:$0]  %s89_s20, 4096, %s91_s23, [#allocation8], %s7216_s21, %s7216_s21, %s7217_s22  }
   0xe   :  { %s47_s11 = sshll.u32 %s9630_s7, 4  ;;  %s7219_s28 = smov [#allocation10]   ;;  %s48_s11 = int_to_ptr.hbm [resolvable:$true] %s47_s11 }
   0xf   :  { %s117_s30 = sshll.u32 %s7219_s28, 4  ;;  %s7220_s29 = smov [#allocation2]   ;;  %s118_s30 = int_to_ptr.vmem [resolvable:$true] %s117_s30 }
  0x10   :  { %120 = dma.hbm_to_vmem [thread:$0]  %s116_s9, 32, %s118_s30, [#allocation11]  }
  0x11   :  { %s49_s0 = sshll.u32 %s7220_s29, 4  ;;  %s7221_s19 = smov 256   ;;  %s50_s0 = int_to_ptr.vmem [resolvable:$true] %s49_s0 }
  0x12   :  { %s7222_s1 = smov 16   ;;  %s75_s24 = sshll.u32 %s9633_s10, 4  ;;  %s76_s24 = int_to_ptr.hbm [resolvable:$true] %s75_s24 }
  0x13   :  { %55 = dma.hbm_to_vmem [thread:$0]  %s48_s11, 4096, %s50_s0, [#allocation3], %s7221_s19, %s7221_s19, %s7222_s1  }
  0x14   :  { %s7223_s20 = smov [#allocation6]   ;;  %s101_s25 = sshll.u32 %s9635_s12, 4  ;;  %s102_s25 = int_to_ptr.hbm [resolvable:$true] %s101_s25 }
  0x15   :  { %s77_s22 = sshll.u32 %s7223_s20, 4  ;;  %s7224_s9 = smov [#allocation9]   ;;  %s78_s22 = int_to_ptr.vmem [resolvable:$true] %s77_s22 }
  0x16   :  { %83 = dma.hbm_to_vmem [thread:$0]  %s76_s24, 2048, %s78_s22, [#allocation5], %s7221_s19, %s7221_s19, %s7222_s1  }
  0x17   :  { %s103_s26 = sshll.u32 %s7224_s9, 4  ;;  %s7225_s27 = smov 128   ;;  %s104_s26 = int_to_ptr.vmem [resolvable:$true] %s103_s26 }
  0x18   :  { %s7226_s28 = smov 8   ;;  %s125_s10 = sshll.u32 %s9637_s14, 4  ;;  %s126_s10 = int_to_ptr.hbm [resolvable:$true] %s125_s10 }
  0x19   :  { %109 = dma.hbm_to_vmem [thread:$0]  %s102_s25, 2048, %s104_s26, [#allocation8], %s7225_s27, %s7225_s27, %s7226_s28  }
  0x1a   :  { %s7227_s29 = smov [#allocation12]   ;;  %s138_s12 = sshll.u32 %s9638_s15, 4  ;;  %s139_s12 = int_to_ptr.hbm [resolvable:$true] %s138_s12 }
  0x1b   :  { %s127_s0 = sshll.u32 %s7227_s29, 4  ;;  %s7228_s19 = smov 640   ;;  %s128_s0 = int_to_ptr.vmem [resolvable:$true] %s127_s0 }
  0x1c   :  { %s7229_s1 = smov 40   ;;  %s7230_s24 = smov [#allocation13]  }
  0x1d   :  { %133 = dma.hbm_to_vmem [thread:$0]  %s126_s10, 20480, %s128_s0, [#allocation11], %s7228_s19, %s7228_s19, %s7229_s1  }
  0x1e   :  { %s140_s20 = sshll.u32 %s7230_s24, 4  ;;  %s141_s20 = int_to_ptr.vmem [resolvable:$true] %s140_s20 }
  0x1f   :  { %146 = dma.hbm_to_vmem [thread:$0]  %s139_s12, 512, %s141_s20, [#allocation14], %s7225_s27, %s7225_s27, %s7226_s28  }
  0x20   :  { %7205 = dma.done.wait [#allocation3], 4096  }
  0x21   :  { %7206 = vsyncadd [#allocation3], 4294963200 }
  0x22   :  { %7207 = dma.done.wait [#allocation5], 2560  }
  0x23   :  { %7208 = vsyncadd [#allocation5], 4294964736 }
  0x24   :  { %7209 = dma.done.wait [#allocation8], 6144  }
  0x25   :  { %7210 = vsyncadd [#allocation8], 4294961152 }
  0x26   :  { %7211 = dma.done.wait [#allocation11], 20512  }
  0x27   :  { %7212 = vsyncadd [#allocation11], 4294946784 }
  0x28   :  { %7213 = dma.done.wait [#allocation14], 512  }
  0x29   :  { %7214 = vsyncadd [#allocation14], 4294966784  ;;  %v5007_v0 = vld [vmem:[#allocation9 + $0x70] sm:$0xf]  ;;  %v6584_v1 = vld [vmem:[#allocation9 + $0x74] sm:$0xf0] }
  0x2a   :  { %v5003_v2 = vld [vmem:[#allocation9 + $0x60] sm:$0xf]  ;;  %v5008_v3 = vor.u32 %v6584_v1, %v5007_v0  ;;  %v6583_v4 = vld [vmem:[#allocation9 + $0x64] sm:$0xf0]  ;;  %v4999_v6 = vld [vmem:[#allocation9 + $0x50] sm:$0xf] }
  0x2b   :  { %v5004_v5 = vor.u32 %v6583_v4, %v5003_v2  ;;  %v6582_v7 = vld [vmem:[#allocation9 + $0x54] sm:$0xf0]  ;;  %v4995_v8 = vld [vmem:[#allocation9 + $0x40] sm:$0xf]  ;;  %v5179_v9 = vld [vmem:[#allocation12 + $0x230] sm:$0xf] }
  0x2c   :  { %551 = vmatpush.bf16.msra.mxu0 %v5008_v3  ;;  %v6630_v10 = vld [vmem:[#allocation12 + $0x254] sm:$0xf0]  ;;  %v6627_v11 = vld [vmem:[#allocation12 + $0x234] sm:$0xf]  ;;  %v5000_v12 = vor.u32 %v6582_v7, %v4999_v6  ;;  %v5181_v14 = vld [vmem:[#allocation12 + $0x258] sm:$0xf0] }
  0x2d   :  { %v5180_v13 = vor.u32 %v6630_v10, %v5179_v9  ;;  %v5155_v15 = vld [vmem:[#allocation12 + $0x1e0] sm:$0xf]  ;;  %v6624_v16 = vld [vmem:[#allocation12 + $0x204] sm:$0xf0]  ;;  %v5184_v18 = vor.u32 %v6627_v11, %v5181_v14  ;;  %v6621_v19 = vld [vmem:[#allocation12 + $0x1e4] sm:$0xf] }
  0x2e   :  { %v6581_v17 = vld [vmem:[#allocation9 + $0x44] sm:$0xf0]  ;;  %v5157_v20 = vld [vmem:[#allocation12 + $0x208] sm:$0xf0]  ;;  %v5156_v21 = vor.u32 %v6624_v16, %v5155_v15  ;;  %v5131_v23 = vld [vmem:[#allocation12 + $0x190] sm:$0xf] }
  0x2f   :  { %856 = vmatpush.bf16.msra.mxu1 %v5180_v13  ;;  %870 = vmatpush.bf16.msra.mxu2 %v5184_v18  ;;  %v5160_v22 = vor.u32 %v6621_v19, %v5157_v20  ;;  %v6618_v24 = vld [vmem:[#allocation12 + $0x1b4] sm:$0xf0]  ;;  %v6615_v25 = vld [vmem:[#allocation12 + $0x194] sm:$0xf]  ;;  %v4996_v26 = vor.u32 %v6581_v17, %v4995_v8  ;;  %v5133_v27 = vld [vmem:[#allocation12 + $0x1b8] sm:$0xf0] }
  0x30   :  { %552 = vmatpush.bf16.msra.mxu0 %v5004_v5  ;;  %v5187_v28 = vld [vmem:[#allocation12 + $0x238] sm:$0xf]  ;;  %v6631_v29 = vld [vmem:[#allocation12 + $0x25c] sm:$0xf0]  ;;  %v4991_v30 = vld [vmem:[#allocation9 + $0x30] sm:$0xf]  ;;  %v5132_v33 = vor.u32 %v6618_v24, %v5131_v23  ;;  %v5136_v35 = vor.u32 %v6615_v25, %v5133_v27 }
  0x31   :  { %v6580_v31 = vld [vmem:[#allocation9 + $0x34] sm:$0xf0]  ;;  %v5188_v32 = vor.u32 %v6631_v29, %v5187_v28  ;;  %v5107_v34 = vld [vmem:[#allocation12 + $0x140] sm:$0xf]  ;;  %v6612_v36 = vld [vmem:[#allocation12 + $0x164] sm:$0xf0] }
  0x32   :  { %v5163_v37 = vld [vmem:[#allocation12 + $0x1e8] sm:$0xf]  ;;  %v6625_v38 = vld [vmem:[#allocation12 + $0x20c] sm:$0xf0]  ;;  %v4992_v39 = vor.u32 %v6580_v31, %v4991_v30  ;;  %v6609_v40 = vld [vmem:[#allocation12 + $0x144] sm:$0xf]  ;;  %v5108_v46 = vor.u32 %v6612_v36, %v5107_v34 }
  0x33   :  { %857 = vmatpush.bf16.msra.mxu1 %v5156_v21  ;;  %871 = vmatpush.bf16.msra.mxu2 %v5160_v22  ;;  %v5109_v41 = vld [vmem:[#allocation12 + $0x168] sm:$0xf0]  ;;  %v5164_v42 = vor.u32 %v6625_v38, %v5163_v37  ;;  %v4987_v43 = vld [vmem:[#allocation9 + $0x20] sm:$0xf]  ;;  %v6579_v44 = vld [vmem:[#allocation9 + $0x24] sm:$0xf0] }
  0x34   :  { %553 = vmatpush.bf16.msra.mxu0 %v5000_v12  ;;  %884 = vmatpush.bf16.msra.mxu3 %v5188_v32  ;;  %v5139_v45 = vld [vmem:[#allocation12 + $0x198] sm:$0xf]  ;;  %v6619_v47 = vld [vmem:[#allocation12 + $0x1bc] sm:$0xf0]  ;;  %v5112_v48 = vor.u32 %v6609_v40, %v5109_v41  ;;  %v5083_v49 = vld [vmem:[#allocation12 + $0xf0] sm:$0xf]  ;;  %v4988_v53 = vor.u32 %v6579_v44, %v4987_v43 }
  0x35   :  { %v6606_v50 = vld [vmem:[#allocation12 + $0x114] sm:$0xf0]  ;;  %v6603_v51 = vld [vmem:[#allocation12 + $0xf4] sm:$0xf]  ;;  %v5140_v52 = vor.u32 %v6619_v47, %v5139_v45  ;;  %v5085_v54 = vld [vmem:[#allocation12 + $0x118] sm:$0xf0] }
  0x36   :  { %v5115_v55 = vld [vmem:[#allocation12 + $0x148] sm:$0xf]  ;;  %v6613_v56 = vld [vmem:[#allocation12 + $0x16c] sm:$0xf0]  ;;  %v6578_v58 = vld [vmem:[#allocation9 + $0x14] sm:$0xf0]  ;;  %v5084_v59 = vor.u32 %v6606_v50, %v5083_v49  ;;  %v5088_v0 = vor.u32 %v6603_v51, %v5085_v54 }
  0x37   :  { %858 = vmatpush.bf16.msra.mxu1 %v5132_v33  ;;  %872 = vmatpush.bf16.msra.mxu2 %v5136_v35  ;;  %v4983_v57 = vld [vmem:[#allocation9 + $0x10] sm:$0xf]  ;;  %v5059_v60 = vld [vmem:[#allocation12 + $0xa0] sm:$0xf]  ;;  %v6600_v61 = vld [vmem:[#allocation12 + $0xc4] sm:$0xf0]  ;;  %v5116_v3 = vor.u32 %v6613_v56, %v5115_v55 }
  0x38   :  { %554 = vmatpush.bf16.msra.mxu0 %v4996_v26  ;;  %885 = vmatpush.bf16.msra.mxu3 %v5164_v42  ;;  %v4979_v62 = vld [vmem:[#allocation9] sm:$0xf]  ;;  %v6577_v63 = vld [vmem:[#allocation9 + $0x4] sm:$0xf0]  ;;  %v5061_v2 = vld [vmem:[#allocation12 + $0xc8] sm:$0xf0]  ;;  %v4984_v4 = vor.u32 %v6578_v58, %v4983_v57  ;;  %v5060_v11 = vor.u32 %v6600_v61, %v5059_v60 }
  0x39   :  { %v6597_v1 = vld [vmem:[#allocation12 + $0xa4] sm:$0xf]  ;;  %v6628_v5 = vld [vmem:[#allocation12 + $0x23c] sm:$0xf]  ;;  %v5035_v7 = vld [vmem:[#allocation12 + $0x50] sm:$0xf]  ;;  %v4980_v15 = vor.u32 %v6577_v63, %v4979_v62 }
  0x3a   :  { %v5189_v6 = vld [vmem:[#allocation12 + $0x260] sm:$0xf0]  ;;  %v6594_v8 = vld [vmem:[#allocation12 + $0x74] sm:$0xf0]  ;;  %s9748_s22 = sld [smem:[#allocation92_spill]]  ;;  %v5064_v14 = vor.u32 %v6597_v1, %v5061_v2  ;;  %vm1045_vm0 = vcmask 130048  }
  0x3b   :  { %859 = vmatpush.bf16.msra.mxu1 %v5108_v46  ;;  %873 = vmatpush.bf16.msra.mxu2 %v5112_v48  ;;  %v6591_v12 = vld [vmem:[#allocation12 + $0x54] sm:$0xf]  ;;  %v5037_v13 = vld [vmem:[#allocation12 + $0x78] sm:$0xf0]  ;;  %v6622_v16 = vld [vmem:[#allocation12 + $0x1ec] sm:$0xf]  ;;  %v5192_v18 = vor.u32 %v6628_v5, %v5189_v6  ;;  %v5036_v21 = vor.u32 %v6594_v8, %v5035_v7 }
  0x3c   :  { %555 = vmatpush.bf16.msra.mxu0 %v4992_v39  ;;  %886 = vmatpush.bf16.msra.mxu3 %v5140_v52  ;;  %v5165_v17 = vld [vmem:[#allocation12 + $0x210] sm:$0xf0]  ;;  %v5011_v19 = vld [vmem:[#allocation12] sm:$0xf]  ;;  %v6588_v20 = vld [vmem:[#allocation12 + $0x24] sm:$0xf0]  ;;  %v5040_v25 = vor.u32 %v6591_v12, %v5037_v13 }
  0x3d   :  { %v6585_v22 = vld [vmem:[#allocation12 + $0x4] sm:$0xf]  ;;  %v5013_v23 = vld [vmem:[#allocation12 + $0x28] sm:$0xf0]  ;;  %v6616_v26 = vld [vmem:[#allocation12 + $0x19c] sm:$0xf]  ;;  %v5168_v28 = vor.u32 %v6622_v16, %v5165_v17  ;;  %v5012_v29 = vor.u32 %v6588_v20, %v5011_v19 }
  0x3e   :  { %v5141_v27 = vld [vmem:[#allocation12 + $0x1c0] sm:$0xf0]  ;;  %v5016_v30 = vor.u32 %v6585_v22, %v5013_v23  ;;  %v6610_v32 = vld [vmem:[#allocation12 + $0x14c] sm:$0xf]  ;;  %v5117_v33 = vld [vmem:[#allocation12 + $0x170] sm:$0xf0] }
  0x3f   :  { %860 = vmatpush.bf16.msra.mxu1 %v5084_v59  ;;  %874 = vmatpush.bf16.msra.mxu2 %v5088_v0  ;;  %v5144_v31 = vor.u32 %v6616_v26, %v5141_v27  ;;  %v5120_v34 = vor.u32 %v6610_v32, %v5117_v33  ;;  %v5091_v35 = vld [vmem:[#allocation12 + $0xf8] sm:$0xf]  ;;  %v6607_v36 = vld [vmem:[#allocation12 + $0x11c] sm:$0xf0]  ;;  %v6604_v37 = vld [vmem:[#allocation12 + $0xfc] sm:$0xf] }
  0x40   :  { %556 = vmatpush.bf16.msra.mxu0 %v4988_v53  ;;  %v180_v9 = vld [vmem:[%s9748_s22] sm:$0xff]  ;;  %v181_v10 = vld [vmem:[%s9748_s22 + $0x8] sm:$0xff]  ;;  %887 = vmatpush.bf16.msra.mxu3 %v5116_v3  ;;  %v5092_v38 = vor.u32 %v6607_v36, %v5091_v35  ;;  %v6601_v48 = vld [vmem:[#allocation12 + $0xcc] sm:$0xf0]  ;;  %s9749_s26 = sld [smem:[#allocation93_spill]]  ;;  %vm1688_vm1 = vcmask 1040384  }
  0x41   :  { %v500_v24 = vpack.c.bf16 %v181_v10, %v180_v9  ;;  %v5093_v39 = vld [vmem:[#allocation12 + $0x120] sm:$0xf0]  ;;  %v5195_v40 = vld [vmem:[#allocation12 + $0x240] sm:$0xf]  ;;  %v6632_v41 = vld [vmem:[#allocation12 + $0x264] sm:$0xf0] }
  0x42   :  { %v5096_v42 = vor.u32 %v6604_v37, %v5093_v39  ;;  %v5196_v43 = vor.u32 %v6632_v41, %v5195_v40  ;;  %v6629_v44 = vld [vmem:[#allocation12 + $0x244] sm:$0xf]  ;;  %v5197_v45 = vld [vmem:[#allocation12 + $0x268] sm:$0xf0]  ;;  %v5067_v47 = vld [vmem:[#allocation12 + $0xa8] sm:$0xf] }
  0x43   :  { %861 = vmatpush.bf16.msra.mxu1 %v5060_v11  ;;  %875 = vmatpush.bf16.msra.mxu2 %v5064_v14  ;;  %v5200_v46 = vor.u32 %v6629_v44, %v5197_v45  ;;  %v6598_v49 = vld [vmem:[#allocation12 + $0xac] sm:$0xf]  ;;  %v5068_v50 = vor.u32 %v6601_v48, %v5067_v47  ;;  %v5069_v51 = vld [vmem:[#allocation12 + $0xd0] sm:$0xf0]  ;;  %v5171_v52 = vld [vmem:[#allocation12 + $0x1f0] sm:$0xf] }
  0x44   :  { %557 = vmatpush.bf16.msra.mxu0 %v4984_v4  ;;  %888 = vmatpush.bf16.msra.mxu3 %v5092_v38  ;;  %v6626_v53 = vld [vmem:[#allocation12 + $0x214] sm:$0xf0]  ;;  %v5072_v54 = vor.u32 %v6598_v49, %v5069_v51  ;;  %v6623_v56 = vld [vmem:[#allocation12 + $0x1f4] sm:$0xf]  ;;  %v5173_v57 = vld [vmem:[#allocation12 + $0x218] sm:$0xf0] }
  0x45   :  { %v5172_v55 = vor.u32 %v6626_v53, %v5171_v52  ;;  %v5176_v58 = vor.u32 %v6623_v56, %v5173_v57  ;;  %v5043_v59 = vld [vmem:[#allocation12 + $0x58] sm:$0xf]  ;;  %v6595_v60 = vld [vmem:[#allocation12 + $0x7c] sm:$0xf0]  ;;  %v6592_v61 = vld [vmem:[#allocation12 + $0x5c] sm:$0xf] }
  0x46   :  { %v5044_v62 = vor.u32 %v6595_v60, %v5043_v59  ;;  %v5045_v63 = vld [vmem:[#allocation12 + $0x80] sm:$0xf0]  ;;  %v5147_v0 = vld [vmem:[#allocation12 + $0x1a0] sm:$0xf]  ;;  %v6620_v1 = vld [vmem:[#allocation12 + $0x1c4] sm:$0xf0] }
  0x47   :  { %862 = vmatpush.bf16.msra.mxu1 %v5036_v21  ;;  %876 = vmatpush.bf16.msra.mxu2 %v5040_v25  ;;  %v5048_v2 = vor.u32 %v6592_v61, %v5045_v63  ;;  %v5148_v3 = vor.u32 %v6620_v1, %v5147_v0  ;;  %v6617_v4 = vld [vmem:[#allocation12 + $0x1a4] sm:$0xf]  ;;  %v5149_v5 = vld [vmem:[#allocation12 + $0x1c8] sm:$0xf0]  ;;  %v5019_v7 = vld [vmem:[#allocation12 + $0x8] sm:$0xf] }
  0x48   :  { %558 = vmatpush.bf16.msra.mxu0 %v4980_v15  ;;  %889 = vmatpush.bf16.msra.mxu3 %v5068_v50  ;;  %v5152_v6 = vor.u32 %v6617_v4, %v5149_v5  ;;  %v6589_v8 = vld [vmem:[#allocation12 + $0x2c] sm:$0xf0]  ;;  %v6586_v9 = vld [vmem:[#allocation12 + $0xc] sm:$0xf]  ;;  %v5021_v11 = vld [vmem:[#allocation12 + $0x30] sm:$0xf0] }
  0x49   :  { %v5020_v10 = vor.u32 %v6589_v8, %v5019_v7  ;;  %v5123_v12 = vld [vmem:[#allocation12 + $0x150] sm:$0xf]  ;;  %v6614_v13 = vld [vmem:[#allocation12 + $0x174] sm:$0xf0]  ;;  %v5024_v14 = vor.u32 %v6586_v9, %v5021_v11  ;;  %v6611_v16 = vld [vmem:[#allocation12 + $0x154] sm:$0xf] }
  0x4a   :  { %v5124_v15 = vor.u32 %v6614_v13, %v5123_v12  ;;  %v5125_v17 = vld [vmem:[#allocation12 + $0x178] sm:$0xf0]  ;;  %v5099_v19 = vld [vmem:[#allocation12 + $0x100] sm:$0xf]  ;;  %v6608_v20 = vld [vmem:[#allocation12 + $0x124] sm:$0xf0] }
  0x4b   :  { %559 = vmatmul.bf16.vlgmr.msra.gmra.mxu0 %v500_v24  ;;  %863 = vmatpush.bf16.msra.mxu1 %v5012_v29  ;;  %v6605_v21 = vld [vmem:[#allocation12 + $0x104] sm:$0xf]  ;;  %v5100_v22 = vor.u32 %v6608_v20, %v5099_v19  ;;  %v5101_v23 = vld [vmem:[#allocation12 + $0x128] sm:$0xf0]  ;;  %v5075_v25 = vld [vmem:[#allocation12 + $0xb0] sm:$0xf] }
  0x4c   :  { %898 = vmatpush.bf16.msrb.mxu0 %v5192_v18  ;;  %877 = vmatpush.bf16.msra.mxu2 %v5016_v30  ;;  %v5128_v18 = vor.u32 %v6611_v16, %v5125_v17  ;;  %v5104_v24 = vor.u32 %v6605_v21, %v5101_v23  ;;  %v6602_v26 = vld [vmem:[#allocation12 + $0xd4] sm:$0xf0]  ;;  %v6599_v27 = vld [vmem:[#allocation12 + $0xb4] sm:$0xf]  ;;  %v5077_v29 = vld [vmem:[#allocation12 + $0xd8] sm:$0xf0] }
  0x4d   :  { %890 = vmatpush.bf16.msra.mxu3 %v5044_v62  ;;  %v5080_v30 = vor.u32 %v6599_v27, %v5077_v29  ;;  %v6596_v32 = vld [vmem:[#allocation12 + $0x84] sm:$0xf0]  ;;  %v6593_v33 = vld [vmem:[#allocation12 + $0x64] sm:$0xf]  ;;  %v5027_v37 = vld [vmem:[#allocation12 + $0x10] sm:$0xf] }
  0x4e   :  { %v6590_v38 = vld [vmem:[#allocation12 + $0x34] sm:$0xf0]  ;;  %v6587_v39 = vld [vmem:[#allocation12 + $0x14] sm:$0xf]  ;;  %v5029_v40 = vld [vmem:[#allocation12 + $0x38] sm:$0xf0] }
  0x4f   :  { %912 = vmatpush.bf16.msrb.mxu1 %v5196_v43  ;;  %v5028_v41 = vor.u32 %v6590_v38, %v5027_v37  ;;  %v6769_v44 = vld [vmem:[#allocation10] ss:$0 sm:$0xff]  ;;  %v183_v47 = vld [vmem:[%s9749_s26 + $0x8] sm:$0xff]  ;;  %v6773_v56 = vld [vmem:[#allocation13 + $0x2] ss:$0 sm:$0xff]  ;;  %s9773_s1 = sld [smem:[#allocation94_spill]] }
  0x50   :  { %899 = vmatpush.bf16.msrb.mxu0 %v5168_v28  ;;  %926 = vmatpush.bf16.msrb.mxu2 %v5200_v46  ;;  %v5076_v28 = vor.u32 %v6602_v26, %v5075_v25  ;;  %v182_v46 = vld [vmem:[%s9749_s26] sm:$0xff]  ;;  %v6416_v4 = vld [vmem:[%s9627_s4 + $0x18] sm:$0xff]  ;;  %v6419_v7 = vld [vmem:[%s9627_s4 + $0x30] sm:$0xff]  ;;  %vm1694_vm2 = vcmask 1041408   ;;  %vm2329_vm6 = vcmask 523264  }
  0x51   :  { %891 = vmatpush.bf16.msra.mxu3 %v5020_v10  ;;  %v6413_v1 = vld [vmem:[%s9627_s4] sm:$0xff]  ;;  %v6420_v8 = vld [vmem:[%s9627_s4 + $0x38] sm:$0xff]  ;;  %v7425_v12 = vld [vmem:[%s9628_s5 + $0x8] sm:$0xff] }
  0x52   :  { %v6417_v5 = vld [vmem:[%s9627_s4 + $0x20] sm:$0xff]  ;;  %v6422_v16 = vld [vmem:[%s9627_s4 + $0x48] sm:$0xff]  ;;  %v7443_v19 = vld [vmem:[%s9628_s5 + $0x10] sm:$0xff] }
  0x53   :  { %913 = vmatpush.bf16.msrb.mxu1 %v5172_v55  ;;  %v6772_v55 = vld [vmem:[#allocation13 + $0x1] ss:$0 sm:$0xff]  ;;  %v7448_v20 = vld [vmem:[%s9628_s5 + $0x18] sm:$0xff]  ;;  %v7473_v29 = vld [vmem:[%s9628_s5 + $0x28] sm:$0xff] }
  0x54   :  { %900 = vmatpush.bf16.msrb.mxu0 %v5144_v31  ;;  %927 = vmatpush.bf16.msrb.mxu2 %v5176_v58  ;;  %v5051_v31 = vld [vmem:[#allocation12 + $0x60] sm:$0xf]  ;;  %v7493_v37 = vld [vmem:[%s9628_s5 + $0x30] sm:$0xff]  ;;  %v7498_v38 = vld [vmem:[%s9628_s5 + $0x38] sm:$0xff] }
  0x55   :  { %v5052_v35 = vor.u32 %v6596_v32, %v5051_v31  ;;  %v6421_v9 = vld [vmem:[%s9627_s4 + $0x40] sm:$0xff] }
  0x56   :  { %v7420_v11 = vld [vmem:[%s9628_s5] sm:$0xff] }
  0x57   :  { %914 = vmatpush.bf16.msrb.mxu1 %v5148_v3  ;;  %v6415_v3 = vld [vmem:[%s9627_s4 + $0x10] sm:$0xff] }
  0x58   :  { %901 = vmatpush.bf16.msrb.mxu0 %v5120_v34  ;;  %928 = vmatpush.bf16.msrb.mxu2 %v5152_v6  ;;  %v5053_v34 = vld [vmem:[#allocation12 + $0x88] sm:$0xf0] }
  0x59   :  { %v5056_v36 = vor.u32 %v6593_v33, %v5053_v34  ;;  %v6418_v6 = vld [vmem:[%s9627_s4 + $0x28] sm:$0xff]  ;;  %v6424_v33 = vld [vmem:[%s9627_s4 + $0x58] sm:$0xff] }
  0x5b   :  { %915 = vmatpush.bf16.msrb.mxu1 %v5124_v15 }
  0x5c   :  { %902 = vmatpush.bf16.msrb.mxu0 %v5096_v42  ;;  %929 = vmatpush.bf16.msrb.mxu2 %v5128_v18  ;;  %v5032_v42 = vor.u32 %v6587_v39, %v5029_v40 }
  0x5f   :  { %916 = vmatpush.bf16.msrb.mxu1 %v5100_v22 }
  0x60   :  { %903 = vmatpush.bf16.msrb.mxu0 %v5072_v54  ;;  %930 = vmatpush.bf16.msrb.mxu2 %v5104_v24  ;;  %v6423_v24 = vld [vmem:[%s9627_s4 + $0x50] sm:$0xff] }
  0x63   :  { %917 = vmatpush.bf16.msrb.mxu1 %v5076_v28  ;;  %v7468_v28 = vld [vmem:[%s9628_s5 + $0x20] sm:$0xff] }
  0x64   :  { %904 = vmatpush.bf16.msrb.mxu0 %v5048_v2  ;;  %931 = vmatpush.bf16.msrb.mxu2 %v5080_v30  ;;  %v6414_v2 = vld [vmem:[%s9627_s4 + $0x8] sm:$0xff] }
  0x67   :  { %918 = vmatpush.bf16.msrb.mxu1 %v5052_v35 }
  0x68   :  { %905 = vmatpush.bf16.msrb.mxu0 %v5024_v14  ;;  %932 = vmatpush.bf16.msrb.mxu2 %v5056_v36 }
  0x6b   :  { %919 = vmatpush.bf16.msrb.mxu1 %v5028_v41 }
  0x6c   :  { %933 = vmatpush.bf16.msrb.mxu2 %v5032_v42  ;;  %v7509_v42 = vld [vmem:[%s9627_s4 + $0x60] sm:$0xff] }
  0xc8   :  { %v560_v43 = vpop.f32.mrf.mxu0 }
  0xc9   :  { %v561_v45 = vadd.f32 %v6769_v44, %v560_v43 }
  0xcb   :  { %v7366_v50 = vadd.f32 %v561_v45, %v182_v46  ;;  %v6492_v45 = vld [vmem:[#allocation2 + $0xf4] sm:$0xf0] }
  0xcd   :  { %9750 = vst [vmem:[#allocation20_spill] sm:$0xff] %v7366_v50 }
  0xd0   :  { %v562_v48 = vpop.f32.mrf.mxu0 }
  0xd1   :  { %v563_v49 = vadd.f32 %v6769_v44, %v562_v48  ;;  %v5579_v44 = vld [vmem:[#allocation2 + $0xe8] sm:$0xf] }
  0xd2   :  { %v7515_v46 = vor.u32 %v6492_v45, %v5579_v44  ;;  %v5563_v48 = vld [vmem:[#allocation2 + $0xc8] sm:$0xf]  ;;  %v6771_v44 = vld [vmem:[#allocation13 + $0x3] ss:$0 sm:$0xff]  ;;  %v7575_v45 = vld [vmem:[%s9628_s5 + $0x70] sm:$0xff] }
  0xd3   :  { %v7368_v51 = vadd.f32 %v563_v49, %v183_v47  ;;  %v6488_v49 = vld [vmem:[#allocation2 + $0xd4] sm:$0xf0] }
  0xd4   :  { %9752 = vst [vmem:[#allocation22_spill] sm:$0xff] %v7515_v46 }
  0xd5   :  { %9751 = vst [vmem:[#allocation21_spill] sm:$0xff] %v7368_v51  ;;  %v615_v52 = vpack.c.bf16 %v7368_v51, %v7366_v50  ;;  %v6459_v51 = vld [vmem:[%s9629_s6 + $0xf4] sm:$0xf] }
  0xd7   :  { %864 = vmatmul.bf16.vlgmr.msra.gmra.mxu1 %v615_v52  ;;  %878 = vmatmul.bf16.vlgmr.msra.gmra.mxu2 %v615_v52 }
  0xd8   :  { %892 = vmatmul.bf16.vlgmr.msra.gmra.mxu3 %v615_v52  ;;  %906 = vmatmul.bf16.vlgmr.msrb.gmra.mxu0 %v615_v52 }
  0xe7   :  { %920 = vmatmul.bf16.vlgmr.msrb.gmra.mxu1 %v615_v52  ;;  %934 = vmatmul.bf16.vlgmr.msrb.gmra.mxu2 %v615_v52  ;;  %v7518_v52 = vor.u32 %v6488_v49, %v5563_v48 }
  0xe9   :  { %9753 = vst [vmem:[#allocation23_spill] sm:$0xff] %v7518_v52 }
 0x155   :  { %v7463_v27 = vpop.f32.mrf.mxu0 }
 0x15a   :  { %v879_v53 = vpop.f32.mrf.mxu2 }
 0x15b   :  { %v893_v54 = vpop.f32.mrf.mxu3  ;;  %v946_v58 = vadd.f32 %v6772_v55, %v879_v53  ;;  %v5547_v53 = vld [vmem:[#allocation2 + $0xa8] sm:$0xf] }
 0x15c   :  { %v950_v61 = vadd.f32 %v6773_v56, %v893_v54  ;;  %v6484_v54 = vld [vmem:[#allocation2 + $0xb4] sm:$0xf0] }
 0x15d   :  { %v7487_v35 = vpop.f32.mrf.mxu0 }
 0x15e   :  { %v955_v48 = vadd.f32 %v6771_v44, %v7487_v35  ;;  %v7597_v35 = vld [vmem:[%s9628_s5 + $0x60] sm:$0xff] }
 0x162   :  { %v881_v57 = vpop.f32.mrf.mxu2 }
 0x163   :  { %v947_v59 = vadd.f32 %v6772_v55, %v881_v57  ;;  %v895_v60 = vpop.f32.mrf.mxu3  ;;  %v7521_v55 = vor.u32 %v6484_v54, %v5547_v53  ;;  %v7531_v57 = vld [vmem:[%s9628_s5 + $0x48] sm:$0xff]  ;;  %v954_v53 = vadd.f32 %v6771_v44, %v7463_v27 }
 0x164   :  { %v951_v62 = vadd.f32 %v6773_v56, %v895_v60  ;;  %v7526_v56 = vld [vmem:[%s9628_s5 + $0x40] sm:$0xff]  ;;  %v6480_v60 = vld [vmem:[#allocation2 + $0x94] sm:$0xf0] }
 0x165   :  { %v964_v63 = vpack.c.bf16 %v947_v59, %v946_v58  ;;  %9754 = vst [vmem:[#allocation24_spill] sm:$0xff] %v7521_v55  ;;  %v5531_v59 = vld [vmem:[#allocation2 + $0x88] sm:$0xf] }
 0x166   :  { %v1215_v0 = vpack.c.bf16 %v951_v62, %v950_v61 }
 0x167   :  { %1101 = vmatpush.bf16.msrb.mxu3 %v964_v63  ;;  %v7539_v63 = vld [vmem:[%s9627_s4 + $0x68] sm:$0xff] }
 0x168   :  { %1223 = vmatpush.bf16.msra.mxu0 %v1215_v0  ;;  %v7541_v0 = vor.u32 %v6480_v60, %v5531_v59  ;;  %v7586_v59 = vpack.c.bf16 %v955_v48, %v954_v53  ;;  %v6770_v48 = vld [vmem:[#allocation13] ss:$0 sm:$0xff] }
 0x16a   :  { %5265 = vmatmul.msk.bf16.vlgmr.msrb.gmra.mxu3 %vm1045_vm0, %v6413_v1  ;;  %9755 = vst [vmem:[#allocation25_spill] sm:$0xff] %v7541_v0 }
 0x16b   :  { %5281 = vmatmul.msk.bf16.vlgmr.msra.gmra.mxu0 %vm1045_vm0, %v6413_v1  ;;  %2041 = vmatpush.bf16.msra.mxu3 %v7515_v46  ;;  %9760 = vst [vmem:[#allocation30_spill] sm:$0xff] %v7586_v59  ;;  %v5411_v46 = vld [vmem:[%s9629_s6 + $0xe0] sm:$0xf] }
 0x16f   :  { %2042 = vmatpush.bf16.msra.mxu3 %v7518_v52 }
 0x173   :  { %2043 = vmatpush.bf16.msra.mxu3 %v7521_v55  ;;  %v6444_v55 = vld [vmem:[%s9629_s6 + $0x74] sm:$0xf0] }
 0x177   :  { %2044 = vmatpush.bf16.msra.mxu3 %v7541_v0 }
 0x17a   :  { %5266 = vmatmul.msk.bf16.gmra.mxu3 %vm1045_vm0, %v6414_v2 }
 0x17b   :  { %5282 = vmatmul.msk.bf16.gmra.mxu0 %vm1045_vm0, %v6414_v2  ;;  %v5515_v2 = vld [vmem:[#allocation2 + $0x68] sm:$0xf] }
 0x18a   :  { %5267 = vmatmul.msk.bf16.gmra.mxu3 %vm1045_vm0, %v6415_v3 }
 0x18b   :  { %5283 = vmatmul.msk.bf16.gmra.mxu0 %vm1045_vm0, %v6415_v3  ;;  %v6476_v3 = vld [vmem:[#allocation2 + $0x74] sm:$0xf0] }
 0x19a   :  { %5268 = vmatmul.msk.bf16.gmra.mxu3 %vm1045_vm0, %v6416_v4 }
 0x19b   :  { %5284 = vmatmul.msk.bf16.gmra.mxu0 %vm1045_vm0, %v6416_v4  ;;  %v7546_v4 = vor.u32 %v6476_v3, %v5515_v2 }
 0x19d   :  { %9756 = vst [vmem:[#allocation26_spill] sm:$0xff] %v7546_v4  ;;  %2045 = vmatpush.bf16.msra.mxu3 %v7546_v4  ;;  %v187_v4 = vld [vmem:[%s9773_s1 + $0x18] sm:$0xff] }
 0x1aa   :  { %5269 = vmatmul.msk.bf16.gmra.mxu3 %vm1045_vm0, %v6417_v5 }
 0x1ab   :  { %5285 = vmatmul.msk.bf16.gmra.mxu0 %vm1045_vm0, %v6417_v5 }
 0x1ba   :  { %5270 = vmatmul.msk.bf16.gmra.mxu3 %vm1045_vm0, %v6418_v6 }
 0x1bb   :  { %5286 = vmatmul.msk.bf16.gmra.mxu0 %vm1045_vm0, %v6418_v6  ;;  %v5499_v6 = vld [vmem:[#allocation2 + $0x48] sm:$0xf] }
 0x1ca   :  { %5271 = vmatmul.msk.bf16.gmra.mxu3 %vm1045_vm0, %v6419_v7 }
 0x1cb   :  { %5287 = vmatmul.msk.bf16.gmra.mxu0 %vm1045_vm0, %v6419_v7  ;;  %v6472_v7 = vld [vmem:[#allocation2 + $0x54] sm:$0xf0] }
 0x1da   :  { %5272 = vmatmul.msk.bf16.gmra.mxu3 %vm1045_vm0, %v6420_v8 }
 0x1db   :  { %5288 = vmatmul.msk.bf16.gmra.mxu0 %vm1045_vm0, %v6420_v8  ;;  %v7549_v8 = vor.u32 %v6472_v7, %v5499_v6  ;;  %v7606_v6 = vld [vmem:[%s9628_s5 + $0x58] sm:$0xff]  ;;  %v7611_v7 = vld [vmem:[%s9628_s5 + $0x50] sm:$0xff] }
 0x1dd   :  { %9757 = vst [vmem:[#allocation27_spill] sm:$0xff] %v7549_v8  ;;  %2046 = vmatpush.bf16.msra.mxu3 %v7549_v8 }
 0x1ea   :  { %5273 = vmatmul.msk.bf16.gmra.mxu3 %vm1045_vm0, %v6421_v9 }
 0x1eb   :  { %5289 = vmatmul.msk.bf16.gmra.mxu0 %vm1045_vm0, %v6421_v9  ;;  %v5483_v9 = vld [vmem:[#allocation2 + $0x28] sm:$0xf] }
 0x1ed   :  { %v1103_v10 = vpop.f32.mrf.mxu3 }
 0x1ee   :  { %v7428_v14 = vmul.f32 %v1103_v10, %v7420_v11  ;;  %v6468_v10 = vld [vmem:[#allocation2 + $0x34] sm:$0xf0] }
 0x1f5   :  { %v1105_v13 = vpop.f32.mrf.mxu3 }
 0x1f6   :  { %v7431_v15 = vmul.f32 %v1105_v13, %v7425_v12  ;;  %v7552_v13 = vor.u32 %v6468_v10, %v5483_v9 }
 0x1f8   :  { %v1338_v17 = vpack.c.bf16 %v7431_v15, %v7428_v14  ;;  %9758 = vst [vmem:[#allocation28_spill] sm:$0xff] %v7552_v13  ;;  %2047 = vmatpush.bf16.msra.mxu3 %v7552_v13  ;;  %v6515_v14 = vld [vmem:[%s9631_s8 + $0xb0] sm:$0xff]  ;;  %v6514_v15 = vld [vmem:[%s9631_s8 + $0xa8] sm:$0xff] }
 0x1f9   :  { %v186_v13 = vld [vmem:[%s9773_s1 + $0x10] sm:$0xff] }
 0x1fa   :  { %5274 = vmatmul.msk.bf16.gmra.mxu3 %vm1045_vm0, %v6422_v16 }
 0x1fb   :  { %5290 = vmatmul.msk.bf16.gmra.mxu0 %vm1045_vm0, %v6422_v16 }
 0x1fd   :  { %v1108_v18 = vpop.f32.mrf.mxu3 }
 0x1fe   :  { %v7451_v22 = vmul.f32 %v1108_v18, %v7443_v19  ;;  %v5467_v18 = vld [vmem:[#allocation2 + $0x8] sm:$0xf] }
 0x205   :  { %v1110_v21 = vpop.f32.mrf.mxu3 }
 0x206   :  { %v7454_v23 = vmul.f32 %v1110_v21, %v7448_v20  ;;  %v6464_v21 = vld [vmem:[#allocation2 + $0x14] sm:$0xf0] }
 0x208   :  { %v1339_v25 = vpack.c.bf16 %v7454_v23, %v7451_v22  ;;  %v6516_v22 = vld [vmem:[%s9631_s8 + $0xb8] sm:$0xff] }
 0x20a   :  { %5275 = vmatmul.msk.bf16.gmra.mxu3 %vm1045_vm0, %v6423_v24 }
 0x20b   :  { %5291 = vmatmul.msk.bf16.gmra.mxu0 %vm1045_vm0, %v6423_v24  ;;  %v7558_v24 = vld [vmem:[%s9627_s4 + $0x70] sm:$0xff] }
 0x20d   :  { %v1113_v26 = vpop.f32.mrf.mxu3 }
 0x20e   :  { %v7476_v31 = vmul.f32 %v1113_v26, %v7468_v28  ;;  %v7560_v26 = vor.u32 %v6464_v21, %v5467_v18 }
 0x210   :  { %9759 = vst [vmem:[#allocation29_spill] sm:$0xff] %v7560_v26  ;;  %2048 = vmatpush.bf16.msra.mxu3 %v7560_v26 }
 0x214   :  { %2301 = vmatpush.bf16.msrb.mxu3 %v6516_v22 }
 0x215   :  { %v1115_v30 = vpop.f32.mrf.mxu3 }
 0x216   :  { %v7479_v32 = vmul.f32 %v1115_v30, %v7473_v29 }
 0x218   :  { %v1340_v34 = vpack.c.bf16 %v7479_v32, %v7476_v31  ;;  %2302 = vmatpush.bf16.msrb.mxu3 %v6515_v14 }
 0x21a   :  { %5276 = vmatmul.msk.bf16.gmra.mxu3 %vm1045_vm0, %v6424_v33 }
 0x21b   :  { %5292 = vmatmul.msk.bf16.gmra.mxu0 %vm1045_vm0, %v6424_v33 }
 0x21c   :  { %2303 = vmatpush.bf16.msrb.mxu3 %v6514_v15 }
 0x21d   :  { %v1118_v36 = vpop.f32.mrf.mxu3 }
 0x21e   :  { %v7501_v40 = vmul.f32 %v1118_v36, %v7493_v37  ;;  %v7568_v36 = vld [vmem:[%s9627_s4 + $0x78] sm:$0xff] }
 0x225   :  { %v1120_v39 = vpop.f32.mrf.mxu3 }
 0x226   :  { %v7504_v41 = vmul.f32 %v1120_v39, %v7498_v38 }
 0x228   :  { %v1341_v43 = vpack.c.bf16 %v7504_v41, %v7501_v40 }
 0x22a   :  { %5277 = vmatmul.msk.bf16.gmra.mxu3 %vm1045_vm0, %v7509_v42 }
 0x22d   :  { %v1123_v47 = vpop.f32.mrf.mxu3 }
 0x22e   :  { %v1191_v61 = vmul.f32 %v1123_v47, %v7526_v56  ;;  %v7580_v47 = vld [vmem:[%s9628_s5 + $0x78] sm:$0xff] }
 0x235   :  { %v1125_v58 = vpop.f32.mrf.mxu3 }
 0x236   :  { %v1192_v62 = vmul.f32 %v1125_v58, %v7531_v57 }
 0x238   :  { %v1342_v1 = vpack.c.bf16 %v1192_v62, %v1191_v61  ;;  %v7591_v61 = vld [vmem:[%s9628_s5 + $0x68] sm:$0xff] }
 0x23a   :  { %5278 = vmatmul.msk.bf16.gmra.mxu3 %vm1045_vm0, %v7539_v63 }
 0x23d   :  { %v1128_v5 = vpop.f32.mrf.mxu3 }
 0x23e   :  { %v1193_v18 = vmul.f32 %v1128_v5, %v7611_v7  ;;  %v865_v5 = vpop.f32.mrf.mxu1 }
 0x23f   :  { %v942_v41 = vadd.f32 %v6770_v48, %v865_v5 }
 0x245   :  { %v1130_v16 = vpop.f32.mrf.mxu3 }
 0x246   :  { %v1194_v9 = vmul.f32 %v1130_v16, %v7606_v6  ;;  %v867_v44 = vpop.f32.mrf.mxu1 }
 0x247   :  { %v943_v40 = vadd.f32 %v6770_v48, %v867_v44 }
 0x248   :  { %v1343_v21 = vpack.c.bf16 %v1194_v9, %v1193_v18  ;;  %v7676_v9 = vld [vmem:[%s9628_s5 + $0xf8] sm:$0xff] }
 0x249   :  { %v7641_v31 = vpack.c.bf16 %v943_v40, %v942_v41  ;;  %v7683_v40 = vld [vmem:[%s9628_s5 + $0xe8] sm:$0xff]  ;;  %v7688_v41 = vld [vmem:[%s9628_s5 + $0xe0] sm:$0xff] }
 0x24a   :  { %5279 = vmatmul.msk.bf16.gmra.mxu3 %vm1045_vm0, %v7558_v24 }
 0x24d   :  { %v1133_v30 = vpop.f32.mrf.mxu3 }
 0x24e   :  { %v1195_v2 = vmul.f32 %v1133_v30, %v7597_v35  ;;  %v921_v44 = vpop.f32.mrf.mxu1 }
 0x255   :  { %v1135_v33 = vpop.f32.mrf.mxu3 }
 0x256   :  { %v1196_v27 = vmul.f32 %v1135_v33, %v7591_v61 }
 0x258   :  { %v1344_v3 = vpack.c.bf16 %v1196_v27, %v1195_v2  ;;  %v6509_v27 = vld [vmem:[%s9631_s8 + $0x80] sm:$0xff] }
 0x25a   :  { %5280 = vmatmul.msk.bf16.gmra.mxu3 %vm1045_vm0, %v7568_v36 }
 0x25d   :  { %v1138_v39 = vpop.f32.mrf.mxu3 }
 0x25e   :  { %v1197_v54 = vmul.f32 %v1138_v39, %v7575_v45 }
 0x265   :  { %v1140_v49 = vpop.f32.mrf.mxu3 }
 0x266   :  { %v1198_v58 = vmul.f32 %v1140_v49, %v7580_v47  ;;  %v6512_v49 = vld [vmem:[%s9631_s8 + $0x98] sm:$0xff] }
 0x268   :  { %v1345_v60 = vpack.c.bf16 %v1198_v58, %v1197_v54  ;;  %v6511_v54 = vld [vmem:[%s9631_s8 + $0x90] sm:$0xff]  ;;  %v6510_v58 = vld [vmem:[%s9631_s8 + $0x88] sm:$0xff] }
 0x26a   :  { %1354 = vmatpush.bf16.xpose.msra.mxu1 %v1345_v60  ;;  %2049 = vmatmul.bf16.vlgmr.msra.gmra.mxu3 %v7586_v59 }
 0x26d   :  { %v7600_v62 = vpop.f32.mrf.mxu3 }
 0x272   :  { %1355 = vmatpush.bf16.xpose.msra.mxu1 %v1344_v3  ;;  %v7671_v3 = vld [vmem:[%s9628_s5 + $0xf0] sm:$0xff] }
 0x275   :  { %v7614_v10 = vpop.f32.mrf.mxu3 }
 0x27a   :  { %1356 = vmatpush.bf16.xpose.msra.mxu1 %v1343_v21 }
 0x27d   :  { %v7617_v30 = vpop.f32.mrf.mxu3 }
 0x282   :  { %1357 = vmatpush.bf16.xpose.msra.mxu1 %v1342_v1 }
 0x285   :  { %v7619_v33 = vpop.f32.mrf.mxu3 }
 0x28a   :  { %1358 = vmatpush.bf16.xpose.msra.mxu1 %v1341_v43 }
 0x28d   :  { %v7624_v39 = vpop.f32.mrf.mxu3 }
 0x292   :  { %1359 = vmatpush.bf16.xpose.msra.mxu1 %v1340_v34 }
 0x295   :  { %v7629_v16 = vpop.f32.mrf.mxu3 }
 0x29a   :  { %1360 = vmatpush.bf16.xpose.msra.mxu1 %v1339_v25  ;;  %v6513_v25 = vld [vmem:[%s9631_s8 + $0xa0] sm:$0xff] }
 0x29b   :  { %2304 = vmatpush.bf16.msrb.mxu3 %v6513_v25  ;;  %v6774_v25 = vld [vmem:[#allocation13 + $0x4] ss:$0 sm:$0xff] }
 0x29d   :  { %v7634_v1 = vpop.f32.mrf.mxu3 }
 0x29f   :  { %2305 = vmatpush.bf16.msrb.mxu3 %v6512_v49 }
 0x2a2   :  { %1361 = vmatpush.bf16.xpose.msra.mxu1 %v1338_v17 }
 0x2a3   :  { %2306 = vmatpush.bf16.msrb.mxu3 %v6511_v54  ;;  %v923_v54 = vpop.f32.mrf.mxu1 }
 0x2a5   :  { %v7639_v43 = vpop.f32.mrf.mxu3 }
 0x2a7   :  { %2307 = vmatpush.bf16.msrb.mxu3 %v6510_v58  ;;  %v7695_v58 = vld [vmem:[%s9628_s5 + $0xd8] sm:$0xff] }
 0x2a9   :  { %1362 = vmatmul.bf16.vlgmr.msra.gmra.mxu1 %v7641_v31 }
 0x2ab   :  { %2308 = vmatpush.bf16.msrb.mxu3 %v6509_v27  ;;  %v7700_v27 = vld [vmem:[%s9628_s5 + $0xd0] sm:$0xff] }
 0x2ad   :  { %v1163_v32 = vpop.f32.mrf.mxu3 }
 0x2b5   :  { %v1165_v34 = vpop.f32.mrf.mxu3 }
 0x2bd   :  { %v1168_v23 = vpop.f32.mrf.mxu3 }
 0x2c5   :  { %v1170_v17 = vpop.f32.mrf.mxu3 }
 0x2cd   :  { %v1173_v53 = vpop.f32.mrf.mxu3 }
 0x2ce   :  { %v1211_v15 = vmul.f32 %v1173_v53, %v7688_v41  ;;  %v1210_v53 = vmul.f32 %v1170_v17, %v7695_v58  ;;  %v7718_v17 = vld [vmem:[%s9628_s5 + $0xc0] sm:$0xff] }
 0x2d5   :  { %v1175_v60 = vpop.f32.mrf.mxu3 }
 0x2d6   :  { %v1212_v22 = vmul.f32 %v1175_v60, %v7683_v40  ;;  %v7704_v60 = vadd.f32 %v6774_v25, %v923_v54  ;;  %v7730_v54 = vld [vmem:[%s9628_s5 + $0xb0] sm:$0xff] }
 0x2d8   :  { %v1352_v49 = vpack.c.bf16 %v1212_v22, %v1211_v15  ;;  %9762 = vst [vmem:[#allocation32_spill] sm:$0xff] %v7704_v60 }
 0x2dd   :  { %v1178_v2 = vpop.f32.mrf.mxu3 }
 0x2de   :  { %v1213_v21 = vmul.f32 %v1178_v2, %v7671_v3  ;;  %v7702_v2 = vadd.f32 %v6774_v25, %v921_v44  ;;  %v1207_v44 = vmul.f32 %v1163_v32, %v7718_v17  ;;  %v7725_v25 = vld [vmem:[%s9628_s5 + $0xb8] sm:$0xff]  ;;  %v7739_v32 = vld [vmem:[%s9628_s5 + $0xa8] sm:$0xff] }
 0x2e0   :  { %9761 = vst [vmem:[#allocation31_spill] sm:$0xff] %v7702_v2 }
 0x2e5   :  { %v1180_v18 = vpop.f32.mrf.mxu3 }
 0x2e6   :  { %v1214_v5 = vmul.f32 %v1180_v18, %v7676_v9 }
 0x2e8   :  { %v1353_v48 = vpack.c.bf16 %v1214_v5, %v1213_v21  ;;  %v1209_v21 = vmul.f32 %v1168_v23, %v7700_v27 }
 0x2ea   :  { %1368 = vmatpush.bf16.xpose.msra.mxu2 %v1353_v48  ;;  %v1351_v22 = vpack.c.bf16 %v1210_v53, %v1209_v21  ;;  %v1206_v53 = vmul.f32 %v7639_v43, %v7725_v25  ;;  %v7744_v21 = vld [vmem:[%s9628_s5 + $0xa0] sm:$0xff] }
 0x2eb   :  { %v1203_v43 = vmul.f32 %v7624_v39, %v7744_v21 }
 0x2ed   :  { %v2050_v14 = vpop.f32.mrf.mxu3 }
 0x2ee   :  { %v2071_v5 = vmul.f32 %v2050_v14, %v7702_v2 }
 0x2f2   :  { %1369 = vmatpush.bf16.xpose.msra.mxu2 %v1352_v49  ;;  %v7713_v49 = vld [vmem:[%s9628_s5 + $0xc8] sm:$0xff] }
 0x2f3   :  { %v1208_v23 = vmul.f32 %v1165_v34, %v7713_v49  ;;  %v1205_v34 = vmul.f32 %v7634_v1, %v7730_v54 }
 0x2f5   :  { %v2052_v18 = vpop.f32.mrf.mxu3  ;;  %v1350_v14 = vpack.c.bf16 %v1208_v23, %v1207_v44 }
 0x2f6   :  { %v2075_v48 = vmul.f32 %v2052_v18, %v7704_v60  ;;  %v1349_v18 = vpack.c.bf16 %v1206_v53, %v1205_v34  ;;  %v7775_v34 = vld [vmem:[%s9628_s5 + $0x88] sm:$0xff] }
 0x2f7   :  { %9765 = vst [vmem:[#allocation35_spill] sm:$0xff] %v7775_v34 }
 0x2f8   :  { %v2079_v15 = vpack.c.bf16 %v2075_v48, %v2071_v5  ;;  %v1204_v5 = vmul.f32 %v7629_v16, %v7739_v32  ;;  %v1225_v48 = vpop.f32.mrf.mxu0 }
 0x2f9   :  { %v7765_v39 = vmul.f32 %v1225_v48, %v7420_v11  ;;  %v7782_v11 = vld [vmem:[%s9628_s5 + $0x80] sm:$0xff] }
 0x2fa   :  { %1370 = vmatpush.bf16.xpose.msra.mxu2 %v1351_v22  ;;  %2309 = vmatmul.bf16.vlgmr.msrb.gmra.mxu3 %v2079_v15  ;;  %v1348_v1 = vpack.c.bf16 %v1204_v5, %v1203_v43  ;;  %v7753_v22 = vld [vmem:[%s9628_s5 + $0x98] sm:$0xff]  ;;  %v7758_v15 = vld [vmem:[%s9628_s5 + $0x90] sm:$0xff]  ;;  %9766 = vst [vmem:[#allocation36_spill] sm:$0xff] %v7782_v11 }
 0x2fb   :  { %v1202_v23 = vmul.f32 %v7619_v33, %v7753_v22  ;;  %v1201_v16 = vmul.f32 %v7617_v30, %v7758_v15  ;;  %9763 = vst [vmem:[#allocation33_spill] sm:$0xff] %v7765_v39 }
 0x300   :  { %v1227_v44 = vpop.f32.mrf.mxu0  ;;  %5293 = vmatmul.msk.bf16.gmra.mxu0 %vm1045_vm0, %v7509_v42  ;;  %v1200_v42 = vmul.f32 %v7614_v10, %v7775_v34 }
 0x301   :  { %v7770_v53 = vmul.f32 %v1227_v44, %v7425_v12  ;;  %v1199_v12 = vmul.f32 %v7600_v62, %v7782_v11 }
 0x302   :  { %1371 = vmatpush.bf16.xpose.msra.mxu2 %v1350_v14  ;;  %v1347_v14 = vpack.c.bf16 %v1202_v23, %v1201_v16 }
 0x303   :  { %9764 = vst [vmem:[#allocation34_spill] sm:$0xff] %v7770_v53 }
 0x308   :  { %v1230_v33 = vpop.f32.mrf.mxu0 }
 0x309   :  { %v7789_v5 = vmul.f32 %v1230_v33, %v7443_v19 }
 0x30a   :  { %1372 = vmatpush.bf16.xpose.msra.mxu2 %v1349_v18  ;;  %v1346_v18 = vpack.c.bf16 %v1200_v42, %v1199_v12 }
 0x30b   :  { %9767 = vst [vmem:[#allocation37_spill] sm:$0xff] %v7789_v5 }
 0x310   :  { %v1232_v43 = vpop.f32.mrf.mxu0  ;;  %5294 = vmatmul.msk.bf16.gmra.mxu0 %vm1045_vm0, %v7539_v63 }
 0x311   :  { %v7794_v48 = vmul.f32 %v1232_v43, %v7448_v20 }
 0x312   :  { %1373 = vmatpush.bf16.xpose.msra.mxu2 %v1348_v1 }
 0x313   :  { %9768 = vst [vmem:[#allocation38_spill] sm:$0xff] %v7794_v48 }
 0x318   :  { %v1235_v1 = vpop.f32.mrf.mxu0 }
 0x319   :  { %v7800_v62 = vmul.f32 %v1235_v1, %v7468_v28 }
 0x31a   :  { %1374 = vmatpush.bf16.xpose.msra.mxu2 %v1347_v14 }
 0x320   :  { %v1237_v23 = vpop.f32.mrf.mxu0  ;;  %5295 = vmatmul.msk.bf16.gmra.mxu0 %vm1045_vm0, %v7558_v24 }
 0x321   :  { %v7805_v19 = vmul.f32 %v1237_v23, %v7473_v29 }
 0x322   :  { %1375 = vmatpush.bf16.xpose.msra.mxu2 %v1346_v18 }
 0x326   :  { %v1363_v23 = vpop.f32.mrf.mxu1 }
 0x328   :  { %v1240_v63 = vpop.f32.mrf.mxu0 }
 0x329   :  { %1376 = vmatmul.bf16.vlgmr.msra.gmra.mxu2 %v7641_v31  ;;  %v7810_v31 = vmul.f32 %v1240_v63, %v7493_v37  ;;  %v184_v63 = vld [vmem:[%s9773_s1] sm:$0xff] }
 0x32a   :  { %v7849_v10 = vadd.f32 %v1363_v23, %v184_v63 }
 0x32e   :  { %v1365_v8 = vpop.f32.mrf.mxu1 }
 0x32f   :  { %v7863_v23 = vadd.f32 %v1365_v8, %v186_v13  ;;  %v5419_v8 = vld [vmem:[%s9629_s6 + $0xf0] sm:$0xf]  ;;  %v5347_v13 = vld [vmem:[%s9629_s6 + $0x60] sm:$0xf] }
 0x330   :  { %v1242_v16 = vpop.f32.mrf.mxu0  ;;  %5296 = vmatmul.msk.bf16.gmra.mxu0 %vm1045_vm0, %v7568_v36 }
 0x331   :  { %v7815_v28 = vmul.f32 %v1242_v16, %v7498_v38  ;;  %v7835_v38 = vpop.f32.mrf.mxu2  ;;  %v185_v16 = vld [vmem:[%s9773_s1 + $0x8] sm:$0xff] }
 0x332   :  { %9769 = vst [vmem:[#allocation39_spill] sm:$0xff] %v7835_v38 }
 0x338   :  { %v7819_v44 = vpop.f32.mrf.mxu0 }
 0x339   :  { %v7839_v43 = vpop.f32.mrf.mxu2 }
 0x33a   :  { %9771 = vst [vmem:[#allocation41_spill] sm:$0xff] %v7839_v43 }
 0x340   :  { %v7821_v29 = vpop.f32.mrf.mxu0 }
 0x348   :  { %v7823_v14 = vpop.f32.mrf.mxu0 }
 0x350   :  { %v7825_v42 = vpop.f32.mrf.mxu0 }
 0x358   :  { %v7827_v37 = vpop.f32.mrf.mxu0 }
 0x360   :  { %v7829_v12 = vpop.f32.mrf.mxu0 }
 0x368   :  { %v7831_v33 = vpop.f32.mrf.mxu0 }
 0x370   :  { %v7833_v36 = vpop.f32.mrf.mxu0 }
 0x378   :  { %v7837_v18 = vpop.f32.mrf.mxu0 }
 0x379   :  { %9770 = vst [vmem:[#allocation40_spill] sm:$0xff] %v7837_v18 }
 0x380   :  { %v7841_v1 = vpop.f32.mrf.mxu0 }
 0x381   :  { %9772 = vst [vmem:[#allocation42_spill] sm:$0xff] %v7841_v1 }
 0x388   :  { %v7855_v26 = vpop.f32.mrf.mxu0 }
 0x3ac   :  { %v1377_v30 = vpop.f32.mrf.mxu2 }
 0x3ad   :  { %v7851_v20 = vadd.f32 %v1377_v30, %v185_v16  ;;  %v7869_v16 = vpop.f32.mrf.mxu0 }
 0x3af   :  { %v1382_v24 = vmax.f32 %v7849_v10, %v7851_v20 }
 0x3b1   :  { %1383 = vmax.xlane.f32.xlu0 %v1382_v24  ;;  %v5355_v24 = vld [vmem:[%s9629_s6 + $0x70] sm:$0xf] }
 0x3b4   :  { %v1379_v0 = vpop.f32.mrf.mxu2 }
 0x3b5   :  { %v7865_v30 = vadd.f32 %v1379_v0, %v187_v4  ;;  %v7880_v0 = vor.u32 %v6444_v55, %v5355_v24  ;;  %v6460_v4 = vld [vmem:[%s9629_s6 + $0xf4] sm:$0xf0]  ;;  %v6458_v55 = vld [vmem:[%s9629_s6 + $0xe4] sm:$0xf0]  ;;  %v7905_v38 = vpop.f32.mrf.mxu0 }
 0x3b6   :  { %v7891_v52 = vor.u32 %v6460_v4, %v5419_v8  ;;  %v7903_v43 = vor.u32 %v6458_v55, %v5411_v46  ;;  %v5339_v8 = vld [vmem:[%s9629_s6 + $0x50] sm:$0xf]  ;;  %v6440_v4 = vld [vmem:[%s9629_s6 + $0x54] sm:$0xf0]  ;;  %v5331_v55 = vld [vmem:[%s9629_s6 + $0x40] sm:$0xf] }
 0x3b7   :  { %v1385_v63 = vmax.f32 %v7863_v23, %v7865_v30  ;;  %9774 = vst [vmem:[#allocation43_spill] sm:$0xff] %v7880_v0  ;;  %1562 = vmatpush.bf16.msrb.mxu1 %v7880_v0  ;;  %v7918_v46 = vor.u32 %v6440_v4, %v5339_v8  ;;  %v6454_v8 = vld [vmem:[%s9629_s6 + $0xc4] sm:$0xf0] }
 0x3b8   :  { %9775 = vst [vmem:[#allocation44_spill] sm:$0xff] %v7891_v52  ;;  %1576 = vmatpush.bf16.msrb.mxu2 %v7891_v52 }
 0x3b9   :  { %1386 = vmax.xlane.f32.xlu0 %v1385_v63  ;;  %v6442_v63 = vld [vmem:[%s9629_s6 + $0x64] sm:$0xf0]  ;;  %9777 = vst [vmem:[#allocation46_spill] sm:$0xff] %v7903_v43 }
 0x3ba   :  { %v7900_v24 = vor.u32 %v6442_v63, %v5347_v13  ;;  %v5403_v13 = vld [vmem:[%s9629_s6 + $0xd0] sm:$0xf]  ;;  %9778 = vst [vmem:[#allocation47_spill] sm:$0xff] %v7918_v46  ;;  %v6456_v63 = vld [vmem:[%s9629_s6 + $0xd4] sm:$0xf0] }
 0x3bb   :  { %v7929_v52 = vor.u32 %v6456_v63, %v5403_v13  ;;  %v5323_v13 = vld [vmem:[%s9629_s6 + $0x30] sm:$0xf]  ;;  %v6436_v63 = vld [vmem:[%s9629_s6 + $0x34] sm:$0xf0] }
 0x3bc   :  { %9776 = vst [vmem:[#allocation45_spill] sm:$0xff] %v7900_v24  ;;  %1563 = vmatpush.bf16.msrb.mxu1 %v7900_v24  ;;  %1577 = vmatpush.bf16.msrb.mxu2 %v7903_v43  ;;  %v6438_v43 = vld [vmem:[%s9629_s6 + $0x44] sm:$0xf0]  ;;  %v5395_v24 = vld [vmem:[%s9629_s6 + $0xc0] sm:$0xf] }
 0x3bd   :  { %9779 = vst [vmem:[#allocation48_spill] sm:$0xff] %v7929_v52  ;;  %v7938_v4 = vor.u32 %v6438_v43, %v5331_v55  ;;  %v7941_v0 = vor.u32 %v6454_v8, %v5395_v24  ;;  %v7943_v60 = vpop.f32.mrf.mxu0  ;;  %v7955_v43 = vor.u32 %v6436_v63, %v5323_v13  ;;  %v6452_v24 = vld [vmem:[%s9629_s6 + $0xb4] sm:$0xf0]  ;;  %v5315_v8 = vld [vmem:[%s9629_s6 + $0x20] sm:$0xf] }
 0x3be   :  { %v5379_v13 = vld [vmem:[%s9629_s6 + $0xa0] sm:$0xf]  ;;  %v6450_v63 = vld [vmem:[%s9629_s6 + $0xa4] sm:$0xf0] }
 0x3bf   :  { %9780 = vst [vmem:[#allocation49_spill] sm:$0xff] %v7938_v4 }
 0x3c0   :  { %1564 = vmatpush.bf16.msrb.mxu1 %v7918_v46  ;;  %1578 = vmatpush.bf16.msrb.mxu2 %v7929_v52  ;;  %9781 = vst [vmem:[#allocation50_spill] sm:$0xff] %v7941_v0  ;;  %v5387_v46 = vld [vmem:[%s9629_s6 + $0xb0] sm:$0xf]  ;;  %v6434_v52 = vld [vmem:[%s9629_s6 + $0x24] sm:$0xf0] }
 0x3c1   :  { %9782 = vst [vmem:[#allocation51_spill] sm:$0xff] %v7955_v43  ;;  %v7961_v55 = vor.u32 %v6452_v24, %v5387_v46  ;;  %v7976_v46 = vor.u32 %v6434_v52, %v5315_v8  ;;  %v7979_v24 = vor.u32 %v6450_v63, %v5379_v13  ;;  %v5371_v52 = vld [vmem:[%s9629_s6 + $0x90] sm:$0xf]  ;;  %v6448_v13 = vld [vmem:[%s9629_s6 + $0x94] sm:$0xf0] }
 0x3c2   :  { %v5299_v63 = vld [vmem:[%s9629_s6] sm:$0xf] }
 0x3c3   :  { %9783 = vst [vmem:[#allocation52_spill] sm:$0xff] %v7961_v55 }
 0x3c4   :  { %1565 = vmatpush.bf16.msrb.mxu1 %v7938_v4  ;;  %1579 = vmatpush.bf16.msrb.mxu2 %v7941_v0  ;;  %9784 = vst [vmem:[#allocation53_spill] sm:$0xff] %v7976_v46  ;;  %v5307_v4 = vld [vmem:[%s9629_s6 + $0x10] sm:$0xf] }
 0x3c5   :  { %9785 = vst [vmem:[#allocation54_spill] sm:$0xff] %v7979_v24  ;;  %v7981_v0 = vpop.f32.mrf.mxu0 }
 0x3c8   :  { %1566 = vmatpush.bf16.msrb.mxu1 %v7955_v43  ;;  %1580 = vmatpush.bf16.msrb.mxu2 %v7961_v55  ;;  %v6432_v43 = vld [vmem:[%s9629_s6 + $0x14] sm:$0xf0]  ;;  %v8005_v55 = vor.u32 %v6448_v13, %v5371_v52  ;;  %v6443_v52 = vld [vmem:[%s9629_s6 + $0x74] sm:$0xf]  ;;  %v5357_v13 = vld [vmem:[%s9629_s6 + $0x78] sm:$0xf0] }
 0x3c9   :  { %v7994_v8 = vor.u32 %v6432_v43, %v5307_v4  ;;  %v6446_v4 = vld [vmem:[%s9629_s6 + $0x84] sm:$0xf0] }
 0x3ca   :  { %9787 = vst [vmem:[#allocation56_spill] sm:$0xff] %v8005_v55 }
 0x3cb   :  { %9786 = vst [vmem:[#allocation55_spill] sm:$0xff] %v7994_v8 }
 0x3cc   :  { %1567 = vmatpush.bf16.msrb.mxu1 %v7976_v46  ;;  %1581 = vmatpush.bf16.msrb.mxu2 %v7979_v24  ;;  %v6430_v24 = vld [vmem:[%s9629_s6 + $0x4] sm:$0xf0]  ;;  %v5363_v46 = vld [vmem:[%s9629_s6 + $0x80] sm:$0xf] }
 0x3cd   :  { %v8014_v43 = vor.u32 %v6430_v24, %v5299_v63  ;;  %v8017_v2 = vor.u32 %v6446_v4, %v5363_v46  ;;  %v8029_v24 = vor.u32 %v6443_v52, %v5357_v13  ;;  %v5421_v46 = vld [vmem:[%s9629_s6 + $0xf8] sm:$0xf0]  ;;  %v6441_v63 = vld [vmem:[%s9629_s6 + $0x64] sm:$0xf]  ;;  %v5349_v4 = vld [vmem:[%s9629_s6 + $0x68] sm:$0xf0] }
 0x3ce   :  { %v6457_v52 = vld [vmem:[%s9629_s6 + $0xe4] sm:$0xf]  ;;  %v5413_v13 = vld [vmem:[%s9629_s6 + $0xe8] sm:$0xf0] }
 0x3cf   :  { %9788 = vst [vmem:[#allocation57_spill] sm:$0xff] %v8014_v43  ;;  %v8055_v50 = vor.u32 %v6457_v52, %v5413_v13  ;;  %v5405_v13 = vld [vmem:[%s9629_s6 + $0xd8] sm:$0xf0] }
 0x3d0   :  { %1568 = vmatpush.bf16.msrb.mxu1 %v7994_v8  ;;  %1582 = vmatpush.bf16.msrb.mxu2 %v8005_v55  ;;  %9789 = vst [vmem:[#allocation58_spill] sm:$0xff] %v8017_v2  ;;  %v8041_v55 = vor.u32 %v6459_v51, %v5421_v46  ;;  %v8052_v8 = vor.u32 %v6441_v63, %v5349_v4  ;;  %v5341_v63 = vld [vmem:[%s9629_s6 + $0x58] sm:$0xf0]  ;;  %v6455_v4 = vld [vmem:[%s9629_s6 + $0xd4] sm:$0xf] }
 0x3d1   :  { %9790 = vst [vmem:[#allocation59_spill] sm:$0xff] %v8029_v24 }
 0x3d2   :  { %9791 = vst [vmem:[#allocation60_spill] sm:$0xff] %v8041_v55 }
 0x3d3   :  { %9792 = vst [vmem:[#allocation61_spill] sm:$0xff] %v8052_v8 }
 0x3d4   :  { %1569 = vmatpush.bf16.msrb.mxu1 %v8014_v43  ;;  %1583 = vmatpush.bf16.msrb.mxu2 %v8017_v2  ;;  %v8049_v43 = vpop.f32.mrf.mxu0  ;;  %9793 = vst [vmem:[#allocation62_spill] sm:$0xff] %v8055_v50 }
 0x3d8   :  { %1590 = vmatpush.bf16.msra.mxu1 %v8029_v24  ;;  %1604 = vmatpush.bf16.msra.mxu2 %v8041_v55  ;;  %v6439_v24 = vld [vmem:[%s9629_s6 + $0x54] sm:$0xf]  ;;  %v6437_v55 = vld [vmem:[%s9629_s6 + $0x44] sm:$0xf] }
 0x3d9   :  { %v8074_v52 = vor.u32 %v6439_v24, %v5341_v63  ;;  %v6453_v24 = vld [vmem:[%s9629_s6 + $0xc4] sm:$0xf] }
 0x3db   :  { %9794 = vst [vmem:[#allocation63_spill] sm:$0xff] %v8074_v52 }
 0x3dc   :  { %1591 = vmatpush.bf16.msra.mxu1 %v8052_v8  ;;  %1605 = vmatpush.bf16.msra.mxu2 %v8055_v50  ;;  %v8059_v51 = vpop.f32.mrf.mxu0  ;;  %v8079_v50 = vor.u32 %v6455_v4, %v5405_v13  ;;  %v5333_v8 = vld [vmem:[%s9629_s6 + $0x48] sm:$0xf0] }
 0x3dd   :  { %v8092_v63 = vor.u32 %v6437_v55, %v5333_v8  ;;  %v5397_v4 = vld [vmem:[%s9629_s6 + $0xc8] sm:$0xf0]  ;;  %v5325_v55 = vld [vmem:[%s9629_s6 + $0x38] sm:$0xf0]  ;;  %v6451_v8 = vld [vmem:[%s9629_s6 + $0xb4] sm:$0xf] }
 0x3de   :  { %9795 = vst [vmem:[#allocation64_spill] sm:$0xff] %v8079_v50 }
 0x3df   :  { %9796 = vst [vmem:[#allocation65_spill] sm:$0xff] %v8092_v63 }
 0x3e0   :  { %1592 = vmatpush.bf16.msra.mxu1 %v8074_v52  ;;  %1606 = vmatpush.bf16.msra.mxu2 %v8079_v50  ;;  %v8099_v50 = vor.u32 %v6453_v24, %v5397_v4  ;;  %v6435_v52 = vld [vmem:[%s9629_s6 + $0x34] sm:$0xf]  ;;  %v5389_v24 = vld [vmem:[%s9629_s6 + $0xb8] sm:$0xf0] }
 0x3e1   :  { %v8112_v59 = vor.u32 %v6435_v52, %v5325_v55  ;;  %v8117_v4 = vor.u32 %v6451_v8, %v5389_v24  ;;  %v6449_v52 = vld [vmem:[%s9629_s6 + $0xa4] sm:$0xf]  ;;  %v5381_v8 = vld [vmem:[%s9629_s6 + $0xa8] sm:$0xf0] }
 0x3e2   :  { %9797 = vst [vmem:[#allocation66_spill] sm:$0xff] %v8099_v50  ;;  %v8135_v24 = vor.u32 %v6449_v52, %v5381_v8  ;;  %v5373_v52 = vld [vmem:[%s9629_s6 + $0x98] sm:$0xf0]  ;;  %v6429_v8 = vld [vmem:[%s9629_s6 + $0x4] sm:$0xf] }
 0x3e3   :  { %9798 = vst [vmem:[#allocation67_spill] sm:$0xff] %v8112_v59 }
 0x3e4   :  { %v8061_v46 = vpop.f32.mrf.mxu0  ;;  %1593 = vmatpush.bf16.msra.mxu1 %v8092_v63  ;;  %1607 = vmatpush.bf16.msra.mxu2 %v8099_v50  ;;  %9799 = vst [vmem:[#allocation68_spill] sm:$0xff] %v8117_v4  ;;  %v6433_v50 = vld [vmem:[%s9629_s6 + $0x24] sm:$0xf]  ;;  %v5317_v63 = vld [vmem:[%s9629_s6 + $0x28] sm:$0xf0] }
 0x3e5   :  { %v8130_v55 = vor.u32 %v6433_v50, %v5317_v63  ;;  %9801 = vst [vmem:[#allocation70_spill] sm:$0xff] %v8135_v24  ;;  %v6447_v50 = vld [vmem:[%s9629_s6 + $0x94] sm:$0xf] }
 0x3e6   :  { %v8159_v53 = vor.u32 %v6447_v50, %v5373_v52 }
 0x3e7   :  { %9800 = vst [vmem:[#allocation69_spill] sm:$0xff] %v8130_v55 }
 0x3e8   :  { %1594 = vmatpush.bf16.msra.mxu1 %v8112_v59  ;;  %1608 = vmatpush.bf16.msra.mxu2 %v8117_v4  ;;  %v6431_v4 = vld [vmem:[%s9629_s6 + $0x14] sm:$0xf]  ;;  %v5309_v59 = vld [vmem:[%s9629_s6 + $0x18] sm:$0xf0] }
 0x3e9   :  { %v8148_v39 = vor.u32 %v6431_v4, %v5309_v59  ;;  %v5365_v59 = vld [vmem:[%s9629_s6 + $0x88] sm:$0xf0] }
 0x3eb   :  { %9802 = vst [vmem:[#allocation71_spill] sm:$0xff] %v8148_v39 }
 0x3ec   :  { %v8063_v2 = vpop.f32.mrf.mxu0  ;;  %1595 = vmatpush.bf16.msra.mxu1 %v8130_v55  ;;  %1609 = vmatpush.bf16.msra.mxu2 %v8135_v24  ;;  %v5301_v55 = vld [vmem:[%s9629_s6 + $0x8] sm:$0xf0]  ;;  %v6445_v24 = vld [vmem:[%s9629_s6 + $0x84] sm:$0xf] }
 0x3ed   :  { %v8168_v4 = vor.u32 %v6429_v8, %v5301_v55  ;;  %v8171_v5 = vor.u32 %v6445_v24, %v5365_v59 }
 0x3ef   :  { %9803 = vst [vmem:[#allocation72_spill] sm:$0xff] %v8171_v5 }
 0x3f0   :  { %1596 = vmatpush.bf16.msra.mxu1 %v8148_v39  ;;  %1610 = vmatpush.bf16.msra.mxu2 %v8159_v53 }
 0x3f4   :  { %v8097_v13 = vpop.f32.mrf.mxu0  ;;  %1597 = vmatpush.bf16.msra.mxu1 %v8168_v4  ;;  %1611 = vmatpush.bf16.msra.mxu2 %v8171_v5 }
 0x3fc   :  { %v1295_v63 = vpop.f32.mrf.mxu0 }
 0x404   :  { %v1297_v50 = vpop.f32.mrf.mxu0 }
 0x40c   :  { %v1300_v1 = vpop.f32.mrf.mxu0 }
 0x414   :  { %v1302_v5 = vpop.f32.mrf.mxu0 }
 0x424   :  { %v1384_v52 = vpop.xlane.xlu0 %1383 }
 0x425   :  { %v1388_v48 = vsub.f32 %v7849_v10, %v1384_v52  ;;  %v1389_v34 = vsub.f32 %v7851_v20, %v1384_v52  ;;  %v1319_v10 = vmul.f32 %v7831_v33, %v7575_v45  ;;  %v1320_v20 = vmul.f32 %v7833_v36, %v7580_v47 }
 0x426   :  { %v1333_v52 = vmul.f32 %v1295_v63, %v7688_v41  ;;  %v1334_v45 = vmul.f32 %v1297_v50, %v7683_v40  ;;  %v1331_v41 = vmul.f32 %v8063_v2, %v7700_v27  ;;  %v1332_v40 = vmul.f32 %v8097_v13, %v7695_v58 }
 0x427   :  { %v1392_v18 = vmul.f32 1.442695, %v1388_v48  ;;  %v1394_v11 = vmul.f32 1.442695, %v1389_v34  ;;  %v1335_v34 = vmul.f32 %v1300_v1, %v7671_v3  ;;  %v1336_v48 = vmul.f32 %v1302_v5, %v7676_v9 }
 0x428   :  { %v1317_v3 = vmul.f32 %v7827_v37, %v7597_v35  ;;  %v1318_v9 = vmul.f32 %v7829_v12, %v7591_v61  ;;  %v1646_v36 = vpack.c.bf16 %v1334_v45, %v1333_v52  ;;  %v1315_v35 = vmul.f32 %v7823_v14, %v7611_v7 }
 0x429   :  { %6803 = vpow2.f32 %v1392_v18  ;;  %v1647_v33 = vpack.c.bf16 %v1336_v48, %v1335_v34  ;;  %v1316_v61 = vmul.f32 %v7825_v42, %v7606_v6  ;;  %v1329_v12 = vmul.f32 %v8059_v51, %v7718_v17  ;;  %v9810_v51 = vld [vmem:[#allocation38_spill] sm:$0xff]  ;;  %v5451_v34 = vld [vmem:[#allocation12 + $0x1f8] sm:$0xf] }
 0x42a   :  { %6805 = vpow2.f32 %v1394_v11  ;;  %v1639_v11 = vpack.c.bf16 %v1320_v20, %v1319_v10  ;;  %v1638_v37 = vpack.c.bf16 %v1318_v9, %v1317_v3  ;;  %v1330_v1 = vmul.f32 %v8061_v46, %v7713_v49  ;;  %v9811_v46 = vld [vmem:[#allocation37_spill] sm:$0xff]  ;;  %v6640_v20 = vld [vmem:[#allocation12 + $0x26c] sm:$0xf0] }
 0x42b   :  { %v1645_v27 = vpack.c.bf16 %v1332_v40, %v1331_v41  ;;  %v1313_v58 = vmul.f32 %v7819_v44, %v7526_v56  ;;  %v1314_v2 = vmul.f32 %v7821_v29, %v7531_v57  ;;  %v1637_v7 = vpack.c.bf16 %v1316_v61, %v1315_v35  ;;  %v5455_v10 = vld [vmem:[#allocation12 + $0x248] sm:$0xf]  ;;  %v6638_v3 = vld [vmem:[#allocation12 + $0x1cc] sm:$0xf0]  ;;  %v5443_v61 = vld [vmem:[#allocation12 + $0x158] sm:$0xf] }
 0x42c   :  { %v1387_v39 = vpop.xlane.xlu0 %1386  ;;  %v1327_v6 = vmul.f32 %v7981_v0, %v7730_v54  ;;  %v1328_v14 = vmul.f32 %v8049_v43, %v7725_v25  ;;  %v1644_v17 = vpack.c.bf16 %v1330_v1, %v1329_v12  ;;  %v1325_v49 = vmul.f32 %v7905_v38, %v7744_v21  ;;  %v9807_v38 = vld [vmem:[#allocation40_spill] sm:$0xff]  ;;  %v9808_v43 = vld [vmem:[#allocation35_spill] sm:$0xff] }
 0x42d   :  { %v1390_v55 = vsub.f32 %v7863_v23, %v1387_v39  ;;  %v1391_v8 = vsub.f32 %v7865_v30, %v1387_v39  ;;  %v1636_v42 = vpack.c.bf16 %v1314_v2, %v1313_v58  ;;  %v1326_v56 = vmul.f32 %v7943_v60, %v7739_v32  ;;  %v9806_v32 = vld [vmem:[#allocation36_spill] sm:$0xff] }
 0x42e   :  { %v1643_v44 = vpack.c.bf16 %v1328_v14, %v1327_v6  ;;  %v9804_v57 = vpack.c.bf16 %v7815_v28, %v7810_v31  ;;  %v1323_v25 = vmul.f32 %v7855_v26, %v7758_v15  ;;  %v1324_v54 = vmul.f32 %v7869_v16, %v7753_v22  ;;  %v9809_v31 = vld [vmem:[#allocation42_spill] sm:$0xff]  ;;  %v9814_v16 = vld [vmem:[#allocation33_spill] sm:$0xff] }
 0x42f   :  { %v1396_v24 = vmul.f32 1.442695, %v1390_v55  ;;  %v1398_v59 = vmul.f32 1.442695, %v1391_v8  ;;  %v8185_v23 = vpop.eup %6803  ;;  %v1642_v29 = vpack.c.bf16 %v1326_v56, %v1325_v49  ;;  %v9805_v21 = vpack.c.bf16 %v7805_v19, %v7800_v62  ;;  %v9813_v15 = vld [vmem:[#allocation34_spill] sm:$0xff] }
 0x430   :  { %v8187_v39 = vpop.eup %6805  ;;  %v1641_v60 = vpack.c.bf16 %v1324_v54, %v1323_v25  ;;  %v1321_v0 = vmul.f32 %v9807_v38, %v9806_v32  ;;  %v1322_v28 = vmul.f32 %v9809_v31, %v9808_v43  ;;  %v9812_v26 = vpack.c.bf16 %v9810_v51, %v9811_v46  ;;  %v6636_v6 = vld [vmem:[#allocation12 + $0x12c] sm:$0xf0]  ;;  %v5435_v49 = vld [vmem:[#allocation12 + $0xb8] sm:$0xf]  ;;  %v6633_v46 = vld [vmem:[#allocation12 + $0x3c] sm:$0xf0] }
 0x431   :  { %6807 = vpow2.f32 %v1396_v24  ;;  %v9815_v13 = vpack.c.bf16 %v9813_v15, %v9814_v16  ;;  %v5456_v48 = vor.u32 %v6640_v20, %v5455_v10  ;;  %v5507_v10 = vld [vmem:[#allocation2 + $0x60] sm:$0xf]  ;;  %v6475_v20 = vld [vmem:[#allocation2 + $0x6c] sm:$0xf0] }
 0x432   :  { %6809 = vpow2.f32 %v1398_v59  ;;  %v1640_v22 = vpack.c.bf16 %v1322_v28, %v1321_v0  ;;  %v5427_v28 = vld [vmem:[#allocation12 + $0x18] sm:$0xf] }
 0x433   :  { %v5428_v15 = vor.u32 %v6633_v46, %v5427_v28  ;;  %v8351_v28 = vld [vmem:[%s9626_s3 + $0x38] sm:$0xff]  ;;  %v8358_v46 = vld [vmem:[%s9626_s3 + $0x30] sm:$0xff] }
 0x437   :  { %v8189_v18 = vpop.eup %6807 }
 0x438   :  { %v8191_v30 = vpop.eup %6809  ;;  %v1400_v47 = vpack.c.bf16 %v8189_v18, %v8185_v23 }
 0x439   :  { %v1401_v5 = vpack.c.bf16 %v8191_v30, %v8187_v39 }
 0x43a   :  { %1570 = vmatmul.bf16.vlgmr.msrb.gmra.mxu1 %v1400_v47 }
 0x43b   :  { %1584 = vmatmul.bf16.vlgmr.msrb.gmra.mxu2 %v1401_v5  ;;  %1648 = vmatpush.bf16.msrb.mxu1 %v1639_v11  ;;  %v6639_v11 = vld [vmem:[#allocation12 + $0x21c] sm:$0xf0] }
 0x43c   :  { %1662 = vmatpush.bf16.msrb.mxu2 %v1647_v33  ;;  %v5452_v45 = vor.u32 %v6639_v11, %v5451_v34  ;;  %v8269_v34 = vor.u32 %v6475_v20, %v5507_v10  ;;  %v6471_v11 = vld [vmem:[#allocation2 + $0x4c] sm:$0xf0] }
 0x43d   :  { %v8388_v10 = vld [vmem:[%s9626_s3 + $0x10] sm:$0xff] }
 0x43e   :  { %9820 = vst [vmem:[#allocation38_spill] sm:$0xff] %v8269_v34 }
 0x43f   :  { %1649 = vmatpush.bf16.msrb.mxu1 %v1638_v37  ;;  %v6637_v37 = vld [vmem:[#allocation12 + $0x17c] sm:$0xf0] }
 0x440   :  { %1663 = vmatpush.bf16.msrb.mxu2 %v1646_v36 }
 0x443   :  { %1650 = vmatpush.bf16.msrb.mxu1 %v1637_v7  ;;  %v5439_v7 = vld [vmem:[#allocation12 + $0x108] sm:$0xf] }
 0x444   :  { %1664 = vmatpush.bf16.msrb.mxu2 %v1645_v27  ;;  %v5444_v27 = vor.u32 %v6637_v37, %v5443_v61 }
 0x447   :  { %1651 = vmatpush.bf16.msrb.mxu1 %v1636_v42  ;;  %v5440_v42 = vor.u32 %v6636_v6, %v5439_v7  ;;  %v5565_v7 = vld [vmem:[#allocation2 + $0xd8] sm:$0xf0] }
 0x448   :  { %1665 = vmatpush.bf16.msrb.mxu2 %v1644_v17  ;;  %v6508_v6 = vld [vmem:[%s9631_s8 + $0x78] sm:$0xff] }
 0x449   :  { %2287 = vmatpush.bf16.msrb.mxu0 %v6508_v6 }
 0x44a   :  { %1598 = vmatmul.bf16.vlgmr.msra.gmra.mxu1 %v1400_v47  ;;  %v5447_v47 = vld [vmem:[#allocation12 + $0x1a8] sm:$0xf] }
 0x44b   :  { %1612 = vmatmul.bf16.vlgmr.msra.gmra.mxu2 %v1401_v5  ;;  %1652 = vmatpush.bf16.msrb.mxu1 %v9804_v57  ;;  %v5448_v40 = vor.u32 %v6638_v3, %v5447_v47  ;;  %v5459_v3 = vld [vmem:[#allocation2] sm:$0xf] }
 0x44c   :  { %1666 = vmatpush.bf16.msrb.mxu2 %v1643_v44 }
 0x44f   :  { %1653 = vmatpush.bf16.msrb.mxu1 %v9805_v21 }
 0x450   :  { %1667 = vmatpush.bf16.msrb.mxu2 %v1642_v29 }
 0x453   :  { %1654 = vmatpush.bf16.msrb.mxu1 %v9812_v26  ;;  %v5571_v26 = vld [vmem:[#allocation2 + $0xe0] sm:$0xf] }
 0x454   :  { %1668 = vmatpush.bf16.msrb.mxu2 %v1641_v60 }
 0x457   :  { %1655 = vmatpush.bf16.msrb.mxu1 %v9815_v13  ;;  %v5555_v13 = vld [vmem:[#allocation2 + $0xc0] sm:$0xf] }
 0x458   :  { %1669 = vmatpush.bf16.msrb.mxu2 %v1640_v22  ;;  %v6491_v22 = vld [vmem:[#allocation2 + $0xec] sm:$0xf0] }
 0x459   :  { %v8257_v16 = vor.u32 %v6491_v22, %v5571_v26  ;;  %v6466_v22 = vld [vmem:[#allocation2 + $0x2c] sm:$0xf] }
 0x45b   :  { %1765 = vmatpush.bf16.msra.mxu1 %v5456_v48  ;;  %9816 = vst [vmem:[#allocation36_spill] sm:$0xff] %v8257_v16  ;;  %v5491_v48 = vld [vmem:[#allocation2 + $0x40] sm:$0xf] }
 0x45f   :  { %1766 = vmatpush.bf16.msra.mxu1 %v5452_v45  ;;  %v5475_v45 = vld [vmem:[#allocation2 + $0x20] sm:$0xf] }
 0x463   :  { %1767 = vmatpush.bf16.msra.mxu1 %v5448_v40 }
 0x467   :  { %1768 = vmatpush.bf16.msra.mxu1 %v5444_v27 }
 0x46b   :  { %1769 = vmatpush.bf16.msra.mxu1 %v5440_v42 }
 0x4b7   :  { %v1571_v62 = vpop.f32.mrf.mxu1 }
 0x4be   :  { %v1585_v19 = vpop.f32.mrf.mxu2 }
 0x4bf   :  { %v1586_v63 = vadd.f32 %v1585_v19, %v1571_v62  ;;  %v1573_v50 = vpop.f32.mrf.mxu1  ;;  %v6487_v62 = vld [vmem:[#allocation2 + $0xcc] sm:$0xf0] }
 0x4c0   :  { %v8260_v19 = vor.u32 %v6487_v62, %v5555_v13  ;;  %v8367_v13 = vld [vmem:[%s9626_s3 + $0x28] sm:$0xff]  ;;  %v8373_v62 = vld [vmem:[%s9626_s3 + $0x20] sm:$0xff] }
 0x4c1   :  { %v1618_v55 = vmax.f32 %v1586_v63, 1e-30  ;;  %v5539_v63 = vld [vmem:[#allocation2 + $0xa0] sm:$0xf] }
 0x4c2   :  { %9817 = vst [vmem:[#allocation40_spill] sm:$0xff] %v8260_v19 }
 0x4c3   :  { %6811 = vrcp.f32 %v1618_v55 }
 0x4c6   :  { %v1587_v8 = vpop.f32.mrf.mxu2 }
 0x4c7   :  { %v1588_v24 = vadd.f32 %v1587_v8, %v1573_v50  ;;  %v1599_v52 = vpop.f32.mrf.mxu1  ;;  %v6483_v50 = vld [vmem:[#allocation2 + $0xac] sm:$0xf0]  ;;  %v5523_v8 = vld [vmem:[#allocation2 + $0x80] sm:$0xf] }
 0x4c8   :  { %v8263_v55 = vor.u32 %v6483_v50, %v5539_v63  ;;  %v6462_v50 = vld [vmem:[#allocation2 + $0xc] sm:$0xf] }
 0x4c9   :  { %v1620_v59 = vmax.f32 %v1588_v24, 1e-30  ;;  %v6812_v9 = vpop.eup %6811  ;;  %v6479_v24 = vld [vmem:[#allocation2 + $0x8c] sm:$0xf0] }
 0x4ca   :  { %v1626_v36 = vmul.f32 %v6812_v9, %v8185_v23  ;;  %v6635_v23 = vld [vmem:[#allocation12 + $0xdc] sm:$0xf0]  ;;  %9818 = vst [vmem:[#allocation35_spill] sm:$0xff] %v8263_v55  ;;  %v6463_v9 = vld [vmem:[#allocation2 + $0xc] sm:$0xf0] }
 0x4cb   :  { %6813 = vrcp.f32 %v1620_v59  ;;  %v5436_v56 = vor.u32 %v6635_v23, %v5435_v49  ;;  %v8266_v59 = vor.u32 %v6479_v24, %v5523_v8  ;;  %v6482_v49 = vld [vmem:[#allocation2 + $0xac] sm:$0xf]  ;;  %v5549_v23 = vld [vmem:[#allocation2 + $0xb8] sm:$0xf0] }
 0x4cc   :  { %v1678_v32 = vrot.slane %v1626_v36, 7  ;;  %v5469_v8 = vld [vmem:[#allocation2 + $0x18] sm:$0xf0] }
 0x4cd   :  { %1770 = vmatpush.bf16.msra.mxu1 %v5436_v56  ;;  %9819 = vst [vmem:[#allocation42_spill] sm:$0xff] %v8266_v59  ;;  %v6507_v56 = vld [vmem:[%s9631_s8 + $0x70] sm:$0xff]  ;;  %v8382_v24 = vld [vmem:[%s9626_s3 + $0x18] sm:$0xff]  ;;  %v8391_v20 = vor.u32 %v6462_v50, %v5469_v8  ;;  %v6522_v50 = vld [vmem:[%s9631_s8 + $0xe8] sm:$0xff] }
 0x4ce   :  { %v1613_v33 = vpop.f32.mrf.mxu2  ;;  %2288 = vmatpush.bf16.msrb.mxu0 %v6507_v56  ;;  %v6521_v8 = vld [vmem:[%s9631_s8 + $0xe0] sm:$0xff] }
 0x4cf   :  { %v1614_v5 = vadd.f32 %v1613_v33, %v1599_v52  ;;  %v1601_v58 = vpop.f32.mrf.mxu1  ;;  %v8272_v52 = vor.u32 %v6471_v11, %v5491_v48  ;;  %v6467_v33 = vld [vmem:[#allocation2 + $0x2c] sm:$0xf0]  ;;  %9832 = vst [vmem:[#allocation79_spill] sm:$0xff] %v8391_v20  ;;  %v6489_v48 = vld [vmem:[#allocation2 + $0xe4] sm:$0xf] }
 0x4d0   :  { %v8275_v47 = vor.u32 %v6467_v33, %v5475_v45  ;;  %v5573_v11 = vld [vmem:[#allocation2 + $0xf0] sm:$0xf0]  ;;  %v8397_v45 = vld [vmem:[%s9626_s3 + $0x8] sm:$0xff]  ;;  %v8403_v33 = vld [vmem:[%s9626_s3] sm:$0xff] }
 0x4d1   :  { %v6814_v41 = vpop.eup %6813  ;;  %v1619_v12 = vmax.f32 %v1614_v5, 1e-30  ;;  %9821 = vst [vmem:[#allocation37_spill] sm:$0xff] %v8272_v52  ;;  %v8278_v5 = vor.u32 %v6463_v9, %v5459_v3  ;;  %v8405_v3 = vor.u32 %v6489_v48, %v5573_v11  ;;  %v6485_v9 = vld [vmem:[#allocation2 + $0xc4] sm:$0xf]  ;;  %v6520_v11 = vld [vmem:[%s9631_s8 + $0xd8] sm:$0xff] }
 0x4d2   :  { %v1628_v35 = vmul.f32 %v6814_v41, %v8189_v18  ;;  %9822 = vst [vmem:[#allocation34_spill] sm:$0xff] %v8275_v47  ;;  %v6776_v48 = vld [vmem:[#allocation13 + $0x6] ss:$0 sm:$0xff] }
 0x4d3   :  { %6815 = vrcp.f32 %v1619_v12  ;;  %9823 = vst [vmem:[#allocation33_spill] sm:$0xff] %v8278_v5 }
 0x4d4   :  { %v1630_v1 = vpack.c.bf16 %v1628_v35, %v1626_v36  ;;  %v1684_v29 = vrot.slane %v1628_v35, 6  ;;  %v6490_v36 = vld [vmem:[#allocation2 + $0xec] sm:$0xf]  ;;  %v5581_v35 = vld [vmem:[#allocation2 + $0xf8] sm:$0xf0]  ;;  %9833 = vst [vmem:[#allocation80_spill] sm:$0xff] %v8405_v3 }
 0x4d5   :  { %v8281_v27 = vor.u32 %v6490_v36, %v5581_v35  ;;  %v6481_v36 = vld [vmem:[#allocation2 + $0xa4] sm:$0xf]  ;;  %v5541_v35 = vld [vmem:[#allocation2 + $0xb0] sm:$0xf0] }
 0x4d6   :  { %v1615_v2 = vpop.f32.mrf.mxu2  ;;  %1656 = vmatmul.bf16.vlgmr.msrb.gmra.mxu1 %v1630_v1  ;;  %v1689_v43 = vsel %vm1688_vm1, %v1678_v32, %v1684_v29  ;;  %v8321_v29 = vld [vmem:[%s9626_s3 + $0x58] sm:$0xff]  ;;  %v6474_v32 = vld [vmem:[#allocation2 + $0x6c] sm:$0xf] }
 0x4d7   :  { %v1616_v14 = vadd.f32 %v1615_v2, %v1601_v58  ;;  %9824 = vst [vmem:[#allocation73_spill] sm:$0xff] %v8281_v27  ;;  %v6486_v2 = vld [vmem:[#allocation2 + $0xcc] sm:$0xf] }
 0x4d8   :  { %v8297_v42 = vor.u32 %v6486_v2, %v5565_v7  ;;  %v6473_v2 = vld [vmem:[#allocation2 + $0x64] sm:$0xf]  ;;  %v5509_v7 = vld [vmem:[#allocation2 + $0x70] sm:$0xf0] }
 0x4d9   :  { %v1621_v17 = vmax.f32 %v1616_v14, 1e-30  ;;  %v6816_v18 = vpop.eup %6815  ;;  %v8289_v14 = vld [vmem:[%s9626_s3 + $0x78] sm:$0xff]  ;;  %v8424_v6 = vor.u32 %v6473_v2, %v5509_v7  ;;  %v6518_v2 = vld [vmem:[%s9631_s8 + $0xc8] sm:$0xff]  ;;  %v6499_v7 = vld [vmem:[%s9631_s8 + $0x30] sm:$0xff] }
 0x4da   :  { %v1627_v44 = vmul.f32 %v6816_v18, %v8187_v39  ;;  %v5431_v39 = vld [vmem:[#allocation12 + $0x68] sm:$0xf]  ;;  %9825 = vst [vmem:[#allocation74_spill] sm:$0xff] %v8297_v42  ;;  %1785 = vmatpush.msra.mxu2 %v8289_v14 }
 0x4db   :  { %6817 = vrcp.f32 %v1621_v17  ;;  %v8294_v17 = vld [vmem:[%s9626_s3 + $0x70] sm:$0xff]  ;;  %v8303_v18 = vld [vmem:[%s9626_s3 + $0x68] sm:$0xff]  ;;  %9837 = vst [vmem:[#allocation84_spill] sm:$0xff] %v8424_v6 }
 0x4dc   :  { %v1679_v54 = vrot.slane %v1627_v44, 7  ;;  %1786 = vmatpush.msra.mxu2 %v8294_v17 }
 0x4de   :  { %1787 = vmatpush.msra.mxu2 %v8303_v18 }
 0x4e1   :  { %v6818_v57 = vpop.eup %6817 }
 0x4e2   :  { %v1629_v25 = vmul.f32 %v6818_v57, %v8191_v30  ;;  %v6634_v30 = vld [vmem:[#allocation12 + $0x8c] sm:$0xf0]  ;;  %v8315_v57 = vor.u32 %v6482_v49, %v5549_v23  ;;  %v6469_v49 = vld [vmem:[#allocation2 + $0x44] sm:$0xf] }
 0x4e3   :  { %v5432_v51 = vor.u32 %v6634_v30, %v5431_v39  ;;  %v6470_v39 = vld [vmem:[#allocation2 + $0x4c] sm:$0xf]  ;;  %v5501_v30 = vld [vmem:[#allocation2 + $0x58] sm:$0xf0]  ;;  %v5493_v23 = vld [vmem:[#allocation2 + $0x50] sm:$0xf0] }
 0x4e4   :  { %v1631_v21 = vpack.c.bf16 %v1629_v25, %v1627_v44  ;;  %v1685_v60 = vrot.slane %v1629_v25, 6  ;;  %v8312_v44 = vld [vmem:[%s9626_s3 + $0x60] sm:$0xff]  ;;  %9826 = vst [vmem:[#allocation75_spill] sm:$0xff] %v8315_v57  ;;  %v6478_v25 = vld [vmem:[#allocation2 + $0x8c] sm:$0xf]  ;;  %v8361_v26 = vor.u32 %v6470_v39, %v5501_v30  ;;  %v8427_v56 = vor.u32 %v6469_v49, %v5493_v23  ;;  %v6523_v39 = vld [vmem:[%s9631_s8 + $0xf0] sm:$0xff] }
 0x4e5   :  { %1771 = vmatpush.bf16.msra.mxu1 %v5432_v51  ;;  %1788 = vmatpush.msra.mxu2 %v8312_v44  ;;  %v9829_v51 = vld [vmem:[#allocation30_spill] sm:$0xff]  ;;  %v6461_v30 = vld [vmem:[#allocation2 + $0x4] sm:$0xf] }
 0x4e6   :  { %1670 = vmatmul.bf16.vlgmr.msrb.gmra.mxu2 %v1631_v21  ;;  %v1690_v38 = vsel %vm1688_vm1, %v1679_v54, %v1685_v60  ;;  %v5533_v54 = vld [vmem:[#allocation2 + $0x98] sm:$0xf0]  ;;  %v8327_v21 = vld [vmem:[%s9626_s3 + $0x50] sm:$0xff]  ;;  %9830 = vst [vmem:[#allocation30_spill] sm:$0xff] %v8361_v26 }
 0x4e7   :  { %v1693_v0 = vrot.slane %v1690_v38, 6  ;;  %v8330_v60 = vor.u32 %v6478_v25, %v5533_v54  ;;  %1789 = vmatpush.msra.mxu2 %v8321_v29  ;;  %v5517_v38 = vld [vmem:[#allocation2 + $0x78] sm:$0xf0]  ;;  %9838 = vst [vmem:[#allocation85_spill] sm:$0xff] %v8427_v56  ;;  %v6465_v54 = vld [vmem:[#allocation2 + $0x24] sm:$0xf] }
 0x4e8   :  { %v6524_v25 = vld [vmem:[%s9631_s8 + $0xf8] sm:$0xff] }
 0x4e9   :  { %v1695_v31 = vsel %vm1694_vm2, %v1689_v43, %v1693_v0  ;;  %1772 = vmatpush.bf16.msra.mxu1 %v5428_v15  ;;  %9827 = vst [vmem:[#allocation76_spill] sm:$0xff] %v8330_v60  ;;  %v8336_v0 = vld [vmem:[%s9626_s3 + $0x48] sm:$0xff]  ;;  %1790 = vmatpush.msra.mxu2 %v8327_v21  ;;  %v8342_v43 = vld [vmem:[%s9626_s3 + $0x40] sm:$0xff]  ;;  %v5485_v15 = vld [vmem:[#allocation2 + $0x38] sm:$0xf0] }
 0x4ea   :  { %1697 = vst [vmem:[%s9640_s17] sm:$0xf] %v1695_v31  ;;  %v8345_v31 = vor.u32 %v6474_v32, %v5517_v38  ;;  %v8376_v63 = vor.u32 %v6466_v22, %v5485_v15  ;;  %v5477_v32 = vld [vmem:[#allocation2 + $0x30] sm:$0xf0] }
 0x4eb   :  { %1791 = vmatpush.msra.mxu2 %v8336_v0  ;;  %v8433_v38 = vor.u32 %v6465_v54, %v5477_v32  ;;  %v5461_v22 = vld [vmem:[#allocation2 + $0x10] sm:$0xf0]  ;;  %v6498_v54 = vld [vmem:[%s9631_s8 + $0x28] sm:$0xff] }
 0x4ec   :  { %9828 = vst [vmem:[#allocation77_spill] sm:$0xff] %v8345_v31  ;;  %v8439_v15 = vor.u32 %v6461_v30, %v5461_v22  ;;  %v9842_v32 = vld [vmem:[#allocation21_spill] sm:$0xff]  ;;  %v6497_v30 = vld [vmem:[%s9631_s8 + $0x20] sm:$0xff] }
 0x4ed   :  { %2013 = vmatpush.bf16.msrb.mxu1 %v8257_v16  ;;  %1792 = vmatpush.msra.mxu2 %v8342_v43  ;;  %9831 = vst [vmem:[#allocation78_spill] sm:$0xff] %v8376_v63 }
 0x4ee   :  { %9839 = vst [vmem:[#allocation86_spill] sm:$0xff] %v8433_v38 }
 0x4ef   :  { %1793 = vmatpush.msra.mxu2 %v8351_v28  ;;  %9840 = vst [vmem:[#allocation87_spill] sm:$0xff] %v8439_v15 }
 0x4f1   :  { %2014 = vmatpush.bf16.msrb.mxu1 %v8260_v19  ;;  %1794 = vmatpush.msra.mxu2 %v8358_v46  ;;  %v6645_v19 = vld [vmem:[#allocation12 + $0x180] sm:$0xf0] }
 0x4f3   :  { %1795 = vmatpush.msra.mxu2 %v8367_v13 }
 0x4f5   :  { %2015 = vmatpush.bf16.msrb.mxu1 %v8263_v55  ;;  %1796 = vmatpush.msra.mxu2 %v8373_v62  ;;  %v5948_v55 = vld [vmem:[#allocation12 + $0x1ac] sm:$0xf] }
 0x4f7   :  { %1797 = vmatpush.msra.mxu2 %v8382_v24 }
 0x4f9   :  { %2016 = vmatpush.bf16.msrb.mxu1 %v8266_v59  ;;  %1798 = vmatpush.msra.mxu2 %v8388_v10  ;;  %v6647_v59 = vld [vmem:[#allocation12 + $0x220] sm:$0xf0] }
 0x4fb   :  { %1799 = vmatpush.msra.mxu2 %v8397_v45 }
 0x4fd   :  { %2017 = vmatpush.bf16.msrb.mxu1 %v8269_v34  ;;  %1800 = vmatpush.msra.mxu2 %v8403_v33 }
 0x4ff   :  { %2027 = vmatpush.bf16.msrb.mxu2 %v8405_v3 }
 0x501   :  { %2018 = vmatpush.bf16.msrb.mxu1 %v8272_v52 }
 0x505   :  { %2019 = vmatpush.bf16.msrb.mxu1 %v8275_v47 }
 0x509   :  { %2020 = vmatpush.bf16.msrb.mxu1 %v8278_v5 }
 0x553   :  { %v1657_v41 = vpop.f32.mrf.mxu1 }
 0x55b   :  { %v1659_v61 = vpop.f32.mrf.mxu1 }
 0x569   :  { %v1671_v40 = vpop.f32.mrf.mxu2 }
 0x56a   :  { %v1672_v12 = vadd.f32 %v1671_v40, %v1657_v41  ;;  %v5557_v41 = vld [vmem:[#allocation2 + $0xd0] sm:$0xf0] }
 0x56b   :  { %v8412_v40 = vor.u32 %v6485_v9, %v5557_v41 }
 0x56d   :  { %9834 = vst [vmem:[#allocation81_spill] sm:$0xff] %v8412_v40  ;;  %2028 = vmatpush.bf16.msrb.mxu2 %v8412_v40 }
 0x571   :  { %v1673_v37 = vpop.f32.mrf.mxu2 }
 0x572   :  { %v1674_v1 = vadd.f32 %v1673_v37, %v1659_v61  ;;  %v8415_v61 = vor.u32 %v6481_v36, %v5541_v35  ;;  %v6506_v37 = vld [vmem:[%s9631_s8 + $0x68] sm:$0xff]  ;;  %v6505_v36 = vld [vmem:[%s9631_s8 + $0x60] sm:$0xff]  ;;  %v6519_v35 = vld [vmem:[%s9631_s8 + $0xd0] sm:$0xff] }
 0x573   :  { %2289 = vmatpush.bf16.msrb.mxu0 %v6506_v37  ;;  %v6500_v37 = vld [vmem:[%s9631_s8 + $0x38] sm:$0xff] }
 0x574   :  { %v1714_v58 = vpack.c.bf16 %v1674_v1, %v1672_v12  ;;  %9835 = vst [vmem:[#allocation82_spill] sm:$0xff] %v8415_v61  ;;  %2029 = vmatpush.bf16.msrb.mxu2 %v8415_v61  ;;  %v6477_v12 = vld [vmem:[#allocation2 + $0x84] sm:$0xf]  ;;  %v5525_v1 = vld [vmem:[#allocation2 + $0x90] sm:$0xf0] }
 0x575   :  { %v6940_v61 = vld [vmem:[#allocation7 + $0xa0] sm:$0xff] }
 0x576   :  { %1773 = vmatmul.bf16.vlgmr.msra.gmra.mxu1 %v1714_v58  ;;  %v8421_v58 = vor.u32 %v6477_v12, %v5525_v1  ;;  %v9841_v12 = vld [vmem:[#allocation20_spill] sm:$0xff] }
 0x577   :  { %2055 = vmatpush.bf16.msra.mxu1 %v8281_v27  ;;  %2290 = vmatpush.bf16.msrb.mxu0 %v6505_v36  ;;  %v6494_v36 = vld [vmem:[%s9631_s8 + $0x8] sm:$0xff]  ;;  %v6551_v27 = vld [vmem:[#allocation7 + $0x30] sm:$0xff] }
 0x578   :  { %9836 = vst [vmem:[#allocation83_spill] sm:$0xff] %v8421_v58  ;;  %2030 = vmatpush.bf16.msrb.mxu2 %v8421_v58  ;;  %v6938_v58 = vld [vmem:[#allocation7 + $0xb0] sm:$0xff] }
 0x57b   :  { %2056 = vmatpush.bf16.msra.mxu1 %v8297_v42 }
 0x57c   :  { %2031 = vmatpush.bf16.msrb.mxu2 %v8424_v6 }
 0x57f   :  { %2057 = vmatpush.bf16.msra.mxu1 %v8315_v57 }
 0x580   :  { %2032 = vmatpush.bf16.msrb.mxu2 %v8427_v56 }
 0x583   :  { %2058 = vmatpush.bf16.msra.mxu1 %v8330_v60 }
 0x584   :  { %2033 = vmatpush.bf16.msrb.mxu2 %v8433_v38  ;;  %v6790_v38 = vld [vmem:[#allocation13 + $0x14] ss:$0 sm:$0xff] }
 0x586   :  { %2021 = vmatmul.bf16.vlgmr.msrb.gmra.mxu1 %v9829_v51 }
 0x587   :  { %2059 = vmatpush.bf16.msra.mxu1 %v8345_v31 }
 0x588   :  { %2034 = vmatpush.bf16.msrb.mxu2 %v8439_v15 }
 0x58b   :  { %2060 = vmatpush.bf16.msra.mxu1 %v8361_v26  ;;  %v2310_v26 = vpop.f32.mrf.mxu3 }
 0x58f   :  { %2061 = vmatpush.bf16.msra.mxu1 %v8376_v63 }
 0x593   :  { %2062 = vmatpush.bf16.msra.mxu1 %v8391_v20 }
 0x596   :  { %2063 = vmatmul.bf16.vlgmr.msra.gmra.mxu1 %v9829_v51 }
 0x597   :  { %2315 = vmatpush.bf16.msrb.mxu1 %v6524_v25  ;;  %v6517_v25 = vld [vmem:[%s9631_s8 + $0xc0] sm:$0xff] }
 0x59b   :  { %2316 = vmatpush.bf16.msrb.mxu1 %v6523_v39 }
 0x59f   :  { %2317 = vmatpush.bf16.msrb.mxu1 %v6522_v50  ;;  %v6496_v50 = vld [vmem:[%s9631_s8 + $0x18] sm:$0xff] }
 0x5a3   :  { %2318 = vmatpush.bf16.msrb.mxu1 %v6521_v8 }
 0x5a7   :  { %2319 = vmatpush.bf16.msrb.mxu1 %v6520_v11  ;;  %v6495_v11 = vld [vmem:[%s9631_s8 + $0x10] sm:$0xff] }
 0x5ab   :  { %2320 = vmatpush.bf16.msrb.mxu1 %v6519_v35 }
 0x5af   :  { %2321 = vmatpush.bf16.msrb.mxu1 %v6518_v2  ;;  %v6493_v2 = vld [vmem:[%s9631_s8] sm:$0xff] }
 0x5b3   :  { %2322 = vmatpush.bf16.msrb.mxu1 %v6517_v25 }
 0x5f3   :  { %v1774_v9 = vpop.f32.mrf.mxu1 }
 0x5f4   :  { %v1775_v41 = vadd.f32 %v6776_v48, %v1774_v9  ;;  %v6503_v9 = vld [vmem:[%s9631_s8 + $0x50] sm:$0xff] }
 0x5f6   :  { %v8461_v1 = vadd.f32 %v1775_v41, %v9841_v12 }
 0x5f8   :  { %1801 = vmatmul.f32.vlgmr.msra.gmra.mxu2 %v8461_v1  ;;  %v1783_v8 = vmul.f32 %v8461_v1, %v8461_v1 }
 0x5f9   :  { %2273 = vmatpush.bf16.msra.mxu2 %v6500_v37  ;;  %v6502_v37 = vld [vmem:[%s9631_s8 + $0x48] sm:$0xff] }
 0x5fb   :  { %v1776_v49 = vpop.f32.mrf.mxu1 }
 0x5fc   :  { %v1777_v23 = vadd.f32 %v6776_v48, %v1776_v49  ;;  %v6504_v48 = vld [vmem:[%s9631_s8 + $0x58] sm:$0xff] }
 0x5fd   :  { %2274 = vmatpush.bf16.msra.mxu2 %v6499_v7  ;;  %2291 = vmatpush.bf16.msrb.mxu0 %v6504_v48 }
 0x5fe   :  { %v8477_v39 = vadd.f32 %v1777_v23, %v9842_v32  ;;  %v9843_v23 = vld [vmem:[#allocation31_spill] sm:$0xff] }
 0x600   :  { %1804 = vmatmul.f32.gmra.mxu2 %v8477_v39  ;;  %v1784_v35 = vmul.f32 %v8477_v39, %v8477_v39 }
 0x601   :  { %2275 = vmatpush.bf16.msra.mxu2 %v6498_v54  ;;  %2292 = vmatpush.bf16.msrb.mxu0 %v6503_v9  ;;  %v9844_v54 = vld [vmem:[#allocation32_spill] sm:$0xff] }
 0x603   :  { %v2022_v22 = vpop.f32.mrf.mxu1 }
 0x604   :  { %v2069_v48 = vmul.f32 %v2022_v22, %v9843_v23 }
 0x605   :  { %2276 = vmatpush.bf16.msra.mxu2 %v6497_v30  ;;  %2293 = vmatpush.bf16.msrb.mxu0 %v6502_v37 }
 0x608   :  { %1807 = vmatmul.f32.gmra.mxu2 %v1783_v8 }
 0x609   :  { %2277 = vmatpush.bf16.msra.mxu2 %v6496_v50 }
 0x60b   :  { %v2024_v41 = vpop.f32.mrf.mxu1 }
 0x60c   :  { %v2073_v8 = vmul.f32 %v2024_v41, %v9844_v54 }
 0x60d   :  { %2278 = vmatpush.bf16.msra.mxu2 %v6495_v11 }
 0x60e   :  { %v2077_v11 = vpack.c.bf16 %v2073_v8, %v2069_v48 }
 0x610   :  { %1810 = vmatmul.f32.gmra.mxu2 %v1784_v35 }
 0x611   :  { %2279 = vmatpush.bf16.msra.mxu2 %v6494_v36 }
 0x613   :  { %v2064_v7 = vpop.f32.mrf.mxu1 }
 0x614   :  { %v2072_v25 = vmul.f32 %v2064_v7, %v9843_v23 }
 0x615   :  { %2280 = vmatpush.bf16.msra.mxu2 %v6493_v2 }
 0x618   :  { %2035 = vmatmul.bf16.vlgmr.msrb.gmra.mxu2 %v9829_v51  ;;  %v6501_v51 = vld [vmem:[%s9631_s8 + $0x40] sm:$0xff] }
 0x619   :  { %2294 = vmatpush.bf16.msrb.mxu0 %v6501_v51 }
 0x61b   :  { %v2066_v49 = vpop.f32.mrf.mxu1 }
 0x61c   :  { %v2076_v30 = vmul.f32 %v2066_v49, %v9844_v54 }
 0x61e   :  { %v2080_v50 = vpack.c.bf16 %v2076_v30, %v2072_v25 }
 0x620   :  { %2323 = vmatmul.bf16.vlgmr.msrb.gmra.mxu1 %v2080_v50 }
 0x628   :  { %2281 = vmatmul.bf16.vlgmr.msra.gmra.mxu2 %v2077_v11 }
 0x67b   :  { %v1802_v9 = vpop.f32.mrf.mxu2 }
 0x67c   :  { %v1814_v35 = vmul.f32 %v1802_v9, %v1802_v9  ;;  %v1820_v20 = vsub.f32 %v8461_v1, %v1802_v9 }
 0x683   :  { %v8513_v36 = vpop.f32.mrf.mxu2 }
 0x68b   :  { %v1808_v37 = vpop.f32.mrf.mxu2 }
 0x68c   :  { %v1816_v2 = vsub.f32 %v1808_v37, %v1814_v35 }
 0x68e   :  { %v1818_v7 = vmax.f32 %v1816_v2, 0.0 }
 0x690   :  { %v1822_v49 = vadd.f32 1e-05, %v1818_v7 }
 0x692   :  { %6819 = vrsqrt.f32 %v1822_v49  ;;  %vm1830_vm4 = vweird.f32 %v1822_v49 }
 0x693   :  { %v8518_v25 = vpop.f32.mrf.mxu2 }
 0x698   :  { %v6820_v41 = vpop.eup %6819 }
 0x699   :  { %v1825_v22 = vmul.f32 %v6820_v41, %v1822_v49  ;;  %vm1831_vm3 = vweird.f32 %v6820_v41 }
 0x69a   :  { %vm1832_vm5 = vmor %vm1830_vm4, %vm1831_vm3 }
 0x69b   :  { %v1826_v30 = vmul.f32 %v6820_v41, %v1825_v22  ;;  %v2036_v50 = vpop.f32.mrf.mxu2 }
 0x69c   :  { %v2070_v37 = vmul.f32 %v2036_v50, %v9843_v23 }
 0x69d   :  { %v1827_v8 = vmul.f32 0.5, %v1826_v30  ;;  %v2324_v31 = vpop.f32.mrf.mxu1 }
 0x69f   :  { %v1828_v48 = vsub.f32 1.5, %v1827_v8 }
 0x6a1   :  { %v1829_v11 = vmul.f32 %v6820_v41, %v1828_v48 }
 0x6a3   :  { %v1833_v51 = vsel %vm1832_vm5, %v6820_v41, %v1829_v11  ;;  %v2038_v63 = vpop.f32.mrf.mxu2  ;;  %v2312_v11 = vpop.f32.mrf.mxu3 }
 0x6a4   :  { %v8521_v35 = vmul.f32 %v1833_v51, %v1820_v20  ;;  %v2074_v2 = vmul.f32 %v2038_v63, %v9844_v54  ;;  %v6528_v51 = vld [vmem:[#allocation4 + $0x18] sm:$0xff] }
 0x6a5   :  { %v2326_v50 = vpop.f32.mrf.mxu1  ;;  %2374 = vmatpush.bf16.msra.mxu0 %v6528_v51 }
 0x6a6   :  { %v2078_v7 = vpack.c.bf16 %v2074_v2, %v2070_v37  ;;  %v6527_v37 = vld [vmem:[#allocation4 + $0x10] sm:$0xff] }
 0x6a8   :  { %2295 = vmatmul.bf16.vlgmr.msrb.gmra.mxu0 %v2078_v7 }
 0x6a9   :  { %2375 = vmatpush.bf16.msra.mxu0 %v6527_v37 }
 0x6ab   :  { %v2282_v22 = vpop.f32.mrf.mxu2 }
 0x6b3   :  { %v2284_v9 = vpop.f32.mrf.mxu2 }
 0x725   :  { %v2296_v30 = vpop.f32.mrf.mxu0 }
 0x726   :  { %v2297_v8 = vadd.f32 %v2296_v30, %v2282_v22 }
 0x728   :  { %v2311_v48 = vadd.f32 %v2310_v26, %v2297_v8  ;;  %v6526_v26 = vld [vmem:[#allocation4 + $0x8] sm:$0xff] }
 0x729   :  { %2376 = vmatpush.bf16.msra.mxu0 %v6526_v26  ;;  %v5764_v26 = vld [vmem:[#allocation6 + $0x40] sm:$0xf] }
 0x72a   :  { %v2325_v49 = vadd.f32 %v2324_v31, %v2311_v48  ;;  %v6525_v31 = vld [vmem:[#allocation4] sm:$0xff] }
 0x72c   :  { %v2330_v1 = vsel %vm2329_vm6, %v2325_v49, -inf }
 0x72d   :  { %v2298_v41 = vpop.f32.mrf.mxu0  ;;  %2331 = vmax.xlane.f32.xlu1 %v2330_v1  ;;  %2377 = vmatpush.bf16.msra.mxu0 %v6525_v31  ;;  %v6539_v31 = vld [vmem:[#allocation6 + $0x4c] sm:$0xf0] }
 0x72e   :  { %v2299_v20 = vadd.f32 %v2298_v41, %v2284_v9 }
 0x730   :  { %v2313_v23 = vadd.f32 %v2312_v11, %v2299_v20  ;;  %v5780_v20 = vld [vmem:[#allocation6 + $0x60] sm:$0xf]  ;;  %v6543_v11 = vld [vmem:[#allocation6 + $0x6c] sm:$0xf0] }
 0x732   :  { %v2327_v63 = vadd.f32 %v2326_v50, %v2313_v23  ;;  %v6541_v23 = vld [vmem:[#allocation6 + $0x64] sm:$0xf]  ;;  %v8534_v50 = vor.u32 %v6543_v11, %v5780_v20  ;;  %v5748_v20 = vld [vmem:[#allocation6 + $0x20] sm:$0xf]  ;;  %v6535_v11 = vld [vmem:[#allocation6 + $0x2c] sm:$0xf0] }
 0x734   :  { %v2333_v54 = vsel %vm2329_vm6, %v2327_v63, -inf  ;;  %2484 = vmatpush.bf16.msrb.mxu0 %v8534_v50 }
 0x735   :  { %2334 = vmax.xlane.f32.xlu1 %v2333_v54  ;;  %v5788_v54 = vld [vmem:[#allocation6 + $0x68] sm:$0xf] }
 0x7a0   :  { %v2332_v2 = vpop.xlane.xlu1 %2331 }
 0x7a1   :  { %v2336_v7 = vsub.f32 %v2325_v49, %v2332_v2  ;;  %v5782_v49 = vld [vmem:[#allocation6 + $0x70] sm:$0xf0]  ;;  %v6537_v2 = vld [vmem:[#allocation6 + $0x44] sm:$0xf] }
 0x7a2   :  { %v8536_v51 = vor.u32 %v6541_v23, %v5782_v49  ;;  %v6533_v23 = vld [vmem:[#allocation6 + $0x24] sm:$0xf]  ;;  %v8552_v49 = vor.u32 %v6535_v11, %v5748_v20  ;;  %v5734_v20 = vld [vmem:[#allocation6 + $0x10] sm:$0xf0]  ;;  %v5740_v11 = vld [vmem:[#allocation6 + $0x8] sm:$0xf] }
 0x7a3   :  { %v2338_v22 = vmul.f32 1.442695, %v2336_v7  ;;  %v8543_v7 = vor.u32 %v6539_v31, %v5764_v26  ;;  %v6536_v26 = vld [vmem:[#allocation6 + $0x34] sm:$0xf0] }
 0x7a4   :  { %9845 = vst [vmem:[#allocation20_spill] sm:$0xff] %v8536_v51  ;;  %2498 = vmatpush.bf16.msrb.mxu2 %v8536_v51  ;;  %v6532_v51 = vld [vmem:[#allocation6 + $0x14] sm:$0xf0] }
 0x7a5   :  { %6821 = vpow2.f32 %v2338_v22  ;;  %v5766_v22 = vld [vmem:[#allocation6 + $0x50] sm:$0xf0]  ;;  %2485 = vmatpush.bf16.msrb.mxu0 %v8543_v7 }
 0x7a8   :  { %v2335_v30 = vpop.xlane.xlu1 %2334 }
 0x7a9   :  { %v2337_v8 = vsub.f32 %v2327_v63, %v2335_v30  ;;  %v6544_v63 = vld [vmem:[#allocation6 + $0x74] sm:$0xf0]  ;;  %v5772_v30 = vld [vmem:[#allocation6 + $0x48] sm:$0xf]  ;;  %2486 = vmatpush.bf16.msrb.mxu0 %v8552_v49 }
 0x7aa   :  { %v8538_v37 = vor.u32 %v6544_v63, %v5788_v54  ;;  %v5750_v54 = vld [vmem:[#allocation6 + $0x30] sm:$0xf0]  ;;  %v5756_v63 = vld [vmem:[#allocation6 + $0x28] sm:$0xf] }
 0x7ab   :  { %v2340_v48 = vmul.f32 1.442695, %v2337_v8  ;;  %v8527_v1 = vpop.eup %6821  ;;  %v6540_v8 = vld [vmem:[#allocation6 + $0x54] sm:$0xf0]  ;;  %v8554_v31 = vor.u32 %v6533_v23, %v5750_v54  ;;  %v8565_v23 = vor.u32 %v6532_v51, %v5740_v11  ;;  %v6542_v54 = vld [vmem:[#allocation6 + $0x6c] sm:$0xf] }
 0x7ac   :  { %2512 = vmatpush.bf16.msra.mxu3 %v8538_v37  ;;  %v6530_v11 = vld [vmem:[#allocation6 + $0xc] sm:$0xf] }
 0x7ad   :  { %6823 = vpow2.f32 %v2340_v48  ;;  %v8545_v48 = vor.u32 %v6537_v2, %v5766_v22  ;;  %9847 = vst [vmem:[#allocation31_spill] sm:$0xff] %v8554_v31  ;;  %v8556_v2 = vor.u32 %v6536_v26, %v5756_v63  ;;  %v5732_v22 = vld [vmem:[#allocation6] sm:$0xf]  ;;  %v5790_v63 = vld [vmem:[#allocation6 + $0x78] sm:$0xf0] }
 0x7ae   :  { %v8570_v26 = vor.u32 %v6542_v54, %v5790_v63  ;;  %v6552_v63 = vld [vmem:[#allocation7 + $0x38] sm:$0xff] }
 0x7af   :  { %9846 = vst [vmem:[#allocation21_spill] sm:$0xff] %v8545_v48  ;;  %2499 = vmatpush.bf16.msrb.mxu2 %v8545_v48  ;;  %2740 = vmatpush.bf16.msra.mxu1 %v6552_v63  ;;  %v6576_v63 = vld [vmem:[#allocation7 + $0xf8] sm:$0xff] }
 0x7b0   :  { %9849 = vst [vmem:[#allocation88_spill] sm:$0xff] %v8570_v26 }
 0x7b3   :  { %v8529_v9 = vpop.eup %6823  ;;  %2500 = vmatpush.bf16.msrb.mxu2 %v8554_v31  ;;  %v6538_v31 = vld [vmem:[#allocation6 + $0x4c] sm:$0xf]  ;;  %2741 = vmatpush.bf16.msra.mxu1 %v6551_v27 }
 0x7b4   :  { %v2342_v41 = vpack.c.bf16 %v8529_v9, %v8527_v1 }
 0x7b6   :  { %5729 = vmatmul.msk.bf16.vlgmr.msra.gmra.mxu0 %vm2329_vm6, %v2342_v41  ;;  %v8547_v41 = vor.u32 %v6540_v8, %v5772_v30  ;;  %v6531_v30 = vld [vmem:[#allocation6 + $0xc] sm:$0xf0]  ;;  %v6529_v8 = vld [vmem:[#allocation6 + $0x4] sm:$0xf] }
 0x7b7   :  { %v8561_v48 = vor.u32 %v6531_v30, %v5732_v22  ;;  %v8563_v60 = vor.u32 %v6529_v8, %v5734_v20  ;;  %v5774_v22 = vld [vmem:[#allocation6 + $0x58] sm:$0xf0]  ;;  %v6534_v8 = vld [vmem:[#allocation6 + $0x2c] sm:$0xf] }
 0x7b8   :  { %2513 = vmatpush.bf16.msra.mxu3 %v8547_v41  ;;  %v8573_v30 = vor.u32 %v6538_v31, %v5774_v22  ;;  %v5758_v20 = vld [vmem:[#allocation6 + $0x38] sm:$0xf0] }
 0x7b9   :  { %9848 = vst [vmem:[#allocation32_spill] sm:$0xff] %v8563_v60  ;;  %2487 = vmatpush.bf16.msrb.mxu0 %v8561_v48  ;;  %2501 = vmatpush.bf16.msrb.mxu2 %v8563_v60  ;;  %v8576_v51 = vor.u32 %v6534_v8, %v5758_v20  ;;  %v5742_v60 = vld [vmem:[#allocation6 + $0x18] sm:$0xf0]  ;;  %v6567_v20 = vld [vmem:[#allocation7 + $0xb0] sm:$0xff] }
 0x7ba   :  { %9850 = vst [vmem:[#allocation89_spill] sm:$0xff] %v8573_v30  ;;  %v8579_v42 = vor.u32 %v6530_v11, %v5742_v60  ;;  %v6568_v31 = vld [vmem:[#allocation7 + $0xb8] sm:$0xff]  ;;  %v6558_v60 = vld [vmem:[#allocation7 + $0x68] sm:$0xff] }
 0x7bb   :  { %9851 = vst [vmem:[#allocation90_spill] sm:$0xff] %v8576_v51  ;;  %v6566_v11 = vld [vmem:[#allocation7 + $0xa8] sm:$0xff] }
 0x7bc   :  { %2514 = vmatpush.bf16.msra.mxu3 %v8556_v2  ;;  %9852 = vst [vmem:[#allocation91_spill] sm:$0xff] %v8579_v42 }
 0x7bd   :  { %2526 = vmatpush.bf16.msra.mxu0 %v8570_v26  ;;  %v6560_v26 = vld [vmem:[#allocation7 + $0x78] sm:$0xff] }
 0x7be   :  { %2754 = vmatpush.bf16.msra.mxu2 %v6560_v26 }
 0x7c0   :  { %2515 = vmatpush.bf16.msra.mxu3 %v8565_v23 }
 0x7c1   :  { %2527 = vmatpush.bf16.msra.mxu0 %v8573_v30  ;;  %v6559_v30 = vld [vmem:[#allocation7 + $0x70] sm:$0xff] }
 0x7c2   :  { %2755 = vmatpush.bf16.msra.mxu2 %v6559_v30  ;;  %v6548_v30 = vld [vmem:[#allocation7 + $0x18] sm:$0xff] }
 0x7c4   :  { %2768 = vmatpush.bf16.msrb.mxu3 %v6568_v31  ;;  %v6556_v31 = vld [vmem:[#allocation7 + $0x58] sm:$0xff] }
 0x7c5   :  { %2528 = vmatpush.bf16.msra.mxu0 %v8576_v51  ;;  %v6550_v51 = vld [vmem:[#allocation7 + $0x28] sm:$0xff] }
 0x7c6   :  { %2742 = vmatpush.bf16.msra.mxu1 %v6550_v51  ;;  %2756 = vmatpush.bf16.msra.mxu2 %v6558_v60  ;;  %v6565_v51 = vld [vmem:[#allocation7 + $0xa0] sm:$0xff]  ;;  %v6563_v60 = vld [vmem:[#allocation7 + $0x90] sm:$0xff] }
 0x7c8   :  { %2769 = vmatpush.bf16.msrb.mxu3 %v6567_v20  ;;  %v6555_v20 = vld [vmem:[#allocation7 + $0x50] sm:$0xff] }
 0x7c9   :  { %2529 = vmatpush.bf16.msra.mxu0 %v8579_v42  ;;  %v6549_v42 = vld [vmem:[#allocation7 + $0x20] sm:$0xff] }
 0x7ca   :  { %2743 = vmatpush.bf16.msra.mxu1 %v6549_v42  ;;  %v6546_v42 = vld [vmem:[#allocation7 + $0x8] sm:$0xff] }
 0x7cc   :  { %2770 = vmatpush.bf16.msrb.mxu3 %v6566_v11  ;;  %v6545_v11 = vld [vmem:[#allocation7] sm:$0xff] }
 0x7ce   :  { %2744 = vmatpush.bf16.msra.mxu1 %v6548_v30  ;;  %v6572_v30 = vld [vmem:[#allocation7 + $0xd8] sm:$0xff] }
 0x7d0   :  { %2771 = vmatpush.bf16.msrb.mxu3 %v6565_v51  ;;  %v6561_v51 = vld [vmem:[#allocation7 + $0x80] sm:$0xff] }
 0x833   :  { %v2379_v57 = vpop.f32.mrf.mxu0 }
 0x834   :  { %v2384_v54 = vmax.f32 %v2379_v57, 1e-30 }
 0x836   :  { %6825 = vrcp.f32 %v2384_v54 }
 0x83b   :  { %v2381_v22 = vpop.f32.mrf.mxu0 }
 0x83c   :  { %v2385_v8 = vmax.f32 %v2381_v22, 1e-30  ;;  %v6826_v57 = vpop.eup %6825  ;;  %v6564_v22 = vld [vmem:[#allocation7 + $0x98] sm:$0xff] }
 0x83d   :  { %v8583_v26 = vmul.f32 %v6826_v57, %v8527_v1  ;;  %v6557_v1 = vld [vmem:[#allocation7 + $0x60] sm:$0xff]  ;;  %2772 = vmatpush.bf16.msrb.mxu3 %v6564_v22  ;;  %v5956_v22 = vld [vmem:[#allocation12 + $0x24c] sm:$0xf] }
 0x83e   :  { %6827 = vrcp.f32 %v2385_v8  ;;  %2757 = vmatpush.bf16.msra.mxu2 %v6557_v1  ;;  %v6574_v8 = vld [vmem:[#allocation7 + $0xe8] sm:$0xff]  ;;  %v6573_v57 = vld [vmem:[#allocation7 + $0xe0] sm:$0xff] }
 0x83f   :  { %v6553_v1 = vld [vmem:[#allocation7 + $0x40] sm:$0xff] }
 0x841   :  { %2773 = vmatpush.bf16.msrb.mxu3 %v6563_v60  ;;  %v6775_v60 = vld [vmem:[#allocation13 + $0x5] ss:$0 sm:$0xff] }
 0x842   :  { %2758 = vmatpush.bf16.msra.mxu2 %v6556_v31  ;;  %v6569_v31 = vld [vmem:[#allocation7 + $0xc0] sm:$0xff] }
 0x844   :  { %v6828_v5 = vpop.eup %6827 }
 0x845   :  { %v8586_v54 = vmul.f32 %v6828_v5, %v8529_v9  ;;  %v6547_v5 = vld [vmem:[#allocation7 + $0x10] sm:$0xff] }
 0x846   :  { %v6575_v9 = vld [vmem:[#allocation7 + $0xf0] sm:$0xff]  ;;  %2745 = vmatpush.bf16.msra.mxu1 %v6547_v5  ;;  %2759 = vmatpush.bf16.msra.mxu2 %v6555_v20 }
 0x847   :  { %v2396_v27 = vpack.c.bf16 %v8586_v54, %v8583_v26  ;;  %v6571_v5 = vld [vmem:[#allocation7 + $0xd0] sm:$0xff] }
 0x849   :  { %5794 = vmatmul.msk.bf16.vlgmr.msrb.gmra.mxu0 %vm2329_vm6, %v2396_v27  ;;  %5795 = vmatmul.msk.bf16.vlgmr.msrb.gmra.mxu2 %vm2329_vm6, %v2396_v27 }
 0x84a   :  { %5796 = vmatmul.msk.bf16.vlgmr.msra.gmra.mxu3 %vm2329_vm6, %v2396_v27  ;;  %2782 = vmatpush.bf16.msrb.mxu0 %v6576_v63  ;;  %v6554_v63 = vld [vmem:[#allocation7 + $0x48] sm:$0xff] }
 0x84b   :  { %2746 = vmatpush.bf16.msra.mxu1 %v6546_v42  ;;  %2760 = vmatpush.bf16.msra.mxu2 %v6554_v63  ;;  %v6648_v42 = vld [vmem:[#allocation12 + $0x270] sm:$0xf0] }
 0x84e   :  { %2783 = vmatpush.bf16.msrb.mxu0 %v6575_v9  ;;  %v6570_v9 = vld [vmem:[#allocation7 + $0xc8] sm:$0xff] }
 0x84f   :  { %2747 = vmatpush.bf16.msra.mxu1 %v6545_v11  ;;  %2761 = vmatpush.bf16.msra.mxu2 %v6553_v1 }
 0x852   :  { %2784 = vmatpush.bf16.msrb.mxu0 %v6574_v8  ;;  %v5957_v8 = vor.u32 %v6648_v42, %v5956_v22 }
 0x853   :  { %2883 = vmatpush.msrb.mxu2 %v8289_v14 }
 0x854   :  { %2863 = vmatpush.bf16.msrb.mxu1 %v5957_v8 }
 0x855   :  { %2884 = vmatpush.msrb.mxu2 %v8294_v17 }
 0x856   :  { %2785 = vmatpush.bf16.msrb.mxu0 %v6573_v57  ;;  %v9853_v57 = vld [vmem:[#allocation39_spill] sm:$0xff] }
 0x857   :  { %2885 = vmatpush.msrb.mxu2 %v8303_v18  ;;  %v962_v63 = vadd.f32 %v6775_v60, %v9853_v57 }
 0x859   :  { %5797 = vmatmul.msk.bf16.vlgmr.msra.gmra.mxu0 %vm2329_vm6, %v2396_v27  ;;  %v6562_v27 = vld [vmem:[#allocation7 + $0x88] sm:$0xff]  ;;  %2886 = vmatpush.msrb.mxu2 %v8312_v44 }
 0x85a   :  { %2774 = vmatpush.bf16.msrb.mxu3 %v6562_v27  ;;  %2786 = vmatpush.bf16.msrb.mxu0 %v6572_v30  ;;  %v9854_v27 = vld [vmem:[#allocation41_spill] sm:$0xff] }
 0x85b   :  { %2887 = vmatpush.msrb.mxu2 %v8321_v29  ;;  %v963_v30 = vadd.f32 %v6775_v60, %v9854_v27 }
 0x85d   :  { %2888 = vmatpush.msrb.mxu2 %v8327_v21 }
 0x85e   :  { %2775 = vmatpush.bf16.msrb.mxu3 %v6561_v51  ;;  %2787 = vmatpush.bf16.msrb.mxu0 %v6571_v5 }
 0x85f   :  { %2889 = vmatpush.msrb.mxu2 %v8336_v0 }
 0x861   :  { %2890 = vmatpush.msrb.mxu2 %v8342_v43 }
 0x862   :  { %2788 = vmatpush.bf16.msrb.mxu0 %v6570_v9 }
 0x863   :  { %2891 = vmatpush.msrb.mxu2 %v8351_v28 }
 0x865   :  { %2892 = vmatpush.msrb.mxu2 %v8358_v46 }
 0x866   :  { %2789 = vmatpush.bf16.msrb.mxu0 %v6569_v31 }
 0x867   :  { %2893 = vmatpush.msrb.mxu2 %v8367_v13 }
 0x869   :  { %2894 = vmatpush.msrb.mxu2 %v8373_v62 }
 0x86b   :  { %2895 = vmatpush.msrb.mxu2 %v8382_v24 }
 0x86d   :  { %2896 = vmatpush.msrb.mxu2 %v8388_v10 }
 0x86f   :  { %2897 = vmatpush.msrb.mxu2 %v8397_v45 }
 0x871   :  { %2898 = vmatpush.msrb.mxu2 %v8403_v33 }
 0x8c6   :  { %v2489_v20 = vpop.f32.mrf.mxu0 }
 0x8c7   :  { %v2536_v5 = vmul.f32 %v2489_v20, %v962_v63 }
 0x8cc   :  { %v2503_v11 = vpop.f32.mrf.mxu2 }
 0x8cd   :  { %v2517_v1 = vpop.f32.mrf.mxu3  ;;  %v2537_v42 = vmul.f32 %v2503_v11, %v962_v63 }
 0x8ce   :  { %v2491_v51 = vpop.f32.mrf.mxu0  ;;  %v2538_v47 = vmul.f32 %v2517_v1, %v962_v63 }
 0x8cf   :  { %v2540_v9 = vmul.f32 %v2491_v51, %v963_v30 }
 0x8d1   :  { %v2544_v31 = vpack.c.bf16 %v2540_v9, %v2536_v5 }
 0x8d3   :  { %2748 = vmatmul.bf16.vlgmr.msra.gmra.mxu1 %v2544_v31  ;;  %v5952_v31 = vld [vmem:[#allocation12 + $0x1fc] sm:$0xf] }
 0x8d4   :  { %v2505_v22 = vpop.f32.mrf.mxu2  ;;  %v5953_v11 = vor.u32 %v6647_v59, %v5952_v31  ;;  %v5928_v59 = vld [vmem:[#allocation12 + $0x1c] sm:$0xf] }
 0x8d5   :  { %v2541_v8 = vmul.f32 %v2505_v22, %v963_v30  ;;  %v2519_v57 = vpop.f32.mrf.mxu3  ;;  %v6646_v22 = vld [vmem:[#allocation12 + $0x1d0] sm:$0xf0] }
 0x8d6   :  { %v2542_v60 = vmul.f32 %v2519_v57, %v963_v30  ;;  %v2531_v27 = vpop.f32.mrf.mxu0  ;;  %2864 = vmatpush.bf16.msrb.mxu1 %v5953_v11  ;;  %v5949_v1 = vor.u32 %v6646_v22, %v5948_v55  ;;  %v5944_v57 = vld [vmem:[#allocation12 + $0x15c] sm:$0xf] }
 0x8d7   :  { %v2545_v52 = vpack.c.bf16 %v2541_v8, %v2537_v42  ;;  %v2539_v5 = vmul.f32 %v2531_v27, %v962_v63  ;;  %v5945_v16 = vor.u32 %v6645_v19, %v5944_v57  ;;  %v5936_v63 = vld [vmem:[#allocation12 + $0xbc] sm:$0xf] }
 0x8d8   :  { %v2546_v20 = vpack.c.bf16 %v2542_v60, %v2538_v47  ;;  %v5940_v47 = vld [vmem:[#allocation12 + $0x10c] sm:$0xf]  ;;  %v6642_v60 = vld [vmem:[#allocation12 + $0x90] sm:$0xf0] }
 0x8d9   :  { %2762 = vmatmul.bf16.vlgmr.msra.gmra.mxu2 %v2545_v52  ;;  %v6644_v52 = vld [vmem:[#allocation12 + $0x130] sm:$0xf0] }
 0x8da   :  { %2776 = vmatmul.bf16.vlgmr.msrb.gmra.mxu3 %v2546_v20  ;;  %2865 = vmatpush.bf16.msrb.mxu1 %v5949_v1  ;;  %v5941_v42 = vor.u32 %v6644_v52, %v5940_v47  ;;  %v6641_v20 = vld [vmem:[#allocation12 + $0x40] sm:$0xf0]  ;;  %v5988_v1 = vld [vmem:[#allocation12 + $0x250] sm:$0xf]  ;;  %v1815_v47 = vmul.f32 %v8513_v36, %v8513_v36  ;;  %v5984_v52 = vld [vmem:[#allocation12 + $0x200] sm:$0xf] }
 0x8db   :  { %v5929_v55 = vor.u32 %v6641_v20, %v5928_v59  ;;  %v5976_v59 = vld [vmem:[#allocation12 + $0x160] sm:$0xf]  ;;  %v6653_v20 = vld [vmem:[#allocation12 + $0x184] sm:$0xf0] }
 0x8de   :  { %v2533_v51 = vpop.f32.mrf.mxu0  ;;  %2866 = vmatpush.bf16.msrb.mxu1 %v5945_v16 }
 0x8df   :  { %v2543_v9 = vmul.f32 %v2533_v51, %v963_v30  ;;  %v6643_v30 = vld [vmem:[#allocation12 + $0xe0] sm:$0xf0] }
 0x8e0   :  { %v5937_v8 = vor.u32 %v6643_v30, %v5936_v63  ;;  %v1817_v63 = vsub.f32 %v8518_v25, %v1815_v47  ;;  %v5968_v25 = vld [vmem:[#allocation12 + $0xc0] sm:$0xf]  ;;  %v6020_v47 = vld [vmem:[#allocation12 + $0x254] sm:$0xf] }
 0x8e1   :  { %v2547_v34 = vpack.c.bf16 %v2543_v9, %v2539_v5 }
 0x8e2   :  { %2867 = vmatpush.bf16.msrb.mxu1 %v5941_v42 }
 0x8e3   :  { %2790 = vmatmul.bf16.vlgmr.msrb.gmra.mxu0 %v2547_v34  ;;  %v5932_v34 = vld [vmem:[#allocation12 + $0x6c] sm:$0xf] }
 0x8e4   :  { %v5933_v27 = vor.u32 %v6642_v60, %v5932_v34  ;;  %v6654_v34 = vld [vmem:[#allocation12 + $0x1d4] sm:$0xf0] }
 0x8e6   :  { %2868 = vmatpush.bf16.msrb.mxu1 %v5937_v8  ;;  %v5980_v8 = vld [vmem:[#allocation12 + $0x1b0] sm:$0xf] }
 0x8e7   :  { %v5981_v60 = vor.u32 %v6654_v34, %v5980_v8 }
 0x8ea   :  { %2869 = vmatpush.bf16.msrb.mxu1 %v5933_v27  ;;  %v1819_v27 = vmax.f32 %v1817_v63, 0.0  ;;  %v6663_v63 = vld [vmem:[#allocation12 + $0x228] sm:$0xf0] }
 0x8ee   :  { %2870 = vmatpush.bf16.msrb.mxu1 %v5929_v55  ;;  %v5977_v55 = vor.u32 %v6653_v20, %v5976_v59  ;;  %v6012_v20 = vld [vmem:[#allocation12 + $0x1b4] sm:$0xf] }
 0x8f2   :  { %3122 = vmatpush.msra.mxu1 %v8289_v14 }
 0x8f4   :  { %3123 = vmatpush.msra.mxu1 %v8294_v17 }
 0x8f6   :  { %3124 = vmatpush.msra.mxu1 %v8303_v18 }
 0x8f8   :  { %3125 = vmatpush.msra.mxu1 %v8312_v44 }
 0x8fa   :  { %3126 = vmatpush.msra.mxu1 %v8321_v29 }
 0x8fc   :  { %3127 = vmatpush.msra.mxu1 %v8327_v21 }
 0x8fe   :  { %3128 = vmatpush.msra.mxu1 %v8336_v0 }
 0x900   :  { %3129 = vmatpush.msra.mxu1 %v8342_v43 }
 0x902   :  { %3130 = vmatpush.msra.mxu1 %v8351_v28 }
 0x904   :  { %3131 = vmatpush.msra.mxu1 %v8358_v46 }
 0x906   :  { %3132 = vmatpush.msra.mxu1 %v8367_v13 }
 0x908   :  { %3133 = vmatpush.msra.mxu1 %v8373_v62  ;;  %v6779_v62 = vld [vmem:[#allocation13 + $0x7] ss:$0 sm:$0xff] }
 0x90a   :  { %3134 = vmatpush.msra.mxu1 %v8382_v24 }
 0x90c   :  { %3135 = vmatpush.msra.mxu1 %v8388_v10 }
 0x90e   :  { %3136 = vmatpush.msra.mxu1 %v8397_v45 }
 0x910   :  { %3137 = vmatpush.msra.mxu1 %v8403_v33 }
 0x950   :  { %v2749_v16 = vpop.f32.mrf.mxu1 }
 0x958   :  { %v2751_v18 = vpop.f32.mrf.mxu1 }
 0x95c   :  { %v2763_v19 = vpop.f32.mrf.mxu2 }
 0x95d   :  { %v2777_v51 = vpop.f32.mrf.mxu3  ;;  %v2764_v17 = vadd.f32 %v2763_v19, %v2749_v16  ;;  %v8645_v16 = vadd.f32 1e-05, %v1819_v27 }
 0x95f   :  { %v2778_v29 = vadd.f32 %v2777_v51, %v2764_v17  ;;  %v5972_v51 = vld [vmem:[#allocation12 + $0x110] sm:$0xf]  ;;  %6829 = vrsqrt.f32 %v8645_v16  ;;  %vm1840_vm11 = vweird.f32 %v8645_v16 }
 0x960   :  { %v2791_v14 = vpop.f32.mrf.mxu0 }
 0x961   :  { %v2792_v46 = vadd.f32 %v2791_v14, %v2778_v29  ;;  %v6652_v14 = vld [vmem:[#allocation12 + $0x134] sm:$0xf0] }
 0x962   :  { %v5973_v17 = vor.u32 %v6652_v14, %v5972_v51 }
 0x964   :  { %v2765_v44 = vpop.f32.mrf.mxu2 }
 0x965   :  { %v2766_v21 = vadd.f32 %v2765_v44, %v2751_v18  ;;  %v2779_v0 = vpop.f32.mrf.mxu3  ;;  %v6651_v18 = vld [vmem:[#allocation12 + $0xe4] sm:$0xf0] }
 0x966   :  { %v5969_v29 = vor.u32 %v6651_v18, %v5968_v25  ;;  %v6008_v18 = vld [vmem:[#allocation12 + $0x164] sm:$0xf] }
 0x967   :  { %v2780_v43 = vadd.f32 %v2779_v0, %v2766_v21 }
 0x968   :  { %v2793_v28 = vpop.f32.mrf.mxu0 }
 0x969   :  { %v2794_v5 = vadd.f32 %v2793_v28, %v2780_v43  ;;  %v8652_v43 = vpop.eup %6829  ;;  %v5964_v28 = vld [vmem:[#allocation12 + $0x70] sm:$0xf] }
 0x96a   :  { %vm1841_vm8 = vweird.f32 %v8652_v43 }
 0x96b   :  { %v2812_v13 = vpack.c.bf16 %v2794_v5, %v2792_v46  ;;  %v6650_v46 = vld [vmem:[#allocation12 + $0x94] sm:$0xf0]  ;;  %vm1842_vm12 = vmor %vm1840_vm11, %vm1841_vm8 }
 0x96d   :  { %2871 = vmatmul.bf16.vlgmr.msrb.gmra.mxu1 %v2812_v13  ;;  %v5965_v13 = vor.u32 %v6650_v46, %v5964_v28 }
 0x9ea   :  { %v2872_v9 = vpop.f32.mrf.mxu1 }
 0x9eb   :  { %v2873_v31 = vadd.f32 %v6779_v62, %v2872_v9 }
 0x9ed   :  { %v8629_v24 = vadd.f32 %v2873_v31, %v9841_v12  ;;  %v6656_v12 = vld [vmem:[#allocation12 + $0x274] sm:$0xf0]  ;;  %v5960_v31 = vld [vmem:[#allocation12 + $0x20] sm:$0xf] }
 0x9ee   :  { %v5989_v57 = vor.u32 %v6656_v12, %v5988_v1 }
 0x9ef   :  { %2899 = vmatmul.f32.vlgmr.msrb.gmra.mxu2 %v8629_v24  ;;  %v2881_v45 = vmul.f32 %v8629_v24, %v8629_v24 }
 0x9f0   :  { %3019 = vmatpush.bf16.msra.mxu3 %v5989_v57 }
 0x9f2   :  { %v2874_v11 = vpop.f32.mrf.mxu1 }
 0x9f3   :  { %v2875_v10 = vadd.f32 %v6779_v62, %v2874_v11  ;;  %v1835_v62 = vmul.f32 %v8652_v43, %v8645_v16  ;;  %v6649_v11 = vld [vmem:[#allocation12 + $0x44] sm:$0xf0] }
 0x9f5   :  { %v8633_v22 = vadd.f32 %v2875_v10, %v9842_v32  ;;  %v6655_v32 = vld [vmem:[#allocation12 + $0x224] sm:$0xf0]  ;;  %v5961_v10 = vor.u32 %v6649_v11, %v5960_v31  ;;  %v1836_v1 = vmul.f32 %v8652_v43, %v1835_v62 }
 0x9f6   :  { %v5985_v42 = vor.u32 %v6655_v32, %v5984_v52  ;;  %v6664_v52 = vld [vmem:[#allocation12 + $0x278] sm:$0xf0] }
 0x9f7   :  { %2902 = vmatmul.f32.gmra.mxu2 %v8633_v22  ;;  %v2882_v33 = vmul.f32 %v8633_v22, %v8633_v22  ;;  %v6021_v32 = vor.u32 %v6664_v52, %v6020_v47  ;;  %v1837_v34 = vmul.f32 0.5, %v1836_v1 }
 0x9f8   :  { %3020 = vmatpush.bf16.msra.mxu3 %v5985_v42  ;;  %v6016_v42 = vld [vmem:[#allocation12 + $0x204] sm:$0xf] }
 0x9f9   :  { %3102 = vmatpush.bf16.msra.mxu0 %v6021_v32  ;;  %v6017_v59 = vor.u32 %v6663_v63, %v6016_v42  ;;  %v1838_v14 = vsub.f32 1.5, %v1837_v34  ;;  %v6778_v32 = vld [vmem:[#allocation13 + $0xd] ss:$0 sm:$0xff] }
 0x9fc   :  { %3021 = vmatpush.bf16.msra.mxu3 %v5981_v60 }
 0x9fd   :  { %3103 = vmatpush.bf16.msra.mxu0 %v6017_v59 }
 0x9ff   :  { %2905 = vmatmul.f32.gmra.mxu2 %v2881_v45 }
 0xa00   :  { %3022 = vmatpush.bf16.msra.mxu3 %v5977_v55  ;;  %v6662_v55 = vld [vmem:[#allocation12 + $0x1d8] sm:$0xf0] }
 0xa01   :  { %v6013_v25 = vor.u32 %v6662_v55, %v6012_v20  ;;  %v6004_v55 = vld [vmem:[#allocation12 + $0x114] sm:$0xf] }
 0xa03   :  { %3104 = vmatpush.bf16.msra.mxu0 %v6013_v25  ;;  %v6658_v25 = vld [vmem:[#allocation12 + $0x98] sm:$0xf0] }
 0xa04   :  { %3023 = vmatpush.bf16.msra.mxu3 %v5973_v17 }
 0xa07   :  { %2908 = vmatmul.f32.gmra.mxu2 %v2882_v33 }
 0xa08   :  { %3024 = vmatpush.bf16.msra.mxu3 %v5969_v29 }
 0xa0c   :  { %3025 = vmatpush.bf16.msra.mxu3 %v5965_v13 }
 0xa10   :  { %3026 = vmatpush.bf16.msra.mxu3 %v5961_v10 }
 0xa72   :  { %v8643_v30 = vpop.f32.mrf.mxu2 }
 0xa73   :  { %v2912_v44 = vmul.f32 %v8643_v30, %v8643_v30  ;;  %v2918_v31 = vsub.f32 %v8629_v24, %v8643_v30  ;;  %v6781_v24 = vld [vmem:[#allocation13 + $0xe] ss:$0 sm:$0xff] }
 0xa7a   :  { %v8647_v19 = vpop.f32.mrf.mxu2 }
 0xa7b   :  { %v2913_v45 = vmul.f32 %v8647_v19, %v8647_v19  ;;  %v2919_v47 = vsub.f32 %v8633_v22, %v8647_v19  ;;  %v6660_v22 = vld [vmem:[#allocation12 + $0x138] sm:$0xf0] }
 0xa7c   :  { %v6005_v19 = vor.u32 %v6660_v22, %v6004_v55  ;;  %v6146_v22 = vld [vmem:[#allocation12 + $0x438] sm:$0xf0] }
 0xa82   :  { %v2906_v21 = vpop.f32.mrf.mxu2 }
 0xa83   :  { %v2914_v0 = vsub.f32 %v2906_v21, %v2912_v44  ;;  %v6661_v44 = vld [vmem:[#allocation12 + $0x188] sm:$0xf0] }
 0xa85   :  { %v2916_v5 = vmax.f32 %v2914_v0, 0.0  ;;  %v1839_v0 = vmul.f32 %v8652_v43, %v1838_v14  ;;  %v6659_v14 = vld [vmem:[#allocation12 + $0xe8] sm:$0xf0] }
 0xa87   :  { %v2920_v9 = vadd.f32 1e-05, %v2916_v5  ;;  %v6009_v5 = vor.u32 %v6661_v44, %v6008_v18  ;;  %v1843_v11 = vsel %vm1842_vm12, %v8652_v43, %v1839_v0  ;;  %v5992_v44 = vld [vmem:[#allocation12 + $0x24] sm:$0xf] }
 0xa89   :  { %6831 = vrsqrt.f32 %v2920_v9  ;;  %vm2928_vm9 = vweird.f32 %v2920_v9  ;;  %3105 = vmatpush.bf16.msra.mxu0 %v6009_v5 }
 0xa8a   :  { %v2909_v33 = vpop.f32.mrf.mxu2 }
 0xa8b   :  { %v2915_v12 = vsub.f32 %v2909_v33, %v2913_v45  ;;  %v1821_v45 = vsub.f32 %v8477_v39, %v8513_v36  ;;  %v6780_v33 = vld [vmem:[#allocation13 + $0xb] ss:$0 sm:$0xff] }
 0xa8d   :  { %v2917_v57 = vmax.f32 %v2915_v12, 0.0  ;;  %v6777_v12 = vld [vmem:[#allocation13 + $0xa] ss:$0 sm:$0xff]  ;;  %3106 = vmatpush.bf16.msra.mxu0 %v6005_v19 }
 0xa8e   :  { %v1847_v43 = vmul.f32 %v6777_v12, %v8521_v35  ;;  %v5996_v35 = vld [vmem:[#allocation12 + $0x74] sm:$0xf] }
 0xa8f   :  { %v6832_v8 = vpop.eup %6831  ;;  %v2921_v60 = vadd.f32 1e-05, %v2917_v57  ;;  %v1845_v57 = vmul.f32 %v1843_v11, %v1821_v45  ;;  %v5997_v18 = vor.u32 %v6658_v25, %v5996_v35  ;;  %v6122_v25 = vld [vmem:[#allocation12 + $0x3e8] sm:$0xf0] }
 0xa90   :  { %v2923_v27 = vmul.f32 %v6832_v8, %v2920_v9  ;;  %vm2929_vm7 = vweird.f32 %v6832_v8 }
 0xa91   :  { %6833 = vrsqrt.f32 %v2921_v60  ;;  %vm2930_vm10 = vmor %vm2928_vm9, %vm2929_vm7  ;;  %vm2938_vm14 = vweird.f32 %v2921_v60  ;;  %v1848_v42 = vmul.f32 %v6777_v12, %v1845_v57 }
 0xa92   :  { %v2924_v51 = vmul.f32 %v6832_v8, %v2923_v27 }
 0xa93   :  { %v1851_v34 = vadd.f32 %v6778_v32, %v1848_v42 }
 0xa94   :  { %v2925_v17 = vmul.f32 0.5, %v2924_v51  ;;  %v6000_v51 = vld [vmem:[#allocation12 + $0xc4] sm:$0xf] }
 0xa96   :  { %v2926_v29 = vsub.f32 1.5, %v2925_v17  ;;  %v6001_v17 = vor.u32 %v6659_v14, %v6000_v51  ;;  %v6120_v51 = vld [vmem:[#allocation12 + $0x3c0] sm:$0xf]  ;;  %v6692_v14 = vld [vmem:[#allocation12 + $0x3e4] sm:$0xf0] }
 0xa97   :  { %v6834_v21 = vpop.eup %6833  ;;  %v6121_v35 = vor.u32 %v6692_v14, %v6120_v51  ;;  %v6128_v51 = vld [vmem:[#allocation12 + $0x3c8] sm:$0xf]  ;;  %v6693_v14 = vld [vmem:[#allocation12 + $0x3ec] sm:$0xf0] }
 0xa98   :  { %v2927_v28 = vmul.f32 %v6832_v8, %v2926_v29  ;;  %v2933_v46 = vmul.f32 %v6834_v21, %v2921_v60  ;;  %vm2939_vm13 = vweird.f32 %v6834_v21  ;;  %3107 = vmatpush.bf16.msra.mxu0 %v6001_v17  ;;  %v6657_v29 = vld [vmem:[#allocation12 + $0x48] sm:$0xf0]  ;;  %v6689_v17 = vld [vmem:[#allocation12 + $0x3c4] sm:$0xf] }
 0xa99   :  { %vm2940_vm15 = vmor %vm2938_vm14, %vm2939_vm13 }
 0xa9a   :  { %v2931_v13 = vsel %vm2930_vm10, %v6832_v8, %v2927_v28  ;;  %v2934_v62 = vmul.f32 %v6834_v21, %v2933_v46  ;;  %v1850_v8 = vadd.f32 %v6778_v32, %v1847_v43  ;;  %v6782_v28 = vld [vmem:[#allocation13 + $0x8] ss:$0 sm:$0xff]  ;;  %v6194_v32 = vld [vmem:[#allocation12 + $0x4d8] sm:$0xf0] }
 0xa9b   :  { %v2942_v9 = vmul.f32 %v2931_v13, %v2918_v31 }
 0xa9c   :  { %v2935_v10 = vmul.f32 0.5, %v2934_v62  ;;  %3108 = vmatpush.bf16.msra.mxu0 %v5997_v18  ;;  %v6200_v18 = vld [vmem:[#allocation12 + $0x4b8] sm:$0xf] }
 0xa9d   :  { %v2945_v52 = vmul.f32 %v6780_v33, %v2942_v9 }
 0xa9e   :  { %v2936_v1 = vsub.f32 1.5, %v2935_v10  ;;  %v6783_v10 = vld [vmem:[#allocation13 + $0x9] ss:$0 sm:$0xff] }
 0xa9f   :  { %v2948_v36 = vadd.f32 %v6781_v24, %v2945_v52  ;;  %v6192_v52 = vld [vmem:[#allocation12 + $0x4b0] sm:$0xf] }
 0xaa0   :  { %v2937_v16 = vmul.f32 %v6834_v21, %v2936_v1 }
 0xaa1   :  { %v2950_v59 = vadd.f32 %v2948_v36, %v1850_v8  ;;  %v6704_v36 = vld [vmem:[#allocation12 + $0x484] sm:$0xf0] }
 0xaa2   :  { %v2941_v30 = vsel %vm2940_vm15, %v6834_v21, %v2937_v16  ;;  %v5993_v21 = vor.u32 %v6657_v29, %v5992_v44  ;;  %v6711_v44 = vld [vmem:[#allocation12 + $0x4dc] sm:$0xf0]  ;;  %v6125_v29 = vor.u32 %v6689_v17, %v6122_v25  ;;  %v6690_v25 = vld [vmem:[#allocation12 + $0x3cc] sm:$0xf] }
 0xaa3   :  { %v2943_v39 = vmul.f32 %v2941_v30, %v2919_v47  ;;  %v6707_v30 = vld [vmem:[#allocation12 + $0x4b4] sm:$0xf] }
 0xaa4   :  { %3109 = vmatpush.bf16.msra.mxu0 %v5993_v21  ;;  %v6197_v42 = vor.u32 %v6707_v30, %v6194_v32  ;;  %v6201_v21 = vor.u32 %v6711_v44, %v6200_v18  ;;  %v6677_v30 = vld [vmem:[#allocation12 + $0x324] sm:$0xf]  ;;  %v6130_v18 = vld [vmem:[#allocation12 + $0x3f0] sm:$0xf0] }
 0xaa5   :  { %v2946_v63 = vmul.f32 %v6780_v33, %v2943_v39  ;;  %v6168_v39 = vld [vmem:[#allocation12 + $0x460] sm:$0xf]  ;;  %v6133_v44 = vor.u32 %v6690_v25, %v6130_v18  ;;  %v6058_v25 = vld [vmem:[#allocation12 + $0x300] sm:$0xf0] }
 0xaa6   :  { %3493 = vmatpush.bf16.msrb.mxu3 %v6197_v42  ;;  %v6169_v8 = vor.u32 %v6704_v36, %v6168_v39  ;;  %v6074_v42 = vld [vmem:[#allocation12 + $0x348] sm:$0xf0]  ;;  %v6152_v39 = vld [vmem:[#allocation12 + $0x418] sm:$0xf]  ;;  %v6699_v36 = vld [vmem:[#allocation12 + $0x43c] sm:$0xf0] }
 0xaa7   :  { %v2949_v27 = vadd.f32 %v6781_v24, %v2946_v63  ;;  %v6710_v24 = vld [vmem:[#allocation12 + $0x4d4] sm:$0xf0]  ;;  %v6701_v63 = vld [vmem:[#allocation12 + $0x464] sm:$0xf]  ;;  %v6160_v18 = vld [vmem:[#allocation12 + $0x420] sm:$0xf] }
 0xaa8   :  { %v6193_v43 = vor.u32 %v6710_v24, %v6192_v52  ;;  %3507 = vmatpush.bf16.msrb.mxu0 %v6201_v21  ;;  %v6072_v52 = vld [vmem:[#allocation12 + $0x320] sm:$0xf]  ;;  %v6680_v24 = vld [vmem:[#allocation12 + $0x344] sm:$0xf0] }
 0xaa9   :  { %v2951_v20 = vadd.f32 %v2949_v27, %v1851_v34  ;;  %v6170_v34 = vld [vmem:[#allocation12 + $0x488] sm:$0xf0]  ;;  %v6073_v32 = vor.u32 %v6680_v24, %v6072_v52  ;;  %v6668_v21 = vld [vmem:[#allocation12 + $0x2a4] sm:$0xf0] }
 0xaaa   :  { %3479 = vmatpush.bf16.msra.mxu2 %v6193_v43  ;;  %v6173_v27 = vor.u32 %v6701_v63, %v6170_v34  ;;  %v6077_v63 = vor.u32 %v6677_v30, %v6074_v42  ;;  %v6696_v34 = vld [vmem:[#allocation12 + $0x41c] sm:$0xf]  ;;  %v6210_v52 = vld [vmem:[#allocation12 + $0x4e8] sm:$0xf0]  ;;  %v6080_v30 = vld [vmem:[#allocation12 + $0x328] sm:$0xf] }
 0xaab   :  { %v2968_v60 = vpack.c.bf16 %v2951_v20, %v2950_v59  ;;  %v6678_v42 = vld [vmem:[#allocation12 + $0x32c] sm:$0xf] }
 0xaac   :  { %3494 = vmatpush.bf16.msrb.mxu3 %v6173_v27  ;;  %v6154_v27 = vld [vmem:[#allocation12 + $0x440] sm:$0xf0] }
 0xaad   :  { %3027 = vmatmul.bf16.vlgmr.msra.gmra.mxu3 %v2968_v60  ;;  %v6695_v60 = vld [vmem:[#allocation12 + $0x414] sm:$0xf] }
 0xaae   :  { %3480 = vmatpush.bf16.msra.mxu2 %v6169_v8  ;;  %v6149_v19 = vor.u32 %v6695_v60, %v6146_v22  ;;  %v6153_v8 = vor.u32 %v6699_v36, %v6152_v39  ;;  %v6674_v60 = vld [vmem:[#allocation12 + $0x2f4] sm:$0xf0]  ;;  %v6082_v36 = vld [vmem:[#allocation12 + $0x350] sm:$0xf0] }
 0xab0   :  { %3495 = vmatpush.bf16.msrb.mxu3 %v6149_v19  ;;  %v6050_v19 = vld [vmem:[#allocation12 + $0x2f8] sm:$0xf0] }
 0xab4   :  { %3496 = vmatpush.bf16.msrb.mxu3 %v6125_v29  ;;  %v6024_v29 = vld [vmem:[#allocation12 + $0x280] sm:$0xf] }
 0xb30   :  { %v3028_v0 = vpop.f32.mrf.mxu3 }
 0xb31   :  { %v3029_v46 = vadd.f32 %v6782_v28, %v3028_v0  ;;  %v6708_v0 = vld [vmem:[#allocation12 + $0x4bc] sm:$0xf] }
 0xb33   :  { %v3033_v62 = vmax.f32 %v3029_v46, 0.0 }
 0xb38   :  { %v3030_v5 = vpop.f32.mrf.mxu3 }
 0xb39   :  { %v3031_v13 = vadd.f32 %v6782_v28, %v3030_v5  ;;  %v6202_v28 = vld [vmem:[#allocation12 + $0x4e0] sm:$0xf0]  ;;  %v6096_v5 = vld [vmem:[#allocation12 + $0x370] sm:$0xf] }
 0xb3a   :  { %v6205_v46 = vor.u32 %v6708_v0, %v6202_v28  ;;  %v6665_v0 = vld [vmem:[#allocation12 + $0x284] sm:$0xf] }
 0xb3b   :  { %v3034_v31 = vmax.f32 %v3031_v13, 0.0  ;;  %v6686_v13 = vld [vmem:[#allocation12 + $0x394] sm:$0xf0] }
 0xb3c   :  { %3521 = vmatpush.bf16.msrb.mxu1 %v6205_v46  ;;  %v6025_v46 = vor.u32 %v6668_v21, %v6024_v29 }
 0xb3d   :  { %v3051_v11 = vpack.c.bf16 %v3034_v31, %v3033_v62  ;;  %v6683_v62 = vld [vmem:[#allocation12 + $0x374] sm:$0xf]  ;;  %v6097_v31 = vor.u32 %v6686_v13, %v6096_v5  ;;  %v6026_v5 = vld [vmem:[#allocation12 + $0x2a8] sm:$0xf0]  ;;  %v6104_v13 = vld [vmem:[#allocation12 + $0x378] sm:$0xf] }
 0xb3f   :  { %3110 = vmatmul.bf16.vlgmr.msra.gmra.mxu0 %v3051_v11  ;;  %v6098_v11 = vld [vmem:[#allocation12 + $0x398] sm:$0xf0] }
 0xbbc   :  { %v3111_v45 = vpop.f32.mrf.mxu0 }
 0xbbd   :  { %v3112_v9 = vadd.f32 %v6783_v10, %v3111_v45  ;;  %v6705_v45 = vld [vmem:[#allocation12 + $0x48c] sm:$0xf0] }
 0xbbf   :  { %v8670_v33 = vadd.f32 %v3112_v9, %v2950_v59  ;;  %v6144_v59 = vld [vmem:[#allocation12 + $0x410] sm:$0xf]  ;;  %v6101_v9 = vor.u32 %v6683_v62, %v6098_v11  ;;  %v6687_v62 = vld [vmem:[#allocation12 + $0x39c] sm:$0xf0] }
 0xbc0   :  { %v6105_v11 = vor.u32 %v6687_v62, %v6104_v13  ;;  %v6032_v62 = vld [vmem:[#allocation12 + $0x288] sm:$0xf] }
 0xbc1   :  { %3138 = vmatmul.f32.vlgmr.msra.gmra.mxu1 %v8670_v33  ;;  %v3120_v16 = vmul.f32 %v8670_v33, %v8670_v33  ;;  %3497 = vmatpush.bf16.msrb.mxu3 %v6101_v9 }
 0xbc4   :  { %v3113_v1 = vpop.f32.mrf.mxu0 }
 0xbc5   :  { %v3114_v12 = vadd.f32 %v6783_v10, %v3113_v1  ;;  %v6176_v10 = vld [vmem:[#allocation12 + $0x468] sm:$0xf]  ;;  %3498 = vmatpush.bf16.msrb.mxu3 %v6077_v63  ;;  %v6184_v63 = vld [vmem:[#allocation12 + $0x470] sm:$0xf] }
 0xbc6   :  { %v6177_v1 = vor.u32 %v6705_v45, %v6176_v10  ;;  %v6684_v10 = vld [vmem:[#allocation12 + $0x37c] sm:$0xf]  ;;  %v6106_v45 = vld [vmem:[#allocation12 + $0x3a0] sm:$0xf0] }
 0xbc7   :  { %v8673_v57 = vadd.f32 %v3114_v12, %v2951_v20  ;;  %v6698_v20 = vld [vmem:[#allocation12 + $0x434] sm:$0xf0]  ;;  %v6702_v12 = vld [vmem:[#allocation12 + $0x46c] sm:$0xf]  ;;  %v6109_v9 = vor.u32 %v6684_v10, %v6106_v45 }
 0xbc8   :  { %v6145_v55 = vor.u32 %v6698_v20, %v6144_v59  ;;  %3508 = vmatpush.bf16.msrb.mxu0 %v6177_v1  ;;  %v6157_v59 = vor.u32 %v6696_v34, %v6154_v27  ;;  %v6048_v20 = vld [vmem:[#allocation12 + $0x2d0] sm:$0xf]  ;;  %v6208_v1 = vld [vmem:[#allocation12 + $0x4c0] sm:$0xf]  ;;  %v6085_v34 = vor.u32 %v6678_v42, %v6082_v36  ;;  %v6688_v36 = vld [vmem:[#allocation12 + $0x3a4] sm:$0xf0] }
 0xbc9   :  { %3141 = vmatmul.f32.gmra.mxu1 %v8673_v57  ;;  %v3121_v47 = vmul.f32 %v8673_v57, %v8673_v57  ;;  %v6049_v22 = vor.u32 %v6674_v60, %v6048_v20  ;;  %v6186_v20 = vld [vmem:[#allocation12 + $0x498] sm:$0xf0] }
 0xbca   :  { %3481 = vmatpush.bf16.msra.mxu2 %v6145_v55  ;;  %v6671_v55 = vld [vmem:[#allocation12 + $0x2d4] sm:$0xf] }
 0xbcb   :  { %v6053_v17 = vor.u32 %v6671_v55, %v6050_v19  ;;  %v6056_v19 = vld [vmem:[#allocation12 + $0x2d8] sm:$0xf] }
 0xbcc   :  { %3509 = vmatpush.bf16.msrb.mxu0 %v6153_v8  ;;  %v6706_v8 = vld [vmem:[#allocation12 + $0x494] sm:$0xf0] }
 0xbcd   :  { %3499 = vmatpush.bf16.msrb.mxu3 %v6053_v17  ;;  %v6185_v27 = vor.u32 %v6706_v8, %v6184_v63  ;;  %v6685_v63 = vld [vmem:[#allocation12 + $0x384] sm:$0xf] }
 0xbce   :  { %3482 = vmatpush.bf16.msra.mxu2 %v6121_v35  ;;  %v6129_v35 = vor.u32 %v6693_v14, %v6128_v51  ;;  %v6675_v51 = vld [vmem:[#allocation12 + $0x2fc] sm:$0xf0]  ;;  %v6672_v14 = vld [vmem:[#allocation12 + $0x2dc] sm:$0xf] }
 0xbcf   :  { %v6061_v29 = vor.u32 %v6672_v14, %v6058_v25 }
 0xbd0   :  { %3510 = vmatpush.bf16.msrb.mxu0 %v6129_v35  ;;  %v6057_v35 = vor.u32 %v6675_v51, %v6056_v19  ;;  %v6090_v19 = vld [vmem:[#allocation12 + $0x358] sm:$0xf0] }
 0xbd1   :  { %3144 = vmatmul.f32.gmra.mxu1 %v3120_v16  ;;  %v6178_v16 = vld [vmem:[#allocation12 + $0x490] sm:$0xf0] }
 0xbd2   :  { %3483 = vmatpush.bf16.msra.mxu2 %v6097_v31  ;;  %v6029_v31 = vor.u32 %v6665_v0, %v6026_v5  ;;  %v6697_v0 = vld [vmem:[#allocation12 + $0x424] sm:$0xf] }
 0xbd4   :  { %3500 = vmatpush.bf16.msrb.mxu3 %v6029_v31  ;;  %3511 = vmatpush.bf16.msrb.mxu0 %v6105_v11  ;;  %v6669_v31 = vld [vmem:[#allocation12 + $0x2ac] sm:$0xf0]  ;;  %v6666_v11 = vld [vmem:[#allocation12 + $0x28c] sm:$0xf] }
 0xbd5   :  { %v6033_v45 = vor.u32 %v6669_v31, %v6032_v62  ;;  %v6040_v62 = vld [vmem:[#allocation12 + $0x290] sm:$0xf]  ;;  %v6670_v31 = vld [vmem:[#allocation12 + $0x2b4] sm:$0xf0] }
 0xbd6   :  { %3484 = vmatpush.bf16.msra.mxu2 %v6073_v32  ;;  %v6681_v32 = vld [vmem:[#allocation12 + $0x34c] sm:$0xf0] }
 0xbd7   :  { %v6081_v39 = vor.u32 %v6681_v32, %v6080_v30 }
 0xbd9   :  { %3147 = vmatmul.f32.gmra.mxu1 %v3121_v47  ;;  %v6181_v47 = vor.u32 %v6702_v12, %v6178_v16  ;;  %v6712_v12 = vld [vmem:[#allocation12 + $0x4e4] sm:$0xf0]  ;;  %v6709_v16 = vld [vmem:[#allocation12 + $0x4c4] sm:$0xf]  ;;  %3512 = vmatpush.bf16.msrb.mxu0 %v6081_v39  ;;  %v6112_v39 = vld [vmem:[#allocation12 + $0x380] sm:$0xf] }
 0xbda   :  { %3485 = vmatpush.bf16.msra.mxu2 %v6049_v22  ;;  %v6213_v24 = vor.u32 %v6709_v16, %v6210_v52  ;;  %v6694_v16 = vld [vmem:[#allocation12 + $0x3f4] sm:$0xf0]  ;;  %v6138_v52 = vld [vmem:[#allocation12 + $0x3f8] sm:$0xf0] }
 0xbdb   :  { %3522 = vmatpush.bf16.msrb.mxu1 %v6181_v47  ;;  %v6209_v47 = vor.u32 %v6712_v12, %v6208_v1  ;;  %v6136_v1 = vld [vmem:[#allocation12 + $0x3d0] sm:$0xf] }
 0xbdc   :  { %3549 = vmatpush.bf16.msra.mxu3 %v6213_v24  ;;  %v6137_v30 = vor.u32 %v6694_v16, %v6136_v1 }
 0xbdd   :  { %3513 = vmatpush.bf16.msrb.mxu0 %v6057_v35 }
 0xbde   :  { %3486 = vmatpush.bf16.msra.mxu2 %v6025_v46  ;;  %v6162_v46 = vld [vmem:[#allocation12 + $0x448] sm:$0xf0] }
 0xbdf   :  { %3523 = vmatpush.bf16.msrb.mxu1 %v6157_v59  ;;  %v6703_v59 = vld [vmem:[#allocation12 + $0x474] sm:$0xf]  ;;  %v6165_v13 = vor.u32 %v6697_v0, %v6162_v46 }
 0xbe0   :  { %v6189_v55 = vor.u32 %v6703_v59, %v6186_v20  ;;  %v6088_v20 = vld [vmem:[#allocation12 + $0x330] sm:$0xf] }
 0xbe1   :  { %3514 = vmatpush.bf16.msrb.mxu0 %v6033_v45  ;;  %v6042_v45 = vld [vmem:[#allocation12 + $0x2b8] sm:$0xf0] }
 0xbe2   :  { %3535 = vmatpush.bf16.msrb.mxu2 %v6209_v47  ;;  %3550 = vmatpush.bf16.msra.mxu3 %v6189_v55  ;;  %v6691_v47 = vld [vmem:[#allocation12 + $0x3d4] sm:$0xf] }
 0xbe3   :  { %3524 = vmatpush.bf16.msrb.mxu1 %v6133_v44  ;;  %v6700_v44 = vld [vmem:[#allocation12 + $0x444] sm:$0xf0]  ;;  %v6141_v32 = vor.u32 %v6691_v47, %v6138_v52 }
 0xbe4   :  { %v6161_v21 = vor.u32 %v6700_v44, %v6160_v18  ;;  %v6064_v18 = vld [vmem:[#allocation12 + $0x2e0] sm:$0xf]  ;;  %v6676_v44 = vld [vmem:[#allocation12 + $0x304] sm:$0xf0] }
 0xbe5   :  { %v6065_v46 = vor.u32 %v6676_v44, %v6064_v18 }
 0xbe6   :  { %3536 = vmatpush.bf16.msrb.mxu2 %v6185_v27  ;;  %3551 = vmatpush.bf16.msra.mxu3 %v6165_v13  ;;  %v6114_v27 = vld [vmem:[#allocation12 + $0x3a8] sm:$0xf0] }
 0xbe7   :  { %3525 = vmatpush.bf16.msrb.mxu1 %v6109_v9  ;;  %v6034_v9 = vld [vmem:[#allocation12 + $0x2b0] sm:$0xf0]  ;;  %v6117_v59 = vor.u32 %v6685_v63, %v6114_v27  ;;  %v6784_v63 = vld [vmem:[#allocation13 + $0xc] ss:$0 sm:$0xff] }
 0xbe8   :  { %v6037_v12 = vor.u32 %v6666_v11, %v6034_v9  ;;  %v6667_v11 = vld [vmem:[#allocation12 + $0x294] sm:$0xf] }
 0xbe9   :  { %v6045_v52 = vor.u32 %v6667_v11, %v6042_v45  ;;  %v9859_v11 = vld [vmem:[#allocation24_spill] sm:$0xff]  ;;  %v6880_v45 = vld [vmem:[%s9631_s8 + $0x58] sm:$0xff] }
 0xbea   :  { %3537 = vmatpush.bf16.msrb.mxu2 %v6161_v21  ;;  %3552 = vmatpush.bf16.msra.mxu3 %v6141_v32  ;;  %v6066_v21 = vld [vmem:[#allocation12 + $0x308] sm:$0xf0] }
 0xbeb   :  { %3526 = vmatpush.bf16.msrb.mxu1 %v6085_v34  ;;  %v6113_v34 = vor.u32 %v6688_v36, %v6112_v39 }
 0xbee   :  { %3538 = vmatpush.bf16.msrb.mxu2 %v6137_v30  ;;  %3553 = vmatpush.bf16.msra.mxu3 %v6117_v59  ;;  %v6785_v59 = vld [vmem:[#allocation13 + $0xf] ss:$0 sm:$0xff] }
 0xbef   :  { %3527 = vmatpush.bf16.msrb.mxu1 %v6061_v29  ;;  %v6673_v29 = vld [vmem:[#allocation12 + $0x2e4] sm:$0xf] }
 0xbf0   :  { %v6069_v13 = vor.u32 %v6673_v29, %v6066_v21  ;;  %v6875_v29 = vld [vmem:[%s9631_s8 + $0x78] sm:$0xff] }
 0xbf2   :  { %3539 = vmatpush.bf16.msrb.mxu2 %v6113_v34 }
 0xbf3   :  { %3528 = vmatpush.bf16.msrb.mxu1 %v6037_v12  ;;  %v6041_v12 = vor.u32 %v6670_v31, %v6040_v62  ;;  %v9858_v62 = vld [vmem:[#allocation23_spill] sm:$0xff] }
 0xbf4   :  { %v6879_v31 = vld [vmem:[%s9631_s8 + $0x60] sm:$0xff] }
 0xc3e   :  { %v8680_v43 = vpop.f32.mrf.mxu1 }
 0xc3f   :  { %v3151_v60 = vmul.f32 %v8680_v43, %v8680_v43 }
 0xc46   :  { %v8682_v28 = vpop.f32.mrf.mxu1 }
 0xc47   :  { %v3152_v24 = vmul.f32 %v8682_v28, %v8682_v28  ;;  %v3158_v34 = vsub.f32 %v8673_v57, %v8682_v28 }
 0xc4e   :  { %v3145_v22 = vpop.f32.mrf.mxu1 }
 0xc4f   :  { %v3153_v17 = vsub.f32 %v3145_v22, %v3151_v60  ;;  %v6682_v60 = vld [vmem:[#allocation12 + $0x354] sm:$0xf0]  ;;  %v6679_v22 = vld [vmem:[#allocation12 + $0x334] sm:$0xf] }
 0xc50   :  { %v6093_v25 = vor.u32 %v6679_v22, %v6090_v19 }
 0xc51   :  { %v3155_v5 = vmax.f32 %v3153_v17, 0.0  ;;  %v6089_v17 = vor.u32 %v6682_v60, %v6088_v20 }
 0xc52   :  { %3554 = vmatpush.bf16.msra.mxu3 %v6093_v25 }
 0xc53   :  { %v8686_v10 = vadd.f32 1e-05, %v3155_v5  ;;  %3540 = vmatpush.bf16.msrb.mxu2 %v6089_v17  ;;  %v6789_v17 = vld [vmem:[#allocation13 + $0x11] ss:$0 sm:$0xff] }
 0xc55   :  { %6835 = vrsqrt.f32 %v8686_v10  ;;  %vm3167_vm4 = vweird.f32 %v8686_v10 }
 0xc56   :  { %v3148_v42 = vpop.f32.mrf.mxu1  ;;  %3555 = vmatpush.bf16.msra.mxu3 %v6069_v13  ;;  %v6878_v13 = vld [vmem:[%s9631_s8 + $0x68] sm:$0xff] }
 0xc57   :  { %v3154_v8 = vsub.f32 %v3148_v42, %v3152_v24  ;;  %3541 = vmatpush.bf16.msrb.mxu2 %v6065_v46  ;;  %v3157_v42 = vsub.f32 %v8670_v33, %v8680_v43  ;;  %v6786_v43 = vld [vmem:[#allocation13 + $0x12] ss:$0 sm:$0xff] }
 0xc58   :  { %v6877_v46 = vld [vmem:[%s9631_s8 + $0x70] sm:$0xff] }
 0xc59   :  { %v3156_v55 = vmax.f32 %v3154_v8, 0.0 }
 0xc5a   :  { %3556 = vmatpush.bf16.msra.mxu3 %v6045_v52  ;;  %v9862_v52 = vld [vmem:[#allocation27_spill] sm:$0xff] }
 0xc5b   :  { %v6836_v51 = vpop.eup %6835  ;;  %v3160_v14 = vadd.f32 1e-05, %v3156_v55  ;;  %3542 = vmatpush.bf16.msrb.mxu2 %v6041_v12  ;;  %v6882_v12 = vld [vmem:[%s9631_s8 + $0x50] sm:$0xff] }
 0xc5c   :  { %v3162_v35 = vmul.f32 %v6836_v51, %v8686_v10  ;;  %vm3168_vm3 = vweird.f32 %v6836_v51 }
 0xc5d   :  { %6837 = vrsqrt.f32 %v3160_v14  ;;  %vm3169_vm5 = vmor %vm3167_vm4, %vm3168_vm3  ;;  %vm3177_vm8 = vweird.f32 %v3160_v14 }
 0xc5e   :  { %v3163_v0 = vmul.f32 %v6836_v51, %v3162_v35 }
 0xc60   :  { %v3164_v5 = vmul.f32 0.5, %v3163_v0  ;;  %v6876_v0 = vld [vmem:[%s9627_s4] sm:$0xff] }
 0xc62   :  { %v3165_v9 = vsub.f32 1.5, %v3164_v5  ;;  %v9857_v5 = vld [vmem:[#allocation22_spill] sm:$0xff] }
 0xc63   :  { %v6838_v1 = vpop.eup %6837 }
 0xc64   :  { %v3166_v16 = vmul.f32 %v6836_v51, %v3165_v9  ;;  %v3172_v47 = vmul.f32 %v6838_v1, %v3160_v14  ;;  %vm3178_vm7 = vweird.f32 %v6838_v1  ;;  %v9860_v9 = vld [vmem:[#allocation25_spill] sm:$0xff] }
 0xc65   :  { %vm3179_vm9 = vmor %vm3177_vm8, %vm3178_vm7 }
 0xc66   :  { %v3173_v24 = vmul.f32 %v6838_v1, %v3172_v47  ;;  %v3170_v30 = vsel %vm3169_vm5, %v6836_v51, %v3166_v16  ;;  %v9861_v16 = vld [vmem:[#allocation26_spill] sm:$0xff]  ;;  %v6883_v47 = vld [vmem:[%s9631_s8 + $0x48] sm:$0xff] }
 0xc67   :  { %v3181_v36 = vmul.f32 %v3170_v30, %v3157_v42  ;;  %v9863_v30 = vld [vmem:[#allocation28_spill] sm:$0xff]  ;;  %v6885_v42 = vld [vmem:[%s9631_s8 + $0xb8] sm:$0xff] }
 0xc68   :  { %v3174_v32 = vmul.f32 0.5, %v3173_v24  ;;  %v6884_v24 = vld [vmem:[%s9631_s8 + $0x40] sm:$0xff] }
 0xc69   :  { %v3184_v27 = vmul.f32 %v6784_v63, %v3181_v36  ;;  %v6889_v36 = vld [vmem:[%s9631_s8 + $0xa0] sm:$0xff] }
 0xc6a   :  { %v3175_v39 = vsub.f32 1.5, %v3174_v32  ;;  %v9864_v32 = vld [vmem:[#allocation29_spill] sm:$0xff] }
 0xc6b   :  { %v8697_v55 = vadd.f32 %v6785_v59, %v3184_v27  ;;  %v6896_v27 = vld [vmem:[%s9627_s4 + $0x28] sm:$0xff] }
 0xc6c   :  { %v3176_v8 = vmul.f32 %v6838_v1, %v3175_v39  ;;  %v6886_v39 = vld [vmem:[%s9627_s4 + $0x10] sm:$0xff] }
 0xc6d   :  { %9855 = vst [vmem:[#allocation39_spill] sm:$0xff] %v8697_v55 }
 0xc6e   :  { %v3180_v10 = vsel %vm3179_vm9, %v6838_v1, %v3176_v8  ;;  %v6881_v1 = vld [vmem:[%s9627_s4 + $0x8] sm:$0xff] }
 0xc6f   :  { %v3182_v20 = vmul.f32 %v3180_v10, %v3158_v34  ;;  %v6893_v8 = vld [vmem:[%s9631_s8 + $0x88] sm:$0xff]  ;;  %v6894_v34 = vld [vmem:[%s9631_s8 + $0x80] sm:$0xff] }
 0xc70   :  { %v6895_v10 = vld [vmem:[%s9627_s4 + $0x20] sm:$0xff] }
 0xc71   :  { %v3185_v60 = vmul.f32 %v6784_v63, %v3182_v20  ;;  %v6891_v63 = vld [vmem:[%s9627_s4 + $0x18] sm:$0xff] }
 0xc72   :  { %v6898_v20 = vld [vmem:[%s9627_s4 + $0x38] sm:$0xff] }
 0xc73   :  { %v8699_v22 = vadd.f32 %v6785_v59, %v3185_v60  ;;  %v6897_v59 = vld [vmem:[%s9627_s4 + $0x30] sm:$0xff]  ;;  %v6899_v60 = vld [vmem:[%s9627_s4 + $0x40] sm:$0xff] }
 0xc75   :  { %9856 = vst [vmem:[#allocation41_spill] sm:$0xff] %v8699_v22  ;;  %v3238_v33 = vpack.c.bf16 %v8699_v22, %v8697_v55  ;;  %v9877_v22 = vld [vmem:[#allocation65_spill] sm:$0xff] }
 0xc77   :  { %3487 = vmatmul.bf16.vlgmr.msra.gmra.mxu2 %v3238_v33  ;;  %3501 = vmatmul.bf16.vlgmr.msrb.gmra.mxu3 %v3238_v33 }
 0xc78   :  { %3515 = vmatmul.bf16.vlgmr.msrb.gmra.mxu0 %v3238_v33  ;;  %3529 = vmatmul.bf16.vlgmr.msrb.gmra.mxu1 %v3238_v33 }
 0xc87   :  { %3543 = vmatmul.bf16.vlgmr.msrb.gmra.mxu2 %v3238_v33  ;;  %3557 = vmatmul.bf16.vlgmr.msra.gmra.mxu3 %v3238_v33 }
 0xcf5   :  { %v3516_v57 = vpop.f32.mrf.mxu0 }
 0xcf6   :  { %v3574_v51 = vadd.f32 %v6786_v43, %v3516_v57 }
 0xcfa   :  { %v3502_v28 = vpop.f32.mrf.mxu3 }
 0xcfb   :  { %v3570_v18 = vadd.f32 %v6789_v17, %v3502_v28 }
 0xcfd   :  { %v3518_v19 = vpop.f32.mrf.mxu0 }
 0xcfe   :  { %v3575_v14 = vadd.f32 %v6786_v43, %v3518_v19  ;;  %v8811_v43 = vld [vmem:[%s9628_s5] sm:$0xff]  ;;  %v8819_v19 = vld [vmem:[%s9628_s5 + $0x8] sm:$0xff] }
 0xd00   :  { %v3710_v35 = vpack.c.bf16 %v3575_v14, %v3574_v51 }
 0xd02   :  { %3718 = vmatpush.bf16.msra.mxu1 %v3710_v35  ;;  %v3504_v25 = vpop.f32.mrf.mxu3 }
 0xd03   :  { %v3571_v44 = vadd.f32 %v6789_v17, %v3504_v25  ;;  %v6902_v17 = vld [vmem:[%s9627_s4 + $0x48] sm:$0xff] }
 0xd05   :  { %v3588_v21 = vpack.c.bf16 %v3571_v44, %v3570_v18  ;;  %6230 = vmatmul.msk.bf16.vlgmr.msra.gmra.mxu1 %vm1045_vm0, %v6876_v0  ;;  %v8834_v18 = vld [vmem:[%s9628_s5 + $0x10] sm:$0xff] }
 0xd06   :  { %4269 = vmatpush.bf16.msrb.mxu1 %v6875_v29  ;;  %v8842_v29 = vld [vmem:[%s9628_s5 + $0x18] sm:$0xff] }
 0xd07   :  { %3596 = vmatpush.bf16.msra.mxu0 %v3588_v21 }
 0xd0a   :  { %4270 = vmatpush.bf16.msrb.mxu1 %v6877_v46  ;;  %6214 = vmatmul.msk.bf16.vlgmr.msra.gmra.mxu0 %vm1045_vm0, %v6876_v0  ;;  %v6905_v46 = vld [vmem:[%s9627_s4 + $0x50] sm:$0xff] }
 0xd0b   :  { %4215 = vmatpush.bf16.msrb.mxu0 %v9857_v5 }
 0xd0e   :  { %4271 = vmatpush.bf16.msrb.mxu1 %v6878_v13  ;;  %v3530_v13 = vpop.f32.mrf.mxu1 }
 0xd0f   :  { %4216 = vmatpush.bf16.msrb.mxu0 %v9858_v62 }
 0xd12   :  { %4272 = vmatpush.bf16.msrb.mxu1 %v6879_v31  ;;  %v8857_v31 = vld [vmem:[%s9628_s5 + $0x20] sm:$0xff] }
 0xd13   :  { %4217 = vmatpush.bf16.msrb.mxu0 %v9859_v11 }
 0xd15   :  { %6231 = vmatmul.msk.bf16.gmra.mxu1 %vm1045_vm0, %v6881_v1 }
 0xd16   :  { %4273 = vmatpush.bf16.msrb.mxu1 %v6880_v45  ;;  %v8865_v45 = vld [vmem:[%s9628_s5 + $0x28] sm:$0xff] }
 0xd17   :  { %4218 = vmatpush.bf16.msrb.mxu0 %v9860_v9 }
 0xd1a   :  { %4274 = vmatpush.bf16.msrb.mxu1 %v6882_v12  ;;  %6215 = vmatmul.msk.bf16.gmra.mxu0 %vm1045_vm0, %v6881_v1  ;;  %v3532_v12 = vpop.f32.mrf.mxu1 }
 0xd1b   :  { %4219 = vmatpush.bf16.msrb.mxu0 %v9861_v16  ;;  %v6908_v16 = vld [vmem:[%s9627_s4 + $0x58] sm:$0xff] }
 0xd1e   :  { %4275 = vmatpush.bf16.msrb.mxu1 %v6883_v47 }
 0xd1f   :  { %4220 = vmatpush.bf16.msrb.mxu0 %v9862_v52 }
 0xd22   :  { %4276 = vmatpush.bf16.msrb.mxu1 %v6884_v24  ;;  %v8880_v24 = vld [vmem:[%s9628_s5 + $0x30] sm:$0xff] }
 0xd23   :  { %4221 = vmatpush.bf16.msrb.mxu0 %v9863_v30 }
 0xd25   :  { %6232 = vmatmul.msk.bf16.gmra.mxu1 %vm1045_vm0, %v6886_v39 }
 0xd26   :  { %4362 = vmatpush.bf16.msra.mxu1 %v8534_v50  ;;  %v6887_v50 = vld [vmem:[%s9631_s8 + $0xb0] sm:$0xff] }
 0xd27   :  { %4222 = vmatpush.bf16.msrb.mxu0 %v9864_v32  ;;  %v8886_v32 = vld [vmem:[%s9628_s5 + $0x38] sm:$0xff] }
 0xd2a   :  { %4363 = vmatpush.bf16.msra.mxu1 %v8543_v7  ;;  %6216 = vmatmul.msk.bf16.gmra.mxu0 %vm1045_vm0, %v6886_v39  ;;  %v6888_v7 = vld [vmem:[%s9631_s8 + $0xa8] sm:$0xff] }
 0xd2b   :  { %4283 = vmatpush.bf16.msra.mxu0 %v6885_v42 }
 0xd2e   :  { %4364 = vmatpush.bf16.msra.mxu1 %v8552_v49  ;;  %v6890_v49 = vld [vmem:[%s9631_s8 + $0x98] sm:$0xff] }
 0xd2f   :  { %4284 = vmatpush.bf16.msra.mxu0 %v6887_v50 }
 0xd32   :  { %4365 = vmatpush.bf16.msra.mxu1 %v8561_v48  ;;  %v6892_v48 = vld [vmem:[%s9631_s8 + $0x90] sm:$0xff] }
 0xd33   :  { %4285 = vmatpush.bf16.msra.mxu0 %v6888_v7  ;;  %v8892_v7 = vld [vmem:[%s9627_s4 + $0x60] sm:$0xff] }
 0xd35   :  { %6233 = vmatmul.msk.bf16.gmra.mxu1 %vm1045_vm0, %v6891_v63 }
 0xd37   :  { %4286 = vmatpush.bf16.msra.mxu0 %v6889_v36 }
 0xd3a   :  { %6217 = vmatmul.msk.bf16.gmra.mxu0 %vm1045_vm0, %v6891_v63 }
 0xd3b   :  { %4287 = vmatpush.bf16.msra.mxu0 %v6890_v49  ;;  %v8899_v49 = vld [vmem:[%s9628_s5 + $0x40] sm:$0xff] }
 0xd3f   :  { %4288 = vmatpush.bf16.msra.mxu0 %v6892_v48  ;;  %v8905_v48 = vld [vmem:[%s9628_s5 + $0x48] sm:$0xff] }
 0xd43   :  { %4289 = vmatpush.bf16.msra.mxu0 %v6893_v8 }
 0xd45   :  { %6234 = vmatmul.msk.bf16.gmra.mxu1 %vm1045_vm0, %v6895_v10 }
 0xd47   :  { %4290 = vmatpush.bf16.msra.mxu0 %v6894_v34 }
 0xd4a   :  { %6218 = vmatmul.msk.bf16.gmra.mxu0 %vm1045_vm0, %v6895_v10 }
 0xd55   :  { %6235 = vmatmul.msk.bf16.gmra.mxu1 %vm1045_vm0, %v6896_v27 }
 0xd5a   :  { %6219 = vmatmul.msk.bf16.gmra.mxu0 %vm1045_vm0, %v6896_v27  ;;  %v8911_v27 = vld [vmem:[%s9627_s4 + $0x68] sm:$0xff] }
 0xd65   :  { %6236 = vmatmul.msk.bf16.gmra.mxu1 %vm1045_vm0, %v6897_v59 }
 0xd6a   :  { %6220 = vmatmul.msk.bf16.gmra.mxu0 %vm1045_vm0, %v6897_v59 }
 0xd75   :  { %6237 = vmatmul.msk.bf16.gmra.mxu1 %vm1045_vm0, %v6898_v20 }
 0xd7a   :  { %6221 = vmatmul.msk.bf16.gmra.mxu0 %vm1045_vm0, %v6898_v20 }
 0xd85   :  { %6238 = vmatmul.msk.bf16.gmra.mxu1 %vm1045_vm0, %v6899_v60 }
 0xd87   :  { %v3598_v33 = vpop.f32.mrf.mxu0 }
 0xd88   :  { %v8814_v28 = vmul.f32 %v8811_v43, %v3598_v33 }
 0xd8a   :  { %6222 = vmatmul.msk.bf16.gmra.mxu0 %vm1045_vm0, %v6899_v60  ;;  %v8918_v60 = vld [vmem:[%s9627_s4 + $0x70] sm:$0xff] }
 0xd8f   :  { %v3600_v57 = vpop.f32.mrf.mxu0 }
 0xd90   :  { %v8822_v51 = vmul.f32 %v8819_v19, %v3600_v57 }
 0xd92   :  { %v3833_v14 = vpack.c.bf16 %v8822_v51, %v8814_v28 }
 0xd95   :  { %6239 = vmatmul.msk.bf16.gmra.mxu1 %vm1045_vm0, %v6902_v17 }
 0xd97   :  { %v3603_v35 = vpop.f32.mrf.mxu0 }
 0xd98   :  { %v8837_v44 = vmul.f32 %v8834_v18, %v3603_v35 }
 0xd9a   :  { %6223 = vmatmul.msk.bf16.gmra.mxu0 %vm1045_vm0, %v6902_v17  ;;  %v8925_v17 = vld [vmem:[%s9627_s4 + $0x78] sm:$0xff] }
 0xd9f   :  { %v3605_v25 = vpop.f32.mrf.mxu0 }
 0xda0   :  { %v8845_v21 = vmul.f32 %v8842_v29, %v3605_v25  ;;  %v8932_v25 = vld [vmem:[%s9628_s5 + $0x70] sm:$0xff] }
 0xda2   :  { %v3834_v0 = vpack.c.bf16 %v8845_v21, %v8837_v44  ;;  %v9033_v21 = vld [vmem:[%s9628_s5 + $0xb8] sm:$0xff] }
 0xda5   :  { %6240 = vmatmul.msk.bf16.gmra.mxu1 %vm1045_vm0, %v6905_v46 }
 0xda7   :  { %v3608_v5 = vpop.f32.mrf.mxu0 }
 0xda8   :  { %v8860_v11 = vmul.f32 %v8857_v31, %v3608_v5  ;;  %v8938_v5 = vld [vmem:[%s9628_s5 + $0x78] sm:$0xff] }
 0xdaa   :  { %6224 = vmatmul.msk.bf16.gmra.mxu0 %vm1045_vm0, %v6905_v46 }
 0xdaf   :  { %v3610_v62 = vpop.f32.mrf.mxu0 }
 0xdb0   :  { %v8868_v9 = vmul.f32 %v8865_v45, %v3610_v62 }
 0xdb2   :  { %v3835_v1 = vpack.c.bf16 %v8868_v9, %v8860_v11  ;;  %v9875_v11 = vld [vmem:[#allocation61_spill] sm:$0xff] }
 0xdb5   :  { %6241 = vmatmul.msk.bf16.gmra.mxu1 %vm1045_vm0, %v6908_v16 }
 0xdb7   :  { %v3613_v47 = vpop.f32.mrf.mxu0 }
 0xdb8   :  { %v3684_v30 = vmul.f32 %v8880_v24, %v3613_v47 }
 0xdba   :  { %6225 = vmatmul.msk.bf16.gmra.mxu0 %vm1045_vm0, %v6908_v16  ;;  %v6787_v16 = vld [vmem:[#allocation13 + $0x13] ss:$0 sm:$0xff] }
 0xdbf   :  { %v3615_v52 = vpop.f32.mrf.mxu0 }
 0xdc0   :  { %v3685_v42 = vmul.f32 %v8886_v32, %v3615_v52  ;;  %v3579_v52 = vadd.f32 %v6787_v16, %v3532_v12 }
 0xdc2   :  { %v3836_v39 = vpack.c.bf16 %v3685_v42, %v3684_v30  ;;  %v3578_v30 = vadd.f32 %v6787_v16, %v3530_v13  ;;  %v8944_v42 = vld [vmem:[%s9628_s5 + $0x68] sm:$0xff]  ;;  %v8962_v13 = vld [vmem:[%s9628_s5 + $0x58] sm:$0xff] }
 0xdc7   :  { %v3618_v50 = vpop.f32.mrf.mxu0 }
 0xdc8   :  { %v3686_v63 = vmul.f32 %v8899_v49, %v3618_v50 }
 0xdca   :  { %6226 = vmatmul.msk.bf16.gmra.mxu0 %vm1045_vm0, %v8892_v7 }
 0xdcf   :  { %v3620_v36 = vpop.f32.mrf.mxu0 }
 0xdd0   :  { %v3687_v8 = vmul.f32 %v8905_v48, %v3620_v36 }
 0xdd2   :  { %v3837_v34 = vpack.c.bf16 %v3687_v8, %v3686_v63  ;;  %v8949_v63 = vpack.c.bf16 %v3579_v52, %v3578_v30  ;;  %v8954_v8 = vld [vmem:[%s9628_s5 + $0x60] sm:$0xff]  ;;  %v3488_v52 = vpop.f32.mrf.mxu2 }
 0xdd3   :  { %v9000_v30 = vld [vmem:[%s9628_s5 + $0xa0] sm:$0xff] }
 0xdd4   :  { %9865 = vst [vmem:[#allocation22_spill] sm:$0xff] %v8949_v63 }
 0xdd7   :  { %v3623_v10 = vpop.f32.mrf.mxu0 }
 0xdda   :  { %6227 = vmatmul.msk.bf16.gmra.mxu0 %vm1045_vm0, %v8911_v27 }
 0xddf   :  { %v3625_v59 = vpop.f32.mrf.mxu0 }
 0xde7   :  { %v3628_v20 = vpop.f32.mrf.mxu0 }
 0xde8   :  { %v3690_v12 = vmul.f32 %v8954_v8, %v3628_v20  ;;  %v8971_v20 = vld [vmem:[%s9628_s5 + $0x50] sm:$0xff] }
 0xdea   :  { %6228 = vmatmul.msk.bf16.gmra.mxu0 %vm1045_vm0, %v8918_v60 }
 0xdef   :  { %v3630_v33 = vpop.f32.mrf.mxu0 }
 0xdf0   :  { %v3691_v50 = vmul.f32 %v8944_v42, %v3630_v33  ;;  %v3689_v33 = vmul.f32 %v8962_v13, %v3625_v59 }
 0xdf7   :  { %v3633_v57 = vpop.f32.mrf.mxu0 }
 0xdf8   :  { %v3692_v46 = vmul.f32 %v8932_v25, %v3633_v57  ;;  %v3839_v57 = vpack.c.bf16 %v3691_v50, %v3690_v12  ;;  %v9008_v12 = vld [vmem:[%s9628_s5 + $0xa8] sm:$0xff] }
 0xdfa   :  { %6229 = vmatmul.msk.bf16.gmra.mxu0 %vm1045_vm0, %v8925_v17 }
 0xdff   :  { %v3635_v35 = vpop.f32.mrf.mxu0 }
 0xe00   :  { %v3693_v62 = vmul.f32 %v8938_v5, %v3635_v35 }
 0xe02   :  { %v3840_v47 = vpack.c.bf16 %v3693_v62, %v3692_v46  ;;  %v3688_v46 = vmul.f32 %v8971_v20, %v3623_v10  ;;  %v8987_v10 = vld [vmem:[%s9628_s5 + $0x98] sm:$0xff] }
 0xe04   :  { %3849 = vmatpush.bf16.xpose.msra.mxu2 %v3840_v47 }
 0xe07   :  { %v8947_v36 = vpop.f32.mrf.mxu0 }
 0xe0a   :  { %4223 = vmatmul.bf16.vlgmr.msrb.gmra.mxu0 %v8949_v63  ;;  %v9878_v63 = vld [vmem:[#allocation67_spill] sm:$0xff] }
 0xe0b   :  { %4390 = vmatpush.bf16.msrb.mxu0 %v8538_v37  ;;  %v3838_v37 = vpack.c.bf16 %v3689_v33, %v3688_v46  ;;  %v9866_v46 = vld [vmem:[#allocation43_spill] sm:$0xff] }
 0xe0c   :  { %3850 = vmatpush.bf16.xpose.msra.mxu2 %v3839_v57  ;;  %v6788_v57 = vld [vmem:[#allocation13 + $0x10] ss:$0 sm:$0xff] }
 0xe0f   :  { %v8965_v35 = vpop.f32.mrf.mxu0  ;;  %4391 = vmatpush.bf16.msrb.mxu0 %v8547_v41  ;;  %v8979_v41 = vld [vmem:[%s9628_s5 + $0x90] sm:$0xff] }
 0xe13   :  { %4392 = vmatpush.bf16.msrb.mxu0 %v8556_v2 }
 0xe14   :  { %3851 = vmatpush.bf16.xpose.msra.mxu2 %v3838_v37  ;;  %v3566_v37 = vadd.f32 %v6788_v57, %v3488_v52  ;;  %v9869_v52 = vld [vmem:[#allocation49_spill] sm:$0xff] }
 0xe17   :  { %v3643_v62 = vpop.f32.mrf.mxu0  ;;  %4393 = vmatpush.bf16.msrb.mxu0 %v8565_v23  ;;  %v9874_v23 = vld [vmem:[#allocation59_spill] sm:$0xff] }
 0xe18   :  { %v8982_v16 = vmul.f32 %v8979_v41, %v3643_v62 }
 0xe1c   :  { %3852 = vmatpush.bf16.xpose.msra.mxu2 %v3837_v34 }
 0xe1f   :  { %v3645_v59 = vpop.f32.mrf.mxu0 }
 0xe20   :  { %v8990_v2 = vmul.f32 %v8987_v10, %v3645_v59  ;;  %v9025_v59 = vld [vmem:[%s9628_s5 + $0xb0] sm:$0xff] }
 0xe24   :  { %3853 = vmatpush.bf16.xpose.msra.mxu2 %v3836_v39 }
 0xe27   :  { %v3648_v34 = vpop.f32.mrf.mxu0 }
 0xe28   :  { %v9003_v50 = vmul.f32 %v9000_v30, %v3648_v34  ;;  %v9868_v34 = vld [vmem:[#allocation47_spill] sm:$0xff] }
 0xe2c   :  { %3854 = vmatpush.bf16.xpose.msra.mxu2 %v3835_v1  ;;  %v3490_v1 = vpop.f32.mrf.mxu2 }
 0xe2d   :  { %v3567_v33 = vadd.f32 %v6788_v57, %v3490_v1  ;;  %v9050_v57 = vld [vmem:[%s9628_s5 + $0xc0] sm:$0xff] }
 0xe2f   :  { %v3650_v47 = vpop.f32.mrf.mxu0  ;;  %v9038_v51 = vpack.c.bf16 %v3567_v33, %v3566_v37 }
 0xe30   :  { %v9011_v39 = vmul.f32 %v9008_v12, %v3650_v47 }
 0xe34   :  { %3855 = vmatpush.bf16.xpose.msra.mxu2 %v3834_v0  ;;  %v9876_v0 = vld [vmem:[#allocation63_spill] sm:$0xff] }
 0xe37   :  { %v3653_v9 = vpop.f32.mrf.mxu0 }
 0xe38   :  { %v9028_v44 = vmul.f32 %v9025_v59, %v3653_v9  ;;  %v9870_v9 = vld [vmem:[#allocation51_spill] sm:$0xff] }
 0xe3c   :  { %3856 = vmatpush.bf16.xpose.msra.mxu2 %v3833_v14  ;;  %v9867_v14 = vld [vmem:[#allocation45_spill] sm:$0xff] }
 0xe3f   :  { %v3655_v62 = vpop.f32.mrf.mxu0 }
 0xe40   :  { %v9036_v28 = vmul.f32 %v9033_v21, %v3655_v62  ;;  %v9871_v62 = vld [vmem:[#allocation53_spill] sm:$0xff] }
 0xe43   :  { %3857 = vmatmul.bf16.vlgmr.msra.gmra.mxu2 %v9038_v51 }
 0xe44   :  { %3897 = vmatpush.bf16.msrb.mxu2 %v9866_v46  ;;  %v9056_v46 = vld [vmem:[%s9628_s5 + $0xc8] sm:$0xff] }
 0xe47   :  { %v3658_v47 = vpop.f32.mrf.mxu0 }
 0xe48   :  { %3898 = vmatpush.bf16.msrb.mxu2 %v9867_v14  ;;  %v3702_v33 = vmul.f32 %v9050_v57, %v3658_v47 }
 0xe4c   :  { %3899 = vmatpush.bf16.msrb.mxu2 %v9868_v34  ;;  %v9872_v34 = vld [vmem:[#allocation55_spill] sm:$0xff] }
 0xe4f   :  { %v3660_v1 = vpop.f32.mrf.mxu0 }
 0xe50   :  { %3900 = vmatpush.bf16.msrb.mxu2 %v9869_v52  ;;  %v3703_v37 = vmul.f32 %v9056_v46, %v3660_v1  ;;  %v9879_v1 = vld [vmem:[#allocation69_spill] sm:$0xff] }
 0xe52   :  { %v3845_v14 = vpack.c.bf16 %v3703_v37, %v3702_v33  ;;  %v9880_v37 = vld [vmem:[#allocation71_spill] sm:$0xff] }
 0xe54   :  { %3901 = vmatpush.bf16.msrb.mxu2 %v9870_v9  ;;  %v9873_v9 = vld [vmem:[#allocation57_spill] sm:$0xff] }
 0xe57   :  { %v3663_v52 = vpop.f32.mrf.mxu0 }
 0xe58   :  { %3902 = vmatpush.bf16.msrb.mxu2 %v9871_v62 }
 0xe5c   :  { %3903 = vmatpush.bf16.msrb.mxu2 %v9872_v34 }
 0xe5f   :  { %v3665_v47 = vpop.f32.mrf.mxu0 }
 0xe60   :  { %3904 = vmatpush.bf16.msrb.mxu2 %v9873_v9 }
 0xe64   :  { %3925 = vmatpush.bf16.msra.mxu2 %v9874_v23  ;;  %v9073_v23 = vld [vmem:[%s9628_s5 + $0xf0] sm:$0xff] }
 0xe67   :  { %v3668_v55 = vpop.f32.mrf.mxu0 }
 0xe68   :  { %3926 = vmatpush.bf16.msra.mxu2 %v9875_v11 }
 0xe6c   :  { %3927 = vmatpush.bf16.msra.mxu2 %v9876_v0  ;;  %v3544_v0 = vpop.f32.mrf.mxu2 }
 0xe6f   :  { %v3670_v33 = vpop.f32.mrf.mxu0 }
 0xe70   :  { %3928 = vmatpush.bf16.msra.mxu2 %v9877_v22  ;;  %v9079_v22 = vld [vmem:[%s9628_s5 + $0xf8] sm:$0xff] }
 0xe74   :  { %3929 = vmatpush.bf16.msra.mxu2 %v9878_v63  ;;  %v3546_v56 = vpop.f32.mrf.mxu2 }
 0xe77   :  { %v3673_v62 = vpop.f32.mrf.mxu0 }
 0xe78   :  { %3930 = vmatpush.bf16.msra.mxu2 %v9879_v1  ;;  %v3708_v11 = vmul.f32 %v9073_v23, %v3673_v62  ;;  %v9091_v62 = vld [vmem:[%s9628_s5 + $0xe0] sm:$0xff] }
 0xe79   :  { %v3706_v15 = vmul.f32 %v9091_v62, %v3668_v55  ;;  %v9107_v55 = vld [vmem:[%s9628_s5 + $0xd0] sm:$0xff] }
 0xe7c   :  { %3931 = vmatpush.bf16.msra.mxu2 %v9880_v37 }
 0xe7f   :  { %v3675_v34 = vpop.f32.mrf.mxu0 }
 0xe80   :  { %3932 = vmatpush.bf16.msra.mxu2 %v8168_v4  ;;  %v3709_v63 = vmul.f32 %v9079_v22, %v3675_v34  ;;  %v9085_v4 = vld [vmem:[%s9628_s5 + $0xe8] sm:$0xff] }
 0xe81   :  { %v3707_v1 = vmul.f32 %v9085_v4, %v3670_v33  ;;  %v9101_v33 = vld [vmem:[%s9628_s5 + $0xd8] sm:$0xff] }
 0xe82   :  { %v3848_v9 = vpack.c.bf16 %v3709_v63, %v3708_v11  ;;  %v9094_v11 = vadd.f32 %v6790_v38, %v3544_v0  ;;  %v9096_v63 = vadd.f32 %v6790_v38, %v3546_v56 }
 0xe83   :  { %v3847_v34 = vpack.c.bf16 %v3707_v1, %v3706_v15  ;;  %v3704_v15 = vmul.f32 %v9107_v55, %v3663_v52  ;;  %v9883_v52 = vpack.c.bf16 %v9036_v28, %v9028_v44  ;;  %v9124_v44 = vld [vmem:[%s9628_s5 + $0x88] sm:$0xff] }
 0xe84   :  { %3863 = vmatpush.bf16.xpose.msrb.mxu3 %v3848_v9  ;;  %9881 = vst [vmem:[#allocation23_spill] sm:$0xff] %v9094_v11  ;;  %v3705_v9 = vmul.f32 %v9101_v33, %v3665_v47  ;;  %v6939_v47 = vld [vmem:[#allocation7 + $0xa8] sm:$0xff]  ;;  %v3695_v28 = vmul.f32 %v9124_v44, %v8965_v35 }
 0xe85   :  { %9882 = vst [vmem:[#allocation24_spill] sm:$0xff] %v9096_v63  ;;  %v9888_v35 = vld [vmem:[#allocation44_spill] sm:$0xff] }
 0xe86   :  { %v3846_v38 = vpack.c.bf16 %v3705_v9, %v3704_v15  ;;  %v9884_v9 = vpack.c.bf16 %v9011_v39, %v9003_v50  ;;  %v6943_v15 = vld [vmem:[#allocation7 + $0x88] sm:$0xff] }
 0xe87   :  { %v4224_v37 = vpop.f32.mrf.mxu0 }
 0xe88   :  { %v4245_v0 = vmul.f32 %v4224_v37, %v9094_v11  ;;  %v6941_v37 = vld [vmem:[#allocation7 + $0x98] sm:$0xff] }
 0xe8c   :  { %3864 = vmatpush.bf16.xpose.msrb.mxu3 %v3847_v34  ;;  %v6937_v34 = vld [vmem:[#allocation7 + $0xb8] sm:$0xff] }
 0xe8f   :  { %v4226_v6 = vpop.f32.mrf.mxu0 }
 0xe90   :  { %v4249_v56 = vmul.f32 %v4226_v6, %v9096_v63  ;;  %v6942_v6 = vld [vmem:[#allocation7 + $0x90] sm:$0xff] }
 0xe92   :  { %v4253_v1 = vpack.c.bf16 %v4249_v56, %v4245_v0 }
 0xe94   :  { %3865 = vmatpush.bf16.xpose.msrb.mxu3 %v3846_v38  ;;  %4291 = vmatmul.bf16.vlgmr.msra.gmra.mxu0 %v4253_v1  ;;  %v9890_v1 = vld [vmem:[#allocation48_spill] sm:$0xff] }
 0xe95   :  { %4454 = vmatpush.bf16.msra.mxu0 %v6937_v34 }
 0xe99   :  { %4455 = vmatpush.bf16.msra.mxu0 %v6938_v58  ;;  %v3720_v58 = vpop.f32.mrf.mxu1 }
 0xe9a   :  { %v9129_v50 = vmul.f32 %v8811_v43, %v3720_v58  ;;  %v6949_v43 = vld [vmem:[%s9773_s1 + $0x10] sm:$0xff]  ;;  %v6950_v58 = vld [vmem:[%s9773_s1 + $0x18] sm:$0xff] }
 0xe9c   :  { %3866 = vmatpush.bf16.xpose.msrb.mxu3 %v3845_v14  ;;  %v6944_v14 = vld [vmem:[#allocation7 + $0x80] sm:$0xff]  ;;  %9886 = vst [vmem:[#allocation25_spill] sm:$0xff] %v9129_v50 }
 0xe9d   :  { %4456 = vmatpush.bf16.msra.mxu0 %v6939_v47  ;;  %v9891_v47 = vld [vmem:[#allocation50_spill] sm:$0xff] }
 0xea1   :  { %4457 = vmatpush.bf16.msra.mxu0 %v6940_v61  ;;  %v9885_v61 = vpack.c.bf16 %v8990_v2, %v8982_v16  ;;  %v3722_v39 = vpop.f32.mrf.mxu1  ;;  %6242 = vmatmul.msk.bf16.gmra.mxu1 %vm1045_vm0, %v8892_v7  ;;  %v9136_v16 = vld [vmem:[%s9628_s5 + $0x80] sm:$0xff]  ;;  %v9889_v7 = vld [vmem:[#allocation46_spill] sm:$0xff] }
 0xea2   :  { %v3694_v2 = vmul.f32 %v9136_v16, %v8947_v36  ;;  %v9141_v0 = vmul.f32 %v8819_v19, %v3722_v39  ;;  %v9899_v39 = vld [vmem:[#allocation66_spill] sm:$0xff] }
 0xea4   :  { %3867 = vmatpush.bf16.xpose.msrb.mxu3 %v9883_v52  ;;  %9887 = vst [vmem:[#allocation26_spill] sm:$0xff] %v9141_v0  ;;  %v3841_v56 = vpack.c.bf16 %v3695_v28, %v3694_v2  ;;  %v9898_v28 = vld [vmem:[#allocation64_spill] sm:$0xff] }
 0xea5   :  { %4458 = vmatpush.bf16.msra.mxu0 %v6941_v37  ;;  %v9892_v37 = vld [vmem:[#allocation52_spill] sm:$0xff] }
 0xea6   :  { %v9900_v2 = vld [vmem:[#allocation68_spill] sm:$0xff] }
 0xea9   :  { %4459 = vmatpush.bf16.msra.mxu0 %v6942_v6  ;;  %v3725_v38 = vpop.f32.mrf.mxu1  ;;  %v9893_v6 = vld [vmem:[#allocation54_spill] sm:$0xff] }
 0xeaa   :  { %v9150_v34 = vmul.f32 %v8834_v18, %v3725_v38 }
 0xeac   :  { %3868 = vmatpush.bf16.xpose.msrb.mxu3 %v9884_v9  ;;  %v9894_v9 = vld [vmem:[#allocation56_spill] sm:$0xff] }
 0xead   :  { %4460 = vmatpush.bf16.msra.mxu0 %v6943_v15 }
 0xeb1   :  { %4461 = vmatpush.bf16.msra.mxu0 %v6944_v14  ;;  %v3727_v36 = vpop.f32.mrf.mxu1  ;;  %6243 = vmatmul.msk.bf16.gmra.mxu1 %vm1045_vm0, %v8911_v27  ;;  %v9895_v27 = vld [vmem:[#allocation58_spill] sm:$0xff]  ;;  %v9896_v14 = vld [vmem:[#allocation60_spill] sm:$0xff] }
 0xeb2   :  { %v9155_v19 = vmul.f32 %v8842_v29, %v3727_v36 }
 0xeb4   :  { %3869 = vmatpush.bf16.xpose.msrb.mxu3 %v9885_v61  ;;  %v9897_v61 = vld [vmem:[#allocation62_spill] sm:$0xff] }
 0xebc   :  { %3870 = vmatpush.bf16.xpose.msrb.mxu3 %v3841_v56 }
 0xec3   :  { %3871 = vmatmul.bf16.vlgmr.msrb.gmra.mxu3 %v9038_v51  ;;  %v3730_v51 = vpop.f32.mrf.mxu1 }
 0xec4   :  { %3911 = vmatpush.bf16.msra.mxu3 %v9888_v35  ;;  %v9164_v18 = vmul.f32 %v8857_v31, %v3730_v51 }
 0xec8   :  { %3912 = vmatpush.bf16.msra.mxu3 %v9889_v7  ;;  %v9902_v7 = vld [vmem:[#allocation72_spill] sm:$0xff] }
 0xecb   :  { %v3732_v15 = vpop.f32.mrf.mxu1  ;;  %6244 = vmatmul.msk.bf16.gmra.mxu1 %vm1045_vm0, %v8918_v60  ;;  %v9901_v60 = vld [vmem:[#allocation70_spill] sm:$0xff] }
 0xecc   :  { %3913 = vmatpush.bf16.msra.mxu3 %v9890_v1  ;;  %v9169_v29 = vmul.f32 %v8865_v45, %v3732_v15 }
 0xed0   :  { %3914 = vmatpush.bf16.msra.mxu3 %v9891_v47 }
 0xed3   :  { %v3735_v31 = vpop.f32.mrf.mxu1 }
 0xed4   :  { %3915 = vmatpush.bf16.msra.mxu3 %v9892_v37  ;;  %v9181_v45 = vmul.f32 %v8880_v24, %v3735_v31  ;;  %v6948_v31 = vld [vmem:[%s9773_s1 + $0x8] sm:$0xff] }
 0xed8   :  { %3916 = vmatpush.bf16.msra.mxu3 %v9893_v6 }
 0xedb   :  { %v3737_v56 = vpop.f32.mrf.mxu1  ;;  %6245 = vmatmul.msk.bf16.gmra.mxu1 %vm1045_vm0, %v8925_v17 }
 0xedc   :  { %3917 = vmatpush.bf16.msra.mxu3 %v9894_v9  ;;  %v9186_v35 = vmul.f32 %v8886_v32, %v3737_v56 }
 0xee0   :  { %3918 = vmatpush.bf16.msra.mxu3 %v9895_v27  ;;  %v3858_v27 = vpop.f32.mrf.mxu2 }
 0xee3   :  { %v9192_v1 = vpop.f32.mrf.mxu1 }
 0xee4   :  { %3939 = vmatpush.bf16.msrb.mxu3 %v9896_v14 }
 0xee8   :  { %3940 = vmatpush.bf16.msrb.mxu3 %v9897_v61  ;;  %v6947_v61 = vld [vmem:[%s9773_s1] sm:$0xff]  ;;  %v3860_v56 = vpop.f32.mrf.mxu2 }
 0xee9   :  { %v3861_v52 = vadd.f32 %v6949_v43, %v3860_v56 }
 0xeeb   :  { %v9194_v36 = vpop.f32.mrf.mxu1 }
 0xeec   :  { %3941 = vmatpush.bf16.msrb.mxu3 %v9898_v28  ;;  %v3859_v28 = vadd.f32 %v6947_v61, %v3858_v27 }
 0xef0   :  { %3942 = vmatpush.bf16.msrb.mxu3 %v9899_v39 }
 0xef3   :  { %v9196_v24 = vpop.f32.mrf.mxu1 }
 0xef4   :  { %3943 = vmatpush.bf16.msrb.mxu3 %v9900_v2 }
 0xef8   :  { %3944 = vmatpush.bf16.msrb.mxu3 %v9901_v60 }
 0xefb   :  { %v9198_v47 = vpop.f32.mrf.mxu1 }
 0xefc   :  { %3945 = vmatpush.bf16.msrb.mxu3 %v8159_v53  ;;  %v9204_v53 = vpop.f32.mrf.mxu3 }
 0xefd   :  { %9903 = vst [vmem:[#allocation27_spill] sm:$0xff] %v9204_v53 }
 0xf00   :  { %3946 = vmatpush.bf16.msrb.mxu3 %v9902_v7 }
 0xf03   :  { %v9200_v37 = vpop.f32.mrf.mxu1 }
 0xf04   :  { %v9208_v9 = vpop.f32.mrf.mxu3 }
 0xf05   :  { %9904 = vst [vmem:[#allocation28_spill] sm:$0xff] %v9208_v9 }
 0xf0b   :  { %v9202_v17 = vpop.f32.mrf.mxu1 }
 0xf13   :  { %v3755_v32 = vpop.f32.mrf.mxu1 }
 0xf14   :  { %v3814_v0 = vmul.f32 %v8932_v25, %v3755_v32  ;;  %v3813_v32 = vmul.f32 %v8944_v42, %v9202_v17 }
 0xf1b   :  { %v3757_v51 = vpop.f32.mrf.mxu1 }
 0xf23   :  { %v9206_v6 = vpop.f32.mrf.mxu1 }
 0xf2b   :  { %v9210_v15 = vpop.f32.mrf.mxu1 }
 0xf33   :  { %v3765_v2 = vpop.f32.mrf.mxu1 }
 0xf34   :  { %v9225_v61 = vmul.f32 %v8979_v41, %v3765_v2 }
 0xf36   :  { %9905 = vst [vmem:[#allocation29_spill] sm:$0xff] %v9225_v61  ;;  %v3815_v61 = vmul.f32 %v8938_v5, %v3757_v51 }
 0xf38   :  { %v3974_v25 = vpack.c.bf16 %v3815_v61, %v3814_v0 }
 0xf3b   :  { %v3767_v38 = vpop.f32.mrf.mxu1 }
 0xf43   :  { %v3770_v9 = vpop.f32.mrf.mxu1 }
 0xf44   :  { %v9233_v43 = vmul.f32 %v9000_v30, %v3770_v9 }
 0xf46   :  { %v3872_v14 = vpop.f32.mrf.mxu3 }
 0xf47   :  { %v3873_v39 = vadd.f32 %v6948_v31, %v3872_v14  ;;  %v9228_v31 = vmul.f32 %v8987_v10, %v3767_v38 }
 0xf49   :  { %v3877_v60 = vmax.f32 %v3859_v28, %v3873_v39  ;;  %9906 = vst [vmem:[#allocation43_spill] sm:$0xff] %v9228_v31 }
 0xf4b   :  { %3878 = vmax.xlane.f32.xlu2 %v3877_v60  ;;  %v3772_v56 = vpop.f32.mrf.mxu1 }
 0xf4c   :  { %v9236_v53 = vmul.f32 %v9008_v12, %v3772_v56 }
 0xf4e   :  { %v3874_v7 = vpop.f32.mrf.mxu3 }
 0xf4f   :  { %v3875_v27 = vadd.f32 %v6950_v58, %v3874_v7 }
 0xf51   :  { %v3880_v14 = vmax.f32 %v3861_v52, %v3875_v27 }
 0xf53   :  { %3881 = vmax.xlane.f32.xlu2 %v3880_v14  ;;  %v3775_v58 = vpop.f32.mrf.mxu1 }
 0xf54   :  { %v9243_v10 = vmul.f32 %v9025_v59, %v3775_v58 }
 0xf5b   :  { %v3777_v38 = vpop.f32.mrf.mxu1 }
 0xf5c   :  { %v9246_v2 = vmul.f32 %v9033_v21, %v3777_v38 }
 0xf63   :  { %v3780_v9 = vpop.f32.mrf.mxu1 }
 0xf64   :  { %v3824_v42 = vmul.f32 %v9050_v57, %v3780_v9  ;;  %v9908_v57 = vpack.c.bf16 %v9246_v2, %v9243_v10  ;;  %v9365_v10 = vld [vmem:[%s9626_s3 + $0x38] sm:$0xff]  ;;  %v9371_v2 = vld [vmem:[%s9626_s3 + $0x30] sm:$0xff]  ;;  %v9383_v9 = vld [vmem:[%s9626_s3 + $0x20] sm:$0xff] }
 0xf6b   :  { %2391 = vrot.lane.b32.xlu2 %v8586_v54, %s7216_s21  ;;  %v3782_v12 = vpop.f32.mrf.mxu1 }
 0xf6c   :  { %v3825_v17 = vmul.f32 %v9056_v46, %v3782_v12  ;;  %v3816_v46 = vmul.f32 %v9136_v16, %v9206_v6  ;;  %v9317_v16 = vld [vmem:[%s9626_s3 + $0x78] sm:$0xff]  ;;  %v9347_v6 = vld [vmem:[%s9626_s3 + $0x50] sm:$0xff] }
 0xf6d   :  { %v9389_v12 = vld [vmem:[%s9626_s3 + $0x18] sm:$0xff] }
 0xf73   :  { %v3785_v7 = vpop.f32.mrf.mxu1 }
 0xf7b   :  { %v3787_v14 = vpop.f32.mrf.mxu1 }
 0xf83   :  { %v3790_v56 = vpop.f32.mrf.mxu1 }
 0xf8b   :  { %v3792_v60 = vpop.f32.mrf.mxu1 }
 0xf93   :  { %v3795_v11 = vpop.f32.mrf.mxu1 }
 0xf9b   :  { %v3797_v30 = vpop.f32.mrf.mxu1 }
 0xfbe   :  { %v3879_v41 = vpop.xlane.xlu2 %3878 }
 0xfbf   :  { %v3883_v63 = vsub.f32 %v3859_v28, %v3879_v41  ;;  %v3884_v54 = vsub.f32 %v3873_v39, %v3879_v41  ;;  %v3830_v28 = vmul.f32 %v9073_v23, %v3795_v11  ;;  %v3828_v23 = vmul.f32 %v9091_v62, %v3790_v56  ;;  %v9407_v56 = vld [vmem:[%s9626_s3] sm:$0xff] }
 0xfc0   :  { %v3826_v62 = vmul.f32 %v9107_v55, %v3785_v7  ;;  %v3808_v55 = vmul.f32 %v8899_v49, %v9192_v1  ;;  %v9909_v49 = vpack.c.bf16 %v9169_v29, %v9164_v18  ;;  %v3817_v1 = vmul.f32 %v9124_v44, %v9210_v15  ;;  %v9915_v29 = vld [vmem:[#allocation26_spill] sm:$0xff]  ;;  %v9353_v15 = vld [vmem:[%s9626_s3 + $0x48] sm:$0xff] }
 0xfc1   :  { %v3887_v40 = vmul.f32 1.442695, %v3883_v63  ;;  %v3889_v59 = vmul.f32 1.442695, %v3884_v54  ;;  %v3831_v63 = vmul.f32 %v9079_v22, %v3797_v30  ;;  %v3829_v22 = vmul.f32 %v9085_v4, %v3792_v60  ;;  %v9916_v60 = vld [vmem:[#allocation25_spill] sm:$0xff] }
 0xfc2   :  { %v3827_v4 = vmul.f32 %v9101_v33, %v3787_v14  ;;  %v3809_v33 = vmul.f32 %v8905_v48, %v9194_v36  ;;  %v9910_v48 = vpack.c.bf16 %v9236_v53, %v9233_v43  ;;  %v9913_v36 = vld [vmem:[#allocation29_spill] sm:$0xff]  ;;  %v3975_v18 = vpack.c.bf16 %v3817_v1, %v3816_v46  ;;  %v9341_v53 = vld [vmem:[%s9626_s3 + $0x58] sm:$0xff]  ;;  %v9359_v43 = vld [vmem:[%s9626_s3 + $0x40] sm:$0xff] }
 0xfc3   :  { %6839 = vpow2.f32 %v3887_v40  ;;  %v3981_v0 = vpack.c.bf16 %v3829_v22, %v3828_v23  ;;  %v9917_v41 = vpack.c.bf16 %v9915_v29, %v9916_v60  ;;  %v9323_v44 = vld [vmem:[%s9626_s3 + $0x70] sm:$0xff]  ;;  %v9377_v30 = vld [vmem:[%s9626_s3 + $0x28] sm:$0xff]  ;;  %v6273_v22 = vld [vmem:[#allocation12 + $0x478] sm:$0xf] }
 0xfc4   :  { %6841 = vpow2.f32 %v3889_v59  ;;  %v3980_v61 = vpack.c.bf16 %v3827_v4, %v3826_v62  ;;  %v9395_v7 = vld [vmem:[%s9626_s3 + $0x10] sm:$0xff]  ;;  %v9401_v14 = vld [vmem:[%s9626_s3 + $0x8] sm:$0xff] }
 0xfc5   :  { %v6720_v23 = vld [vmem:[#allocation12 + $0x4ec] sm:$0xf0]  ;;  %v6269_v62 = vld [vmem:[#allocation12 + $0x428] sm:$0xf] }
 0xfc6   :  { %v3882_v58 = vpop.xlane.xlu2 %3881  ;;  %v6718_v4 = vld [vmem:[#allocation12 + $0x44c] sm:$0xf0] }
 0xfc7   :  { %v3885_v3 = vsub.f32 %v3861_v52, %v3882_v58  ;;  %v3886_v50 = vsub.f32 %v3875_v27, %v3882_v58  ;;  %v3982_v52 = vpack.c.bf16 %v3831_v63, %v3830_v28  ;;  %v3810_v27 = vmul.f32 %v8971_v20, %v9196_v24 }
 0xfc8   :  { %v3979_v20 = vpack.c.bf16 %v3825_v17, %v3824_v42  ;;  %v3971_v24 = vpack.c.bf16 %v3809_v33, %v3808_v55  ;;  %v6717_v55 = vld [vmem:[#allocation12 + $0x3fc] sm:$0xf0] }
 0xfc9   :  { %v3891_v21 = vmul.f32 1.442695, %v3885_v3  ;;  %v3893_v38 = vmul.f32 1.442695, %v3886_v50  ;;  %v9254_v39 = vpop.eup %6839 }
 0xfca   :  { %v9258_v3 = vpop.eup %6841 }
 0xfcb   :  { %6843 = vpow2.f32 %v3891_v21 }
 0xfcc   :  { %6845 = vpow2.f32 %v3893_v38 }
 0xfce   :  { %v2392_v31 = vpop.permute.xlu2 %2391 }
 0xfcf   :  { %v2394_v40 = vsel %vm2329_vm6, %v8583_v26, %v2392_v31  ;;  %v3812_v26 = vmul.f32 %v8954_v8, %v9200_v37  ;;  %v3811_v8 = vmul.f32 %v8962_v13, %v9198_v47  ;;  %v9907_v13 = vpack.c.bf16 %v9186_v35, %v9181_v45  ;;  %v9912_v35 = vld [vmem:[#allocation43_spill] sm:$0xff] }
 0xfd0   :  { %2395 = vst [vmem:[%s9641_s18 - $0x7] sm:$0x80] %v2394_v40  ;;  %v9911_v45 = vpack.c.bf16 %v9155_v19, %v9150_v34  ;;  %v9914_v47 = vpack.c.bf16 %v9912_v35, %v9913_v36  ;;  %v9329_v34 = vld [vmem:[%s9626_s3 + $0x68] sm:$0xff]  ;;  %v9335_v19 = vld [vmem:[%s9626_s3 + $0x60] sm:$0xff] }
 0xfd1   :  { %v9263_v50 = vpop.eup %6843  ;;  %v3973_v37 = vpack.c.bf16 %v3813_v32, %v3812_v26  ;;  %v3972_v31 = vpack.c.bf16 %v3811_v8, %v3810_v27  ;;  %v6253_v36 = vld [vmem:[#allocation12 + $0x2e8] sm:$0xf] }
 0xfd2   :  { %v9265_v5 = vpop.eup %6845  ;;  %v3895_v11 = vpack.c.bf16 %v9263_v50, %v9254_v39 }
 0xfd3   :  { %v3896_v51 = vpack.c.bf16 %v9265_v5, %v9258_v3 }
 0xfd4   :  { %3905 = vmatmul.bf16.vlgmr.msrb.gmra.mxu2 %v3895_v11 }
 0xfd5   :  { %3919 = vmatmul.bf16.vlgmr.msra.gmra.mxu3 %v3896_v51  ;;  %3983 = vmatpush.bf16.msrb.mxu2 %v3974_v25  ;;  %v6277_v25 = vld [vmem:[#allocation12 + $0x4c8] sm:$0xf] }
 0xfd6   :  { %3997 = vmatpush.bf16.msra.mxu3 %v3982_v52  ;;  %v6719_v52 = vld [vmem:[#allocation12 + $0x49c] sm:$0xf0] }
 0xfd7   :  { %v6274_v32 = vor.u32 %v6719_v52, %v6273_v22  ;;  %v9921_v22 = vld [vmem:[#allocation83_spill] sm:$0xff]  ;;  %v9923_v52 = vld [vmem:[#allocation85_spill] sm:$0xff] }
 0xfd9   :  { %3984 = vmatpush.bf16.msrb.mxu2 %v3973_v37  ;;  %v6270_v37 = vor.u32 %v6718_v4, %v6269_v62  ;;  %v6713_v62 = vld [vmem:[#allocation12 + $0x2bc] sm:$0xf0] }
 0xfda   :  { %3998 = vmatpush.bf16.msra.mxu3 %v3981_v0 }
 0xfdd   :  { %3985 = vmatpush.bf16.msrb.mxu2 %v3972_v31 }
 0xfde   :  { %3999 = vmatpush.bf16.msra.mxu3 %v3980_v61  ;;  %v6265_v61 = vld [vmem:[#allocation12 + $0x3d8] sm:$0xf] }
 0xfe1   :  { %3986 = vmatpush.bf16.msrb.mxu2 %v3971_v24  ;;  %v6266_v24 = vor.u32 %v6717_v55, %v6265_v61  ;;  %v9932_v61 = vld [vmem:[#allocation34_spill] sm:$0xff]  ;;  %v9933_v55 = vld [vmem:[#allocation33_spill] sm:$0xff] }
 0xfe2   :  { %4000 = vmatpush.bf16.msra.mxu3 %v3979_v20 }
 0xfe4   :  { %3933 = vmatmul.bf16.vlgmr.msra.gmra.mxu2 %v3895_v11  ;;  %v6278_v11 = vor.u32 %v6720_v23, %v6277_v25  ;;  %v9920_v23 = vld [vmem:[#allocation82_spill] sm:$0xff] }
 0xfe5   :  { %3947 = vmatmul.bf16.vlgmr.msrb.gmra.mxu3 %v3896_v51  ;;  %3987 = vmatpush.bf16.msrb.mxu2 %v9907_v13 }
 0xfe6   :  { %4001 = vmatpush.bf16.msra.mxu3 %v9908_v57  ;;  %v6261_v57 = vld [vmem:[#allocation12 + $0x388] sm:$0xf] }
 0xfe9   :  { %3988 = vmatpush.bf16.msrb.mxu2 %v9909_v49  ;;  %v6716_v49 = vld [vmem:[#allocation12 + $0x3ac] sm:$0xf0] }
 0xfea   :  { %4002 = vmatpush.bf16.msra.mxu3 %v9910_v48  ;;  %v6262_v1 = vor.u32 %v6716_v49, %v6261_v57 }
 0xfed   :  { %3989 = vmatpush.bf16.msrb.mxu2 %v9911_v45  ;;  %v6257_v45 = vld [vmem:[#allocation12 + $0x338] sm:$0xf] }
 0xfee   :  { %4003 = vmatpush.bf16.msra.mxu3 %v9914_v47  ;;  %v6714_v47 = vld [vmem:[#allocation12 + $0x30c] sm:$0xf0] }
 0xfef   :  { %v6254_v60 = vor.u32 %v6714_v47, %v6253_v36  ;;  %v9941_v36 = vld [vmem:[#allocation78_spill] sm:$0xff]  ;;  %v9942_v47 = vld [vmem:[#allocation79_spill] sm:$0xff] }
 0xff1   :  { %3990 = vmatpush.bf16.msrb.mxu2 %v9917_v41 }
 0xff2   :  { %4004 = vmatpush.bf16.msra.mxu3 %v3975_v18 }
 0xff5   :  { %4099 = vmatpush.bf16.msra.mxu2 %v6278_v11  ;;  %v9922_v11 = vld [vmem:[#allocation84_spill] sm:$0xff] }
 0xff6   :  { %4119 = vmatpush.msrb.mxu3 %v9317_v16 }
 0xff8   :  { %4120 = vmatpush.msrb.mxu3 %v9323_v44 }
 0xff9   :  { %4100 = vmatpush.bf16.msra.mxu2 %v6274_v32  ;;  %v9925_v32 = vld [vmem:[#allocation87_spill] sm:$0xff] }
 0xffa   :  { %4121 = vmatpush.msrb.mxu3 %v9329_v34 }
 0xffc   :  { %4122 = vmatpush.msrb.mxu3 %v9335_v19 }
 0xffd   :  { %4101 = vmatpush.bf16.msra.mxu2 %v6270_v37  ;;  %v9929_v37 = vld [vmem:[#allocation42_spill] sm:$0xff] }
 0xffe   :  { %4123 = vmatpush.msrb.mxu3 %v9341_v53 }
0x1000   :  { %4124 = vmatpush.msrb.mxu3 %v9347_v6 }
0x1001   :  { %4102 = vmatpush.bf16.msra.mxu2 %v6266_v24 }
0x1002   :  { %4125 = vmatpush.msrb.mxu3 %v9353_v15 }
0x1004   :  { %4126 = vmatpush.msrb.mxu3 %v9359_v43 }
0x1005   :  { %4103 = vmatpush.bf16.msra.mxu2 %v6262_v1  ;;  %v9936_v1 = vld [vmem:[#allocation75_spill] sm:$0xff] }
0x1006   :  { %4127 = vmatpush.msrb.mxu3 %v9365_v10 }
0x1008   :  { %4128 = vmatpush.msrb.mxu3 %v9371_v2 }
0x100a   :  { %4129 = vmatpush.msrb.mxu3 %v9377_v30 }
0x100c   :  { %4130 = vmatpush.msrb.mxu3 %v9383_v9 }
0x100e   :  { %4131 = vmatpush.msrb.mxu3 %v9389_v12 }
0x1010   :  { %4132 = vmatpush.msrb.mxu3 %v9395_v7 }
0x1012   :  { %4133 = vmatpush.msrb.mxu3 %v9401_v14 }
0x1014   :  { %4134 = vmatpush.msrb.mxu3 %v9407_v56 }
0x1057   :  { %v3906_v54 = vpop.f32.mrf.mxu2 }
0x1058   :  { %v3920_v59 = vpop.f32.mrf.mxu3 }
0x1059   :  { %v3921_v58 = vadd.f32 %v3920_v59, %v3906_v54 }
0x105b   :  { %v3953_v21 = vmax.f32 %v3921_v58, 1e-30 }
0x105d   :  { %6847 = vrcp.f32 %v3953_v21 }
0x105f   :  { %v3908_v38 = vpop.f32.mrf.mxu2 }
0x1060   :  { %v3922_v28 = vpop.f32.mrf.mxu3 }
0x1061   :  { %v3923_v63 = vadd.f32 %v3922_v28, %v3908_v38 }
0x1063   :  { %v3955_v40 = vmax.f32 %v3923_v63, 1e-30  ;;  %v6848_v0 = vpop.eup %6847 }
0x1064   :  { %v3961_v42 = vmul.f32 %v6848_v0, %v9254_v39  ;;  %v6715_v39 = vld [vmem:[#allocation12 + $0x35c] sm:$0xf0] }
0x1065   :  { %6849 = vrcp.f32 %v3955_v40  ;;  %v6258_v35 = vor.u32 %v6715_v39, %v6257_v45  ;;  %v9918_v40 = vld [vmem:[#allocation80_spill] sm:$0xff]  ;;  %v9938_v39 = vld [vmem:[#allocation22_spill] sm:$0xff] }
0x1066   :  { %v4013_v38 = vrot.slane %v3961_v42, 7  ;;  %v9926_v0 = vld [vmem:[#allocation36_spill] sm:$0xff] }
0x1067   :  { %v3934_v26 = vpop.f32.mrf.mxu2  ;;  %4104 = vmatpush.bf16.msra.mxu2 %v6258_v35  ;;  %v9937_v45 = vld [vmem:[#allocation76_spill] sm:$0xff]  ;;  %v9940_v35 = vld [vmem:[#allocation30_spill] sm:$0xff] }
0x1068   :  { %v3948_v51 = vpop.f32.mrf.mxu3 }
0x1069   :  { %v3949_v27 = vadd.f32 %v3948_v51, %v3934_v26  ;;  %v9924_v26 = vld [vmem:[#allocation86_spill] sm:$0xff]  ;;  %v6249_v51 = vld [vmem:[#allocation12 + $0x298] sm:$0xf] }
0x106a   :  { %v6250_v4 = vor.u32 %v6713_v62, %v6249_v51  ;;  %v6983_v51 = vld [vmem:[%s9631_s8 + $0x38] sm:$0xff] }
0x106b   :  { %v6850_v8 = vpop.eup %6849  ;;  %v3954_v33 = vmax.f32 %v3949_v27, 1e-30  ;;  %4105 = vmatpush.bf16.msra.mxu2 %v6254_v60  ;;  %v9927_v27 = vld [vmem:[#allocation40_spill] sm:$0xff] }
0x106c   :  { %v3963_v17 = vmul.f32 %v6850_v8, %v9263_v50  ;;  %v9928_v8 = vld [vmem:[#allocation35_spill] sm:$0xff]  ;;  %v6969_v60 = vld [vmem:[%s9631_s8 + $0xe8] sm:$0xff] }
0x106d   :  { %6851 = vrcp.f32 %v3954_v33 }
0x106e   :  { %v3965_v31 = vpack.c.bf16 %v3963_v17, %v3961_v42  ;;  %v4019_v54 = vrot.slane %v3963_v17, 6  ;;  %v9930_v42 = vld [vmem:[#allocation38_spill] sm:$0xff]  ;;  %v9931_v17 = vld [vmem:[#allocation37_spill] sm:$0xff] }
0x106f   :  { %v3936_v20 = vpop.f32.mrf.mxu2  ;;  %4106 = vmatpush.bf16.msra.mxu2 %v6250_v4 }
0x1070   :  { %v3950_v13 = vpop.f32.mrf.mxu3  ;;  %3991 = vmatmul.bf16.vlgmr.msrb.gmra.mxu2 %v3965_v31  ;;  %v4023_v25 = vsel %vm1688_vm1, %v4013_v38, %v4019_v54  ;;  %v6971_v54 = vld [vmem:[%s9631_s8 + $0xd8] sm:$0xff] }
0x1071   :  { %v3951_v48 = vadd.f32 %v3950_v13, %v3936_v20  ;;  %v6975_v38 = vld [vmem:[#allocation7 + $0x38] sm:$0xff] }
0x1073   :  { %v3956_v46 = vmax.f32 %v3951_v48, 1e-30  ;;  %v6852_v50 = vpop.eup %6851  ;;  %4187 = vmatpush.bf16.msrb.mxu2 %v9926_v0  ;;  %v9934_v48 = vld [vmem:[#allocation73_spill] sm:$0xff] }
0x1074   :  { %v3962_v18 = vmul.f32 %v6852_v50, %v9258_v3  ;;  %v9939_v50 = vld [vmem:[#allocation77_spill] sm:$0xff] }
0x1075   :  { %6853 = vrcp.f32 %v3956_v46  ;;  %v9935_v46 = vld [vmem:[#allocation74_spill] sm:$0xff] }
0x1076   :  { %v4014_v59 = vrot.slane %v3962_v18, 7  ;;  %v6984_v0 = vld [vmem:[%s9631_s8 + $0x30] sm:$0xff] }
0x1077   :  { %4188 = vmatpush.bf16.msrb.mxu2 %v9927_v27  ;;  %v9944_v27 = vld [vmem:[#allocation41_spill] sm:$0xff] }
0x107b   :  { %v6854_v29 = vpop.eup %6853  ;;  %4189 = vmatpush.bf16.msrb.mxu2 %v9928_v8 }
0x107c   :  { %v3964_v41 = vmul.f32 %v6854_v29, %v9265_v5  ;;  %v9919_v5 = vld [vmem:[#allocation81_spill] sm:$0xff] }
0x107d   :  { %v6968_v29 = vld [vmem:[%s9631_s8 + $0xf0] sm:$0xff] }
0x107e   :  { %v3966_v58 = vpack.c.bf16 %v3964_v41, %v3962_v18  ;;  %v4020_v21 = vrot.slane %v3964_v41, 6  ;;  %v6967_v18 = vld [vmem:[%s9631_s8 + $0xf8] sm:$0xff]  ;;  %v6970_v41 = vld [vmem:[%s9631_s8 + $0xe0] sm:$0xff] }
0x107f   :  { %4190 = vmatpush.bf16.msrb.mxu2 %v9929_v37  ;;  %v6985_v37 = vld [vmem:[%s9631_s8 + $0x28] sm:$0xff] }
0x1080   :  { %v4024_v28 = vsel %vm1688_vm1, %v4014_v59, %v4020_v21  ;;  %4005 = vmatmul.bf16.vlgmr.msra.gmra.mxu3 %v3966_v58  ;;  %v6972_v59 = vld [vmem:[%s9631_s8 + $0xd0] sm:$0xff]  ;;  %v6973_v58 = vld [vmem:[%s9631_s8 + $0xc8] sm:$0xff]  ;;  %v6974_v21 = vld [vmem:[%s9631_s8 + $0xc0] sm:$0xff] }
0x1081   :  { %v4027_v63 = vrot.slane %v4024_v28, 6  ;;  %4201 = vmatpush.bf16.msra.mxu3 %v9918_v40  ;;  %v6976_v28 = vld [vmem:[#allocation7 + $0x30] sm:$0xff]  ;;  %v6978_v40 = vld [vmem:[#allocation7 + $0x20] sm:$0xff] }
0x1083   :  { %v4028_v3 = vsel %vm1694_vm2, %v4023_v25, %v4027_v63  ;;  %4191 = vmatpush.bf16.msrb.mxu2 %v9930_v42  ;;  %v6977_v63 = vld [vmem:[#allocation7 + $0x28] sm:$0xff]  ;;  %v6979_v25 = vld [vmem:[#allocation7 + $0x18] sm:$0xff] }
0x1084   :  { %6246 = vst [vmem:[%s9640_s17 + $0x4] sm:$0xf] %v4028_v3  ;;  %v6980_v3 = vld [vmem:[#allocation7 + $0x10] sm:$0xff] }
0x1085   :  { %4202 = vmatpush.bf16.msra.mxu3 %v9919_v5  ;;  %v6981_v5 = vld [vmem:[#allocation7 + $0x8] sm:$0xff] }
0x1087   :  { %4192 = vmatpush.bf16.msrb.mxu2 %v9931_v17  ;;  %v6986_v17 = vld [vmem:[%s9631_s8 + $0x20] sm:$0xff] }
0x1089   :  { %4203 = vmatpush.bf16.msra.mxu3 %v9920_v23  ;;  %v6982_v23 = vld [vmem:[#allocation7] sm:$0xff] }
0x108b   :  { %4193 = vmatpush.bf16.msrb.mxu2 %v9932_v61 }
0x108d   :  { %4204 = vmatpush.bf16.msra.mxu3 %v9921_v22  ;;  %v6792_v22 = vld [vmem:[#allocation13 + $0x16] ss:$0 sm:$0xff] }
0x108f   :  { %4194 = vmatpush.bf16.msrb.mxu2 %v9933_v55  ;;  %v6987_v55 = vld [vmem:[%s9631_s8 + $0x18] sm:$0xff] }
0x1091   :  { %4205 = vmatpush.bf16.msra.mxu3 %v9922_v11 }
0x1095   :  { %4206 = vmatpush.bf16.msra.mxu3 %v9923_v52 }
0x1099   :  { %4207 = vmatpush.bf16.msra.mxu3 %v9924_v26  ;;  %v9943_v26 = vld [vmem:[#allocation39_spill] sm:$0xff] }
0x109d   :  { %4208 = vmatpush.bf16.msra.mxu3 %v9925_v32 }
0x10f3   :  { %v3992_v33 = vpop.f32.mrf.mxu2 }
0x10fb   :  { %v3994_v20 = vpop.f32.mrf.mxu2 }
0x1103   :  { %v4006_v31 = vpop.f32.mrf.mxu3 }
0x1104   :  { %v4007_v13 = vadd.f32 %v4006_v31, %v3992_v33  ;;  %v6988_v31 = vld [vmem:[%s9631_s8 + $0x10] sm:$0xff] }
0x110b   :  { %v4008_v24 = vpop.f32.mrf.mxu3 }
0x110c   :  { %v4009_v57 = vadd.f32 %v4008_v24, %v3994_v20  ;;  %v6989_v24 = vld [vmem:[%s9631_s8 + $0x8] sm:$0xff] }
0x110e   :  { %v4048_v49 = vpack.c.bf16 %v4009_v57, %v4007_v13  ;;  %v6990_v57 = vld [vmem:[%s9631_s8] sm:$0xff] }
0x1110   :  { %4107 = vmatmul.bf16.vlgmr.msra.gmra.mxu2 %v4048_v49  ;;  %v6991_v49 = vld [vmem:[#allocation4 + $0x18] sm:$0xff] }
0x1111   :  { %4229 = vmatpush.bf16.msra.mxu2 %v9934_v48 }
0x1115   :  { %4230 = vmatpush.bf16.msra.mxu2 %v9935_v46  ;;  %v9945_v46 = vld [vmem:[#allocation23_spill] sm:$0xff] }
0x1119   :  { %4231 = vmatpush.bf16.msra.mxu2 %v9936_v1 }
0x111d   :  { %4232 = vmatpush.bf16.msra.mxu2 %v9937_v45  ;;  %v9946_v45 = vld [vmem:[#allocation24_spill] sm:$0xff] }
0x1120   :  { %4195 = vmatmul.bf16.vlgmr.msrb.gmra.mxu2 %v9938_v39 }
0x1121   :  { %4233 = vmatpush.bf16.msra.mxu2 %v9939_v50 }
0x1125   :  { %4234 = vmatpush.bf16.msra.mxu2 %v9940_v35  ;;  %v6992_v35 = vld [vmem:[#allocation4 + $0x10] sm:$0xff] }
0x1129   :  { %4235 = vmatpush.bf16.msra.mxu2 %v9941_v36 }
0x112d   :  { %4236 = vmatpush.bf16.msra.mxu2 %v9942_v47  ;;  %v6993_v47 = vld [vmem:[#allocation4 + $0x8] sm:$0xff] }
0x1130   :  { %4237 = vmatmul.bf16.vlgmr.msra.gmra.mxu2 %v9938_v39 }
0x1131   :  { %4297 = vmatpush.bf16.msrb.mxu2 %v6967_v18 }
0x1135   :  { %4298 = vmatpush.bf16.msrb.mxu2 %v6968_v29 }
0x1139   :  { %4299 = vmatpush.bf16.msrb.mxu2 %v6969_v60  ;;  %v6994_v60 = vld [vmem:[#allocation4] sm:$0xff] }
0x113d   :  { %4300 = vmatpush.bf16.msrb.mxu2 %v6970_v41  ;;  %v9947_v41 = vld [vmem:[#allocation20_spill] sm:$0xff] }
0x1141   :  { %4301 = vmatpush.bf16.msrb.mxu2 %v6971_v54  ;;  %v9948_v54 = vld [vmem:[#allocation21_spill] sm:$0xff] }
0x1145   :  { %4302 = vmatpush.bf16.msrb.mxu2 %v6972_v59  ;;  %v9949_v59 = vld [vmem:[#allocation31_spill] sm:$0xff] }
0x1149   :  { %4303 = vmatpush.bf16.msrb.mxu2 %v6973_v58  ;;  %v9950_v58 = vld [vmem:[#allocation32_spill] sm:$0xff] }
0x114d   :  { %4304 = vmatpush.bf16.msrb.mxu2 %v6974_v21 }
0x1151   :  { %4426 = vmatpush.bf16.msra.mxu2 %v6975_v38 }
0x1155   :  { %4427 = vmatpush.bf16.msra.mxu2 %v6976_v28 }
0x1159   :  { %4428 = vmatpush.bf16.msra.mxu2 %v6977_v63 }
0x115d   :  { %4429 = vmatpush.bf16.msra.mxu2 %v6978_v40 }
0x1161   :  { %4430 = vmatpush.bf16.msra.mxu2 %v6979_v25 }
0x1165   :  { %4431 = vmatpush.bf16.msra.mxu2 %v6980_v3 }
0x1169   :  { %4432 = vmatpush.bf16.msra.mxu2 %v6981_v5 }
0x116d   :  { %4433 = vmatpush.bf16.msra.mxu2 %v6982_v23 }
0x1193   :  { %v4108_v11 = vpop.f32.mrf.mxu2 }
0x1194   :  { %v4109_v52 = vadd.f32 %v6792_v22, %v4108_v11 }
0x1196   :  { %v9471_v32 = vadd.f32 %v4109_v52, %v9943_v26 }
0x1198   :  { %4135 = vmatmul.f32.vlgmr.msrb.gmra.mxu3 %v9471_v32  ;;  %v4117_v61 = vmul.f32 %v9471_v32, %v9471_v32 }
0x1199   :  { %4255 = vmatpush.bf16.msrb.mxu3 %v6983_v51 }
0x119b   :  { %v4110_v62 = vpop.f32.mrf.mxu2 }
0x119c   :  { %v4111_v4 = vadd.f32 %v6792_v22, %v4110_v62 }
0x119d   :  { %4256 = vmatpush.bf16.msrb.mxu3 %v6984_v0 }
0x119e   :  { %v9481_v8 = vadd.f32 %v4111_v4, %v9944_v27 }
0x11a0   :  { %4138 = vmatmul.f32.gmra.mxu3 %v9481_v8  ;;  %v4118_v20 = vmul.f32 %v9481_v8, %v9481_v8 }
0x11a1   :  { %4257 = vmatpush.bf16.msrb.mxu3 %v6985_v37 }
0x11a3   :  { %v4196_v42 = vpop.f32.mrf.mxu2 }
0x11a4   :  { %v4243_v29 = vmul.f32 %v4196_v42, %v9945_v46 }
0x11a5   :  { %4258 = vmatpush.bf16.msrb.mxu3 %v6986_v17 }
0x11a8   :  { %4141 = vmatmul.f32.gmra.mxu3 %v4117_v61 }
0x11a9   :  { %4259 = vmatpush.bf16.msrb.mxu3 %v6987_v55 }
0x11ab   :  { %v4198_v33 = vpop.f32.mrf.mxu2 }
0x11ac   :  { %v4247_v18 = vmul.f32 %v4198_v33, %v9946_v45 }
0x11ad   :  { %4260 = vmatpush.bf16.msrb.mxu3 %v6988_v31 }
0x11b0   :  { %4144 = vmatmul.f32.gmra.mxu3 %v4118_v20 }
0x11b1   :  { %4261 = vmatpush.bf16.msrb.mxu3 %v6989_v24 }
0x11b3   :  { %v4238_v13 = vpop.f32.mrf.mxu2 }
0x11b4   :  { %v4246_v1 = vmul.f32 %v4238_v13, %v9945_v46 }
0x11b5   :  { %4262 = vmatpush.bf16.msrb.mxu3 %v6990_v57 }
0x11b8   :  { %4209 = vmatmul.bf16.vlgmr.msra.gmra.mxu3 %v9938_v39  ;;  %v4251_v39 = vpack.c.bf16 %v4247_v18, %v4243_v29  ;;  %v9952_v29 = vld [vmem:[#allocation89_spill] sm:$0xff] }
0x11b9   :  { %4331 = vmatpush.bf16.msra.mxu3 %v6991_v49 }
0x11bb   :  { %v4240_v48 = vpop.f32.mrf.mxu2 }
0x11bc   :  { %v4250_v50 = vmul.f32 %v4240_v48, %v9946_v45 }
0x11bd   :  { %4332 = vmatpush.bf16.msra.mxu3 %v6992_v35 }
0x11be   :  { %v4254_v36 = vpack.c.bf16 %v4250_v50, %v4246_v1 }
0x11c0   :  { %4305 = vmatmul.bf16.vlgmr.msrb.gmra.mxu2 %v4254_v36  ;;  %v9951_v36 = vld [vmem:[#allocation88_spill] sm:$0xff] }
0x11c1   :  { %4333 = vmatpush.bf16.msra.mxu3 %v6993_v47 }
0x11c5   :  { %4334 = vmatpush.bf16.msra.mxu3 %v6994_v60 }
0x11c8   :  { %4263 = vmatmul.bf16.vlgmr.msrb.gmra.mxu3 %v4251_v39  ;;  %v4292_v39 = vpop.f32.mrf.mxu0 }
0x11c9   :  { %4376 = vmatpush.bf16.msrb.mxu3 %v9947_v41 }
0x11cd   :  { %4377 = vmatpush.bf16.msrb.mxu3 %v9948_v54 }
0x11d1   :  { %4378 = vmatpush.bf16.msrb.mxu3 %v9949_v59 }
0x11d5   :  { %4379 = vmatpush.bf16.msrb.mxu3 %v9950_v58 }
0x121b   :  { %v4136_v21 = vpop.f32.mrf.mxu3 }
0x121c   :  { %v4148_v28 = vmul.f32 %v4136_v21, %v4136_v21  ;;  %v4154_v33 = vsub.f32 %v9471_v32, %v4136_v21 }
0x1223   :  { %v4139_v38 = vpop.f32.mrf.mxu3 }
0x1224   :  { %v4149_v5 = vmul.f32 %v4139_v38, %v4139_v38  ;;  %v4155_v32 = vsub.f32 %v9481_v8, %v4139_v38 }
0x122b   :  { %v4142_v63 = vpop.f32.mrf.mxu3 }
0x122c   :  { %v4150_v40 = vsub.f32 %v4142_v63, %v4148_v28 }
0x122e   :  { %v4152_v25 = vmax.f32 %v4150_v40, 0.0  ;;  %v4294_v40 = vpop.f32.mrf.mxu0 }
0x1230   :  { %v4156_v3 = vadd.f32 1e-05, %v4152_v25 }
0x1232   :  { %6855 = vrsqrt.f32 %v4156_v3  ;;  %vm4164_vm1 = vweird.f32 %v4156_v3 }
0x1233   :  { %v4145_v23 = vpop.f32.mrf.mxu3 }
0x1234   :  { %v4151_v22 = vsub.f32 %v4145_v23, %v4149_v5 }
0x1236   :  { %v4153_v11 = vmax.f32 %v4151_v22, 0.0 }
0x1238   :  { %v6856_v52 = vpop.eup %6855  ;;  %v4157_v51 = vadd.f32 1e-05, %v4153_v11 }
0x1239   :  { %v4159_v62 = vmul.f32 %v6856_v52, %v4156_v3  ;;  %vm4165_vm0 = vweird.f32 %v6856_v52 }
0x123a   :  { %6857 = vrsqrt.f32 %v4157_v51  ;;  %vm4166_vm2 = vmor %vm4164_vm1, %vm4165_vm0  ;;  %vm4174_vm11 = vweird.f32 %v4157_v51 }
0x123b   :  { %v4160_v4 = vmul.f32 %v6856_v52, %v4159_v62  ;;  %v4210_v0 = vpop.f32.mrf.mxu3 }
0x123c   :  { %v4244_v57 = vmul.f32 %v4210_v0, %v9945_v46  ;;  %v9953_v46 = vld [vmem:[#allocation90_spill] sm:$0xff] }
0x123d   :  { %v4161_v37 = vmul.f32 0.5, %v4160_v4 }
0x123f   :  { %v4162_v42 = vsub.f32 1.5, %v4161_v37 }
0x1240   :  { %v6858_v17 = vpop.eup %6857 }
0x1241   :  { %v4163_v61 = vmul.f32 %v6856_v52, %v4162_v42  ;;  %v4169_v55 = vmul.f32 %v6858_v17, %v4157_v51  ;;  %vm4175_vm10 = vweird.f32 %v6858_v17 }
0x1242   :  { %vm4176_vm12 = vmor %vm4174_vm11, %vm4175_vm10 }
0x1243   :  { %v4167_v31 = vsel %vm4166_vm2, %v6856_v52, %v4163_v61  ;;  %v4170_v20 = vmul.f32 %v6858_v17, %v4169_v55  ;;  %v4212_v24 = vpop.f32.mrf.mxu3  ;;  %v4306_v59 = vpop.f32.mrf.mxu2  ;;  %v6996_v61 = vld [vmem:[#allocation7 + $0x70] sm:$0xff]  ;;  %v6997_v55 = vld [vmem:[#allocation7 + $0x68] sm:$0xff] }
0x1244   :  { %v9516_v13 = vmul.f32 %v4167_v31, %v4154_v33  ;;  %v4248_v49 = vmul.f32 %v4212_v24, %v9946_v45  ;;  %v9954_v45 = vld [vmem:[#allocation91_spill] sm:$0xff]  ;;  %v7001_v24 = vld [vmem:[#allocation7 + $0x48] sm:$0xff] }
0x1245   :  { %v4171_v48 = vmul.f32 0.5, %v4170_v20  ;;  %v6998_v33 = vld [vmem:[#allocation7 + $0x60] sm:$0xff]  ;;  %v6999_v31 = vld [vmem:[#allocation7 + $0x58] sm:$0xff]  ;;  %v7000_v20 = vld [vmem:[#allocation7 + $0x50] sm:$0xff] }
0x1246   :  { %v4252_v1 = vpack.c.bf16 %v4248_v49, %v4244_v57  ;;  %v7002_v57 = vld [vmem:[#allocation7 + $0x40] sm:$0xff] }
0x1247   :  { %v4172_v50 = vsub.f32 1.5, %v4171_v48 }
0x1248   :  { %4277 = vmatmul.bf16.vlgmr.msrb.gmra.mxu1 %v4252_v1 }
0x1249   :  { %v4173_v35 = vmul.f32 %v6858_v17, %v4172_v50  ;;  %4404 = vmatpush.bf16.msrb.mxu1 %v9951_v36 }
0x124b   :  { %v4177_v47 = vsel %vm4176_vm12, %v6858_v17, %v4173_v35  ;;  %v4264_v60 = vpop.f32.mrf.mxu3  ;;  %v4308_v3 = vpop.f32.mrf.mxu2  ;;  %v6995_v17 = vld [vmem:[#allocation7 + $0x78] sm:$0xff] }
0x124c   :  { %v9522_v18 = vmul.f32 %v4177_v47, %v4155_v32 }
0x124d   :  { %4405 = vmatpush.bf16.msrb.mxu1 %v9952_v29 }
0x1251   :  { %4406 = vmatpush.bf16.msrb.mxu1 %v9953_v46  ;;  %v7003_v46 = vld [vmem:[#allocation7 + $0xf8] sm:$0xff] }
0x1253   :  { %v4266_v8 = vpop.f32.mrf.mxu3 }
0x1255   :  { %4407 = vmatpush.bf16.msrb.mxu1 %v9954_v45  ;;  %v7004_v45 = vld [vmem:[#allocation7 + $0xf0] sm:$0xff] }
0x12c5   :  { %v4278_v41 = vpop.f32.mrf.mxu1 }
0x12c6   :  { %v4279_v54 = vadd.f32 %v4278_v41, %v4264_v60  ;;  %v7005_v60 = vld [vmem:[#allocation7 + $0xe8] sm:$0xff]  ;;  %v7007_v41 = vld [vmem:[#allocation7 + $0xd8] sm:$0xff] }
0x12c8   :  { %v4293_v58 = vadd.f32 %v4292_v39, %v4279_v54  ;;  %v7006_v39 = vld [vmem:[#allocation7 + $0xe0] sm:$0xff]  ;;  %v7008_v54 = vld [vmem:[#allocation7 + $0xd0] sm:$0xff] }
0x12ca   :  { %v4307_v21 = vadd.f32 %v4306_v59, %v4293_v58  ;;  %v7009_v59 = vld [vmem:[#allocation7 + $0xc8] sm:$0xff]  ;;  %v7010_v58 = vld [vmem:[#allocation7 + $0xc0] sm:$0xff] }
0x12cc   :  { %v4311_v28 = vsel %vm2329_vm6, %v4307_v21, -inf }
0x12cd   :  { %v4280_v38 = vpop.f32.mrf.mxu1  ;;  %4312 = vmax.xlane.f32.xlu0 %v4311_v28 }
0x12ce   :  { %v4281_v63 = vadd.f32 %v4280_v38, %v4266_v8  ;;  %v6315_v8 = vld [vmem:[#allocation12 + $0x4cc] sm:$0xf]  ;;  %v6728_v38 = vld [vmem:[#allocation12 + $0x4f0] sm:$0xf0] }
0x12d0   :  { %v4295_v25 = vadd.f32 %v4294_v40, %v4281_v63  ;;  %v6316_v63 = vor.u32 %v6728_v38, %v6315_v8  ;;  %v6722_v8 = vld [vmem:[#allocation12 + $0x310] sm:$0xf0] }
0x12d2   :  { %v4309_v5 = vadd.f32 %v4308_v3, %v4295_v25  ;;  %4549 = vmatpush.bf16.msrb.mxu2 %v6316_v63  ;;  %v6791_v3 = vld [vmem:[#allocation13 + $0x15] ss:$0 sm:$0xff]  ;;  %v6287_v63 = vld [vmem:[#allocation12 + $0x29c] sm:$0xf] }
0x12d4   :  { %v4314_v23 = vsel %vm2329_vm6, %v4309_v5, -inf }
0x12d5   :  { %4315 = vmax.xlane.f32.xlu1 %v4314_v23  ;;  %v9955_v23 = vld [vmem:[#allocation27_spill] sm:$0xff] }
0x1340   :  { %v4313_v22 = vpop.xlane.xlu0 %4312 }
0x1341   :  { %v4317_v11 = vsub.f32 %v4307_v21, %v4313_v22  ;;  %v3586_v22 = vadd.f32 %v6791_v3, %v9955_v23 }
0x1343   :  { %v4319_v52 = vmul.f32 1.442695, %v4317_v11  ;;  %v9956_v11 = vld [vmem:[#allocation28_spill] sm:$0xff] }
0x1345   :  { %6859 = vpow2.f32 %v4319_v52  ;;  %v3587_v52 = vadd.f32 %v6791_v3, %v9956_v11 }
0x1348   :  { %v4316_v51 = vpop.xlane.xlu1 %4315 }
0x1349   :  { %v4318_v62 = vsub.f32 %v4309_v5, %v4316_v51 }
0x134b   :  { %v4321_v4 = vmul.f32 1.442695, %v4318_v62  ;;  %v6860_v0 = vpop.eup %6859 }
0x134d   :  { %6861 = vpow2.f32 %v4321_v4 }
0x1353   :  { %v6862_v37 = vpop.eup %6861 }
0x1354   :  { %v4323_v42 = vpack.c.bf16 %v6862_v37, %v6860_v0 }
0x1356   :  { %6279 = vmatmul.msk.bf16.vlgmr.msra.gmra.mxu3 %vm2329_vm6, %v4323_v42 }
0x1357   :  { %4440 = vmatpush.bf16.msra.mxu3 %v6995_v17 }
0x135b   :  { %4441 = vmatpush.bf16.msra.mxu3 %v6996_v61 }
0x135f   :  { %4442 = vmatpush.bf16.msra.mxu3 %v6997_v55 }
0x1363   :  { %4443 = vmatpush.bf16.msra.mxu3 %v6998_v33 }
0x1367   :  { %4444 = vmatpush.bf16.msra.mxu3 %v6999_v31 }
0x136b   :  { %4445 = vmatpush.bf16.msra.mxu3 %v7000_v20 }
0x136f   :  { %4446 = vmatpush.bf16.msra.mxu3 %v7001_v24 }
0x1373   :  { %4447 = vmatpush.bf16.msra.mxu3 %v7002_v57 }
0x13d9   :  { %v4336_v49 = vpop.f32.mrf.mxu3 }
0x13da   :  { %v4341_v48 = vmax.f32 %v4336_v49, 1e-30 }
0x13dc   :  { %6863 = vrcp.f32 %v4341_v48 }
0x13e1   :  { %v4338_v1 = vpop.f32.mrf.mxu3 }
0x13e2   :  { %v4342_v50 = vmax.f32 %v4338_v1, 1e-30  ;;  %v6864_v35 = vpop.eup %6863 }
0x13e3   :  { %v4345_v32 = vmul.f32 %v6864_v35, %v6860_v0  ;;  %v6727_v35 = vld [vmem:[#allocation12 + $0x4a0] sm:$0xf0] }
0x13e4   :  { %6865 = vrcp.f32 %v4342_v50  ;;  %v6311_v50 = vld [vmem:[#allocation12 + $0x47c] sm:$0xf] }
0x13ea   :  { %v6866_v36 = vpop.eup %6865 }
0x13eb   :  { %v4346_v47 = vmul.f32 %v6866_v36, %v6862_v37  ;;  %v6312_v36 = vor.u32 %v6727_v35, %v6311_v50  ;;  %v6327_v50 = vld [vmem:[#allocation12 + $0x340] sm:$0xf]  ;;  %v6731_v35 = vld [vmem:[#allocation12 + $0x364] sm:$0xf0] }
0x13ed   :  { %4348 = vrot.lane.b32.xlu0 %v4346_v47, %s7216_s21  ;;  %v4354_v29 = vpack.c.bf16 %v4346_v47, %v4345_v32  ;;  %4550 = vmatpush.bf16.msrb.mxu2 %v6312_v36  ;;  %v6726_v47 = vld [vmem:[#allocation12 + $0x450] sm:$0xf0] }
0x13ef   :  { %6281 = vmatmul.msk.bf16.vlgmr.msra.gmra.mxu1 %vm2329_vm6, %v4354_v29  ;;  %6282 = vmatmul.msk.bf16.vlgmr.msrb.gmra.mxu3 %vm2329_vm6, %v4354_v29 }
0x13f0   :  { %6283 = vmatmul.msk.bf16.vlgmr.msrb.gmra.mxu0 %vm2329_vm6, %v4354_v29  ;;  %4468 = vmatpush.bf16.msra.mxu1 %v7003_v46  ;;  %v6303_v46 = vld [vmem:[#allocation12 + $0x3dc] sm:$0xf] }
0x13f1   :  { %4569 = vmatpush.msrb.mxu3 %v9317_v16 }
0x13f3   :  { %4570 = vmatpush.msrb.mxu3 %v9323_v44 }
0x13f4   :  { %4469 = vmatpush.bf16.msra.mxu1 %v7004_v45  ;;  %v6725_v45 = vld [vmem:[#allocation12 + $0x400] sm:$0xf0] }
0x13f5   :  { %4571 = vmatpush.msrb.mxu3 %v9329_v34 }
0x13f7   :  { %4572 = vmatpush.msrb.mxu3 %v9335_v19 }
0x13f8   :  { %4470 = vmatpush.bf16.msra.mxu1 %v7005_v60  ;;  %v6304_v60 = vor.u32 %v6725_v45, %v6303_v46  ;;  %v6323_v46 = vld [vmem:[#allocation12 + $0x2f0] sm:$0xf]  ;;  %v6730_v45 = vld [vmem:[#allocation12 + $0x314] sm:$0xf0] }
0x13f9   :  { %4573 = vmatpush.msrb.mxu3 %v9341_v53 }
0x13fb   :  { %4574 = vmatpush.msrb.mxu3 %v9347_v6 }
0x13fc   :  { %4471 = vmatpush.bf16.msra.mxu1 %v7006_v39  ;;  %v6299_v39 = vld [vmem:[#allocation12 + $0x38c] sm:$0xf] }
0x13fd   :  { %4575 = vmatpush.msrb.mxu3 %v9353_v15 }
0x13ff   :  { %6284 = vmatmul.msk.bf16.vlgmr.msrb.gmra.mxu1 %vm2329_vm6, %v4354_v29  ;;  %4576 = vmatpush.msrb.mxu3 %v9359_v43 }
0x1400   :  { %4472 = vmatpush.bf16.msra.mxu1 %v7007_v41  ;;  %v6724_v41 = vld [vmem:[#allocation12 + $0x3b0] sm:$0xf0] }
0x1401   :  { %4577 = vmatpush.msrb.mxu3 %v9365_v10 }
0x1403   :  { %4578 = vmatpush.msrb.mxu3 %v9371_v2 }
0x1404   :  { %4473 = vmatpush.bf16.msra.mxu1 %v7008_v54  ;;  %v6300_v54 = vor.u32 %v6724_v41, %v6299_v39  ;;  %v6324_v39 = vor.u32 %v6730_v45, %v6323_v46  ;;  %v6739_v46 = vld [vmem:[#allocation12 + $0x368] sm:$0xf0]  ;;  %v6355_v45 = vld [vmem:[#allocation12 + $0x2f4] sm:$0xf] }
0x1405   :  { %4579 = vmatpush.msrb.mxu3 %v9377_v30 }
0x1407   :  { %4580 = vmatpush.msrb.mxu3 %v9383_v9 }
0x1408   :  { %4474 = vmatpush.bf16.msra.mxu1 %v7009_v59  ;;  %v6295_v59 = vld [vmem:[#allocation12 + $0x33c] sm:$0xf] }
0x1409   :  { %4581 = vmatpush.msrb.mxu3 %v9389_v12 }
0x140b   :  { %4582 = vmatpush.msrb.mxu3 %v9395_v7 }
0x140c   :  { %4475 = vmatpush.bf16.msra.mxu1 %v7010_v58  ;;  %v6723_v58 = vld [vmem:[#allocation12 + $0x360] sm:$0xf0] }
0x140d   :  { %4583 = vmatpush.msrb.mxu3 %v9401_v14 }
0x140f   :  { %4584 = vmatpush.msrb.mxu3 %v9407_v56 }
0x145f   :  { %v4349_v21 = vpop.permute.xlu0 %4348 }
0x1460   :  { %v4351_v28 = vsel %vm2329_vm6, %v4345_v32, %v4349_v21  ;;  %v6307_v32 = vld [vmem:[#allocation12 + $0x42c] sm:$0xf]  ;;  %v6296_v21 = vor.u32 %v6723_v58, %v6295_v59  ;;  %v6729_v59 = vld [vmem:[#allocation12 + $0x2c4] sm:$0xf0] }
0x1461   :  { %6280 = vst [vmem:[%s9641_s18 - $0x6] sm:$0x80] %v4351_v28  ;;  %v6308_v29 = vor.u32 %v6726_v47, %v6307_v32  ;;  %v6291_v28 = vld [vmem:[#allocation12 + $0x2ec] sm:$0xf]  ;;  %v6328_v32 = vor.u32 %v6731_v35, %v6327_v50 }
0x1462   :  { %v6292_v38 = vor.u32 %v6722_v8, %v6291_v28 }
0x1463   :  { %4551 = vmatpush.bf16.msrb.mxu2 %v6308_v29 }
0x1467   :  { %4552 = vmatpush.bf16.msrb.mxu2 %v6304_v60 }
0x146b   :  { %4553 = vmatpush.bf16.msrb.mxu2 %v6300_v54  ;;  %v6319_v54 = vld [vmem:[#allocation12 + $0x2a0] sm:$0xf] }
0x146c   :  { %v4367_v40 = vpop.f32.mrf.mxu1  ;;  %v6320_v58 = vor.u32 %v6729_v59, %v6319_v54 }
0x146d   :  { %v4395_v25 = vpop.f32.mrf.mxu0  ;;  %v4414_v62 = vmul.f32 %v4367_v40, %v3586_v22  ;;  %v6721_v40 = vld [vmem:[#allocation12 + $0x2c0] sm:$0xf0] }
0x146e   :  { %v4416_v37 = vmul.f32 %v4395_v25, %v3586_v22  ;;  %v6288_v25 = vor.u32 %v6721_v40, %v6287_v63  ;;  %v6379_v63 = vld [vmem:[#allocation12 + $0x4d4] sm:$0xf]  ;;  %v6744_v40 = vld [vmem:[#allocation12 + $0x4f8] sm:$0xf0] }
0x146f   :  { %4554 = vmatpush.bf16.msrb.mxu2 %v6296_v21 }
0x1472   :  { %v4381_v5 = vpop.f32.mrf.mxu3 }
0x1473   :  { %v4415_v33 = vmul.f32 %v4381_v5, %v3586_v22  ;;  %4555 = vmatpush.bf16.msrb.mxu2 %v6292_v38 }
0x1474   :  { %v4369_v51 = vpop.f32.mrf.mxu1 }
0x1475   :  { %v4418_v4 = vmul.f32 %v4369_v51, %v3587_v52  ;;  %v4397_v0 = vpop.f32.mrf.mxu0 }
0x1476   :  { %v4420_v42 = vmul.f32 %v4397_v0, %v3587_v52 }
0x1477   :  { %v4422_v17 = vpack.c.bf16 %v4418_v4, %v4414_v62  ;;  %4556 = vmatpush.bf16.msrb.mxu2 %v6288_v25  ;;  %v6347_v4 = vld [vmem:[#allocation12 + $0x4d0] sm:$0xf]  ;;  %v6380_v25 = vor.u32 %v6744_v40, %v6379_v63 }
0x1478   :  { %v4424_v61 = vpack.c.bf16 %v4420_v42, %v4416_v37  ;;  %v6343_v37 = vld [vmem:[#allocation12 + $0x480] sm:$0xf]  ;;  %v6735_v42 = vld [vmem:[#allocation12 + $0x4a4] sm:$0xf0] }
0x1479   :  { %4434 = vmatmul.bf16.vlgmr.msra.gmra.mxu2 %v4422_v17  ;;  %v6344_v17 = vor.u32 %v6735_v42, %v6343_v37  ;;  %4788 = vmatpush.bf16.msrb.mxu1 %v6380_v25  ;;  %v6793_v37 = vld [vmem:[#allocation13 + $0x1a] ss:$0 sm:$0xff]  ;;  %v6799_v25 = vld [vmem:[#allocation13 + $0x19] ss:$0 sm:$0xff] }
0x147a   :  { %4462 = vmatmul.bf16.vlgmr.msra.gmra.mxu0 %v4424_v61  ;;  %v4383_v55 = vpop.f32.mrf.mxu3 }
0x147b   :  { %v4419_v31 = vmul.f32 %v4383_v55, %v3587_v52  ;;  %4808 = vmatpush.msra.mxu2 %v9317_v16  ;;  %v6734_v55 = vld [vmem:[#allocation12 + $0x454] sm:$0xf0] }
0x147c   :  { %v4409_v20 = vpop.f32.mrf.mxu1 }
0x147d   :  { %v4423_v24 = vpack.c.bf16 %v4419_v31, %v4415_v33  ;;  %v4417_v49 = vmul.f32 %v4409_v20, %v3586_v22  ;;  %4809 = vmatpush.msra.mxu2 %v9323_v44  ;;  %v6335_v31 = vld [vmem:[#allocation12 + $0x3e0] sm:$0xf]  ;;  %v6733_v20 = vld [vmem:[#allocation12 + $0x404] sm:$0xf0] }
0x147f   :  { %4448 = vmatmul.bf16.vlgmr.msra.gmra.mxu3 %v4423_v24  ;;  %4810 = vmatpush.msra.mxu2 %v9329_v34  ;;  %v6336_v24 = vor.u32 %v6733_v20, %v6335_v31  ;;  %v4181_v31 = vmul.f32 %v6793_v37, %v9516_v13  ;;  %v6794_v20 = vld [vmem:[#allocation13 + $0x1d] ss:$0 sm:$0xff] }
0x1481   :  { %4811 = vmatpush.msra.mxu2 %v9335_v19 }
0x1483   :  { %4812 = vmatpush.msra.mxu2 %v9341_v53 }
0x1484   :  { %v4411_v57 = vpop.f32.mrf.mxu1 }
0x1485   :  { %v4421_v48 = vmul.f32 %v4411_v57, %v3587_v52  ;;  %4813 = vmatpush.msra.mxu2 %v9347_v6 }
0x1487   :  { %v4425_v1 = vpack.c.bf16 %v4421_v48, %v4417_v49  ;;  %4814 = vmatpush.msra.mxu2 %v9353_v15  ;;  %v6331_v49 = vld [vmem:[#allocation12 + $0x390] sm:$0xf]  ;;  %v6732_v48 = vld [vmem:[#allocation12 + $0x3b4] sm:$0xf0] }
0x1489   :  { %4476 = vmatmul.bf16.vlgmr.msra.gmra.mxu1 %v4425_v1  ;;  %4815 = vmatpush.msra.mxu2 %v9359_v43  ;;  %v6332_v1 = vor.u32 %v6732_v48, %v6331_v49  ;;  %v4184_v48 = vadd.f32 %v6794_v20, %v4181_v31  ;;  %v6746_v31 = vld [vmem:[#allocation9 + $0x18] sm:$0xf0] }
0x148b   :  { %4816 = vmatpush.msra.mxu2 %v9365_v10 }
0x148d   :  { %4817 = vmatpush.msra.mxu2 %v9371_v2 }
0x148f   :  { %4818 = vmatpush.msra.mxu2 %v9377_v30 }
0x1491   :  { %4819 = vmatpush.msra.mxu2 %v9383_v9  ;;  %v6795_v9 = vld [vmem:[#allocation13 + $0x17] ss:$0 sm:$0xff] }
0x1493   :  { %4820 = vmatpush.msra.mxu2 %v9389_v12 }
0x1495   :  { %4821 = vmatpush.msra.mxu2 %v9395_v7 }
0x1497   :  { %4822 = vmatpush.msra.mxu2 %v9401_v14 }
0x1499   :  { %4823 = vmatpush.msra.mxu2 %v9407_v56 }
0x14f7   :  { %v4463_v5 = vpop.f32.mrf.mxu0 }
0x14fc   :  { %v4435_v3 = vpop.f32.mrf.mxu2 }
0x14ff   :  { %v4465_v15 = vpop.f32.mrf.mxu0 }
0x1502   :  { %v4449_v23 = vpop.f32.mrf.mxu3 }
0x1503   :  { %v4450_v44 = vadd.f32 %v4449_v23, %v4435_v3  ;;  %v6375_v3 = vld [vmem:[#allocation12 + $0x484] sm:$0xf] }
0x1504   :  { %v4437_v34 = vpop.f32.mrf.mxu2 }
0x1505   :  { %v4464_v53 = vadd.f32 %v4463_v5, %v4450_v44  ;;  %v6743_v5 = vld [vmem:[#allocation12 + $0x4a8] sm:$0xf0] }
0x1506   :  { %v4477_v16 = vpop.f32.mrf.mxu1 }
0x1507   :  { %v4478_v10 = vadd.f32 %v4477_v16, %v4464_v53  ;;  %v6742_v53 = vld [vmem:[#allocation12 + $0x458] sm:$0xf0] }
0x150a   :  { %v4451_v19 = vpop.f32.mrf.mxu3 }
0x150b   :  { %v4452_v6 = vadd.f32 %v4451_v19, %v4437_v34  ;;  %v6376_v34 = vor.u32 %v6743_v5, %v6375_v3  ;;  %v6371_v19 = vld [vmem:[#allocation12 + $0x434] sm:$0xf] }
0x150d   :  { %v4466_v43 = vadd.f32 %v4465_v15, %v4452_v6  ;;  %4789 = vmatpush.bf16.msrb.mxu1 %v6376_v34 }
0x150e   :  { %v4479_v22 = vpop.f32.mrf.mxu1 }
0x150f   :  { %v4480_v2 = vadd.f32 %v4479_v22, %v4466_v43  ;;  %v6372_v43 = vor.u32 %v6742_v53, %v6371_v19  ;;  %v6367_v22 = vld [vmem:[#allocation12 + $0x3e4] sm:$0xf] }
0x1511   :  { %v4498_v30 = vpack.c.bf16 %v4480_v2, %v4478_v10  ;;  %v6741_v10 = vld [vmem:[#allocation12 + $0x408] sm:$0xf0]  ;;  %4790 = vmatpush.bf16.msrb.mxu1 %v6372_v43 }
0x1513   :  { %4557 = vmatmul.bf16.vlgmr.msrb.gmra.mxu2 %v4498_v30 }
0x1596   :  { %v4558_v11 = vpop.f32.mrf.mxu2 }
0x1597   :  { %v4559_v52 = vadd.f32 %v6795_v9, %v4558_v11 }
0x1599   :  { %v9574_v12 = vadd.f32 %v4559_v52, %v9943_v26  ;;  %v6736_v26 = vld [vmem:[#allocation12 + $0x4f4] sm:$0xf0]  ;;  %v6368_v52 = vor.u32 %v6741_v10, %v6367_v22  ;;  %v6407_v22 = vld [vmem:[#allocation9 + $0x64] sm:$0xf]  ;;  %v6751_v10 = vld [vmem:[#allocation9 + $0x68] sm:$0xf0] }
0x159a   :  { %v6348_v0 = vor.u32 %v6736_v26, %v6347_v4  ;;  %v6796_v26 = vld [vmem:[#allocation13 + $0x1b] ss:$0 sm:$0xff] }
0x159b   :  { %4585 = vmatmul.f32.vlgmr.msrb.gmra.mxu3 %v9574_v12  ;;  %v4567_v14 = vmul.f32 %v9574_v12, %v9574_v12  ;;  %4791 = vmatpush.bf16.msrb.mxu1 %v6368_v52 }
0x159c   :  { %4705 = vmatpush.bf16.msrb.mxu0 %v6348_v0 }
0x159e   :  { %v4560_v51 = vpop.f32.mrf.mxu2 }
0x159f   :  { %v4561_v7 = vadd.f32 %v6795_v9, %v4560_v51 }
0x15a0   :  { %4706 = vmatpush.bf16.msrb.mxu0 %v6344_v17 }
0x15a1   :  { %v9578_v62 = vadd.f32 %v4561_v7, %v9944_v27  ;;  %v6339_v27 = vld [vmem:[#allocation12 + $0x430] sm:$0xf] }
0x15a2   :  { %v6340_v33 = vor.u32 %v6734_v55, %v6339_v27  ;;  %v6797_v55 = vld [vmem:[#allocation13 + $0x1e] ss:$0 sm:$0xff] }
0x15a3   :  { %4588 = vmatmul.f32.gmra.mxu3 %v9578_v62  ;;  %v4568_v56 = vmul.f32 %v9578_v62, %v9578_v62 }
0x15a4   :  { %4707 = vmatpush.bf16.msrb.mxu0 %v6340_v33 }
0x15a8   :  { %4708 = vmatpush.bf16.msrb.mxu0 %v6336_v24 }
0x15ab   :  { %4591 = vmatmul.f32.gmra.mxu3 %v4567_v14 }
0x15ac   :  { %4709 = vmatpush.bf16.msrb.mxu0 %v6332_v1 }
0x15b0   :  { %4710 = vmatpush.bf16.msrb.mxu0 %v6328_v32 }
0x15b3   :  { %4594 = vmatmul.f32.gmra.mxu3 %v4568_v56 }
0x15b4   :  { %4711 = vmatpush.bf16.msrb.mxu0 %v6324_v39  ;;  %v6351_v39 = vld [vmem:[#allocation12 + $0x2a4] sm:$0xf] }
0x15b8   :  { %4712 = vmatpush.bf16.msrb.mxu0 %v6320_v58  ;;  %v6798_v58 = vld [vmem:[#allocation13 + $0x18] ss:$0 sm:$0xff] }
0x161e   :  { %v9585_v61 = vpop.f32.mrf.mxu3 }
0x161f   :  { %v4598_v36 = vmul.f32 %v9585_v61, %v9585_v61  ;;  %v4604_v14 = vsub.f32 %v9574_v12, %v9585_v61  ;;  %v4182_v12 = vmul.f32 %v6793_v37, %v9522_v18  ;;  %v6738_v18 = vld [vmem:[#allocation12 + $0x318] sm:$0xf0]  ;;  %v6391_v37 = vld [vmem:[#allocation9 + $0x24] sm:$0xf] }
0x1621   :  { %v4185_v1 = vadd.f32 %v6794_v20, %v4182_v12 }
0x1626   :  { %v9587_v57 = vpop.f32.mrf.mxu3 }
0x1627   :  { %v4599_v21 = vmul.f32 %v9587_v57, %v9587_v57  ;;  %v4605_v17 = vsub.f32 %v9578_v62, %v9587_v57  ;;  %v6363_v62 = vld [vmem:[#allocation12 + $0x394] sm:$0xf]  ;;  %v6740_v57 = vld [vmem:[#allocation12 + $0x3b8] sm:$0xf0] }
0x162e   :  { %v4592_v47 = vpop.f32.mrf.mxu3 }
0x162f   :  { %v4600_v29 = vsub.f32 %v4592_v47, %v4598_v36  ;;  %v6364_v47 = vor.u32 %v6740_v57, %v6363_v62 }
0x1631   :  { %v4602_v60 = vmax.f32 %v4600_v29, 0.0  ;;  %4792 = vmatpush.bf16.msrb.mxu1 %v6364_v47  ;;  %v6359_v29 = vld [vmem:[#allocation12 + $0x344] sm:$0xf] }
0x1632   :  { %v6360_v13 = vor.u32 %v6739_v46, %v6359_v29 }
0x1633   :  { %v4606_v41 = vadd.f32 1e-05, %v4602_v60  ;;  %v6356_v60 = vor.u32 %v6738_v18, %v6355_v45 }
0x1635   :  { %6867 = vrsqrt.f32 %v4606_v41  ;;  %vm4614_vm13 = vweird.f32 %v4606_v41  ;;  %4793 = vmatpush.bf16.msrb.mxu1 %v6360_v13 }
0x1636   :  { %v4595_v28 = vpop.f32.mrf.mxu3 }
0x1637   :  { %v4601_v8 = vsub.f32 %v4595_v28, %v4599_v21 }
0x1639   :  { %v4603_v38 = vmax.f32 %v4601_v8, 0.0  ;;  %4794 = vmatpush.bf16.msrb.mxu1 %v6356_v60 }
0x163b   :  { %v6868_v23 = vpop.eup %6867  ;;  %v4607_v16 = vadd.f32 1e-05, %v4603_v38 }
0x163c   :  { %v4609_v44 = vmul.f32 %v6868_v23, %v4606_v41  ;;  %vm4615_vm6 = vweird.f32 %v6868_v23  ;;  %v6737_v41 = vld [vmem:[#allocation12 + $0x2c8] sm:$0xf0] }
0x163d   :  { %6869 = vrsqrt.f32 %v4607_v16  ;;  %vm4616_vm14 = vmor %vm4614_vm13, %vm4615_vm6  ;;  %vm4624_vm3 = vweird.f32 %v4607_v16  ;;  %v6352_v54 = vor.u32 %v6737_v41, %v6351_v39 }
0x163e   :  { %v4610_v6 = vmul.f32 %v6868_v23, %v4609_v44 }
0x163f   :  { %4795 = vmatpush.bf16.msrb.mxu1 %v6352_v54 }
0x1640   :  { %v4611_v15 = vmul.f32 0.5, %v4610_v6  ;;  %v6411_v6 = vld [vmem:[#allocation9 + $0x74] sm:$0xf] }
0x1642   :  { %v4612_v2 = vsub.f32 1.5, %v4611_v15  ;;  %v6752_v15 = vld [vmem:[#allocation9 + $0x78] sm:$0xf0] }
0x1643   :  { %v6870_v30 = vpop.eup %6869  ;;  %v6412_v43 = vor.u32 %v6752_v15, %v6411_v6  ;;  %v7011_v15 = vld [vmem:[%s9748_s22] sm:$0xff] }
0x1644   :  { %v4613_v9 = vmul.f32 %v6868_v23, %v4612_v2  ;;  %v4619_v11 = vmul.f32 %v6870_v30, %v4607_v16  ;;  %vm4625_vm15 = vweird.f32 %v6870_v30  ;;  %v6408_v2 = vor.u32 %v6751_v10, %v6407_v22  ;;  %v7012_v10 = vld [vmem:[%s9748_s22 + $0x8] sm:$0xff] }
0x1645   :  { %vm4626_vm4 = vmor %vm4624_vm3, %vm4625_vm15  ;;  %4942 = vmatpush.bf16.msra.mxu3 %v6412_v43 }
0x1646   :  { %v4617_v51 = vsel %vm4616_vm14, %v6868_v23, %v4613_v9  ;;  %v4620_v7 = vmul.f32 %v6870_v30, %v4619_v11  ;;  %v6403_v9 = vld [vmem:[#allocation9 + $0x54] sm:$0xf]  ;;  %v6750_v11 = vld [vmem:[#allocation9 + $0x58] sm:$0xf0] }
0x1647   :  { %v4628_v4 = vmul.f32 %v4617_v51, %v4604_v14  ;;  %v6404_v52 = vor.u32 %v6750_v11, %v6403_v9  ;;  %v6399_v51 = vld [vmem:[#allocation9 + $0x44] sm:$0xf] }
0x1648   :  { %v4621_v56 = vmul.f32 0.5, %v4620_v7  ;;  %v6749_v7 = vld [vmem:[#allocation9 + $0x48] sm:$0xf0] }
0x1649   :  { %v4631_v27 = vmul.f32 %v6796_v26, %v4628_v4  ;;  %4943 = vmatpush.bf16.msra.mxu3 %v6408_v2  ;;  %v6400_v14 = vor.u32 %v6749_v7, %v6399_v51  ;;  %v6395_v4 = vld [vmem:[#allocation9 + $0x34] sm:$0xf] }
0x164a   :  { %v4622_v0 = vsub.f32 1.5, %v4621_v56 }
0x164b   :  { %v4634_v24 = vadd.f32 %v6797_v55, %v4631_v27 }
0x164c   :  { %v4623_v42 = vmul.f32 %v6870_v30, %v4622_v0 }
0x164d   :  { %v4636_v35 = vadd.f32 %v4634_v24, %v4184_v48  ;;  %4944 = vmatpush.bf16.msra.mxu3 %v6404_v52  ;;  %v6383_v24 = vld [vmem:[#allocation9 + $0x4] sm:$0xf] }
0x164e   :  { %v4627_v33 = vsel %vm4626_vm4, %v6870_v30, %v4623_v42  ;;  %v6747_v42 = vld [vmem:[#allocation9 + $0x28] sm:$0xf0] }
0x164f   :  { %v4629_v61 = vmul.f32 %v4627_v33, %v4605_v17  ;;  %v6392_v17 = vor.u32 %v6747_v42, %v6391_v37  ;;  %v6387_v33 = vld [vmem:[#allocation9 + $0x14] sm:$0xf] }
0x1650   :  { %v6388_v12 = vor.u32 %v6746_v31, %v6387_v33 }
0x1651   :  { %v4632_v49 = vmul.f32 %v6796_v26, %v4629_v61  ;;  %4945 = vmatpush.bf16.msra.mxu3 %v6400_v14  ;;  %v6748_v26 = vld [vmem:[#allocation9 + $0x38] sm:$0xf0] }
0x1652   :  { %v6396_v0 = vor.u32 %v6748_v26, %v6395_v4 }
0x1653   :  { %v4635_v50 = vadd.f32 %v6797_v55, %v4632_v49  ;;  %v6745_v49 = vld [vmem:[#allocation9 + $0x8] sm:$0xf0] }
0x1654   :  { %v6384_v48 = vor.u32 %v6745_v49, %v6383_v24 }
0x1655   :  { %v4637_v36 = vadd.f32 %v4635_v50, %v4185_v1  ;;  %4946 = vmatpush.bf16.msra.mxu3 %v6396_v0 }
0x1657   :  { %v4654_v32 = vpack.c.bf16 %v4637_v36, %v4636_v35 }
0x1659   :  { %4713 = vmatmul.bf16.vlgmr.msrb.gmra.mxu0 %v4654_v32  ;;  %4947 = vmatpush.bf16.msra.mxu3 %v6392_v17 }
0x165d   :  { %4948 = vmatpush.bf16.msra.mxu3 %v6388_v12 }
0x1661   :  { %4949 = vmatpush.bf16.msra.mxu3 %v6384_v48 }
0x16d6   :  { %v4714_v59 = vpop.f32.mrf.mxu0 }
0x16d7   :  { %v4715_v21 = vadd.f32 %v6798_v58, %v4714_v59 }
0x16d9   :  { %v4719_v38 = vmax.f32 %v4715_v21, 0.0 }
0x16de   :  { %v4716_v28 = vpop.f32.mrf.mxu0 }
0x16df   :  { %v4717_v8 = vadd.f32 %v6798_v58, %v4716_v28  ;;  %v6800_v28 = vld [vmem:[#allocation13 + $0x1c] ss:$0 sm:$0xff] }
0x16e1   :  { %v4720_v63 = vmax.f32 %v4717_v8, 0.0 }
0x16e3   :  { %v4737_v40 = vpack.c.bf16 %v4720_v63, %v4719_v38 }
0x16e5   :  { %4796 = vmatmul.bf16.vlgmr.msrb.gmra.mxu1 %v4737_v40 }
0x1762   :  { %v4797_v3 = vpop.f32.mrf.mxu1 }
0x1763   :  { %v4798_v5 = vadd.f32 %v6799_v25, %v4797_v3  ;;  %v6801_v3 = vld [vmem:[#allocation13 + $0x1f] ss:$0 sm:$0xff] }
0x1765   :  { %v9599_v23 = vadd.f32 %v4798_v5, %v4636_v35 }
0x1767   :  { %4824 = vmatmul.f32.vlgmr.msra.gmra.mxu2 %v9599_v23  ;;  %v4806_v19 = vmul.f32 %v9599_v23, %v9599_v23 }
0x176a   :  { %v4799_v16 = vpop.f32.mrf.mxu1 }
0x176b   :  { %v4800_v44 = vadd.f32 %v6799_v25, %v4799_v16 }
0x176d   :  { %v9602_v34 = vadd.f32 %v4800_v44, %v4637_v36 }
0x176f   :  { %4827 = vmatmul.f32.gmra.mxu2 %v9602_v34  ;;  %v4807_v53 = vmul.f32 %v9602_v34, %v9602_v34 }
0x1777   :  { %4830 = vmatmul.f32.gmra.mxu2 %v4806_v19 }
0x177f   :  { %4833 = vmatmul.f32.gmra.mxu2 %v4807_v53  ;;  %v6802_v53 = vld [vmem:[#allocation10 + $0x1] ss:$0 sm:$0xff] }
0x17ea   :  { %v4825_v30 = vpop.f32.mrf.mxu2 }
0x17eb   :  { %v4837_v27 = vmul.f32 %v4825_v30, %v4825_v30  ;;  %v4843_v59 = vsub.f32 %v9599_v23, %v4825_v30 }
0x17f2   :  { %v4828_v56 = vpop.f32.mrf.mxu2 }
0x17f3   :  { %v4838_v50 = vmul.f32 %v4828_v56, %v4828_v56  ;;  %v4844_v38 = vsub.f32 %v9602_v34, %v4828_v56 }
0x17fa   :  { %v4831_v55 = vpop.f32.mrf.mxu2 }
0x17fb   :  { %v4839_v20 = vsub.f32 %v4831_v55, %v4837_v27 }
0x17fd   :  { %v4841_v61 = vmax.f32 %v4839_v20, 0.0 }
0x17ff   :  { %v4845_v1 = vadd.f32 1e-05, %v4841_v61 }
0x1801   :  { %6871 = vrsqrt.f32 %v4845_v1  ;;  %vm4853_vm7 = vweird.f32 %v4845_v1 }
0x1802   :  { %v4834_v35 = vpop.f32.mrf.mxu2 }
0x1803   :  { %v4840_v36 = vsub.f32 %v4834_v35, %v4838_v50 }
0x1805   :  { %v4842_v32 = vmax.f32 %v4840_v36, 0.0 }
0x1807   :  { %v6872_v62 = vpop.eup %6871  ;;  %v4846_v57 = vadd.f32 1e-05, %v4842_v32 }
0x1808   :  { %v4848_v47 = vmul.f32 %v6872_v62, %v4845_v1  ;;  %vm4854_vm5 = vweird.f32 %v6872_v62 }
0x1809   :  { %6873 = vrsqrt.f32 %v4846_v57  ;;  %vm4855_vm8 = vmor %vm4853_vm7, %vm4854_vm5  ;;  %vm4863_vm0 = vweird.f32 %v4846_v57 }
0x180a   :  { %v4849_v29 = vmul.f32 %v6872_v62, %v4848_v47 }
0x180c   :  { %v4850_v46 = vmul.f32 0.5, %v4849_v29 }
0x180e   :  { %v4851_v13 = vsub.f32 1.5, %v4850_v46 }
0x180f   :  { %v6874_v45 = vpop.eup %6873 }
0x1810   :  { %v4852_v18 = vmul.f32 %v6872_v62, %v4851_v13  ;;  %v4858_v60 = vmul.f32 %v6874_v45, %v4846_v57  ;;  %vm4864_vm9 = vweird.f32 %v6874_v45 }
0x1811   :  { %vm4865_vm1 = vmor %vm4863_vm0, %vm4864_vm9 }
0x1812   :  { %v4859_v39 = vmul.f32 %v6874_v45, %v4858_v60  ;;  %v4856_v41 = vsel %vm4855_vm8, %v6872_v62, %v4852_v18 }
0x1813   :  { %v4867_v21 = vmul.f32 %v4856_v41, %v4843_v59 }
0x1814   :  { %v4860_v54 = vmul.f32 0.5, %v4859_v39 }
0x1815   :  { %v4870_v40 = vmul.f32 %v6800_v28, %v4867_v21 }
0x1816   :  { %v4861_v58 = vsub.f32 1.5, %v4860_v54 }
0x1817   :  { %v4873_v16 = vadd.f32 %v6801_v3, %v4870_v40 }
0x1818   :  { %v4862_v8 = vmul.f32 %v6874_v45, %v4861_v58 }
0x181a   :  { %v4866_v63 = vsel %vm4865_vm1, %v6874_v45, %v4862_v8 }
0x181b   :  { %v4868_v25 = vmul.f32 %v4866_v63, %v4844_v38 }
0x181d   :  { %v4871_v5 = vmul.f32 %v6800_v28, %v4868_v25 }
0x181f   :  { %v4874_v44 = vadd.f32 %v6801_v3, %v4871_v5 }
0x1821   :  { %v4891_v19 = vpack.c.bf16 %v4874_v44, %v4873_v16 }
0x1823   :  { %4950 = vmatmul.bf16.vlgmr.msra.gmra.mxu3 %v4891_v19 }
0x18a6   :  { %v4951_v23 = vpop.f32.mrf.mxu3 }
0x18a7   :  { %v4952_v6 = vadd.f32 %v6802_v53, %v4951_v23 }
0x18a9   :  { %v4956_v43 = vadd.f32 %v7011_v15, %v4952_v6 }
0x18ab   :  { %4958 = vst [vmem:[%s9639_s16] sm:$0xff] %v4956_v43 }
0x18ae   :  { %v4953_v34 = vpop.f32.mrf.mxu3 }
0x18af   :  { %v4954_v22 = vadd.f32 %v6802_v53, %v4953_v34 }
0x18b1   :  { %v4957_v2 = vadd.f32 %v7012_v10, %v4954_v22 }
0x18b3   :  { %4959 = vst [vmem:[%s9639_s16 + $0x8] sm:$0xff] %v4957_v2 }
0x18b4   :  { %4972 = vsyncpa [#allocation3], 1 }
0x18b5   :  { %4973 = vsyncpa [#allocation5], 1 }
0x18b6   :  { %4974 = vsyncpa [#allocation8], 1 }
0x18b7   :  { %4975 = vsyncpa [#allocation11], 1 }
0x18b8   :  { %4976 = vsyncpa [#allocation14], 1 }

</bundles_post_ra>
